<compile_context>
chip_gen: v5e
topology: v5e:2x2
jax: 0.10.0
libtpu: 0.0.40
codegen_flags: <defaults>
</compile_context>

<pallas_src>
import functools

import jax
import jax.numpy as jnp
from jax import lax
from jax.experimental import pallas as pl
from jax.experimental.pallas import tpu as pltpu


# Constructor args of the atrous blocks: kernel 3, padding == dilation in {3, 6, 9}.
_DILATIONS = (3, 6, 9)
_PAD = max(_DILATIONS)                       # one shared spatial pad for all dilations
_TAP_OFFSETS = tuple(sorted({((i - 1) * d, (j - 1) * d)
                             for d in _DILATIONS for i in range(3) for j in range(3)}))
# 25 distinct (dy, dx): the three 3x3 dilated stencils overlap only at (0, 0).


def _pick_th(h):
    """Rows per grid step: largest divisor that still gives >=2 blocks."""
    for c in (32, 16, 8, 4, 2):
        if h % c == 0 and h // c >= 2:
            return c
    return h


def _vmem_limit_bytes():
    # v5e/v6e: 128 MiB VMEM -> allow ~96 MiB; v7x: 64 MiB per TC -> ~48 MiB.
    try:
        cap = int(pltpu.get_tpu_info().vmem_capacity_bytes)
    except Exception:
        cap = 128 * 1024 * 1024
    return max(32 * 1024 * 1024, min((cap * 3) // 4, 100 * 1024 * 1024))


# ----------------------------------------------------------------------------
# Fused ASPP kernel: 25-tap stencil conv + per-batch shift + GroupNorm stats.
#   grid = (B, H // th);  taps are a static in-kernel K reduction.
# ----------------------------------------------------------------------------
def _aspp_fused_kernel(offsets, pad, th, width,
                       x_ref, w_ref, shift_ref, o_ref, stats_ref):
    # x_ref:     (Hp, Wp, C)   bf16  -- whole padded image of this batch element
    # w_ref:     (T, C, out)   bf16  -- composed tap weights
    # shift_ref: (1, out)      f32   -- folded biases + pooling contribution (per batch)
    # o_ref:     (th, W, out)  f32   -- pre-GroupNorm output tile
    # stats_ref: (2, out)      f32   -- per-channel [sum; sumsq], accumulated over hb
    hb = pl.program_id(1)
    row0 = hb * th
    c_in = x_ref.shape[-1]
    n_out = o_ref.shape[-1]

    # Group taps by row offset: one dynamic-offset band load per distinct dy,
    # column shifts are static slices of the loaded band.
    row_groups = {}
    for t, (dy, dx) in enumerate(offsets):
        row_groups.setdefault(dy, []).append((t, dx))

    acc = jnp.zeros((th * width, n_out), jnp.float32)
    for dy in sorted(row_groups):
        band = x_ref[pl.ds(row0 + pad + dy, th), :, :]            # (th, Wp, C)
        for t, dx in row_groups[dy]:
            win = band[:, pad + dx:pad + dx + width, :]           # (th, W, C)
            acc = acc + jnp.dot(win.reshape(th * width, c_in), w_ref[t],
                                preferred_element_type=jnp.float32)

    y = acc + shift_ref[...]                                      # (th*W, out)
    o_ref[...] = y.reshape(th, width, n_out)

    # GroupNorm statistics: per-channel sum / sumsq, lane-dense (channels last).
    @pl.when(hb == 0)
    def _():
        stats_ref[...] = jnp.zeros_like(stats_ref)

    stats_ref[...] += jnp.concatenate(
        [jnp.sum(y, axis=0, keepdims=True),
         jnp.sum(y * y, axis=0, keepdims=True)], axis=0)


# ----------------------------------------------------------------------------
# Parameters: raw (per-branch, like the PyTorch module) and fused (composed).
# ----------------------------------------------------------------------------
def make_raw_params(key, in_ch, out_ch):
    ks = jax.random.split(key, 15)
    c = in_ch

    def cw(k, shape, fan_in):
        return jax.random.normal(k, shape, jnp.float32) * (2.0 / fan_in) ** 0.5

    p = {
        # NOTE: self.conv of the PyTorch module is unused in forward() -> omitted.
        "w1": cw(ks[0], (c, c), c),                      # 1x1 branch, (Cin, Cout)
        "b1": jax.random.normal(ks[1], (c,), jnp.float32) * 0.01,
        "w6": cw(ks[2], (3, 3, c, c), 9 * c),            # HWIO, dilation 3
        "b6": jax.random.normal(ks[3], (c,), jnp.float32) * 0.01,
        "w12": cw(ks[4], (3, 3, c, c), 9 * c),           # dilation 6
        "b12": jax.random.normal(ks[5], (c,), jnp.float32) * 0.01,
        "w18": cw(ks[6], (3, 3, c, c), 9 * c),           # dilation 9
        "b18": jax.random.normal(ks[7], (c,), jnp.float32) * 0.01,
        # ASPPPooling: AdaptiveAvgPool2d(1) -> 1x1 conv (no bias) -> BN(eval) -> ReLU
        "wp": cw(ks[8], (c, c), c),
        # final 1x1 over the 6C concat
        "wo": cw(ks[11], (6 * c, out_ch), 6 * c),
        "bo": jax.random.normal(ks[12], (out_ch,), jnp.float32) * 0.01,
        # GroupNorm(8, out_ch)
        "gn_gamma": jax.random.uniform(ks[13], (out_ch,), jnp.float32, 0.5, 1.5),
        "gn_beta": jax.random.normal(ks[14], (out_ch,), jnp.float32) * 0.1,
    }
    gamma = jax.random.uniform(ks[9], (c,), jnp.float32, 0.5, 1.5)
    beta = jax.random.normal(ks[10], (c,), jnp.float32) * 0.1
    r_mean = jnp.zeros((c,), jnp.float32)
    r_var = jnp.ones((c,), jnp.float32)
    s = gamma * lax.rsqrt(r_var + 1e-5)
    p["pool_scale"] = s
    p["pool_shift"] = beta - r_mean * s
    return p


def fuse_aspp_params(p, in_ch):
    """Compose branch conv weights with the final 1x1 conv (exact, in f32)."""
    c = in_ch
    wo = p["wo"]
    wo_x, wo_1, wo_6, wo_12, wo_18, wo_pool = [wo[i * c:(i + 1) * c] for i in range(6)]

    taps = {}
    for d, wd, wos in ((3, p["w6"], wo_6), (6, p["w12"], wo_12), (9, p["w18"], wo_18)):
        for i in range(3):
            for j in range(3):
                off = ((i - 1) * d, (j - 1) * d)
                taps[off] = taps.get(off, 0.0) + wd[i, j] @ wos
    # identity branch (x itself in the concat) and the 1x1 branch hit the centre tap
    taps[(0, 0)] = taps[(0, 0)] + wo_x + p["w1"] @ wo_1

    w_taps = jnp.stack([taps[o] for o in _TAP_OFFSETS]).astype(jnp.bfloat16)  # (25,C,out)
    shift_base = (p["bo"] + p["b1"] @ wo_1 + p["b6"] @ wo_6
                  + p["b12"] @ wo_12 + p["b18"] @ wo_18)                      # (out,)
    return {
        "w_taps": w_taps, "shift_base": shift_base,
        "wp": p["wp"], "pool_scale": p["pool_scale"], "pool_shift": p["pool_shift"],
        "wo_pool": wo_pool, "gn_gamma": p["gn_gamma"], "gn_beta": p["gn_beta"],
    }


# ----------------------------------------------------------------------------
# Forward pass (Pallas path)
# ----------------------------------------------------------------------------
def aspp_forward(fused, x_nchw):
    b, c, h, w = x_nchw.shape
    out_ch = fused["gn_gamma"].shape[0]
    th = _pick_th(h)
    n_hb = h // th
    n_tap = len(_TAP_OFFSETS)

    # ASPPPooling branch: (B, C) work only -> plain jnp (no MXU kernel launch).
    pooled = jnp.mean(x_nchw, axis=(2, 3))                               # (B, C) f32
    pooled = jnp.maximum(pooled @ fused["wp"] * fused["pool_scale"]
                         + fused["pool_shift"], 0.0)
    # Fold the spatially-constant pooling contribution + all conv biases into a
    # per-batch, per-output-channel shift applied in the kernel epilogue.
    shift = (fused["shift_base"][None, :] + pooled @ fused["wo_pool"])
    shift = shift.astype(jnp.float32).reshape(b, 1, out_ch)

    # Single bf16 padded NHWC copy of the input (pad = 9 shared by all dilations);
    # transpose + cast + pad fuse into one XLA copy.  No f32 NHWC copy.
    x_pad = jnp.pad(jnp.transpose(x_nchw, (0, 2, 3, 1)).astype(jnp.bfloat16),
                    ((0, 0), (_PAD, _PAD), (_PAD, _PAD), (0, 0)))
    hp, wp = h + 2 * _PAD, w + 2 * _PAD

    # TODO(synk): for very large H*W also tile W (manual-DMA row windows) so the
    # resident padded image per batch stays bounded on v7x's 64 MiB VMEM.
    net, stats = pl.pallas_call(
        functools.partial(_aspp_fused_kernel, _TAP_OFFSETS, _PAD, th, w),
        out_shape=(jax.ShapeDtypeStruct((b, h, w, out_ch), jnp.float32),
                   jax.ShapeDtypeStruct((b, 2, out_ch), jnp.float32)),
        grid_spec=pltpu.PrefetchScalarGridSpec(
            num_scalar_prefetch=0,
            grid=(b, n_hb),
            in_specs=[
                # whole padded image of one batch element; block index constant
                # across hb -> fetched once per batch element.
                pl.BlockSpec((None, hp, wp, c), lambda bi, hi: (bi, 0, 0, 0)),
                # all composed tap weights, resident for the whole grid.
                pl.BlockSpec((n_tap, c, out_ch), lambda bi, hi: (0, 0, 0)),
                # per-batch shift (biases + pooling branch).
                pl.BlockSpec((None, 1, out_ch), lambda bi, hi: (bi, 0, 0)),
            ],
            out_specs=[
                pl.BlockSpec((None, th, w, out_ch), lambda bi, hi: (bi, hi, 0, 0)),
                # revisited across hb -> VMEM-resident GroupNorm stats accumulator.
                pl.BlockSpec((None, 2, out_ch), lambda bi, hi: (bi, 0, 0)),
            ],
        ),
        compiler_params=pltpu.CompilerParams(
            dimension_semantics=("parallel", "arbitrary"),
            vmem_limit_bytes=_vmem_limit_bytes(),
        ),
    )(x_pad, fused["w_taps"], shift)

    # Finish GroupNorm(8) + ReLU from the in-kernel per-channel sums (tiny work),
    # then normalize + transpose back to NCHW (fused by XLA into one pass).
    g = 8
    cs = out_ch // g
    cnt = h * w * cs
    gsum = stats[:, 0, :].reshape(b, g, cs).sum(-1)                       # (B, 8)
    gsq = stats[:, 1, :].reshape(b, g, cs).sum(-1)
    mu = gsum / cnt
    var = jnp.maximum(gsq / cnt - mu * mu, 0.0)
    inv = lax.rsqrt(var + 1e-5)
    scale = jnp.repeat(inv, cs, axis=1) * fused["gn_gamma"][None, :]      # (B, out)
    bias = fused["gn_beta"][None, :] - jnp.repeat(mu, cs, axis=1) * scale
    net = jnp.maximum(net * scale[:, None, None, :] + bias[:, None, None, :], 0.0)
    return jnp.transpose(net, (0, 3, 1, 2))                               # NCHW


# ----------------------------------------------------------------------------
# Pure-JAX per-branch reference (float32), mirrors the PyTorch module.
# ----------------------------------------------------------------------------
def aspp_reference(p, x_nchw):
    x = jnp.transpose(x_nchw, (0, 2, 3, 1)).astype(jnp.float32)           # NHWC
    b, h, w, c = x.shape

    def dilated(weight_hwio, bias, d):
        y = lax.conv_general_dilated(
            x, weight_hwio, window_strides=(1, 1), padding=((d, d), (d, d)),
            rhs_dilation=(d, d), dimension_numbers=("NHWC", "HWIO", "NHWC"))
        return y + bias

    b1 = x @ p["w1"] + p["b1"]
    b6 = dilated(p["w6"], p["b6"], 3)
    b12 = dilated(p["w12"], p["b12"], 6)
    b18 = dilated(p["w18"], p["b18"], 9)
    pooled = jnp.maximum(jnp.mean(x, axis=(1, 2)) @ p["wp"] * p["pool_scale"]
                         + p["pool_shift"], 0.0)
    pool_up = jnp.broadcast_to(pooled[:, None, None, :], (b, h, w, c))
    cat = jnp.concatenate([x, b1, b6, b12, b18, pool_up], axis=-1)
    net = cat @ p["wo"] + p["bo"]

    out_ch = net.shape[-1]
    r = net.reshape(b, h, w, 8, out_ch // 8)
    mu = r.mean(axis=(1, 2, 4), keepdims=True)
    var = ((r - mu) ** 2).mean(axis=(1, 2, 4), keepdims=True)
    r = (r - mu) * lax.rsqrt(var + 1e-5)
    net = r.reshape(b, h, w, out_ch) * p["gn_gamma"] + p["gn_beta"]
    return jnp.transpose(jnp.maximum(net, 0.0), (0, 3, 1, 2))


if __name__ == "__main__":
    key = jax.random.PRNGKey(0)
    k_param, k_x = jax.random.split(key)

    # Small shapes consistent with ASPP(in_channel, output); output must be a
    # multiple of 8 for GroupNorm(8, output).  Real configs (C=out=256) make the
    # kernel's MXU operands 256-wide and the output lane-dense.
    in_ch, out_ch = 32, 16
    B, H, W = 2, 16, 16
    x = jax.random.normal(k_x, (B, in_ch, H, W), jnp.float32)

    raw = make_raw_params(k_param, in_ch, out_ch)
    fused = fuse_aspp_params(raw, in_ch)

    fwd = jax.jit(aspp_forward)
    out = jax.block_until_ready(fwd(fused, x))
    assert out.shape == (B, out_ch, H, W), out.shape
    assert bool(jnp.all(jnp.isfinite(out)))

    ref = jax.block_until_ready(jax.jit(aspp_reference)(raw, x))
    err = float(jnp.max(jnp.abs(out - ref)))
    assert err < 0.15, f"max abs err vs f32 reference: {err}"

    print("KERNEL_OK")
</pallas_src>

<mosaic_0001>
module attributes {stable_mosaic.version = 11 : i64} {
  func.func @_aspp_fused_kernel(%arg0: i32, %arg1: i32, %arg2: memref<1x34x34x32xbf16, #tpu.memory_space<vmem>>, %arg3: memref<25x32x16xbf16, #tpu.memory_space<vmem>>, %arg4: memref<1x1x16xf32, #tpu.memory_space<vmem>>, %arg5: memref<1x8x16x16xf32, #tpu.memory_space<vmem>>, %arg6: memref<1x2x16xf32, #tpu.memory_space<vmem>>) attributes {dimension_semantics = [#tpu.dimension_semantics<parallel>, #tpu.dimension_semantics<arbitrary>], iteration_bounds = array<i64: 2, 2>, scalar_prefetch = 0 : i64, scratch_operands = 0 : i64, tpu.core_type = #tpu.core_type<tc>, window_params = [{transform_indices = @transform_0, window_bounds = array<i64: 1, 34, 34, 32>}, {pipeline_mode = #tpu.pipeline_mode<synchronous>, transform_indices = @transform_1, window_bounds = array<i64: 25, 32, 16>}, {transform_indices = @transform_2, window_bounds = array<i64: 1, 1, 16>}, {transform_indices = @transform_3, window_bounds = array<i64: 1, 8, 16, 16>}, {transform_indices = @transform_4, window_bounds = array<i64: 1, 2, 16>}]} {
    %c8_i32 = arith.constant 8 : i32
    %0 = arith.muli %arg1, %c8_i32 : i32
    %cst = arith.constant 0.000000e+00 : f32
    %1 = vector.broadcast %cst : f32 to vector<128x16xf32>
    %c9_i32 = arith.constant 9 : i32
    %2 = arith.addi %0, %c9_i32 : i32
    %c-9_i32 = arith.constant -9 : i32
    %3 = arith.addi %2, %c-9_i32 : i32
    %c0 = arith.constant 0 : index
    %4 = arith.index_cast %3 : i32 to index
    %c0_0 = arith.constant 0 : index
    %c0_1 = arith.constant 0 : index
    %5 = vector.load %arg2[%c0, %4, %c0_0, %c0_1] : memref<1x34x34x32xbf16, #tpu.memory_space<vmem>>, vector<1x8x34x32xbf16>
    %6 = vector.shape_cast %5 : vector<1x8x34x32xbf16> to vector<8x34x32xbf16>
    %7 = vector.extract_strided_slice %6 {offsets = [0, 0, 0], sizes = [8, 16, 32], strides = [1, 1, 1]} : vector<8x34x32xbf16> to vector<8x16x32xbf16>
    %8 = vector.shape_cast %7 : vector<8x16x32xbf16> to vector<128x32xbf16>
    %c0_2 = arith.constant 0 : index
    %c0_3 = arith.constant 0 : index
    %c0_4 = arith.constant 0 : index
    %9 = vector.load %arg3[%c0_2, %c0_3, %c0_4] : memref<25x32x16xbf16, #tpu.memory_space<vmem>>, vector<1x32x16xbf16>
    %10 = vector.shape_cast %9 : vector<1x32x16xbf16> to vector<32x16xbf16>
    %cst_5 = arith.constant dense<0.000000e+00> : vector<128x16xf32>
    %11 = tpu.matmul %8, %10, %cst_5 {dimension_numbers = #tpu.dot_dimension_numbers<[1], [0], [0], [1], [0, 0, 1, 1], [], []>} : vector<128x32xbf16>, vector<32x16xbf16>, vector<128x16xf32> -> vector<128x16xf32>
    %12 = arith.addf %1, %11 : vector<128x16xf32>
    %13 = vector.extract_strided_slice %6 {offsets = [0, 9, 0], sizes = [8, 16, 32], strides = [1, 1, 1]} : vector<8x34x32xbf16> to vector<8x16x32xbf16>
    %14 = vector.shape_cast %13 : vector<8x16x32xbf16> to vector<128x32xbf16>
    %c1 = arith.constant 1 : index
    %c0_6 = arith.constant 0 : index
    %c0_7 = arith.constant 0 : index
    %15 = vector.load %arg3[%c1, %c0_6, %c0_7] : memref<25x32x16xbf16, #tpu.memory_space<vmem>>, vector<1x32x16xbf16>
    %16 = vector.shape_cast %15 : vector<1x32x16xbf16> to vector<32x16xbf16>
    %cst_8 = arith.constant dense<0.000000e+00> : vector<128x16xf32>
    %17 = tpu.matmul %14, %16, %cst_8 {dimension_numbers = #tpu.dot_dimension_numbers<[1], [0], [0], [1], [0, 0, 1, 1], [], []>} : vector<128x32xbf16>, vector<32x16xbf16>, vector<128x16xf32> -> vector<128x16xf32>
    %18 = arith.addf %12, %17 : vector<128x16xf32>
    %19 = vector.extract_strided_slice %6 {offsets = [0, 18, 0], sizes = [8, 16, 32], strides = [1, 1, 1]} : vector<8x34x32xbf16> to vector<8x16x32xbf16>
    %20 = vector.shape_cast %19 : vector<8x16x32xbf16> to vector<128x32xbf16>
    %c2 = arith.constant 2 : index
    %c0_9 = arith.constant 0 : index
    %c0_10 = arith.constant 0 : index
    %21 = vector.load %arg3[%c2, %c0_9, %c0_10] : memref<25x32x16xbf16, #tpu.memory_space<vmem>>, vector<1x32x16xbf16>
    %22 = vector.shape_cast %21 : vector<1x32x16xbf16> to vector<32x16xbf16>
    %cst_11 = arith.constant dense<0.000000e+00> : vector<128x16xf32>
    %23 = tpu.matmul %20, %22, %cst_11 {dimension_numbers = #tpu.dot_dimension_numbers<[1], [0], [0], [1], [0, 0, 1, 1], [], []>} : vector<128x32xbf16>, vector<32x16xbf16>, vector<128x16xf32> -> vector<128x16xf32>
    %24 = arith.addf %18, %23 : vector<128x16xf32>
    %c9_i32_12 = arith.constant 9 : i32
    %25 = arith.addi %0, %c9_i32_12 : i32
    %c-6_i32 = arith.constant -6 : i32
    %26 = arith.addi %25, %c-6_i32 : i32
    %c0_13 = arith.constant 0 : index
    %27 = arith.index_cast %26 : i32 to index
    %c0_14 = arith.constant 0 : index
    %c0_15 = arith.constant 0 : index
    %28 = vector.load %arg2[%c0_13, %27, %c0_14, %c0_15] : memref<1x34x34x32xbf16, #tpu.memory_space<vmem>>, vector<1x8x34x32xbf16>
    %29 = vector.shape_cast %28 : vector<1x8x34x32xbf16> to vector<8x34x32xbf16>
    %30 = vector.extract_strided_slice %29 {offsets = [0, 3, 0], sizes = [8, 16, 32], strides = [1, 1, 1]} : vector<8x34x32xbf16> to vector<8x16x32xbf16>
    %31 = vector.shape_cast %30 : vector<8x16x32xbf16> to vector<128x32xbf16>
    %c3 = arith.constant 3 : index
    %c0_16 = arith.constant 0 : index
    %c0_17 = arith.constant 0 : index
    %32 = vector.load %arg3[%c3, %c0_16, %c0_17] : memref<25x32x16xbf16, #tpu.memory_space<vmem>>, vector<1x32x16xbf16>
    %33 = vector.shape_cast %32 : vector<1x32x16xbf16> to vector<32x16xbf16>
    %cst_18 = arith.constant dense<0.000000e+00> : vector<128x16xf32>
    %34 = tpu.matmul %31, %33, %cst_18 {dimension_numbers = #tpu.dot_dimension_numbers<[1], [0], [0], [1], [0, 0, 1, 1], [], []>} : vector<128x32xbf16>, vector<32x16xbf16>, vector<128x16xf32> -> vector<128x16xf32>
    %35 = arith.addf %24, %34 : vector<128x16xf32>
    %36 = vector.extract_strided_slice %29 {offsets = [0, 9, 0], sizes = [8, 16, 32], strides = [1, 1, 1]} : vector<8x34x32xbf16> to vector<8x16x32xbf16>
    %37 = vector.shape_cast %36 : vector<8x16x32xbf16> to vector<128x32xbf16>
    %c4 = arith.constant 4 : index
    %c0_19 = arith.constant 0 : index
    %c0_20 = arith.constant 0 : index
    %38 = vector.load %arg3[%c4, %c0_19, %c0_20] : memref<25x32x16xbf16, #tpu.memory_space<vmem>>, vector<1x32x16xbf16>
    %39 = vector.shape_cast %38 : vector<1x32x16xbf16> to vector<32x16xbf16>
    %cst_21 = arith.constant dense<0.000000e+00> : vector<128x16xf32>
    %40 = tpu.matmul %37, %39, %cst_21 {dimension_numbers = #tpu.dot_dimension_numbers<[1], [0], [0], [1], [0, 0, 1, 1], [], []>} : vector<128x32xbf16>, vector<32x16xbf16>, vector<128x16xf32> -> vector<128x16xf32>
    %41 = arith.addf %35, %40 : vector<128x16xf32>
    %42 = vector.extract_strided_slice %29 {offsets = [0, 15, 0], sizes = [8, 16, 32], strides = [1, 1, 1]} : vector<8x34x32xbf16> to vector<8x16x32xbf16>
    %43 = vector.shape_cast %42 : vector<8x16x32xbf16> to vector<128x32xbf16>
    %c5 = arith.constant 5 : index
    %c0_22 = arith.constant 0 : index
    %c0_23 = arith.constant 0 : index
    %44 = vector.load %arg3[%c5, %c0_22, %c0_23] : memref<25x32x16xbf16, #tpu.memory_space<vmem>>, vector<1x32x16xbf16>
    %45 = vector.shape_cast %44 : vector<1x32x16xbf16> to vector<32x16xbf16>
    %cst_24 = arith.constant dense<0.000000e+00> : vector<128x16xf32>
    %46 = tpu.matmul %43, %45, %cst_24 {dimension_numbers = #tpu.dot_dimension_numbers<[1], [0], [0], [1], [0, 0, 1, 1], [], []>} : vector<128x32xbf16>, vector<32x16xbf16>, vector<128x16xf32> -> vector<128x16xf32>
    %47 = arith.addf %41, %46 : vector<128x16xf32>
    %c9_i32_25 = arith.constant 9 : i32
    %48 = arith.addi %0, %c9_i32_25 : i32
    %c-3_i32 = arith.constant -3 : i32
    %49 = arith.addi %48, %c-3_i32 : i32
    %c0_26 = arith.constant 0 : index
    %50 = arith.index_cast %49 : i32 to index
    %c0_27 = arith.constant 0 : index
    %c0_28 = arith.constant 0 : index
    %51 = vector.load %arg2[%c0_26, %50, %c0_27, %c0_28] : memref<1x34x34x32xbf16, #tpu.memory_space<vmem>>, vector<1x8x34x32xbf16>
    %52 = vector.shape_cast %51 : vector<1x8x34x32xbf16> to vector<8x34x32xbf16>
    %53 = vector.extract_strided_slice %52 {offsets = [0, 6, 0], sizes = [8, 16, 32], strides = [1, 1, 1]} : vector<8x34x32xbf16> to vector<8x16x32xbf16>
    %54 = vector.shape_cast %53 : vector<8x16x32xbf16> to vector<128x32xbf16>
    %c6 = arith.constant 6 : index
    %c0_29 = arith.constant 0 : index
    %c0_30 = arith.constant 0 : index
    %55 = vector.load %arg3[%c6, %c0_29, %c0_30] : memref<25x32x16xbf16, #tpu.memory_space<vmem>>, vector<1x32x16xbf16>
    %56 = vector.shape_cast %55 : vector<1x32x16xbf16> to vector<32x16xbf16>
    %cst_31 = arith.constant dense<0.000000e+00> : vector<128x16xf32>
    %57 = tpu.matmul %54, %56, %cst_31 {dimension_numbers = #tpu.dot_dimension_numbers<[1], [0], [0], [1], [0, 0, 1, 1], [], []>} : vector<128x32xbf16>, vector<32x16xbf16>, vector<128x16xf32> -> vector<128x16xf32>
    %58 = arith.addf %47, %57 : vector<128x16xf32>
    %59 = vector.extract_strided_slice %52 {offsets = [0, 9, 0], sizes = [8, 16, 32], strides = [1, 1, 1]} : vector<8x34x32xbf16> to vector<8x16x32xbf16>
    %60 = vector.shape_cast %59 : vector<8x16x32xbf16> to vector<128x32xbf16>
    %c7 = arith.constant 7 : index
    %c0_32 = arith.constant 0 : index
    %c0_33 = arith.constant 0 : index
    %61 = vector.load %arg3[%c7, %c0_32, %c0_33] : memref<25x32x16xbf16, #tpu.memory_space<vmem>>, vector<1x32x16xbf16>
    %62 = vector.shape_cast %61 : vector<1x32x16xbf16> to vector<32x16xbf16>
    %cst_34 = arith.constant dense<0.000000e+00> : vector<128x16xf32>
    %63 = tpu.matmul %60, %62, %cst_34 {dimension_numbers = #tpu.dot_dimension_numbers<[1], [0], [0], [1], [0, 0, 1, 1], [], []>} : vector<128x32xbf16>, vector<32x16xbf16>, vector<128x16xf32> -> vector<128x16xf32>
    %64 = arith.addf %58, %63 : vector<128x16xf32>
    %65 = vector.extract_strided_slice %52 {offsets = [0, 12, 0], sizes = [8, 16, 32], strides = [1, 1, 1]} : vector<8x34x32xbf16> to vector<8x16x32xbf16>
    %66 = vector.shape_cast %65 : vector<8x16x32xbf16> to vector<128x32xbf16>
    %c8 = arith.constant 8 : index
    %c0_35 = arith.constant 0 : index
    %c0_36 = arith.constant 0 : index
    %67 = vector.load %arg3[%c8, %c0_35, %c0_36] : memref<25x32x16xbf16, #tpu.memory_space<vmem>>, vector<1x32x16xbf16>
    %68 = vector.shape_cast %67 : vector<1x32x16xbf16> to vector<32x16xbf16>
    %cst_37 = arith.constant dense<0.000000e+00> : vector<128x16xf32>
    %69 = tpu.matmul %66, %68, %cst_37 {dimension_numbers = #tpu.dot_dimension_numbers<[1], [0], [0], [1], [0, 0, 1, 1], [], []>} : vector<128x32xbf16>, vector<32x16xbf16>, vector<128x16xf32> -> vector<128x16xf32>
    %70 = arith.addf %64, %69 : vector<128x16xf32>
    %c9_i32_38 = arith.constant 9 : i32
    %71 = arith.addi %0, %c9_i32_38 : i32
    %c0_i32 = arith.constant 0 : i32
    %72 = arith.addi %71, %c0_i32 : i32
    %c0_39 = arith.constant 0 : index
    %73 = arith.index_cast %72 : i32 to index
    %c0_40 = arith.constant 0 : index
    %c0_41 = arith.constant 0 : index
    %74 = vector.load %arg2[%c0_39, %73, %c0_40, %c0_41] : memref<1x34x34x32xbf16, #tpu.memory_space<vmem>>, vector<1x8x34x32xbf16>
    %75 = vector.shape_cast %74 : vector<1x8x34x32xbf16> to vector<8x34x32xbf16>
    %76 = vector.extract_strided_slice %75 {offsets = [0, 0, 0], sizes = [8, 16, 32], strides = [1, 1, 1]} : vector<8x34x32xbf16> to vector<8x16x32xbf16>
    %77 = vector.shape_cast %76 : vector<8x16x32xbf16> to vector<128x32xbf16>
    %c9 = arith.constant 9 : index
    %c0_42 = arith.constant 0 : index
    %c0_43 = arith.constant 0 : index
    %78 = vector.load %arg3[%c9, %c0_42, %c0_43] : memref<25x32x16xbf16, #tpu.memory_space<vmem>>, vector<1x32x16xbf16>
    %79 = vector.shape_cast %78 : vector<1x32x16xbf16> to vector<32x16xbf16>
    %cst_44 = arith.constant dense<0.000000e+00> : vector<128x16xf32>
    %80 = tpu.matmul %77, %79, %cst_44 {dimension_numbers = #tpu.dot_dimension_numbers<[1], [0], [0], [1], [0, 0, 1, 1], [], []>} : vector<128x32xbf16>, vector<32x16xbf16>, vector<128x16xf32> -> vector<128x16xf32>
    %81 = arith.addf %70, %80 : vector<128x16xf32>
    %82 = vector.extract_strided_slice %75 {offsets = [0, 3, 0], sizes = [8, 16, 32], strides = [1, 1, 1]} : vector<8x34x32xbf16> to vector<8x16x32xbf16>
    %83 = vector.shape_cast %82 : vector<8x16x32xbf16> to vector<128x32xbf16>
    %c10 = arith.constant 10 : index
    %c0_45 = arith.constant 0 : index
    %c0_46 = arith.constant 0 : index
    %84 = vector.load %arg3[%c10, %c0_45, %c0_46] : memref<25x32x16xbf16, #tpu.memory_space<vmem>>, vector<1x32x16xbf16>
    %85 = vector.shape_cast %84 : vector<1x32x16xbf16> to vector<32x16xbf16>
    %cst_47 = arith.constant dense<0.000000e+00> : vector<128x16xf32>
    %86 = tpu.matmul %83, %85, %cst_47 {dimension_numbers = #tpu.dot_dimension_numbers<[1], [0], [0], [1], [0, 0, 1, 1], [], []>} : vector<128x32xbf16>, vector<32x16xbf16>, vector<128x16xf32> -> vector<128x16xf32>
    %87 = arith.addf %81, %86 : vector<128x16xf32>
    %88 = vector.extract_strided_slice %75 {offsets = [0, 6, 0], sizes = [8, 16, 32], strides = [1, 1, 1]} : vector<8x34x32xbf16> to vector<8x16x32xbf16>
    %89 = vector.shape_cast %88 : vector<8x16x32xbf16> to vector<128x32xbf16>
    %c11 = arith.constant 11 : index
    %c0_48 = arith.constant 0 : index
    %c0_49 = arith.constant 0 : index
    %90 = vector.load %arg3[%c11, %c0_48, %c0_49] : memref<25x32x16xbf16, #tpu.memory_space<vmem>>, vector<1x32x16xbf16>
    %91 = vector.shape_cast %90 : vector<1x32x16xbf16> to vector<32x16xbf16>
    %cst_50 = arith.constant dense<0.000000e+00> : vector<128x16xf32>
    %92 = tpu.matmul %89, %91, %cst_50 {dimension_numbers = #tpu.dot_dimension_numbers<[1], [0], [0], [1], [0, 0, 1, 1], [], []>} : vector<128x32xbf16>, vector<32x16xbf16>, vector<128x16xf32> -> vector<128x16xf32>
    %93 = arith.addf %87, %92 : vector<128x16xf32>
    %94 = vector.extract_strided_slice %75 {offsets = [0, 9, 0], sizes = [8, 16, 32], strides = [1, 1, 1]} : vector<8x34x32xbf16> to vector<8x16x32xbf16>
    %95 = vector.shape_cast %94 : vector<8x16x32xbf16> to vector<128x32xbf16>
    %c12 = arith.constant 12 : index
    %c0_51 = arith.constant 0 : index
    %c0_52 = arith.constant 0 : index
    %96 = vector.load %arg3[%c12, %c0_51, %c0_52] : memref<25x32x16xbf16, #tpu.memory_space<vmem>>, vector<1x32x16xbf16>
    %97 = vector.shape_cast %96 : vector<1x32x16xbf16> to vector<32x16xbf16>
    %cst_53 = arith.constant dense<0.000000e+00> : vector<128x16xf32>
    %98 = tpu.matmul %95, %97, %cst_53 {dimension_numbers = #tpu.dot_dimension_numbers<[1], [0], [0], [1], [0, 0, 1, 1], [], []>} : vector<128x32xbf16>, vector<32x16xbf16>, vector<128x16xf32> -> vector<128x16xf32>
    %99 = arith.addf %93, %98 : vector<128x16xf32>
    %100 = vector.extract_strided_slice %75 {offsets = [0, 12, 0], sizes = [8, 16, 32], strides = [1, 1, 1]} : vector<8x34x32xbf16> to vector<8x16x32xbf16>
    %101 = vector.shape_cast %100 : vector<8x16x32xbf16> to vector<128x32xbf16>
    %c13 = arith.constant 13 : index
    %c0_54 = arith.constant 0 : index
    %c0_55 = arith.constant 0 : index
    %102 = vector.load %arg3[%c13, %c0_54, %c0_55] : memref<25x32x16xbf16, #tpu.memory_space<vmem>>, vector<1x32x16xbf16>
    %103 = vector.shape_cast %102 : vector<1x32x16xbf16> to vector<32x16xbf16>
    %cst_56 = arith.constant dense<0.000000e+00> : vector<128x16xf32>
    %104 = tpu.matmul %101, %103, %cst_56 {dimension_numbers = #tpu.dot_dimension_numbers<[1], [0], [0], [1], [0, 0, 1, 1], [], []>} : vector<128x32xbf16>, vector<32x16xbf16>, vector<128x16xf32> -> vector<128x16xf32>
    %105 = arith.addf %99, %104 : vector<128x16xf32>
    %106 = vector.extract_strided_slice %75 {offsets = [0, 15, 0], sizes = [8, 16, 32], strides = [1, 1, 1]} : vector<8x34x32xbf16> to vector<8x16x32xbf16>
    %107 = vector.shape_cast %106 : vector<8x16x32xbf16> to vector<128x32xbf16>
    %c14 = arith.constant 14 : index
    %c0_57 = arith.constant 0 : index
    %c0_58 = arith.constant 0 : index
    %108 = vector.load %arg3[%c14, %c0_57, %c0_58] : memref<25x32x16xbf16, #tpu.memory_space<vmem>>, vector<1x32x16xbf16>
    %109 = vector.shape_cast %108 : vector<1x32x16xbf16> to vector<32x16xbf16>
    %cst_59 = arith.constant dense<0.000000e+00> : vector<128x16xf32>
    %110 = tpu.matmul %107, %109, %cst_59 {dimension_numbers = #tpu.dot_dimension_numbers<[1], [0], [0], [1], [0, 0, 1, 1], [], []>} : vector<128x32xbf16>, vector<32x16xbf16>, vector<128x16xf32> -> vector<128x16xf32>
    %111 = arith.addf %105, %110 : vector<128x16xf32>
    %112 = vector.extract_strided_slice %75 {offsets = [0, 18, 0], sizes = [8, 16, 32], strides = [1, 1, 1]} : vector<8x34x32xbf16> to vector<8x16x32xbf16>
    %113 = vector.shape_cast %112 : vector<8x16x32xbf16> to vector<128x32xbf16>
    %c15 = arith.constant 15 : index
    %c0_60 = arith.constant 0 : index
    %c0_61 = arith.constant 0 : index
    %114 = vector.load %arg3[%c15, %c0_60, %c0_61] : memref<25x32x16xbf16, #tpu.memory_space<vmem>>, vector<1x32x16xbf16>
    %115 = vector.shape_cast %114 : vector<1x32x16xbf16> to vector<32x16xbf16>
    %cst_62 = arith.constant dense<0.000000e+00> : vector<128x16xf32>
    %116 = tpu.matmul %113, %115, %cst_62 {dimension_numbers = #tpu.dot_dimension_numbers<[1], [0], [0], [1], [0, 0, 1, 1], [], []>} : vector<128x32xbf16>, vector<32x16xbf16>, vector<128x16xf32> -> vector<128x16xf32>
    %117 = arith.addf %111, %116 : vector<128x16xf32>
    %c9_i32_63 = arith.constant 9 : i32
    %118 = arith.addi %0, %c9_i32_63 : i32
    %c3_i32 = arith.constant 3 : i32
    %119 = arith.addi %118, %c3_i32 : i32
    %c0_64 = arith.constant 0 : index
    %120 = arith.index_cast %119 : i32 to index
    %c0_65 = arith.constant 0 : index
    %c0_66 = arith.constant 0 : index
    %121 = vector.load %arg2[%c0_64, %120, %c0_65, %c0_66] : memref<1x34x34x32xbf16, #tpu.memory_space<vmem>>, vector<1x8x34x32xbf16>
    %122 = vector.shape_cast %121 : vector<1x8x34x32xbf16> to vector<8x34x32xbf16>
    %123 = vector.extract_strided_slice %122 {offsets = [0, 6, 0], sizes = [8, 16, 32], strides = [1, 1, 1]} : vector<8x34x32xbf16> to vector<8x16x32xbf16>
    %124 = vector.shape_cast %123 : vector<8x16x32xbf16> to vector<128x32xbf16>
    %c16 = arith.constant 16 : index
    %c0_67 = arith.constant 0 : index
    %c0_68 = arith.constant 0 : index
    %125 = vector.load %arg3[%c16, %c0_67, %c0_68] : memref<25x32x16xbf16, #tpu.memory_space<vmem>>, vector<1x32x16xbf16>
    %126 = vector.shape_cast %125 : vector<1x32x16xbf16> to vector<32x16xbf16>
    %cst_69 = arith.constant dense<0.000000e+00> : vector<128x16xf32>
    %127 = tpu.matmul %124, %126, %cst_69 {dimension_numbers = #tpu.dot_dimension_numbers<[1], [0], [0], [1], [0, 0, 1, 1], [], []>} : vector<128x32xbf16>, vector<32x16xbf16>, vector<128x16xf32> -> vector<128x16xf32>
    %128 = arith.addf %117, %127 : vector<128x16xf32>
    %129 = vector.extract_strided_slice %122 {offsets = [0, 9, 0], sizes = [8, 16, 32], strides = [1, 1, 1]} : vector<8x34x32xbf16> to vector<8x16x32xbf16>
    %130 = vector.shape_cast %129 : vector<8x16x32xbf16> to vector<128x32xbf16>
    %c17 = arith.constant 17 : index
    %c0_70 = arith.constant 0 : index
    %c0_71 = arith.constant 0 : index
    %131 = vector.load %arg3[%c17, %c0_70, %c0_71] : memref<25x32x16xbf16, #tpu.memory_space<vmem>>, vector<1x32x16xbf16>
    %132 = vector.shape_cast %131 : vector<1x32x16xbf16> to vector<32x16xbf16>
    %cst_72 = arith.constant dense<0.000000e+00> : vector<128x16xf32>
    %133 = tpu.matmul %130, %132, %cst_72 {dimension_numbers = #tpu.dot_dimension_numbers<[1], [0], [0], [1], [0, 0, 1, 1], [], []>} : vector<128x32xbf16>, vector<32x16xbf16>, vector<128x16xf32> -> vector<128x16xf32>
    %134 = arith.addf %128, %133 : vector<128x16xf32>
    %135 = vector.extract_strided_slice %122 {offsets = [0, 12, 0], sizes = [8, 16, 32], strides = [1, 1, 1]} : vector<8x34x32xbf16> to vector<8x16x32xbf16>
    %136 = vector.shape_cast %135 : vector<8x16x32xbf16> to vector<128x32xbf16>
    %c18 = arith.constant 18 : index
    %c0_73 = arith.constant 0 : index
    %c0_74 = arith.constant 0 : index
    %137 = vector.load %arg3[%c18, %c0_73, %c0_74] : memref<25x32x16xbf16, #tpu.memory_space<vmem>>, vector<1x32x16xbf16>
    %138 = vector.shape_cast %137 : vector<1x32x16xbf16> to vector<32x16xbf16>
    %cst_75 = arith.constant dense<0.000000e+00> : vector<128x16xf32>
    %139 = tpu.matmul %136, %138, %cst_75 {dimension_numbers = #tpu.dot_dimension_numbers<[1], [0], [0], [1], [0, 0, 1, 1], [], []>} : vector<128x32xbf16>, vector<32x16xbf16>, vector<128x16xf32> -> vector<128x16xf32>
    %140 = arith.addf %134, %139 : vector<128x16xf32>
    %c9_i32_76 = arith.constant 9 : i32
    %141 = arith.addi %0, %c9_i32_76 : i32
    %c6_i32 = arith.constant 6 : i32
    %142 = arith.addi %141, %c6_i32 : i32
    %c0_77 = arith.constant 0 : index
    %143 = arith.index_cast %142 : i32 to index
    %c0_78 = arith.constant 0 : index
    %c0_79 = arith.constant 0 : index
    %144 = vector.load %arg2[%c0_77, %143, %c0_78, %c0_79] : memref<1x34x34x32xbf16, #tpu.memory_space<vmem>>, vector<1x8x34x32xbf16>
    %145 = vector.shape_cast %144 : vector<1x8x34x32xbf16> to vector<8x34x32xbf16>
    %146 = vector.extract_strided_slice %145 {offsets = [0, 3, 0], sizes = [8, 16, 32], strides = [1, 1, 1]} : vector<8x34x32xbf16> to vector<8x16x32xbf16>
    %147 = vector.shape_cast %146 : vector<8x16x32xbf16> to vector<128x32xbf16>
    %c19 = arith.constant 19 : index
    %c0_80 = arith.constant 0 : index
    %c0_81 = arith.constant 0 : index
    %148 = vector.load %arg3[%c19, %c0_80, %c0_81] : memref<25x32x16xbf16, #tpu.memory_space<vmem>>, vector<1x32x16xbf16>
    %149 = vector.shape_cast %148 : vector<1x32x16xbf16> to vector<32x16xbf16>
    %cst_82 = arith.constant dense<0.000000e+00> : vector<128x16xf32>
    %150 = tpu.matmul %147, %149, %cst_82 {dimension_numbers = #tpu.dot_dimension_numbers<[1], [0], [0], [1], [0, 0, 1, 1], [], []>} : vector<128x32xbf16>, vector<32x16xbf16>, vector<128x16xf32> -> vector<128x16xf32>
    %151 = arith.addf %140, %150 : vector<128x16xf32>
    %152 = vector.extract_strided_slice %145 {offsets = [0, 9, 0], sizes = [8, 16, 32], strides = [1, 1, 1]} : vector<8x34x32xbf16> to vector<8x16x32xbf16>
    %153 = vector.shape_cast %152 : vector<8x16x32xbf16> to vector<128x32xbf16>
    %c20 = arith.constant 20 : index
    %c0_83 = arith.constant 0 : index
    %c0_84 = arith.constant 0 : index
    %154 = vector.load %arg3[%c20, %c0_83, %c0_84] : memref<25x32x16xbf16, #tpu.memory_space<vmem>>, vector<1x32x16xbf16>
    %155 = vector.shape_cast %154 : vector<1x32x16xbf16> to vector<32x16xbf16>
    %cst_85 = arith.constant dense<0.000000e+00> : vector<128x16xf32>
    %156 = tpu.matmul %153, %155, %cst_85 {dimension_numbers = #tpu.dot_dimension_numbers<[1], [0], [0], [1], [0, 0, 1, 1], [], []>} : vector<128x32xbf16>, vector<32x16xbf16>, vector<128x16xf32> -> vector<128x16xf32>
    %157 = arith.addf %151, %156 : vector<128x16xf32>
    %158 = vector.extract_strided_slice %145 {offsets = [0, 15, 0], sizes = [8, 16, 32], strides = [1, 1, 1]} : vector<8x34x32xbf16> to vector<8x16x32xbf16>
    %159 = vector.shape_cast %158 : vector<8x16x32xbf16> to vector<128x32xbf16>
    %c21 = arith.constant 21 : index
    %c0_86 = arith.constant 0 : index
    %c0_87 = arith.constant 0 : index
    %160 = vector.load %arg3[%c21, %c0_86, %c0_87] : memref<25x32x16xbf16, #tpu.memory_space<vmem>>, vector<1x32x16xbf16>
    %161 = vector.shape_cast %160 : vector<1x32x16xbf16> to vector<32x16xbf16>
    %cst_88 = arith.constant dense<0.000000e+00> : vector<128x16xf32>
    %162 = tpu.matmul %159, %161, %cst_88 {dimension_numbers = #tpu.dot_dimension_numbers<[1], [0], [0], [1], [0, 0, 1, 1], [], []>} : vector<128x32xbf16>, vector<32x16xbf16>, vector<128x16xf32> -> vector<128x16xf32>
    %163 = arith.addf %157, %162 : vector<128x16xf32>
    %c9_i32_89 = arith.constant 9 : i32
    %164 = arith.addi %0, %c9_i32_89 : i32
    %c9_i32_90 = arith.constant 9 : i32
    %165 = arith.addi %164, %c9_i32_90 : i32
    %c0_91 = arith.constant 0 : index
    %166 = arith.index_cast %165 : i32 to index
    %c0_92 = arith.constant 0 : index
    %c0_93 = arith.constant 0 : index
    %167 = vector.load %arg2[%c0_91, %166, %c0_92, %c0_93] : memref<1x34x34x32xbf16, #tpu.memory_space<vmem>>, vector<1x8x34x32xbf16>
    %168 = vector.shape_cast %167 : vector<1x8x34x32xbf16> to vector<8x34x32xbf16>
    %169 = vector.extract_strided_slice %168 {offsets = [0, 0, 0], sizes = [8, 16, 32], strides = [1, 1, 1]} : vector<8x34x32xbf16> to vector<8x16x32xbf16>
    %170 = vector.shape_cast %169 : vector<8x16x32xbf16> to vector<128x32xbf16>
    %c22 = arith.constant 22 : index
    %c0_94 = arith.constant 0 : index
    %c0_95 = arith.constant 0 : index
    %171 = vector.load %arg3[%c22, %c0_94, %c0_95] : memref<25x32x16xbf16, #tpu.memory_space<vmem>>, vector<1x32x16xbf16>
    %172 = vector.shape_cast %171 : vector<1x32x16xbf16> to vector<32x16xbf16>
    %cst_96 = arith.constant dense<0.000000e+00> : vector<128x16xf32>
    %173 = tpu.matmul %170, %172, %cst_96 {dimension_numbers = #tpu.dot_dimension_numbers<[1], [0], [0], [1], [0, 0, 1, 1], [], []>} : vector<128x32xbf16>, vector<32x16xbf16>, vector<128x16xf32> -> vector<128x16xf32>
    %174 = arith.addf %163, %173 : vector<128x16xf32>
    %175 = vector.extract_strided_slice %168 {offsets = [0, 9, 0], sizes = [8, 16, 32], strides = [1, 1, 1]} : vector<8x34x32xbf16> to vector<8x16x32xbf16>
    %176 = vector.shape_cast %175 : vector<8x16x32xbf16> to vector<128x32xbf16>
    %c23 = arith.constant 23 : index
    %c0_97 = arith.constant 0 : index
    %c0_98 = arith.constant 0 : index
    %177 = vector.load %arg3[%c23, %c0_97, %c0_98] : memref<25x32x16xbf16, #tpu.memory_space<vmem>>, vector<1x32x16xbf16>
    %178 = vector.shape_cast %177 : vector<1x32x16xbf16> to vector<32x16xbf16>
    %cst_99 = arith.constant dense<0.000000e+00> : vector<128x16xf32>
    %179 = tpu.matmul %176, %178, %cst_99 {dimension_numbers = #tpu.dot_dimension_numbers<[1], [0], [0], [1], [0, 0, 1, 1], [], []>} : vector<128x32xbf16>, vector<32x16xbf16>, vector<128x16xf32> -> vector<128x16xf32>
    %180 = arith.addf %174, %179 : vector<128x16xf32>
    %181 = vector.extract_strided_slice %168 {offsets = [0, 18, 0], sizes = [8, 16, 32], strides = [1, 1, 1]} : vector<8x34x32xbf16> to vector<8x16x32xbf16>
    %182 = vector.shape_cast %181 : vector<8x16x32xbf16> to vector<128x32xbf16>
    %c24 = arith.constant 24 : index
    %c0_100 = arith.constant 0 : index
    %c0_101 = arith.constant 0 : index
    %183 = vector.load %arg3[%c24, %c0_100, %c0_101] : memref<25x32x16xbf16, #tpu.memory_space<vmem>>, vector<1x32x16xbf16>
    %184 = vector.shape_cast %183 : vector<1x32x16xbf16> to vector<32x16xbf16>
    %cst_102 = arith.constant dense<0.000000e+00> : vector<128x16xf32>
    %185 = tpu.matmul %182, %184, %cst_102 {dimension_numbers = #tpu.dot_dimension_numbers<[1], [0], [0], [1], [0, 0, 1, 1], [], []>} : vector<128x32xbf16>, vector<32x16xbf16>, vector<128x16xf32> -> vector<128x16xf32>
    %186 = arith.addf %180, %185 : vector<128x16xf32>
    %c0_103 = arith.constant 0 : index
    %c0_104 = arith.constant 0 : index
    %c0_105 = arith.constant 0 : index
    %187 = vector.load %arg4[%c0_103, %c0_104, %c0_105] : memref<1x1x16xf32, #tpu.memory_space<vmem>>, vector<1x1x16xf32>
    %188 = vector.shape_cast %187 : vector<1x1x16xf32> to vector<1x16xf32>
    %189 = vector.broadcast %188 : vector<1x16xf32> to vector<128x16xf32>
    %190 = arith.addf %186, %189 : vector<128x16xf32>
    %191 = vector.shape_cast %190 : vector<128x16xf32> to vector<8x16x16xf32>
    %c0_106 = arith.constant 0 : index
    %c0_107 = arith.constant 0 : index
    %c0_108 = arith.constant 0 : index
    %c0_109 = arith.constant 0 : index
    %192 = vector.load %arg5[%c0_106, %c0_107, %c0_108, %c0_109] : memref<1x8x16x16xf32, #tpu.memory_space<vmem>>, vector<1x8x16x16xf32>
    %193 = vector.shape_cast %192 : vector<1x8x16x16xf32> to vector<8x16x16xf32>
    %194 = vector.shape_cast %191 : vector<8x16x16xf32> to vector<1x8x16x16xf32>
    tpu.vector_store %arg5[%c0_106, %c0_107, %c0_108, %c0_109], %194 {strides = array<i32>} : memref<1x8x16x16xf32, #tpu.memory_space<vmem>>, vector<1x8x16x16xf32>,
    %c0_i32_110 = arith.constant 0 : i32
    %195 = arith.cmpi eq, %arg1, %c0_i32_110 : i32
    %196 = arith.extui %195 : i1 to i32
    %c0_i32_111 = arith.constant 0 : i32
    %197 = arith.cmpi ne, %196, %c0_i32_111 : i32
    scf.if %197 {
      %cst_120 = arith.constant 0.000000e+00 : f32
      %210 = vector.broadcast %cst_120 : f32 to vector<2x16xf32>
      %c0_121 = arith.constant 0 : index
      %c0_122 = arith.constant 0 : index
      %c0_123 = arith.constant 0 : index
      %211 = vector.load %arg6[%c0_121, %c0_122, %c0_123] : memref<1x2x16xf32, #tpu.memory_space<vmem>>, vector<1x2x16xf32>
      %212 = vector.shape_cast %211 : vector<1x2x16xf32> to vector<2x16xf32>
      %213 = vector.shape_cast %210 : vector<2x16xf32> to vector<1x2x16xf32>
      tpu.vector_store %arg6[%c0_121, %c0_122, %c0_123], %213 {strides = array<i32>} : memref<1x2x16xf32, #tpu.memory_space<vmem>>, vector<1x2x16xf32>,
    } else {
    }
    %c0_112 = arith.constant 0 : index
    %c0_113 = arith.constant 0 : index
    %c0_114 = arith.constant 0 : index
    %198 = vector.load %arg6[%c0_112, %c0_113, %c0_114] : memref<1x2x16xf32, #tpu.memory_space<vmem>>, vector<1x2x16xf32>
    %199 = vector.shape_cast %198 : vector<1x2x16xf32> to vector<2x16xf32>
    %cst_115 = arith.constant dense<0.000000e+00> : vector<16xf32>
    %200 = vector.multi_reduction <add>, %190, %cst_115 [0] : vector<128x16xf32> to vector<16xf32>
    %201 = vector.shape_cast %200 : vector<16xf32> to vector<1x16xf32>
    %202 = arith.mulf %190, %190 : vector<128x16xf32>
    %cst_116 = arith.constant dense<0.000000e+00> : vector<16xf32>
    %203 = vector.multi_reduction <add>, %202, %cst_116 [0] : vector<128x16xf32> to vector<16xf32>
    %204 = vector.shape_cast %203 : vector<16xf32> to vector<1x16xf32>
    %205 = tpu.concatenate %201, %204 in 0 : vector<1x16xf32>, vector<1x16xf32> -> vector<2x16xf32>
    %206 = arith.addf %199, %205 : vector<2x16xf32>
    %c0_117 = arith.constant 0 : index
    %c0_118 = arith.constant 0 : index
    %c0_119 = arith.constant 0 : index
    %207 = vector.load %arg6[%c0_117, %c0_118, %c0_119] : memref<1x2x16xf32, #tpu.memory_space<vmem>>, vector<1x2x16xf32>
    %208 = vector.shape_cast %207 : vector<1x2x16xf32> to vector<2x16xf32>
    %209 = vector.shape_cast %206 : vector<2x16xf32> to vector<1x2x16xf32>
    tpu.vector_store %arg6[%c0_117, %c0_118, %c0_119], %209 {strides = array<i32>} : memref<1x2x16xf32, #tpu.memory_space<vmem>>, vector<1x2x16xf32>,
    return
  }
  func.func @transform_0(%arg0: i32, %arg1: i32) -> (i32, i32, i32, i32) {
    %c0_i32 = arith.constant 0 : i32
    %c0_i32_0 = arith.constant 0 : i32
    %c0_i32_1 = arith.constant 0 : i32
    %c0_i32_2 = arith.constant 0 : i32
    return %arg0, %c0_i32, %c0_i32_0, %c0_i32_1 : i32, i32, i32, i32
  }
  func.func @transform_1(%arg0: i32, %arg1: i32) -> (i32, i32, i32) {
    %c0_i32 = arith.constant 0 : i32
    %c0_i32_0 = arith.constant 0 : i32
    %c0_i32_1 = arith.constant 0 : i32
    %c0_i32_2 = arith.constant 0 : i32
    return %c0_i32, %c0_i32_0, %c0_i32_1 : i32, i32, i32
  }
  func.func @transform_2(%arg0: i32, %arg1: i32) -> (i32, i32, i32) {
    %c0_i32 = arith.constant 0 : i32
    %c0_i32_0 = arith.constant 0 : i32
    %c0_i32_1 = arith.constant 0 : i32
    return %arg0, %c0_i32, %c0_i32_0 : i32, i32, i32
  }
  func.func @transform_3(%arg0: i32, %arg1: i32) -> (i32, i32, i32, i32) {
    %c0_i32 = arith.constant 0 : i32
    %c0_i32_0 = arith.constant 0 : i32
    %c0_i32_1 = arith.constant 0 : i32
    return %arg0, %arg1, %c0_i32, %c0_i32_0 : i32, i32, i32, i32
  }
  func.func @transform_4(%arg0: i32, %arg1: i32) -> (i32, i32, i32) {
    %c0_i32 = arith.constant 0 : i32
    %c0_i32_0 = arith.constant 0 : i32
    %c0_i32_1 = arith.constant 0 : i32
    return %arg0, %c0_i32, %c0_i32_0 : i32, i32, i32
  }
}

</mosaic_0001>

<bundles_post_ra>
// kernel: squeeze.3
= control target key start
LH: loop header
LB: loop body
LE: loop exit
PB: predicated region body
PF: predicated region fallthrough
CT: control target
= control target key end

     0   :  { %s66_s8 = smov 122   ;;  %s67_s9 = smov 118   ;;  %vm7_vm0 = vcmask 15360   ;;  %s117_s0 = inlined_call_operand.vmem [shape: f32[2,16], index: 0, kind: input, shape index: {}]   ;;  %s118_s1 = inlined_call_operand.vmem [shape: f32[2,8,2], index: 1, kind: output, shape index: {}]  }
   0x1   :  { %v4_v0 = vld [vmem:[%s117_s0] sm:$0x3]  ;;  %s65_s0 = smov 126   ;;  %s68_s10 = smov 124  }
   0x2   :  { %5 = vst [vmem:[#allocation0] sm:$0x3] %v4_v0  ;;  %s69_s11 = smov 120   ;;  %s70_s12 = smov 116  }
   0x3   :  { %s71_s13 = smov 114  }
   0x9   :  { %v9_v1 = vld [vmem:[#allocation0] sm:$0x3]  }
   0xa   :  { %v21_v2 = vld [vmem:[#allocation0] sm:$0x3]   ;;  %10 = vrot.lane.b32.xlu0 %v9_v1, %s65_s0 }
   0xb   :  { %22 = vrot.lane.b32.xlu1 %v21_v2, %s66_s8  ;;  %v33_v3 = vld [vmem:[#allocation0] sm:$0x3]  }
   0xc   :  { %34 = vrot.lane.b32.xlu2 %v33_v3, %s67_s9  ;;  %v15_v4 = vld [vmem:[#allocation0] sm:$0x3]  }
   0xd   :  { %v27_v5 = vld [vmem:[#allocation0] sm:$0x3]  }
   0xe   :  { %v39_v6 = vld [vmem:[#allocation0] sm:$0x3]  }
   0xf   :  { %v45_v7 = vld [vmem:[#allocation0] sm:$0x3]  }
  0x10   :  { %v6_v8 = vld [vmem:[#allocation0] sm:$0x3]  }
  0x11   :  { %8 = vst.msk [vmem:[%s118_s1] ss:$8 sm:$0x3] %vm7_vm0, %v6_v8  }
  0x12   :  { %16 = vrot.lane.b32.xlu0 %v15_v4, %s68_s10 }
  0x13   :  { %28 = vrot.lane.b32.xlu1 %v27_v5, %s69_s11 }
  0x14   :  { %40 = vrot.lane.b32.xlu2 %v39_v6, %s70_s12 }
  0x1a   :  { %46 = vrot.lane.b32.xlu0 %v45_v7, %s71_s13 }
  0x66   :  { %v35_v9 = vpop.permute.xlu2 %34  }
  0x67   :  { %55 = vst.msk [vmem:[%s118_s1 + $0x5] ss:$8 sm:$0x3] %vm7_vm0, %v35_v9  }
  0x6e   :  { %v41_v10 = vpop.permute.xlu2 %40  }
  0x6f   :  { %56 = vst.msk [vmem:[%s118_s1 + $0x6] ss:$8 sm:$0x3] %vm7_vm0, %v41_v10  }
  0x7c   :  { %v11_v11 = vpop.permute.xlu0 %10  }
  0x7d   :  { %v23_v12 = vpop.permute.xlu1 %22   ;;  %51 = vst.msk [vmem:[%s118_s1 + $0x1] ss:$8 sm:$0x3] %vm7_vm0, %v11_v11  }
  0x7e   :  { %53 = vst.msk [vmem:[%s118_s1 + $0x3] ss:$8 sm:$0x3] %vm7_vm0, %v23_v12  }
  0x84   :  { %v17_v13 = vpop.permute.xlu0 %16  }
  0x85   :  { %v29_v14 = vpop.permute.xlu1 %28   ;;  %52 = vst.msk [vmem:[%s118_s1 + $0x2] ss:$8 sm:$0x3] %vm7_vm0, %v17_v13  }
  0x86   :  { %54 = vst.msk [vmem:[%s118_s1 + $0x4] ss:$8 sm:$0x3] %vm7_vm0, %v29_v14  }
  0x8c   :  { %v47_v15 = vpop.permute.xlu0 %46  }
  0x8d   :  { %57 = vst.msk [vmem:[%s118_s1 + $0x7] ss:$8 sm:$0x3] %vm7_vm0, %v47_v15  }

// kernel: aspp_forward.1
= control target key start
LH: loop header
LB: loop body
LE: loop exit
PB: predicated region body
PF: predicated region fallthrough
CT: control target
= control target key end

     0   :  { %s7944_s15 = smov 0   ;;  %s7946_s16 = smov 0   ;;  %s11246_s0 = inlined_call_operand.vmem [shape: bf16[2,34,34,32], index: 0, kind: input, shape index: {}]   ;;  %s11247_s1 = inlined_call_operand.vmem [shape: bf16[25,32,16], index: 1, kind: input, shape index: {}]   ;;  %s11248_s2 = inlined_call_operand.vmem [shape: f32[2,1,16], index: 2, kind: input, shape index: {}]   ;;  %s11249_s3 = inlined_call_operand.vmem [shape: f32[2,16,16,16], index: 3, kind: output, shape index: {0}]   ;;  %s11250_s4 = inlined_call_operand.vmem [shape: f32[2,2,16], index: 4, kind: output, shape index: {1}]  }
   0x1   :  { %s7948_s17 = smov 0   ;;  %s7950_s18 = smov 0  }
   0x2   :  { %s7952_s19 = smov 0  }
   0x3 LB: > { %s24_s20 = sadd.s32 1, %s7908_s17  ;;  %s27_s21 = sadd.s32 1, %s7912_s18  ;;  %s7916_s19 = sphi %s7952_s19, %s15_s19   ;;  %s7912_s18 = sphi %s7950_s18, %s11492_s18   ;;  %s7908_s17 = sphi %s7948_s17, %s11491_s17   ;;  %s7904_s16 = sphi %s7946_s16, %s11490_s16   ;;  %s7900_s15 = sphi %s7944_s15, %s11489_s15  }
   0x4   : > { %p25_p0 = scmp.ge.s32.totalorder %s24_s20, 2  ;;  %p6788_p1 = scmp.ge.s32.totalorder %s7916_s19, 1 }
   0x5   : > { %p187_p2 = scmp.lt.s32.totalorder %s7916_s19, 5 }
   0x6   : > { %s11494_s20 = smov (%p25_p0, %s24_s20), 0  ;;  %s11496_s21 = smov (!%p25_p0, %s27_s21), %s7912_s18 }
   0x7   : > { %p188_p3 = pnand %p6788_p1, %p187_p2  ;;  %p29_p4 = scmp.ge.s32.totalorder %s11496_s21, 2 }
   0x9   : > { %s11498_s21 = smov (%p29_p4, %s11496_s21), 0  ;;  %191 = sbr.rel (%p188_p3) target bundleno = 1030 (0x406), region = 32 }
   0xe   : > { %v7721_v0 = vld [vmem:[%s11247_s1 + $0x18] sm:$0xff]  ;;  %p225_p5 = scmp.lt.s32.totalorder %s7904_s16, 1  ;;  %v7720_v1 = vld [vmem:[%s11247_s1 + $0x10] sm:$0xff]  ;;  %s7709_s26 = smul.u32 160, %s7900_s15  ;;  %v7723_v2 = vld [vmem:[%s11247_s1 + $0x28] sm:$0xff]  ;;  %vm533_vm2 = vcmask 261120  }
   0xf   : > { %7784 = vmatpush.bf16.msra.mxu1 %v7721_v0  ;;  %7785 = vmatpush.bf16.msra.mxu2 %v7721_v0  ;;  %v7725_v3 = vld [vmem:[%s11247_s1 + $0x38] sm:$0xff]  ;;  %v7719_v4 = vld [vmem:[%s11247_s1 + $0x8] sm:$0xff]  ;;  %vm297_vm0 = vsmask.f32 3328  ;;  %vm298_vm1 = vsmask.f32 7440 }
  0x10   : > { %s11500_s16 = smov (!%p225_p5, %s7904_s16), 1  ;;  %7786 = vmatpush.bf16.msra.mxu3 %v7721_v0  ;;  %564 = vmatpush.bf16.msra.mxu0 %v7721_v0  ;;  %v7727_v5 = vld [vmem:[%s11247_s1 + $0x48] sm:$0xff]  ;;  %vm8027_vm3 = vmor %vm297_vm0, %vm298_vm1  ;;  %v7722_v55 = vld [vmem:[%s11247_s1 + $0x20] sm:$0xff]  ;;  %vm756_vm4 = vcmask 1042432   ;;  %vm757_vm5 = vcmask 1046532   ;;  %vm1861_vm12 = vcmask 1040384  }
  0x11   : > { %s7790_s27 = smul.u32 680, %s11500_s16  ;;  %vm8143_vm6 = vmor %vm756_vm4, %vm757_vm5  ;;  %vm981_vm7 = vsmask.f32 2304  ;;  %vm982_vm8 = vsmask.f32 6416  ;;  %vm1862_vm13 = vcmask 1044484   ;;  %s232_s14 = scalar_lea.vmem %s11248_s2, %s11500_s16 }
  0x12   : > { %vm8180_vm9 = vmor %vm981_vm7, %vm982_vm8  ;;  %vm1580_vm10 = vsmask.f32 256  ;;  %vm1581_vm11 = vsmask.f32 4368  ;;  %vm2380_vm0 = vcmask 1041408   ;;  %vm2381_vm1 = vcmask 1045508  }
  0x13   : > { %7787 = vmatpush.bf16.msra.mxu1 %v7720_v1  ;;  %7788 = vmatpush.bf16.msra.mxu2 %v7720_v1  ;;  %s229_s12 = scalar_lea.vmem %s11246_s0, %s7790_s27  ;;  %vm8543_vm14 = vmor %vm1580_vm10, %vm1581_vm11  ;;  %s6794_s22 = sshll.u32 %s11500_s16, 1 }
  0x14   : > { %7789 = vmatpush.bf16.msra.mxu3 %v7720_v1  ;;  %565 = vmatpush.bf16.msra.mxu0 %v7720_v1  ;;  %s8001_s13 = scalar_lea.vmem %s229_s12, %s7709_s26  ;;  %vm8557_vm15 = vmor %vm1861_vm12, %vm1862_vm13  ;;  %s10902_s25 = scalar_lea.vmem %s11250_s4, %s6794_s22 }
  0x15   : > { %v264_v6 = vld [vmem:[%s8001_s13 + $0x2c] sm:$0xf]  ;;  %v8005_v7 = vld [vmem:[%s8001_s13 + $0x30] sm:$0xf]  ;;  %v8008_v8 = vld [vmem:[%s8001_s13 + $0x34] sm:$0xf] }
  0x16   : > { %v349_v9 = vshrl.u32 %v264_v6, 16  ;;  %v352_v10 = vshll.u32 %v264_v6, 16  ;;  %v358_v11 = vshll.u32 %v8005_v7, 16  ;;  %v362_v12 = vshrl.u32 %v8005_v7, 16  ;;  %v274_v13 = vld [vmem:[%s8001_s13 + $0x54] sm:$0xf]  ;;  %vm8605_vm4 = vmor %vm2380_vm0, %vm2381_vm1 }
  0x17   : > { %886 = vmatpush.bf16.msrb.mxu2 %v7723_v2  ;;  %689 = vmatpush.bf16.msrb.mxu1 %v7719_v4  ;;  %v368_v14 = vshll.u32 %v8008_v8, 16  ;;  %v8015_v15 = vld [vmem:[%s8001_s13 + $0x58] sm:$0xf]  ;;  %v8018_v16 = vld [vmem:[%s8001_s13 + $0x5c] sm:$0xf]  ;;  %v397_v17 = vshrl.u32 %v274_v13, 16 }
  0x18   : > { %1279 = vmatpush.bf16.msrb.mxu3 %v7725_v3  ;;  %1521 = vmatpush.bf16.msrb.mxu0 %v7727_v5  ;;  %v351_v18 = vrot.slane %v349_v9, 4  ;;  %v354_v19 = vrot.slane %v352_v10, 5  ;;  %v360_v20 = vrot.slane %v358_v11, 5  ;;  %v364_v21 = vrot.slane %v362_v12, 4  ;;  %v284_v22 = vld [vmem:[%s8001_s13 + $0x7c] sm:$0xf] }
  0x19   : > { %v370_v23 = vrot.slane %v368_v14, 5  ;;  %v399_v24 = vrot.slane %v397_v17, 4  ;;  %v400_v25 = vshll.u32 %v274_v13, 16  ;;  %v406_v26 = vshll.u32 %v8015_v15, 16  ;;  %v285_v31 = vld [vmem:[%s8001_s13 + $0x80] sm:$0xf] }
  0x1a   : > { %v355_v27 = vor.u32 %v354_v19, %v351_v18  ;;  %v365_v28 = vor.u32 %v364_v21, %v360_v20  ;;  %v410_v29 = vshrl.u32 %v8015_v15, 16  ;;  %v416_v30 = vshll.u32 %v8018_v16, 16  ;;  %v286_v42 = vld [vmem:[%s8001_s13 + $0x84] sm:$0xf]  ;;  %v8043_v63 = vld [vmem:[%s8001_s13 + $0x8] sm:$0xf] }
  0x1b   : > { %v402_v33 = vrot.slane %v400_v25, 5  ;;  %v408_v34 = vrot.slane %v406_v26, 5  ;;  %v445_v35 = vshrl.u32 %v284_v22, 16  ;;  %v448_v36 = vshll.u32 %v284_v22, 16  ;;  %v254_v50 = vld [vmem:[%s8001_s13 + $0x4] sm:$0xf]  ;;  %887 = vmatpush.bf16.msrb.mxu2 %v7722_v55 }
  0x1c   : > { %v356_v37 = vrot.slane %v355_v27, 4  ;;  %v366_v38 = vrot.slane %v365_v28, 4  ;;  %v412_v39 = vrot.slane %v410_v29, 4  ;;  %v418_v40 = vrot.slane %v416_v30, 5  ;;  %v8048_v5 = vld [vmem:[%s8001_s13 + $0xc] sm:$0xf] }
  0x1d   : > { %v403_v41 = vor.u32 %v402_v33, %v399_v24  ;;  %v447_v43 = vrot.slane %v445_v35, 4  ;;  %v450_v44 = vrot.slane %v448_v36, 5  ;;  %v454_v45 = vshll.u32 %v285_v31, 16  ;;  %v269_v12 = vld [vmem:[%s8001_s13 + $0x40] sm:$0xf]  ;;  %v7724_v19 = vld [vmem:[%s11247_s1 + $0x30] sm:$0xff] }
  0x1e   : > { %v361_v46 = vsel %vm8027_vm3, %v356_v37, %v360_v20  ;;  %v371_v47 = vsel %vm8027_vm3, %v366_v38, %v370_v23  ;;  %v413_v48 = vor.u32 %v412_v39, %v408_v34  ;;  %v458_v49 = vshrl.u32 %v285_v31, 16  ;;  %v7718_v20 = vld [vmem:[%s11247_s1] sm:$0xff]  ;;  %v8073_v30 = vld [vmem:[%s8001_s13 + $0x48] sm:$0xf]  ;;  %1280 = vmatpush.bf16.msrb.mxu3 %v7724_v19  ;;  %s6792_s27 = sshll.u32 %s11500_s16, 5  ;;  %p7706_p7 = scmp.ne.s32.totalorder %s7900_s15, 0 }
  0x1f   : > { %v501_v51 = vunpack.c.l.b16 %v361_v46  ;;  %v502_v52 = vunpack.c.l.b16 %v371_v47  ;;  %v404_v53 = vrot.slane %v403_v41, 4  ;;  %v451_v54 = vor.u32 %v450_v44, %v447_v43  ;;  %v7726_v21 = vld [vmem:[%s11247_s1 + $0x40] sm:$0xff]  ;;  %690 = vmatpush.bf16.msrb.mxu1 %v7718_v20  ;;  %v279_v37 = vld [vmem:[%s8001_s13 + $0x68] sm:$0xf] }
  0x20   : > { %v414_v56 = vrot.slane %v413_v48, 4  ;;  %v456_v57 = vrot.slane %v454_v45, 5  ;;  %v460_v58 = vrot.slane %v458_v49, 4  ;;  %v464_v59 = vshll.u32 %v286_v42, 16  ;;  %v8068_v26 = vld [vmem:[%s8001_s13 + $0x44] sm:$0xf]  ;;  %1522 = vmatpush.bf16.msrb.mxu0 %v7726_v21 }
  0x21   : > { %v515_v60 = vpack.c.b16 %v502_v52, %v501_v51  ;;  %v409_v61 = vsel %vm8027_vm3, %v404_v53, %v408_v34  ;;  %v452_v62 = vrot.slane %v451_v54, 4  ;;  %v301_v0 = vshrl.u32 %v254_v50, 16  ;;  %v8081_v49 = vld [vmem:[%s8001_s13 + $0x6c] sm:$0xf]  ;;  %v8087_v54 = vld [vmem:[%s8001_s13 + $0x70] sm:$0xf] }
  0x22   : > { %v419_v1 = vsel %vm8027_vm3, %v414_v56, %v418_v40  ;;  %v505_v2 = vunpack.c.l.b16 %v409_v61  ;;  %v461_v3 = vor.u32 %v460_v58, %v456_v57  ;;  %v466_v4 = vrot.slane %v464_v59, 5  ;;  %v289_v56 = vld [vmem:[%s8001_s13 + $0x90] sm:$0xf] }
  0x23   : > { %6812 = vmatmul.msk.bf16.vlgmr.msra.gmra.mxu1 %vm533_vm2, %v515_v60  ;;  %v506_v6 = vunpack.c.l.b16 %v419_v1  ;;  %v457_v9 = vsel %vm8027_vm3, %v452_v62, %v456_v57  ;;  %v303_v10 = vrot.slane %v301_v0, 4  ;;  %v304_v11 = vshll.u32 %v254_v50, 16 }
  0x24   : > { %v462_v13 = vrot.slane %v461_v3, 4  ;;  %v509_v14 = vunpack.c.l.b16 %v457_v9  ;;  %v310_v17 = vshll.u32 %v8043_v63, 16  ;;  %v314_v18 = vshrl.u32 %v8043_v63, 16 }
  0x25   : > { %v517_v22 = vpack.c.b16 %v506_v6, %v505_v2  ;;  %v306_v23 = vrot.slane %v304_v11, 5  ;;  %v320_v24 = vshll.u32 %v8048_v5, 16  ;;  %v761_v25 = vrot.slane %v8048_v5, 5 }
  0x26   : > { %v467_v27 = vsel %vm8027_vm3, %v462_v13, %v466_v4  ;;  %v312_v28 = vrot.slane %v310_v17, 5  ;;  %v316_v29 = vrot.slane %v314_v18, 4  ;;  %v373_v31 = vshrl.u32 %v269_v12, 16  ;;  %v8098_v13 = vld [vmem:[%s8001_s13 + $0x94] sm:$0xf]  ;;  %v7731_v17 = vld [vmem:[%s11247_s1 + $0x68] sm:$0xff] }
  0x27   : > { %6814 = vmatmul.msk.bf16.vlgmr.msra.gmra.mxu2 %vm533_vm2, %v517_v22  ;;  %v510_v33 = vunpack.c.l.b16 %v467_v27  ;;  %v307_v34 = vor.u32 %v306_v23, %v303_v10  ;;  %v322_v35 = vrot.slane %v320_v24, 5  ;;  %v376_v36 = vshll.u32 %v269_v12, 16  ;;  %v259_v22 = vld [vmem:[%s8001_s13 + $0x18] sm:$0xf] }
  0x28   : > { %v317_v38 = vor.u32 %v316_v29, %v312_v28  ;;  %v375_v39 = vrot.slane %v373_v31, 4  ;;  %v382_v40 = vshll.u32 %v8068_v26, 16  ;;  %v386_v41 = vshrl.u32 %v8068_v26, 16  ;;  %1991 = vmatpush.bf16.msra.mxu2 %v7731_v17  ;;  %v6896_v17 = vld [vmem:[%s8001_s13 + $0x3c] sm:$0xf] }
  0x29   : > { %v519_v42 = vpack.c.b16 %v510_v33, %v509_v14  ;;  %v308_v43 = vrot.slane %v307_v34, 4  ;;  %v378_v44 = vrot.slane %v376_v36, 5  ;;  %v392_v45 = vshll.u32 %v8073_v30, 16  ;;  %v8101_v14 = vld [vmem:[%s8001_s13 + $0x98] sm:$0xf] }
  0x2a   : > { %v318_v46 = vrot.slane %v317_v38, 4  ;;  %v384_v47 = vrot.slane %v382_v40, 5  ;;  %v388_v48 = vrot.slane %v386_v41, 4  ;;  %v421_v50 = vshrl.u32 %v279_v37, 16  ;;  %v7733_v40 = vld [vmem:[%s11247_s1 + $0x78] sm:$0xff] }
  0x2b   : > { %6816 = vmatmul.msk.bf16.vlgmr.msra.gmra.mxu3 %vm533_vm2, %v519_v42  ;;  %v313_v51 = vsel %vm8027_vm3, %v308_v43, %v312_v28  ;;  %v379_v52 = vor.u32 %v378_v44, %v375_v39  ;;  %v394_v53 = vrot.slane %v392_v45, 5  ;;  %v424_v55 = vshll.u32 %v279_v37, 16  ;;  %v7729_v41 = vld [vmem:[%s11247_s1 + $0x58] sm:$0xff]  ;;  %v7735_v42 = vld [vmem:[%s11247_s1 + $0x88] sm:$0xff] }
  0x2c   : > { %v323_v57 = vsel %vm8027_vm3, %v318_v46, %v322_v35  ;;  %v497_v58 = vunpack.c.l.b16 %v313_v51  ;;  %v389_v59 = vor.u32 %v388_v48, %v384_v47  ;;  %v423_v60 = vrot.slane %v421_v50, 4  ;;  %v8114_v35 = vld [vmem:[%s8001_s13 + $0x1c] sm:$0xf]  ;;  %2313 = vmatpush.bf16.msra.mxu3 %v7733_v40  ;;  %1742 = vmatpush.bf16.msra.mxu1 %v7729_v41 }
  0x2d   : > { %v498_v61 = vunpack.c.l.b16 %v323_v57  ;;  %v380_v62 = vrot.slane %v379_v52, 4  ;;  %v426_v0 = vrot.slane %v424_v55, 5  ;;  %v430_v1 = vshll.u32 %v8081_v49, 16 }
  0x2e   : > { %v390_v2 = vrot.slane %v389_v59, 4  ;;  %v434_v3 = vshrl.u32 %v8081_v49, 16  ;;  %v440_v4 = vshll.u32 %v8087_v54, 16  ;;  %v469_v6 = vshrl.u32 %v289_v56, 16 }
  0x2f   : > { %v513_v9 = vpack.c.b16 %v498_v61, %v497_v58  ;;  %v385_v10 = vsel %vm8027_vm3, %v380_v62, %v384_v47  ;;  %v427_v11 = vor.u32 %v426_v0, %v423_v60  ;;  %v432_v12 = vrot.slane %v430_v1, 5  ;;  %v8128_v47 = vld [vmem:[%s8001_s13 + $0x20] sm:$0xf] }
  0x30   : > { %v395_v18 = vsel %vm8027_vm3, %v390_v2, %v394_v53  ;;  %v503_v19 = vunpack.c.l.b16 %v385_v10  ;;  %v436_v20 = vrot.slane %v434_v3, 4  ;;  %v442_v21 = vrot.slane %v440_v4, 5 }
  0x31   : > { %6810 = vmatmul.msk.bf16.vlgmr.msra.gmra.mxu0 %vm533_vm2, %v513_v9  ;;  %v504_v23 = vunpack.c.l.b16 %v395_v18  ;;  %v428_v24 = vrot.slane %v427_v11, 4  ;;  %v471_v27 = vrot.slane %v469_v6, 4  ;;  %v472_v28 = vshll.u32 %v289_v56, 16  ;;  %v257_v9 = vld [vmem:[%s8001_s13 + $0x10] sm:$0x1] }
  0x32   : > { %v437_v29 = vor.u32 %v436_v20, %v432_v12  ;;  %v478_v31 = vshll.u32 %v8098_v13, 16  ;;  %v482_v33 = vshrl.u32 %v8098_v13, 16  ;;  %v488_v34 = vshll.u32 %v8101_v14, 16  ;;  %2510 = vmatpush.bf16.msra.mxu0 %v7735_v42 }
  0x33   : > { %v516_v36 = vpack.c.b16 %v504_v23, %v503_v19  ;;  %v433_v37 = vsel %vm8027_vm3, %v428_v24, %v432_v12  ;;  %v474_v38 = vrot.slane %v472_v28, 5  ;;  %v325_v39 = vshrl.u32 %v259_v22, 16 }
  0x34   : > { %v438_v43 = vrot.slane %v437_v29, 4  ;;  %v507_v44 = vunpack.c.l.b16 %v433_v37  ;;  %v480_v45 = vrot.slane %v478_v31, 5  ;;  %v484_v46 = vrot.slane %v482_v33, 4  ;;  %v6897_v31 = vld [vmem:[%s8001_s13 + $0x40] sm:$0xf] }
  0x35   : > { %6813 = vmatmul.msk.bf16.gmra.mxu1 %vm533_vm2, %v516_v36  ;;  %v475_v48 = vor.u32 %v474_v38, %v471_v27  ;;  %v490_v50 = vrot.slane %v488_v34, 5  ;;  %v327_v51 = vrot.slane %v325_v39, 4  ;;  %v328_v52 = vshll.u32 %v259_v22, 16  ;;  %v6898_v33 = vld [vmem:[%s8001_s13 + $0x44] sm:$0xf] }
  0x36   : > { %v443_v53 = vsel %vm8027_vm3, %v438_v43, %v442_v21  ;;  %v485_v55 = vor.u32 %v484_v46, %v480_v45  ;;  %v334_v56 = vshll.u32 %v8114_v35, 16  ;;  %v338_v57 = vshrl.u32 %v8114_v35, 16  ;;  %v6899_v39 = vld [vmem:[%s8001_s13 + $0x48] sm:$0xf] }
  0x37   : > { %v508_v58 = vunpack.c.l.b16 %v443_v53  ;;  %v476_v59 = vrot.slane %v475_v48, 4  ;;  %v330_v60 = vrot.slane %v328_v52, 5  ;;  %v344_v61 = vshll.u32 %v8128_v47, 16  ;;  %v7710_v48 = vld [vmem:[%s8001_s13] sm:$0xff] }
  0x38   : > { %v486_v62 = vrot.slane %v485_v55, 4  ;;  %v336_v0 = vrot.slane %v334_v56, 5  ;;  %v340_v1 = vrot.slane %v338_v57, 4  ;;  %v11324_v20 = vmov 0 }
  0x39   : > { %v518_v2 = vpack.c.b16 %v508_v58, %v507_v44  ;;  %v481_v3 = vsel %vm8027_vm3, %v476_v59, %v480_v45  ;;  %v331_v4 = vor.u32 %v330_v60, %v327_v51  ;;  %v346_v6 = vrot.slane %v344_v61, 5 }
  0x3a   : > { %v491_v10 = vsel %vm8027_vm3, %v486_v62, %v490_v50  ;;  %v511_v11 = vunpack.c.l.b16 %v481_v3  ;;  %v341_v12 = vor.u32 %v340_v1, %v336_v0  ;;  %v11325_v20 = vsel %vm8143_vm6, 4294967295, %v11324_v20  ;;  %v262_v62 = vld [vmem:[%s8001_s13 + $0x24] sm:$0x1] }
  0x3b   : > { %6815 = vmatmul.msk.bf16.gmra.mxu2 %vm533_vm2, %v518_v2  ;;  %v512_v18 = vunpack.c.l.b16 %v491_v10  ;;  %v332_v19 = vrot.slane %v331_v4, 4  ;;  %11326 = vst [vmem:[#allocation2_spill] sm:$0xff] %v11325_v20  ;;  %v6866_v21 = vrot.slane %v8043_v63, 9  ;;  %v763_v22 = vrot.slane %v761_v25, 4 }
  0x3c   : > { %v342_v23 = vrot.slane %v341_v12, 4  ;;  %v764_v24 = vrot.slane %v257_v9, 5  ;;  %v985_v63 = vshrl.u32 %v6896_v17, 16  ;;  %v988_v42 = vshll.u32 %v6896_v17, 16 }
  0x3d   : > { %v520_v27 = vpack.c.b16 %v512_v18, %v511_v11  ;;  %v337_v28 = vsel %vm8027_vm3, %v332_v19, %v336_v0  ;;  %v762_v29 = vsel %vm8143_vm6, %v6866_v21, %v761_v25  ;;  %v8164_v25 = vshrl.u32 %v6897_v31, 16 }
  0x3e   : > { %v347_v34 = vsel %vm8027_vm3, %v342_v23, %v346_v6  ;;  %v499_v36 = vunpack.c.l.b16 %v337_v28  ;;  %v765_v37 = vsel %vm8143_vm6, %v763_v22, %v764_v24  ;;  %v820_v38 = vunpack.c.l.b16 %v762_v29  ;;  %v6900_v6 = vld [vmem:[%s8001_s13 + $0x50] sm:$0xf] }
  0x3f   : > { %6817 = vmatmul.msk.bf16.gmra.mxu3 %vm533_vm2, %v520_v27  ;;  %v500_v40 = vunpack.c.l.b16 %v347_v34  ;;  %v821_v5 = vunpack.c.l.b16 %v765_v37  ;;  %v987_v41 = vrot.slane %v985_v63, 5  ;;  %v997_v43 = vshll.u32 %v6897_v31, 16  ;;  %v6902_v37 = vld [vmem:[%s8001_s13 + $0x58] sm:$0xf] }
  0x40   : > { %v8166_v44 = vshrl.u32 %v6898_v33, 16  ;;  %v8168_v45 = vshll.u32 %v6898_v33, 16  ;;  %v990_v51 = vrot.slane %v988_v42, 6  ;;  %v1348_v52 = vshll.u32 %v6899_v39, 16 }
  0x41   : > { %v514_v46 = vpack.c.b16 %v500_v40, %v499_v36  ;;  %v836_v50 = vpack.c.b16 %v821_v5, %v820_v38  ;;  %v996_v53 = vrot.slane %v8164_v25, 5  ;;  %v999_v55 = vrot.slane %v997_v43, 6  ;;  %v6901_v36 = vld [vmem:[%s8001_s13 + $0x54] sm:$0xf]  ;;  %v8206_v5 = vld [vmem:[%s8001_s13 + $0x5c] sm:$0xf] }
  0x42   : > { %v1006_v56 = vrot.slane %v8166_v44, 5  ;;  %v1009_v57 = vrot.slane %v8168_v45, 6  ;;  %v991_v58 = vor.u32 %v990_v51, %v987_v41  ;;  %v1338_v59 = vrot.slane %v8164_v25, 4 }
  0x43   : > { %6811 = vmatmul.msk.bf16.gmra.mxu0 %vm533_vm2, %v514_v46  ;;  %v1339_v60 = vrot.slane %v997_v43, 5  ;;  %v1342_v61 = vrot.slane %v8168_v45, 5  ;;  %v11327_v0 = vmov 0  ;;  %v1000_v1 = vor.u32 %v999_v55, %v996_v53 }
  0x44   : > { %v11328_v0 = vsel %vm8180_vm9, 4294967295, %v11327_v0  ;;  %v1010_v2 = vor.u32 %v1009_v57, %v1006_v56  ;;  %v1344_v3 = vrot.slane %v8166_v44, 4  ;;  %v1350_v4 = vrot.slane %v1348_v52, 5 }
  0x45   : > { %11329 = vst [vmem:[#allocation3_spill] sm:$0xff] %v11328_v0  ;;  %6858 = vmatmul.msk.bf16.vlgmr.msrb.gmra.mxu1 %vm533_vm2, %v7710_v48  ;;  %v992_v9 = vrot.slane %v991_v58, 4  ;;  %v1340_v10 = vor.u32 %v1339_v60, %v1338_v59  ;;  %v1589_v11 = vshrl.u32 %v6899_v39, 16  ;;  %v6867_v12 = vrot.slane %v8114_v35, 9 }
  0x46   : > { %v1002_v17 = vrot.slane %v1000_v1, 4  ;;  %v1345_v18 = vor.u32 %v1344_v3, %v1342_v61  ;;  %v768_v19 = vrot.slane %v8128_v47, 5  ;;  %v771_v21 = vrot.slane %v262_v62, 5 }
  0x47   : > { %v1001_v22 = vsel %vm8180_vm9, %v992_v9, %v1000_v1  ;;  %v1341_v23 = vrot.slane %v1340_v10, 4  ;;  %v1591_v24 = vrot.slane %v1589_v11, 7  ;;  %v1013_v27 = vshrl.u32 %v6900_v6, 16 }
  0x48   : > { %v1011_v28 = vsel %vm8180_vm9, %v1002_v17, %v1010_v2  ;;  %v1213_v29 = vunpack.c.l.b16 %v1001_v22  ;;  %v1346_v31 = vrot.slane %v1345_v18, 4  ;;  %v8195_v35 = vsel %vm8143_vm6, %v6867_v12, %v768_v19  ;;  %v6904_v12 = vld [vmem:[%s8001_s13 + $0x64] sm:$0xf]  ;;  %v7711_v17 = vld [vmem:[%s8001_s13 + $0x14] sm:$0xff] }
  0x49   : > { %v1214_v33 = vunpack.c.l.b16 %v1011_v28  ;;  %v1343_v47 = vsel %vm8027_vm3, %v1341_v23, %v1342_v61  ;;  %v8199_v63 = vor.u32 %v1591_v24, %v1348_v52  ;;  %v770_v34 = vrot.slane %v768_v19, 4 }
  0x4a   : > { %v1351_v38 = vsel %vm8027_vm3, %v1346_v31, %v1350_v4  ;;  %v1455_v39 = vunpack.c.l.b16 %v1343_v47  ;;  %v1015_v40 = vrot.slane %v1013_v27, 5  ;;  %v1016_v46 = vshll.u32 %v6900_v6, 16  ;;  %v267_v4 = vld [vmem:[%s8001_s13 + $0x38] sm:$0x1] }
  0x4b   : > { %6886 = vmatmul.msk.bf16.vlgmr.msrb.gmra.mxu2 %vm533_vm2, %v836_v50  ;;  %v1229_v41 = vpack.c.b16 %v1214_v33, %v1213_v29  ;;  %v1456_v42 = vunpack.c.l.b16 %v1351_v38  ;;  %v772_v43 = vsel %vm8143_vm6, %v770_v34, %v771_v21  ;;  %v822_v48 = vunpack.c.l.b16 %v8195_v35 }
  0x4c   : > { %v8212_v51 = vshrl.u32 %v6901_v36, 16  ;;  %v1025_v52 = vshll.u32 %v6901_v36, 16  ;;  %v8214_v53 = vshrl.u32 %v6902_v37, 16  ;;  %v823_v55 = vunpack.c.l.b16 %v772_v43 }
  0x4d   : > { %v1018_v56 = vrot.slane %v1016_v46, 6  ;;  %v8216_v57 = vshll.u32 %v6902_v37, 16  ;;  %v11256_v50 = vshll.u32 %v8206_v5, 16  ;;  %v1471_v58 = vpack.c.b16 %v1456_v42, %v1455_v39  ;;  %v6905_v37 = vld [vmem:[%s8001_s13 + $0x68] sm:$0xf] }
  0x4e   : > { %v1024_v59 = vrot.slane %v8212_v51, 5  ;;  %v1027_v60 = vrot.slane %v1025_v52, 6  ;;  %v1034_v61 = vrot.slane %v8214_v53, 5  ;;  %v1352_v2 = vrot.slane %v8212_v51, 4 }
  0x4f   : > { %6940 = vmatmul.msk.bf16.vlgmr.msrb.gmra.mxu3 %vm533_vm2, %v1229_v41  ;;  %v1019_v62 = vor.u32 %v1018_v56, %v1015_v40  ;;  %v1037_v1 = vrot.slane %v8216_v57, 6  ;;  %v1353_v3 = vrot.slane %v1025_v52, 5  ;;  %v1356_v9 = vrot.slane %v8216_v57, 5  ;;  %v6906_v40 = vld [vmem:[%s8001_s13 + $0x6c] sm:$0xf] }
  0x50   : > { %v1028_v6 = vor.u32 %v1027_v60, %v1024_v59  ;;  %v1358_v10 = vrot.slane %v8214_v53, 4  ;;  %v1364_v11 = vrot.slane %v11256_v50, 5  ;;  %v6868_v22 = vrot.slane %v8005_v7, 9 }
  0x51   : > { %v1020_v18 = vrot.slane %v1019_v62, 4  ;;  %v1038_v19 = vor.u32 %v1037_v1, %v1034_v61  ;;  %v1354_v21 = vor.u32 %v1353_v3, %v1352_v2  ;;  %v775_v27 = vrot.slane %v8008_v8, 5 }
  0x52   : > { %v1030_v23 = vrot.slane %v1028_v6, 4  ;;  %v1359_v24 = vor.u32 %v1358_v10, %v1356_v9  ;;  %v778_v28 = vrot.slane %v267_v4, 5  ;;  %v1041_v35 = vshrl.u32 %v6904_v12, 16 }
  0x53   : > { %6960 = vmatmul.msk.bf16.vlgmr.msrb.gmra.mxu0 %vm533_vm2, %v1471_v58  ;;  %v1029_v29 = vsel %vm8180_vm9, %v1020_v18, %v1028_v6  ;;  %v1355_v31 = vrot.slane %v1354_v21, 4  ;;  %v1044_v33 = vshll.u32 %v6904_v12, 16  ;;  %v776_v7 = vsel %vm8143_vm6, %v6868_v22, %v775_v27  ;;  %v8261_v12 = vld [vmem:[%s8001_s13 + $0x70] sm:$0xf] }
  0x54   : > { %v1039_v47 = vsel %vm8180_vm9, %v1030_v23, %v1038_v19  ;;  %v1215_v34 = vunpack.c.l.b16 %v1029_v29  ;;  %v1360_v36 = vrot.slane %v1359_v24, 4  ;;  %v777_v39 = vrot.slane %v775_v27, 4  ;;  %v272_v23 = vld [vmem:[%s8001_s13 + $0x4c] sm:$0x1] }
  0x55   : > { %6859 = vmatmul.msk.bf16.gmra.mxu1 %vm533_vm2, %v7711_v17  ;;  %v1216_v8 = vunpack.c.l.b16 %v1039_v47  ;;  %v1357_v38 = vsel %vm8027_vm3, %v1355_v31, %v1356_v9  ;;  %v824_v42 = vunpack.c.l.b16 %v776_v7  ;;  %v1043_v43 = vrot.slane %v1041_v35, 5  ;;  %v7712_v7 = vld [vmem:[%s8001_s13 + $0x28] sm:$0xff] }
  0x56   : > { %v1365_v41 = vsel %vm8027_vm3, %v1360_v36, %v1364_v11  ;;  %v1046_v46 = vrot.slane %v1044_v33, 6  ;;  %v837_v52 = vpack.c.b16 %v823_v55, %v822_v48  ;;  %v1457_v56 = vunpack.c.l.b16 %v1357_v38 }
  0x57   : > { %v779_v58 = vsel %vm8143_vm6, %v777_v39, %v778_v28  ;;  %v8249_v59 = vshrl.u32 %v6905_v37, 16  ;;  %v1230_v60 = vpack.c.b16 %v1216_v8, %v1215_v34  ;;  %v1053_v62 = vshll.u32 %v6905_v37, 16  ;;  %v6908_v8 = vld [vmem:[%s8001_s13 + $0x78] sm:$0xf] }
  0x58   : > { %v825_v61 = vunpack.c.l.b16 %v779_v58  ;;  %v8251_v1 = vshrl.u32 %v6906_v40, 16  ;;  %v1458_v2 = vunpack.c.l.b16 %v1365_v41  ;;  %v1047_v3 = vor.u32 %v1046_v46, %v1043_v43 }
  0x59   : > { %v1052_v4 = vrot.slane %v8249_v59, 5  ;;  %v8254_v6 = vshll.u32 %v6906_v40, 16  ;;  %v1055_v55 = vrot.slane %v1053_v62, 6  ;;  %v1366_v10 = vrot.slane %v8249_v59, 4 }
  0x5a   : > { %v838_v48 = vpack.c.b16 %v825_v61, %v824_v42  ;;  %v1062_v9 = vrot.slane %v8251_v1, 5  ;;  %v1367_v17 = vrot.slane %v1053_v62, 5  ;;  %v1372_v19 = vrot.slane %v8251_v1, 4 }
  0x5b   : > { %6887 = vmatmul.msk.bf16.gmra.mxu2 %vm533_vm2, %v837_v52  ;;  %v1065_v11 = vrot.slane %v8254_v6, 6  ;;  %v1370_v18 = vrot.slane %v8254_v6, 5  ;;  %v1056_v21 = vor.u32 %v1055_v55, %v1052_v4  ;;  %v6869_v22 = vrot.slane %v8068_v26, 9  ;;  %v6910_v52 = vld [vmem:[%s8001_s13 + $0x80] sm:$0xf] }
  0x5c   : > { %v782_v24 = vrot.slane %v8073_v30, 5  ;;  %v1472_v27 = vpack.c.b16 %v1458_v2, %v1457_v56  ;;  %v1048_v28 = vrot.slane %v1047_v3, 4  ;;  %v11255_v31 = vshll.u32 %v8261_v12, 16  ;;  %v6909_v30 = vld [vmem:[%s8001_s13 + $0x7c] sm:$0xf] }
  0x5d   : > { %v1066_v29 = vor.u32 %v1065_v11, %v1062_v9  ;;  %v1058_v35 = vrot.slane %v1056_v21, 4  ;;  %v1368_v33 = vor.u32 %v1367_v17, %v1366_v10  ;;  %v1373_v47 = vor.u32 %v1372_v19, %v1370_v18 }
  0x5e   : > { %v783_v34 = vsel %vm8143_vm6, %v6869_v22, %v782_v24  ;;  %v784_v26 = vrot.slane %v782_v24, 4  ;;  %v785_v36 = vrot.slane %v272_v23, 5  ;;  %v1057_v38 = vsel %vm8180_vm9, %v1048_v28, %v1056_v21 }
  0x5f   : > { %6941 = vmatmul.msk.bf16.gmra.mxu3 %vm533_vm2, %v1230_v60  ;;  %v826_v37 = vunpack.c.l.b16 %v783_v34  ;;  %v1378_v39 = vrot.slane %v11255_v31, 5  ;;  %v1067_v41 = vsel %vm8180_vm9, %v1058_v35, %v1066_v29  ;;  %v1369_v42 = vrot.slane %v1368_v33, 4  ;;  %v8304_v35 = vld [vmem:[%s8001_s13 + $0x84] sm:$0xf]  ;;  %v8495_v31 = vld [vmem:[%s8001_s13 + $0x80] sm:$0xf] }
  0x60   : > { %v786_v40 = vsel %vm8143_vm6, %v784_v26, %v785_v36  ;;  %v1374_v43 = vrot.slane %v1373_v47, 4  ;;  %v1069_v56 = vshrl.u32 %v6908_v8, 16  ;;  %v1072_v58 = vshll.u32 %v6908_v8, 16  ;;  %v6912_v8 = vld [vmem:[%s8001_s13 + $0x8c] sm:$0xf] }
  0x61   : > { %v827_v46 = vunpack.c.l.b16 %v786_v40  ;;  %v8285_v60 = vshrl.u32 %v6909_v30, 16  ;;  %v1081_v61 = vshll.u32 %v6909_v30, 16  ;;  %v8290_v2 = vshrl.u32 %v6910_v52, 16  ;;  %v7730_v30 = vld [vmem:[%s11247_s1 + $0x60] sm:$0xff] }
  0x62   : > { %v8292_v3 = vshll.u32 %v6910_v52, 16  ;;  %v1217_v4 = vunpack.c.l.b16 %v1057_v38  ;;  %v1218_v55 = vunpack.c.l.b16 %v1067_v41  ;;  %v1371_v9 = vsel %vm8027_vm3, %v1369_v42, %v1370_v18  ;;  %v6913_v41 = vld [vmem:[%s8001_s13 + $0x90] sm:$0xf]  ;;  %v7713_v42 = vld [vmem:[%s8001_s13 + $0x3c] sm:$0xff]  ;;  %1992 = vmatpush.bf16.msra.mxu2 %v7730_v30 }
  0x63   : > { %6961 = vmatmul.msk.bf16.gmra.mxu0 %vm533_vm2, %v1472_v27  ;;  %v8288_v62 = vpack.c.b16 %v827_v46, %v826_v37  ;;  %v1379_v10 = vsel %vm8027_vm3, %v1374_v43, %v1378_v39  ;;  %v1071_v11 = vrot.slane %v1069_v56, 5  ;;  %v1074_v17 = vrot.slane %v1072_v58, 6 }
  0x64   : > { %v1080_v19 = vrot.slane %v8285_v60, 5  ;;  %v1083_v21 = vrot.slane %v1081_v61, 6  ;;  %v1380_v22 = vrot.slane %v8285_v60, 4  ;;  %v1381_v23 = vrot.slane %v1081_v61, 5  ;;  %v6914_v61 = vld [vmem:[%s8001_s13 + $0x94] sm:$0xf] }
  0x65   : > { %6860 = vmatmul.msk.bf16.gmra.mxu1 %vm533_vm2, %v7712_v7  ;;  %v1384_v24 = vrot.slane %v8292_v3, 5  ;;  %v1386_v27 = vrot.slane %v8290_v2, 4  ;;  %v1231_v28 = vpack.c.b16 %v1218_v55, %v1217_v4  ;;  %v1459_v18 = vunpack.c.l.b16 %v1371_v9  ;;  %v7732_v9 = vld [vmem:[%s11247_s1 + $0x70] sm:$0xff] }
  0x66   : > { %v1460_v29 = vunpack.c.l.b16 %v1379_v10  ;;  %v1075_v33 = vor.u32 %v1074_v17, %v1071_v11  ;;  %v1084_v47 = vor.u32 %v1083_v21, %v1080_v19  ;;  %v1090_v34 = vrot.slane %v8290_v2, 5  ;;  %v7728_v10 = vld [vmem:[%s11247_s1 + $0x50] sm:$0xff]  ;;  %v7734_v11 = vld [vmem:[%s11247_s1 + $0x80] sm:$0xff]  ;;  %2314 = vmatpush.bf16.msra.mxu3 %v7732_v9 }
  0x67   : > { %v1093_v26 = vrot.slane %v8292_v3, 6  ;;  %v1382_v36 = vor.u32 %v1381_v23, %v1380_v22  ;;  %v1387_v7 = vor.u32 %v1386_v27, %v1384_v24  ;;  %v11253_v37 = vshll.u32 %v8304_v35, 16  ;;  %v277_v21 = vld [vmem:[%s8001_s13 + $0x60] sm:$0x1]  ;;  %1743 = vmatpush.bf16.msra.mxu1 %v7728_v10  ;;  %2511 = vmatpush.bf16.msra.mxu0 %v7734_v11 }
  0x68   : > { %v1076_v38 = vrot.slane %v1075_v33, 4  ;;  %v1086_v39 = vrot.slane %v1084_v47, 4  ;;  %v1097_v43 = vshrl.u32 %v6912_v8, 16  ;;  %v1100_v46 = vshll.u32 %v6912_v8, 16 }
  0x69   : > { %v1094_v40 = vor.u32 %v1093_v26, %v1090_v34  ;;  %v1383_v52 = vrot.slane %v1382_v36, 4  ;;  %v1388_v56 = vrot.slane %v1387_v7, 4  ;;  %v1392_v58 = vrot.slane %v11253_v37, 5 }
  0x6a   : > { %v8320_v4 = vshrl.u32 %v6913_v41, 16  ;;  %v1109_v55 = vshll.u32 %v6913_v41, 16  ;;  %v1085_v17 = vsel %vm8180_vm9, %v1076_v38, %v1084_v47  ;;  %v789_v22 = vrot.slane %v8018_v16, 5 }
  0x6b   : > { %6888 = vmatmul.msk.bf16.gmra.mxu2 %vm533_vm2, %v838_v48  ;;  %v1473_v48 = vpack.c.b16 %v1460_v29, %v1459_v18  ;;  %v1095_v19 = vsel %vm8180_vm9, %v1086_v39, %v1094_v40  ;;  %v1099_v23 = vrot.slane %v1097_v43, 5  ;;  %v1102_v27 = vrot.slane %v1100_v46, 6 }
  0x6c   : > { %v1393_v18 = vsel %vm8027_vm3, %v1388_v56, %v1392_v58  ;;  %v8342_v29 = vshrl.u32 %v6914_v61, 16  ;;  %v8344_v33 = vshll.u32 %v6914_v61, 16  ;;  %v1219_v47 = vunpack.c.l.b16 %v1085_v17 }
  0x6d   : > { %v1220_v34 = vunpack.c.l.b16 %v1095_v19  ;;  %v1108_v26 = vrot.slane %v8320_v4, 5  ;;  %v1111_v16 = vrot.slane %v1109_v55, 6  ;;  %v6870_v36 = vrot.slane %v8015_v15, 9  ;;  %v6916_v19 = vld [vmem:[%s8001_s13 + $0xa0] sm:$0xf] }
  0x6e   : > { %v792_v7 = vrot.slane %v277_v21, 5  ;;  %v1103_v30 = vor.u32 %v1102_v27, %v1099_v23  ;;  %v1394_v38 = vrot.slane %v8320_v4, 4  ;;  %v1395_v39 = vrot.slane %v1109_v55, 5  ;;  %v7714_v21 = vld [vmem:[%s8001_s13 + $0x50] sm:$0xff] }
  0x6f   : > { %6942 = vmatmul.msk.bf16.gmra.mxu3 %vm533_vm2, %v1231_v28  ;;  %v1385_v28 = vsel %vm8027_vm3, %v1383_v52, %v1384_v24  ;;  %v1462_v24 = vunpack.c.l.b16 %v1393_v18  ;;  %v1398_v40 = vrot.slane %v8344_v33, 5  ;;  %v1400_v41 = vrot.slane %v8342_v29, 4  ;;  %v8356_v52 = vld [vmem:[%s8001_s13 + $0x98] sm:$0xf] }
  0x70   : > { %v1461_v8 = vunpack.c.l.b16 %v1385_v28  ;;  %v1112_v43 = vor.u32 %v1111_v16, %v1108_v26  ;;  %v1118_v15 = vrot.slane %v8342_v29, 5  ;;  %v1121_v46 = vrot.slane %v8344_v33, 6  ;;  %v6917_v28 = vld [vmem:[%s8001_s13 + $0xa4] sm:$0xf] }
  0x71   : > { %v790_v56 = vsel %vm8143_vm6, %v6870_v36, %v789_v22  ;;  %v1104_v61 = vrot.slane %v1103_v30, 4  ;;  %v1396_v55 = vor.u32 %v1395_v39, %v1394_v38  ;;  %v11252_v9 = vshll.u32 %v8356_v52, 16 }
  0x72   : > { %v1474_v10 = vpack.c.b16 %v1462_v24, %v1461_v8  ;;  %v1114_v11 = vrot.slane %v1112_v43, 4  ;;  %v1122_v17 = vor.u32 %v1121_v46, %v1118_v15  ;;  %v828_v23 = vunpack.c.l.b16 %v790_v56 }
  0x73   : > { %6962 = vmatmul.msk.bf16.gmra.mxu0 %vm533_vm2, %v1473_v48  ;;  %v791_v48 = vrot.slane %v789_v22, 4  ;;  %v1113_v22 = vsel %vm8180_vm9, %v1104_v61, %v1112_v43  ;;  %v1397_v18 = vrot.slane %v1396_v55, 4  ;;  %v1125_v16 = vshrl.u32 %v6916_v19, 16 }
  0x74   : > { %v1123_v26 = vsel %vm8180_vm9, %v1114_v11, %v1122_v17  ;;  %v1128_v36 = vshll.u32 %v6916_v19, 16  ;;  %v8375_v8 = vshrl.u32 %v6917_v28, 16  ;;  %v1137_v24 = vshll.u32 %v6917_v28, 16 }
  0x75   : > { %6861 = vmatmul.msk.bf16.gmra.mxu1 %vm533_vm2, %v7713_v42  ;;  %v1232_v42 = vpack.c.b16 %v1220_v34, %v1219_v47  ;;  %v793_v58 = vsel %vm8143_vm6, %v791_v48, %v792_v7  ;;  %v1406_v34 = vrot.slane %v11252_v9, 5  ;;  %v6918_v7 = vld [vmem:[%s8001_s13 + $0xa8] sm:$0xf]  ;;  %v1221_v30 = vunpack.c.l.b16 %v1113_v22 }
  0x76   : > { %v829_v27 = vunpack.c.l.b16 %v793_v58  ;;  %v1222_v38 = vunpack.c.l.b16 %v1123_v26  ;;  %v1399_v39 = vsel %vm8027_vm3, %v1397_v18, %v1398_v40  ;;  %v796_v43 = vrot.slane %v8087_v54, 5 }
  0x77   : > { %v1127_v15 = vrot.slane %v1125_v16, 5  ;;  %v1130_v46 = vrot.slane %v1128_v36, 6  ;;  %v8384_v56 = vshrl.u32 %v6918_v7, 16  ;;  %v8386_v58 = vshll.u32 %v6918_v7, 16 }
  0x78   : > { %v840_v48 = vpack.c.b16 %v829_v27, %v828_v23  ;;  %v1136_v61 = vrot.slane %v8375_v8, 5  ;;  %v1139_v55 = vrot.slane %v1137_v24, 6  ;;  %v1463_v11 = vunpack.c.l.b16 %v1399_v39 }
  0x79   : > { %v798_v19 = vrot.slane %v796_v43, 4  ;;  %v1131_v54 = vor.u32 %v1130_v46, %v1127_v15  ;;  %v1149_v23 = vrot.slane %v8386_v58, 6  ;;  %v1408_v27 = vrot.slane %v8375_v8, 4  ;;  %v6922_v15 = vld [vmem:[%s8001_s13 + $0xbc] sm:$0xf] }
  0x7a   : > { %v1140_v28 = vor.u32 %v1139_v55, %v1136_v61  ;;  %v1409_v22 = vrot.slane %v1137_v24, 5  ;;  %v1414_v18 = vrot.slane %v8384_v56, 4  ;;  %v6920_v24 = vld [vmem:[%s8001_s13 + $0xb4] sm:$0xf] }
  0x7b   : > { %6889 = vmatmul.msk.bf16.gmra.mxu2 %vm533_vm2, %v8288_v62  ;;  %v1401_v62 = vor.u32 %v1400_v41, %v1398_v40  ;;  %v1233_v40 = vpack.c.b16 %v1222_v38, %v1221_v30  ;;  %v1132_v36 = vrot.slane %v1131_v54, 4  ;;  %v1153_v46 = vshrl.u32 %v6920_v24, 16 }
  0x7c   : > { %v1142_v30 = vrot.slane %v1140_v28, 4  ;;  %v1410_v38 = vor.u32 %v1409_v22, %v1408_v27  ;;  %v1156_v61 = vshll.u32 %v6920_v24, 16  ;;  %v7833_v24 = vld [vmem:[%s8001_s13 + $0x84] sm:$0xf] }
  0x7d   : > { %v1402_v47 = vrot.slane %v1401_v62, 4  ;;  %v6871_v62 = vrot.slane %v8081_v49, 9  ;;  %v1412_v49 = vrot.slane %v8386_v58, 5  ;;  %v1155_v27 = vrot.slane %v1153_v46, 5 }
  0x7e   : > { %v1158_v22 = vrot.slane %v1156_v61, 6 }
  0x7f   : > { %6943 = vmatmul.msk.bf16.gmra.mxu3 %vm533_vm2, %v1232_v42  ;;  %v1407_v41 = vsel %vm8027_vm3, %v1402_v47, %v1406_v34  ;;  %v282_v42 = vld [vmem:[%s8001_s13 + $0x74] sm:$0x1]  ;;  %v8397_v47 = vld [vmem:[%s8001_s13 + $0xac] sm:$0xf]  ;;  %v797_v34 = vsel %vm8143_vm6, %v6871_v62, %v796_v43  ;;  %v1415_v39 = vor.u32 %v1414_v18, %v1412_v49 }
  0x80   : > { %v1464_v17 = vunpack.c.l.b16 %v1407_v41  ;;  %v11251_v41 = vshll.u32 %v8397_v47, 16  ;;  %v830_v62 = vunpack.c.l.b16 %v797_v34  ;;  %v1159_v46 = vor.u32 %v1158_v22, %v1155_v27 }
  0x82   : > { %v1475_v26 = vpack.c.b16 %v1464_v17, %v1463_v11  ;;  %v1411_v17 = vrot.slane %v1410_v38, 4  ;;  %v1420_v54 = vrot.slane %v11251_v41, 5  ;;  %v1160_v41 = vrot.slane %v1159_v46, 4 }
  0x83   : > { %6963 = vmatmul.msk.bf16.gmra.mxu0 %vm533_vm2, %v1474_v10  ;;  %v799_v10 = vrot.slane %v282_v42, 5  ;;  %v7715_v42 = vld [vmem:[%s8001_s13 + $0x64] sm:$0xff] }
  0x85   : > { %6862 = vmatmul.msk.bf16.gmra.mxu1 %vm533_vm2, %v7714_v21  ;;  %v1146_v21 = vrot.slane %v8384_v56, 5  ;;  %v800_v16 = vsel %vm8143_vm6, %v798_v19, %v799_v10  ;;  %v1416_v19 = vrot.slane %v1415_v39, 4 }
  0x86   : > { %v831_v10 = vunpack.c.l.b16 %v800_v16 }
  0x87   : > { %v1150_v7 = vor.u32 %v1149_v23, %v1146_v21  ;;  %v8419_v21 = vshrl.u32 %v6922_v15, 16  ;;  %v8421_v23 = vshll.u32 %v6922_v15, 16 }
  0x88   : > { %v841_v34 = vpack.c.b16 %v831_v10, %v830_v62  ;;  %v8436_v10 = vld [vmem:[%s8001_s13 + $0xc0] sm:$0xf] }
  0x89   : > { %v1151_v11 = vsel %vm8180_vm9, %v1142_v30, %v1150_v7  ;;  %11331 = vst [vmem:[#allocation5_spill] sm:$0xff] %v8421_v23  ;;  %v1421_v7 = vsel %vm8027_vm3, %v1416_v19, %v1420_v54  ;;  %v287_v30 = vld [vmem:[%s8001_s13 + $0x88] sm:$0x1]  ;;  %v1428_v15 = vrot.slane %v8419_v21, 4  ;;  %v1174_v62 = vrot.slane %v8419_v21, 5 }
  0x8a   : > { %v1224_v16 = vunpack.c.l.b16 %v1151_v11  ;;  %11332 = vst [vmem:[#allocation6_spill] sm:$0xff] %v8436_v10 }
  0x8b   : > { %6890 = vmatmul.msk.bf16.gmra.mxu2 %vm533_vm2, %v840_v48  ;;  %v6921_v48 = vld [vmem:[%s8001_s13 + $0xb8] sm:$0xf] }
  0x8c   : > { %v8409_v43 = vshrl.u32 %v6921_v48, 16  ;;  %v1165_v55 = vshll.u32 %v6921_v48, 16  ;;  %v803_v48 = vrot.slane %v7833_v24, 5  ;;  %v806_v24 = vrot.slane %v287_v30, 5 }
  0x8e   : > { %11330 = vst [vmem:[#allocation4_spill] sm:$0xff] %v8409_v43  ;;  %v1167_v18 = vrot.slane %v1165_v55, 6  ;;  %v1422_v38 = vrot.slane %v8409_v43, 4  ;;  %v1423_v39 = vrot.slane %v1165_v55, 5  ;;  %v7834_v55 = vld [vmem:[%s8001_s13 + $0x80] sm:$0xf] }
  0x8f   : > { %6944 = vmatmul.msk.bf16.gmra.mxu3 %vm533_vm2, %v1233_v40  ;;  %v1141_v40 = vsel %vm8180_vm9, %v1132_v36, %v1140_v28  ;;  %v1164_v28 = vrot.slane %v8409_v43, 5  ;;  %v1413_v36 = vsel %vm8027_vm3, %v1411_v17, %v1412_v49  ;;  %v1177_v49 = vrot.slane %v8421_v23, 6  ;;  %v8645_v43 = vld [vmem:[%s8001_s13 + $0xa8] sm:$0xf] }
  0x90   : > { %v1465_v11 = vunpack.c.l.b16 %v1413_v36  ;;  %v1466_v17 = vunpack.c.l.b16 %v1421_v7  ;;  %v6872_v19 = vrot.slane %v7834_v55, 9  ;;  %v805_v54 = vrot.slane %v803_v48, 4 }
  0x91   : > { %v1168_v61 = vor.u32 %v1167_v18, %v1164_v28  ;;  %v1424_v27 = vor.u32 %v1423_v39, %v1422_v38  ;;  %v11254_v28 = vshll.u32 %v8436_v10, 16  ;;  %v6924_v18 = vld [vmem:[%s8001_s13 + $0xc8] sm:$0xf]  ;;  %v1178_v37 = vor.u32 %v1177_v49, %v1174_v62  ;;  %v7716_v39 = vld [vmem:[%s8001_s13 + $0x78] sm:$0xff] }
  0x92   : > { %v804_v36 = vsel %vm8143_vm6, %v6872_v19, %v803_v48  ;;  %v807_v7 = vsel %vm8143_vm6, %v805_v54, %v806_v24  ;;  %v1181_v30 = vshrl.u32 %v6924_v18, 16  ;;  %v1184_v38 = vshll.u32 %v6924_v18, 16  ;;  %v6926_v19 = vld [vmem:[%s8001_s13 + $0xd0] sm:$0xf] }
  0x93   : > { %6964 = vmatmul.msk.bf16.gmra.mxu0 %vm533_vm2, %v1475_v26  ;;  %v1223_v26 = vunpack.c.l.b16 %v1141_v40  ;;  %v1170_v9 = vrot.slane %v1168_v61, 4  ;;  %v1434_v62 = vrot.slane %v11254_v28, 5  ;;  %v1169_v49 = vsel %vm8180_vm9, %v1160_v41, %v1168_v61 }
  0x94   : > { %v833_v55 = vunpack.c.l.b16 %v807_v7  ;;  %v1183_v54 = vrot.slane %v1181_v30, 5  ;;  %v1186_v24 = vrot.slane %v1184_v38, 6  ;;  %v8467_v18 = vshrl.u32 %v6926_v19, 16  ;;  %v292_v30 = vld [vmem:[%s8001_s13 + $0x9c] sm:$0x1] }
  0x95   : > { %6863 = vmatmul.msk.bf16.gmra.mxu1 %vm533_vm2, %v7715_v42  ;;  %v1426_v42 = vrot.slane %v8421_v23, 5  ;;  %v1234_v40 = vpack.c.b16 %v1224_v16, %v1223_v26  ;;  %v6925_v26 = vld [vmem:[%s8001_s13 + $0xcc] sm:$0xf] }
  0x96   : > { %v1193_v48 = vshll.u32 %v6925_v26, 16  ;;  %11334 = vst [vmem:[#allocation8_spill] sm:$0xff] %v8467_v18  ;;  %v1187_v38 = vor.u32 %v1186_v24, %v1183_v54  ;;  %v813_v54 = vrot.slane %v292_v30, 5  ;;  %v1442_v24 = vrot.slane %v8467_v18, 4 }
  0x97   : > { %v1429_v22 = vor.u32 %v1428_v15, %v1426_v42  ;;  %v1425_v15 = vrot.slane %v1424_v27, 4  ;;  %v1225_v27 = vunpack.c.l.b16 %v1169_v49 }
  0x98   : > { %v1195_v61 = vrot.slane %v1193_v48, 6 }
  0x99   : > { %v1430_v46 = vrot.slane %v1429_v22, 4  ;;  %v1427_v41 = vsel %vm8027_vm3, %v1425_v15, %v1426_v42  ;;  %v1437_v42 = vrot.slane %v1193_v48, 5 }
  0x9b   : > { %6891 = vmatmul.msk.bf16.gmra.mxu2 %vm533_vm2, %v841_v34  ;;  %v1476_v34 = vpack.c.b16 %v1466_v17, %v1465_v11  ;;  %v8457_v11 = vshrl.u32 %v6925_v26, 16  ;;  %v832_v17 = vunpack.c.l.b16 %v804_v36  ;;  %v810_v36 = vrot.slane %v8101_v14, 5 }
  0x9d   : > { %11333 = vst [vmem:[#allocation7_spill] sm:$0xff] %v8457_v11  ;;  %v842_v26 = vpack.c.b16 %v833_v55, %v832_v17  ;;  %v1202_v17 = vrot.slane %v8467_v18, 5  ;;  %v812_v55 = vrot.slane %v810_v36, 4 }
  0x9f   : > { %6945 = vmatmul.msk.bf16.gmra.mxu3 %vm533_vm2, %v1234_v40  ;;  %v1179_v40 = vsel %vm8180_vm9, %v1170_v9, %v1178_v37  ;;  %v1435_v37 = vsel %vm8027_vm3, %v1430_v46, %v1434_v62  ;;  %v1192_v9 = vrot.slane %v8457_v11, 5  ;;  %v1467_v46 = vunpack.c.l.b16 %v1427_v41 }
  0xa0   : > { %v8444_v16 = vpop.f32.mrf.mxu1  ;;  %v1226_v22 = vunpack.c.l.b16 %v1179_v40  ;;  %v1468_v62 = vunpack.c.l.b16 %v1435_v37  ;;  %v6873_v40 = vrot.slane %v8098_v13, 9  ;;  %v8488_v37 = vld [vmem:[%s8001_s13 + $0x7c] sm:$0xf] }
  0xa1   : > { %v2051_v50 = vshrl.u32 %v8488_v37, 16 }
  0xa2   : > { %v1235_v15 = vpack.c.b16 %v1226_v22, %v1225_v27  ;;  %v1188_v27 = vrot.slane %v1187_v38, 4  ;;  %v8485_v22 = vld [vmem:[%s8001_s13 + $0xd4] sm:$0xf]  ;;  %v811_v30 = vsel %vm8143_vm6, %v6873_v40, %v810_v36  ;;  %v814_v38 = vsel %vm8143_vm6, %v812_v55, %v813_v54 }
  0xa3   : > { %6965 = vmatmul.msk.bf16.gmra.mxu0 %vm533_vm2, %v1476_v34  ;;  %v8469_v34 = vshll.u32 %v6926_v19, 16  ;;  %v1196_v19 = vor.u32 %v1195_v61, %v1192_v9  ;;  %11336 = vst [vmem:[#allocation10_spill] sm:$0xff] %v8485_v22  ;;  %v1477_v9 = vpack.c.b16 %v1468_v62, %v1467_v46  ;;  %v2060_v36 = vshll.u32 %v8495_v31, 16 }
  0xa4   : > { %v2064_v40 = vshrl.u32 %v8495_v31, 16  ;;  %v834_v54 = vunpack.c.l.b16 %v811_v30  ;;  %v11338_v20 = vshll.u32 %v8485_v22, 16 }
  0xa5   : > { %6864 = vmatmul.msk.bf16.gmra.mxu1 %vm533_vm2, %v7716_v39  ;;  %11335 = vst [vmem:[#allocation9_spill] sm:$0xff] %v8469_v34  ;;  %v1436_v39 = vrot.slane %v8457_v11, 4  ;;  %v1205_v14 = vrot.slane %v8469_v34, 6  ;;  %v1440_v48 = vrot.slane %v8469_v34, 5  ;;  %v1198_v28 = vrot.slane %v1196_v19, 4  ;;  %v7749_v34 = vld [vmem:[%s11247_s1 + $0xb8] sm:$0xff] }
  0xa6   : > { %v1197_v46 = vsel %vm8180_vm9, %v1188_v27, %v1196_v19  ;;  %v1585_v19 = vrot.slane %v8166_v44, 7  ;;  %v7745_v44 = vld [vmem:[%s11247_s1 + $0x98] sm:$0xff]  ;;  %3248 = vmatpush.bf16.msrb.mxu3 %v7749_v34  ;;  %v1866_v34 = vrot.slane %v8488_v37, 7  ;;  %v8575_v11 = vld [vmem:[%s8001_s13 + $0x90] sm:$0xf] }
  0xa7   : > { %v1438_v41 = vor.u32 %v1437_v42, %v1436_v39  ;;  %v1443_v39 = vor.u32 %v1442_v24, %v1440_v48  ;;  %v835_v24 = vunpack.c.l.b16 %v814_v38  ;;  %2700 = vmatpush.bf16.msrb.mxu1 %v7745_v44 }
  0xa8   : > { %v8472_v7 = vpop.f32.mrf.mxu1  ;;  %v1586_v0 = vor.u32 %v1585_v19, %v8168_v45  ;;  %v1588_v22 = vrot.slane %v1585_v19, 4 }
  0xa9   : > { %v1439_v62 = vrot.slane %v1438_v41, 4  ;;  %v1227_v41 = vunpack.c.l.b16 %v1197_v46  ;;  %v1444_v42 = vrot.slane %v1443_v39, 4  ;;  %v8534_v39 = vrot.slane %v2060_v36, 5  ;;  %v7751_v36 = vld [vmem:[%s11247_s1 + $0xc8] sm:$0xff] }
  0xaa   : > { %v8476_v49 = vpop.f32.mrf.mxu2  ;;  %v2066_v46 = vrot.slane %v2064_v40, 4  ;;  %3490 = vmatpush.bf16.msrb.mxu0 %v7751_v36 }
  0xab   : > { %6892 = vmatmul.msk.bf16.gmra.mxu2 %vm533_vm2, %v842_v26  ;;  %v1206_v26 = vor.u32 %v1205_v14, %v1202_v17  ;;  %v7747_v17 = vld [vmem:[%s11247_s1 + $0xa8] sm:$0xff]  ;;  %v2054_v14 = vshll.u32 %v8488_v37, 16 }
  0xac   : > { %3054 = vmatpush.bf16.msrb.mxu2 %v7747_v17  ;;  %v2067_v44 = vor.u32 %v2066_v46, %v8534_v39 }
  0xad   : > { %v1207_v27 = vsel %vm8180_vm9, %v1198_v28, %v1206_v26  ;;  %v2053_v28 = vrot.slane %v2051_v50, 4  ;;  %v6998_v26 = vld [vmem:[%s8001_s13 + $0x78] sm:$0xf]  ;;  %v2056_v38 = vrot.slane %v2054_v14, 5  ;;  %v843_v50 = vpack.c.b16 %v835_v24, %v834_v54  ;;  %v8551_v14 = vld [vmem:[%s8001_s13 + $0x84] sm:$0xf] }
  0xae   : > { %v8490_v13 = vpop.f32.mrf.mxu0  ;;  %v8492_v61 = vpop.f32.mrf.mxu3  ;;  %v7030_v45 = vrot.slane %v6998_v26, 11  ;;  %v1868_v26 = vrot.slane %v1866_v34, 4 }
  0xaf   : > { %11337 = vst [vmem:[#allocation11_spill] sm:$0xff] %v8492_v61  ;;  %6946 = vmatmul.msk.bf16.gmra.mxu3 %vm533_vm2, %v1235_v15  ;;  %v7717_v15 = vld [vmem:[%s8001_s13 + $0x8c] sm:$0xff]  ;;  %v1448_v61 = vrot.slane %v11338_v20, 5  ;;  %v6968_v20 = vrot.slane %v8164_v25, 11 }
  0xb1   : > { %v1449_v25 = vsel %vm8027_vm3, %v1444_v42, %v1448_v61  ;;  %v2057_v42 = vor.u32 %v2056_v38, %v2053_v28  ;;  %v1587_v19 = vsel %vm8543_vm14, %v6968_v20, %v1586_v0  ;;  %v1869_v28 = vrot.slane %v8495_v31, 7 }
  0xb2   : > { %v8513_v55 = vpop.f32.mrf.mxu1  ;;  %v8527_v30 = vpop.f32.mrf.mxu2  ;;  %v1470_v54 = vunpack.c.l.b16 %v1449_v25  ;;  %v2070_v38 = vshll.u32 %v8551_v14, 16  ;;  %v1867_v25 = vsel %vm8557_vm15, %v7030_v45, %v1866_v34  ;;  %v2385_v45 = vrot.slane %v8495_v31, 6 }
  0xb3   : > { %6966 = vmatmul.msk.bf16.gmra.mxu0 %vm533_vm2, %v1477_v9  ;;  %v1441_v9 = vsel %vm8027_vm3, %v1439_v62, %v1440_v48  ;;  %v1228_v48 = vunpack.c.l.b16 %v1207_v27  ;;  %v1593_v27 = vsel %vm8543_vm14, %v1588_v22, %v8199_v63  ;;  %v2058_v20 = vrot.slane %v2057_v42, 4  ;;  %v8578_v63 = vld [vmem:[%s8001_s13 + $0x94] sm:$0xf] }
  0xb4   : > { %v1469_v40 = vunpack.c.l.b16 %v1441_v9  ;;  %v1677_v0 = vunpack.c.l.b16 %v1593_v27  ;;  %v1925_v36 = vunpack.c.l.b16 %v1867_v25  ;;  %v2072_v34 = vrot.slane %v2070_v38, 5 }
  0xb5   : > { %6865 = vmatmul.msk.bf16.gmra.mxu1 %vm533_vm2, %v7717_v15  ;;  %v1236_v9 = vpack.c.b16 %v1228_v48, %v1227_v41  ;;  %v1600_v41 = vshrl.u32 %v8206_v5, 16  ;;  %v1870_v48 = vsel %vm8557_vm15, %v1868_v26, %v1869_v28  ;;  %v2088_v27 = vshrl.u32 %v8578_v63, 16 }
  0xb6   : > { %v8536_v17 = vpop.f32.mrf.mxu0  ;;  %v8548_v15 = vpop.f32.mrf.mxu3  ;;  %v1478_v22 = vpack.c.b16 %v1470_v54, %v1469_v40  ;;  %v2078_v40 = vshll.u32 %v8575_v11, 16  ;;  %v2084_v54 = vshll.u32 %v8578_v63, 16  ;;  %v1926_v28 = vunpack.c.l.b16 %v1870_v48 }
  0xb7   : > { %11341 = vst [vmem:[#allocation12_spill] sm:$0xff] %v8548_v15  ;;  %v1676_v15 = vunpack.c.l.b16 %v1587_v19  ;;  %v2075_v19 = vshrl.u32 %v8575_v11, 16  ;;  %v7078_v38 = vrot.slane %v8488_v37, 10  ;;  %v1596_v25 = vrot.slane %v8214_v53, 7 }
  0xb8   : > { %v1602_v18 = vrot.slane %v1600_v41, 7  ;;  %v2080_v37 = vrot.slane %v2078_v40, 5  ;;  %v2090_v53 = vrot.slane %v2088_v27, 4  ;;  %v6969_v41 = vrot.slane %v8212_v51, 11  ;;  %v7002_v40 = vld [vmem:[%s8001_s13 + $0x8c] sm:$0xf] }
  0xb9   : > { %v2077_v48 = vrot.slane %v2075_v19, 4 }
  0xba   : > { %v8561_v24 = vpop.f32.mrf.mxu1 }
  0xbb   : > { %6893 = vmatmul.msk.bf16.gmra.mxu2 %vm533_vm2, %v843_v50  ;;  %v2068_v50 = vrot.slane %v2067_v44, 4  ;;  %v1692_v44 = vpack.c.b16 %v1677_v0, %v1676_v15  ;;  %v2081_v51 = vor.u32 %v2080_v37, %v2077_v48  ;;  %v8641_v37 = vld [vmem:[%s8001_s13 + $0xa4] sm:$0xf] }
  0xbd   : > { %v2073_v0 = vsel %vm8027_vm3, %v2068_v50, %v2072_v34  ;;  %v1599_v34 = vrot.slane %v1596_v25, 4 }
  0xbe   : > { %v8580_v46 = vpop.f32.mrf.mxu2  ;;  %v2248_v27 = vunpack.c.l.b16 %v2073_v0 }
  0xbf   : > { %11344 = vst [vmem:[#allocation13_spill] sm:$0xff] %v8580_v46  ;;  %6947 = vmatmul.msk.bf16.gmra.mxu3 %vm533_vm2, %v1236_v9  ;;  %v2063_v9 = vsel %vm8027_vm3, %v2058_v20, %v8534_v39  ;;  %v2387_v39 = vrot.slane %v2385_v45, 4  ;;  %v2388_v20 = vrot.slane %v8551_v14, 6  ;;  %v8609_v46 = vrot.slane %v2084_v54, 5 }
  0xc0   : > { %v8587_v42 = vpop.f32.mrf.mxu0  ;;  %v1597_v14 = vor.u32 %v1596_v25, %v8216_v57  ;;  %v1941_v54 = vpack.c.b16 %v1926_v28, %v1925_v36  ;;  %v2247_v10 = vunpack.c.l.b16 %v2063_v9  ;;  %v1876_v36 = vrot.slane %v8578_v63, 7 }
  0xc1   : > { %v2091_v57 = vor.u32 %v2090_v53, %v8609_v46  ;;  %v1611_v53 = vshrl.u32 %v8261_v12, 16 }
  0xc2   : > { %v8596_v26 = vpop.f32.mrf.mxu3  ;;  %v692_v31 = vpop.f32.mrf.mxu1  ;;  %v2263_v0 = vpack.c.b16 %v2248_v27, %v2247_v10 }
  0xc3   : > { %11345 = vst [vmem:[#allocation14_spill] sm:$0xff] %v8596_v26  ;;  %6967 = vmatmul.msk.bf16.gmra.mxu0 %vm533_vm2, %v1478_v22  ;;  %v693_v15 = vadd.f32 %v692_v31, %v8490_v13  ;;  %v1873_v13 = vrot.slane %v8575_v11, 7  ;;  %v8614_v22 = vld [vmem:[%s8001_s13 + $0x98] sm:$0xf]  ;;  %v11349_v31 = vshll.u32 %v8206_v5, 16  ;;  %v7031_v5 = vrot.slane %v7002_v40, 11 }
  0xc4   : > { %v2094_v25 = vshll.u32 %v8614_v22, 16  ;;  %v2092_v40 = vrot.slane %v2091_v57, 4  ;;  %v2112_v57 = vshrl.u32 %v8645_v43, 16 }
  0xc5   : > { %6988 = vmatmul.msk.bf16.vlgmr.msra.gmra.mxu1 %vm533_vm2, %v1692_v44  ;;  %v1603_v19 = vor.u32 %v1602_v18, %v11349_v31  ;;  %v2386_v44 = vsel %vm8605_vm4, %v7078_v38, %v2385_v45  ;;  %v1875_v18 = vrot.slane %v1873_v13, 4  ;;  %v1598_v45 = vsel %vm8543_vm14, %v6969_v41, %v1597_v14 }
  0xc6   : > { %v8616_v50 = vpop.f32.mrf.mxu2  ;;  %v2082_v31 = vrot.slane %v2081_v51, 4  ;;  %v1678_v41 = vunpack.c.l.b16 %v1598_v45  ;;  %v2108_v51 = vshll.u32 %v8645_v43, 16 }
  0xc7   : > { %11348 = vst [vmem:[#allocation15_spill] sm:$0xff] %v8616_v50  ;;  %v2389_v50 = vsel %vm8605_vm4, %v2387_v39, %v2388_v20  ;;  %v1604_v38 = vsel %vm8543_vm14, %v1599_v34, %v1603_v19  ;;  %v2444_v39 = vunpack.c.l.b16 %v2386_v44  ;;  %v1874_v34 = vsel %vm8557_vm15, %v7031_v5, %v1873_v13 }
  0xc8   : > { %v8625_v23 = vpop.f32.mrf.mxu0  ;;  %v2445_v20 = vunpack.c.l.b16 %v2389_v50  ;;  %v1679_v14 = vunpack.c.l.b16 %v1604_v38  ;;  %v1877_v10 = vsel %vm8557_vm15, %v1875_v18, %v1876_v36  ;;  %v2099_v19 = vshrl.u32 %v8641_v37, 16 }
  0xc9   : > { %v1927_v5 = vunpack.c.l.b16 %v1874_v34  ;;  %v1607_v18 = vrot.slane %v8251_v1, 7 }
  0xca   : > { %v8632_v9 = vpop.f32.mrf.mxu3  ;;  %v694_v28 = vpop.f32.mrf.mxu1  ;;  %v2460_v27 = vpack.c.b16 %v2445_v20, %v2444_v39  ;;  %v1693_v36 = vpack.c.b16 %v1679_v14, %v1678_v41  ;;  %v2395_v20 = vrot.slane %v8614_v22, 6  ;;  %v8667_v14 = vrot.slane %v2108_v51, 5 }
  0xcb   : > { %11350 = vst [vmem:[#allocation16_spill] sm:$0xff] %v8632_v9  ;;  %7050 = vmatmul.msk.bf16.vlgmr.msra.gmra.mxu2 %vm533_vm2, %v1941_v54  ;;  %v695_v48 = vadd.f32 %v694_v28, %v8536_v17  ;;  %v2096_v9 = vrot.slane %v2094_v25, 5  ;;  %v2392_v17 = vrot.slane %v8578_v63, 6  ;;  %v2102_v54 = vshll.u32 %v8641_v37, 16 }
  0xcc   : > { %v1613_v25 = vrot.slane %v1611_v53, 7  ;;  %v1928_v28 = vunpack.c.l.b16 %v1877_v10  ;;  %v2087_v63 = vsel %vm8027_vm3, %v2082_v31, %v8609_v46  ;;  %v2101_v53 = vrot.slane %v2099_v19, 4  ;;  %v8675_v19 = vld [vmem:[%s8001_s13 + $0xac] sm:$0xf] }
  0xcd   : > { %v2097_v45 = vsel %vm8027_vm3, %v2092_v40, %v2096_v9  ;;  %v2394_v39 = vrot.slane %v2392_v17, 4  ;;  %v2104_v34 = vrot.slane %v2102_v54, 5  ;;  %v2114_v46 = vrot.slane %v2112_v57, 4  ;;  %v7006_v57 = vld [vmem:[%s8001_s13 + $0xa0] sm:$0xf] }
  0xce   : > { %v889_v50 = vpop.f32.mrf.mxu2  ;;  %v6970_v9 = vrot.slane %v8249_v59, 11  ;;  %v1610_v31 = vrot.slane %v1607_v18, 4  ;;  %v11351_v40 = vshll.u32 %v8261_v12, 16  ;;  %v2249_v22 = vunpack.c.l.b16 %v2087_v63 }
  0xcf   : > { %7070 = vmatmul.msk.bf16.vlgmr.msra.gmra.mxu3 %vm533_vm2, %v2263_v0  ;;  %v929_v44 = vadd.f32 %v889_v50, %v693_v15  ;;  %v7079_v15 = vrot.slane %v8575_v11, 10  ;;  %v1608_v11 = vor.u32 %v1607_v18, %v8254_v6  ;;  %v2250_v50 = vunpack.c.l.b16 %v2097_v45 }
  0xd0   : > { %v1524_v13 = vpop.f32.mrf.mxu0  ;;  %v1614_v10 = vor.u32 %v1613_v25, %v11351_v40  ;;  %v2396_v59 = vsel %vm8605_vm4, %v2394_v39, %v2395_v20  ;;  %v1880_v6 = vrot.slane %v8641_v37, 7  ;;  %v1942_v51 = vpack.c.b16 %v1928_v28, %v1927_v5 }
  0xd1   : > { %v1609_v18 = vsel %vm8543_vm14, %v6970_v9, %v1608_v11  ;;  %v2264_v63 = vpack.c.b16 %v2250_v50, %v2249_v22  ;;  %v1883_v28 = vrot.slane %v8645_v43, 7  ;;  %v2399_v11 = vrot.slane %v8645_v43, 6 }
  0xd2   : > { %v1282_v38 = vpop.f32.mrf.mxu3  ;;  %v697_v0 = vpop.f32.mrf.mxu1  ;;  %v1882_v5 = vrot.slane %v1880_v6, 4  ;;  %v1622_v40 = vshrl.u32 %v8304_v35, 16 }
  0xd3   : > { %7098 = vmatmul.msk.bf16.vlgmr.msra.gmra.mxu0 %vm533_vm2, %v2460_v27  ;;  %v1322_v1 = vadd.f32 %v1282_v38, %v929_v44  ;;  %v698_v41 = vadd.f32 %v697_v0, %v8587_v42  ;;  %v2393_v27 = vsel %vm8605_vm4, %v7079_v15, %v2392_v17  ;;  %v2105_v44 = vor.u32 %v2104_v34, %v2101_v53 }
  0xd4   : > { %v2118_v17 = vshll.u32 %v8675_v19, 16  ;;  %v2446_v45 = vunpack.c.l.b16 %v2393_v27  ;;  %v2447_v15 = vunpack.c.l.b16 %v2396_v59  ;;  %v1680_v34 = vunpack.c.l.b16 %v1609_v18  ;;  %v8704_v27 = vld [vmem:[%s8001_s13 + $0xbc] sm:$0xf] }
  0xd5   : > { %6989 = vmatmul.msk.bf16.gmra.mxu1 %vm533_vm2, %v1693_v36  ;;  %v8677_v54 = vadd.f32 %v1524_v13, %v1322_v1  ;;  %v1615_v13 = vsel %vm8543_vm14, %v1610_v31, %v1614_v10  ;;  %v2115_v36 = vor.u32 %v2114_v46, %v8667_v14  ;;  %v2106_v39 = vrot.slane %v2105_v44, 4  ;;  %v8696_v31 = vld [vmem:[%s8001_s13 + $0xb8] sm:$0xf] }
  0xd6   : > { %v891_v42 = vpop.f32.mrf.mxu2  ;;  %v1681_v1 = vunpack.c.l.b16 %v1615_v13  ;;  %v2120_v9 = vrot.slane %v2118_v17, 5  ;;  %v2461_v10 = vpack.c.b16 %v2447_v15, %v2446_v45  ;;  %v7080_v44 = vrot.slane %v8641_v37, 10 }
  0xd7   : > { %v930_v12 = vadd.f32 %v891_v42, %v695_v48  ;;  %v7032_v48 = vrot.slane %v7006_v57, 11  ;;  %v2116_v46 = vrot.slane %v2115_v36, 4  ;;  %v1884_v42 = vsel %vm8557_vm15, %v1882_v5, %v1883_v28 }
  0xd8   : > { %v1526_v25 = vpop.f32.mrf.mxu0  ;;  %v1694_v59 = vpack.c.b16 %v1681_v1, %v1680_v34  ;;  %v2111_v43 = vsel %vm8027_vm3, %v2106_v39, %v8667_v14  ;;  %v2402_v57 = vrot.slane %v8675_v19, 6  ;;  %v2123_v18 = vshrl.u32 %v8696_v31, 16 }
  0xd9   : > { %v1881_v50 = vsel %vm8557_vm15, %v7032_v48, %v1880_v6  ;;  %v2401_v6 = vrot.slane %v2399_v11, 4  ;;  %v2126_v13 = vshll.u32 %v8696_v31, 16  ;;  %v2136_v36 = vshrl.u32 %v8704_v27, 16 }
  0xda   : > { %v1284_v38 = vpop.f32.mrf.mxu3  ;;  %v699_v0 = vpop.f32.mrf.mxu1  ;;  %v1624_v14 = vrot.slane %v1622_v40, 7  ;;  %v1929_v45 = vunpack.c.l.b16 %v1881_v50  ;;  %v1618_v15 = vrot.slane %v8290_v2, 7  ;;  %v2251_v48 = vunpack.c.l.b16 %v2111_v43 }
  0xdb   : > { %v1323_v20 = vadd.f32 %v1284_v38, %v930_v12  ;;  %7051 = vmatmul.msk.bf16.gmra.mxu2 %vm533_vm2, %v1942_v51  ;;  %v700_v53 = vadd.f32 %v699_v0, %v8625_v23  ;;  %v2121_v51 = vsel %vm8027_vm3, %v2116_v46, %v2120_v9  ;;  %v1930_v0 = vunpack.c.l.b16 %v1884_v42 }
  0xdc   : > { %v2252_v5 = vunpack.c.l.b16 %v2121_v51  ;;  %v2400_v28 = vsel %vm8605_vm4, %v7080_v44, %v2399_v11  ;;  %v2125_v39 = vrot.slane %v2123_v18, 4  ;;  %v2128_v2 = vrot.slane %v2126_v13, 5 }
  0xdd   : > { %v8718_v17 = vadd.f32 %v1526_v25, %v1323_v20  ;;  %v2403_v25 = vsel %vm8605_vm4, %v2401_v6, %v2402_v57  ;;  %v2138_v34 = vrot.slane %v2136_v36, 4  ;;  %v6971_v46 = vrot.slane %v8285_v60, 11 }
  0xde   : > { %v894_v22 = vpop.f32.mrf.mxu2  ;;  %v1619_v9 = vor.u32 %v1618_v15, %v8292_v3  ;;  %v1621_v40 = vrot.slane %v1618_v15, 4  ;;  %v11352_v11 = vshll.u32 %v8304_v35, 16  ;;  %v1943_v42 = vpack.c.b16 %v1930_v0, %v1929_v45  ;;  %v8753_v0 = vld [vmem:[%s8001_s13 + $0xcc] sm:$0xf] }
  0xdf   : > { %7071 = vmatmul.msk.bf16.gmra.mxu3 %vm533_vm2, %v2264_v63  ;;  %v931_v23 = vadd.f32 %v894_v22, %v698_v41  ;;  %v2132_v41 = vshll.u32 %v8704_v27, 16  ;;  %v8737_v22 = vld [vmem:[%s8001_s13 + $0xc0] sm:$0xf]  ;;  %v2265_v44 = vpack.c.b16 %v2252_v5, %v2251_v48  ;;  %v2449_v51 = vunpack.c.l.b16 %v2403_v25 }
  0xe0   : > { %v1529_v12 = vpop.f32.mrf.mxu0  ;;  %v2129_v6 = vor.u32 %v2128_v2, %v2125_v39  ;;  %v2142_v60 = vshll.u32 %v8737_v22, 16  ;;  %v1620_v35 = vsel %vm8543_vm14, %v6971_v46, %v1619_v9  ;;  %v1633_v45 = vshrl.u32 %v8356_v52, 16  ;;  %v8758_v2 = vld [vmem:[%s8001_s13 + $0xd0] sm:$0xf] }
  0xe1   : > { %v8728_v20 = vrot.slane %v2132_v41, 5  ;;  %v1682_v15 = vunpack.c.l.b16 %v1620_v35  ;;  %v7748_v35 = vld [vmem:[%s11247_s1 + $0xb0] sm:$0xff] }
  0xe2   : > { %v1287_v63 = vpop.f32.mrf.mxu3  ;;  %v702_v37 = vpop.f32.mrf.mxu1  ;;  %v2130_v25 = vrot.slane %v2129_v6, 4  ;;  %v1629_v6 = vrot.slane %v8342_v29, 7  ;;  %3249 = vmatpush.bf16.msrb.mxu3 %v7748_v35  ;;  %v8825_v35 = vld [vmem:[%s8001_s13 + $0xe4] sm:$0xf] }
  0xe3   : > { %7099 = vmatmul.msk.bf16.gmra.mxu0 %vm533_vm2, %v2461_v10  ;;  %v1324_v38 = vadd.f32 %v1287_v63, %v931_v23  ;;  %v703_v19 = vadd.f32 %v702_v37, %v8444_v16  ;;  %v1625_v10 = vor.u32 %v1624_v14, %v11352_v11  ;;  %v7010_v23 = vld [vmem:[%s8001_s13 + $0xb4] sm:$0xf]  ;;  %v2139_v13 = vor.u32 %v2138_v34, %v8728_v20 }
  0xe4   : > { %v7033_v18 = vrot.slane %v7010_v23, 11  ;;  %v1890_v63 = vrot.slane %v8704_v27, 7  ;;  %v2406_v37 = vrot.slane %v8704_v27, 6  ;;  %v2144_v34 = vrot.slane %v2142_v60, 5 }
  0xe5   : > { %6990 = vmatmul.msk.bf16.gmra.mxu1 %vm533_vm2, %v1694_v59  ;;  %v8730_v1 = vadd.f32 %v1529_v12, %v1324_v38  ;;  %v1887_v59 = vrot.slane %v8696_v31, 7  ;;  %v2448_v12 = vunpack.c.l.b16 %v2400_v28  ;;  %v2140_v39 = vrot.slane %v2139_v13, 4 }
  0xe6   : > { %v896_v16 = vpop.f32.mrf.mxu2  ;;  %v2408_v9 = vrot.slane %v2406_v37, 4  ;;  %v2147_v11 = vshrl.u32 %v8753_v0, 16  ;;  %v2160_v23 = vshrl.u32 %v8758_v2, 16  ;;  %v1894_v13 = vrot.slane %v8753_v0, 7 }
  0xe7   : > { %v932_v50 = vadd.f32 %v896_v16, %v700_v53  ;;  %v1626_v53 = vsel %vm8543_vm14, %v1621_v40, %v1625_v10  ;;  %v1889_v14 = vrot.slane %v1887_v59, 4  ;;  %v2462_v48 = vpack.c.b16 %v2449_v51, %v2448_v12 }
  0xe8   : > { %v1531_v43 = vpop.f32.mrf.mxu0  ;;  %v1683_v38 = vunpack.c.l.b16 %v1626_v53  ;;  %v1888_v28 = vsel %vm8557_vm15, %v7033_v18, %v1887_v59  ;;  %v7081_v16 = vrot.slane %v8696_v31, 10  ;;  %v2409_v40 = vrot.slane %v8737_v22, 6 }
  0xe9   : > { %v1891_v27 = vsel %vm8557_vm15, %v1889_v14, %v1890_v63  ;;  %v2150_v10 = vshll.u32 %v8753_v0, 16  ;;  %v1635_v31 = vrot.slane %v1633_v45, 7  ;;  %v1931_v51 = vunpack.c.l.b16 %v1888_v28  ;;  %v7014_v28 = vld [vmem:[%s8001_s13 + $0xc8] sm:$0xf] }
  0xea   : > { %v1289_v3 = vpop.f32.mrf.mxu3  ;;  %v704_v57 = vpop.f32.mrf.mxu1  ;;  %v2135_v22 = vsel %vm8027_vm3, %v2130_v25, %v8728_v20  ;;  %v7744_v20 = vld [vmem:[%s11247_s1 + $0x90] sm:$0xff]  ;;  %v2407_v29 = vsel %vm8605_vm4, %v7081_v16, %v2406_v37  ;;  %v2149_v53 = vrot.slane %v2147_v11, 4  ;;  %v2162_v14 = vrot.slane %v2160_v23, 4 }
  0xeb   : > { %v1325_v41 = vadd.f32 %v1289_v3, %v932_v50  ;;  %7052 = vmatmul.msk.bf16.gmra.mxu2 %vm533_vm2, %v1943_v42  ;;  %v705_v36 = vadd.f32 %v704_v57, %v8472_v7  ;;  %v7746_v50 = vld [vmem:[%s11247_s1 + $0xa0] sm:$0xff]  ;;  %v1695_v42 = vpack.c.b16 %v1683_v38, %v1682_v15  ;;  %v1932_v57 = vunpack.c.l.b16 %v1891_v27  ;;  %v8804_v25 = vld [vmem:[%s8001_s13 + $0xd4] sm:$0xf]  ;;  %2701 = vmatpush.bf16.msrb.mxu1 %v7744_v20 }
  0xec   : > { %3055 = vmatpush.bf16.msrb.mxu2 %v7746_v50  ;;  %v2152_v18 = vrot.slane %v2150_v10, 5  ;;  %v6972_v15 = vrot.slane %v8320_v4, 11  ;;  %v1630_v37 = vor.u32 %v1629_v6, %v8344_v33  ;;  %v1632_v38 = vrot.slane %v1629_v6, 4  ;;  %v7750_v4 = vld [vmem:[%s11247_s1 + $0xc0] sm:$0xff] }
  0xed   : > { %v8772_v59 = vadd.f32 %v1531_v43, %v1325_v41  ;;  %v2145_v43 = vsel %vm8027_vm3, %v2140_v39, %v2144_v34  ;;  %v2253_v27 = vunpack.c.l.b16 %v2135_v22  ;;  %v7034_v33 = vrot.slane %v7014_v28, 11  ;;  %3491 = vmatpush.bf16.msrb.mxu0 %v7750_v4  ;;  %v8820_v22 = vld [vmem:[%s8001_s13 + $0xe0] sm:$0xf] }
  0xee   : > { %v899_v5 = vpop.f32.mrf.mxu2  ;;  %v2254_v34 = vunpack.c.l.b16 %v2145_v43  ;;  %v2166_v11 = vshll.u32 %v8804_v25, 16  ;;  %v1897_v23 = vrot.slane %v8758_v2, 7  ;;  %v2416_v4 = vrot.slane %v8804_v25, 6 }
  0xef   : > { %7072 = vmatmul.msk.bf16.gmra.mxu3 %vm533_vm2, %v2265_v44  ;;  %v933_v7 = vadd.f32 %v899_v5, %v703_v19  ;;  %v2156_v19 = vshll.u32 %v8758_v2, 16  ;;  %v11354_v25 = vshll.u32 %v8397_v47, 16 }
  0xf0   : > { %v1534_v46 = vpop.f32.mrf.mxu0 }
  0xf1   : > { %v8794_v41 = vrot.slane %v2156_v19, 5  ;;  %v1896_v19 = vrot.slane %v1894_v13, 4 }
  0xf2   : > { %v1292_v44 = vpop.f32.mrf.mxu3  ;;  %v707_v12 = vpop.f32.mrf.mxu1 }
  0xf3   : > { %7100 = vmatmul.msk.bf16.gmra.mxu0 %vm533_vm2, %v2462_v48  ;;  %v1326_v60 = vadd.f32 %v1292_v44, %v933_v7  ;;  %v708_v3 = vadd.f32 %v707_v12, %v8513_v55  ;;  %v2410_v55 = vsel %vm8605_vm4, %v2408_v9, %v2409_v40  ;;  %v11353_v48 = vshll.u32 %v8356_v52, 16 }
  0xf4   : > { %v1944_v7 = vpack.c.b16 %v1932_v57, %v1931_v51  ;;  %v2451_v9 = vunpack.c.l.b16 %v2410_v55  ;;  %v2153_v40 = vor.u32 %v2152_v18, %v2149_v53  ;;  %v2163_v52 = vor.u32 %v2162_v14, %v8794_v41 }
  0xf5   : > { %6991 = vmatmul.msk.bf16.gmra.mxu1 %vm533_vm2, %v1695_v42  ;;  %v8796_v63 = vadd.f32 %v1534_v46, %v1326_v60  ;;  %v1636_v5 = vor.u32 %v1635_v31, %v11353_v48  ;;  %v2450_v46 = vunpack.c.l.b16 %v2407_v29  ;;  %v2266_v44 = vpack.c.b16 %v2254_v34, %v2253_v27 }
  0xf6   : > { %v901_v45 = vpop.f32.mrf.mxu2  ;;  %v1644_v51 = vshrl.u32 %v8397_v47, 16  ;;  %v1895_v57 = vsel %vm8557_vm15, %v7034_v33, %v1894_v13  ;;  %v2154_v43 = vrot.slane %v2153_v40, 4  ;;  %v1898_v55 = vsel %vm8557_vm15, %v1896_v19, %v1897_v23  ;;  %v8856_v19 = vld [vmem:[%s8001_s13 + $0xe8] sm:$0xf] }
  0xf7   : > { %v934_v39 = vadd.f32 %v901_v45, %v705_v36  ;;  %v1631_v36 = vsel %vm8543_vm14, %v6972_v15, %v1630_v37  ;;  %v1637_v42 = vsel %vm8543_vm14, %v1632_v38, %v1636_v5  ;;  %v2463_v20 = vpack.c.b16 %v2451_v9, %v2450_v46 }
  0xf8   : > { %v1536_v16 = vpop.f32.mrf.mxu0  ;;  %v1684_v6 = vunpack.c.l.b16 %v1631_v36  ;;  %v1685_v60 = vunpack.c.l.b16 %v1637_v42  ;;  %v2164_v53 = vrot.slane %v2163_v52, 4  ;;  %v2168_v18 = vrot.slane %v2166_v11, 5 }
  0xf9   : > { %v2413_v14 = vrot.slane %v8758_v2, 6  ;;  %v2171_v45 = vshrl.u32 %v8820_v22, 16  ;;  %v2174_v15 = vshll.u32 %v8820_v22, 16  ;;  %v1646_v13 = vrot.slane %v1644_v51, 7 }
  0xfa   : > { %v1294_v10 = vpop.f32.mrf.mxu3  ;;  %v709_v50 = vpop.f32.mrf.mxu1  ;;  %v1933_v38 = vunpack.c.l.b16 %v1895_v57  ;;  %v2180_v48 = vshll.u32 %v8825_v35, 16  ;;  %v2184_v5 = vshrl.u32 %v8825_v35, 16  ;;  %v1696_v28 = vpack.c.b16 %v1685_v60, %v1684_v6 }
  0xfb   : > { %v1327_v31 = vadd.f32 %v1294_v10, %v934_v39  ;;  %7053 = vmatmul.msk.bf16.gmra.mxu2 %vm533_vm2, %v1944_v7  ;;  %v710_v12 = vadd.f32 %v709_v50, %v8561_v24  ;;  %v2159_v39 = vsel %vm8027_vm3, %v2154_v43, %v8794_v41  ;;  %v1934_v34 = vunpack.c.l.b16 %v1898_v55 }
  0xfc   : > { %v2169_v46 = vsel %vm8027_vm3, %v2164_v53, %v2168_v18  ;;  %v7082_v9 = vrot.slane %v8753_v0, 10  ;;  %v2415_v40 = vrot.slane %v2413_v14, 4  ;;  %v2173_v41 = vrot.slane %v2171_v45, 4 }
  0xfd   : > { %v8839_v2 = vadd.f32 %v1536_v16, %v1327_v31  ;;  %v2176_v52 = vrot.slane %v2174_v15, 5  ;;  %v7018_v16 = vld [vmem:[%s8001_s13 + $0xdc] sm:$0xf]  ;;  %v1901_v11 = vrot.slane %v8820_v22, 7  ;;  %v8849_v10 = vrot.slane %v2180_v48, 5 }
  0xfe   : > { %v904_v29 = vpop.f32.mrf.mxu2  ;;  %v2186_v50 = vrot.slane %v2184_v5, 4  ;;  %v1647_v42 = vor.u32 %v1646_v13, %v11354_v25  ;;  %v2256_v51 = vunpack.c.l.b16 %v2169_v46  ;;  %v2414_v60 = vsel %vm8605_vm4, %v7082_v9, %v2413_v14  ;;  %v8875_v48 = vld [vmem:[%s8001_s13 + $0xf4] sm:$0xf] }
  0xff   : > { %7073 = vmatmul.msk.bf16.gmra.mxu3 %vm533_vm2, %v2266_v44  ;;  %v935_v24 = vadd.f32 %v904_v29, %v708_v3  ;;  %v1640_v3 = vrot.slane %v8384_v56, 7  ;;  %v6973_v56 = vrot.slane %v8375_v8, 11  ;;  %v1945_v8 = vpack.c.b16 %v1934_v34, %v1933_v38 }
 0x100   : > { %v1539_v37 = vpop.f32.mrf.mxu0  ;;  %v2255_v44 = vunpack.c.l.b16 %v2159_v39  ;;  %v2417_v57 = vsel %vm8605_vm4, %v2415_v40, %v2416_v4  ;;  %v2177_v47 = vor.u32 %v2176_v52, %v2173_v41  ;;  %v2190_v29 = vshll.u32 %v8856_v19, 16 }
 0x101   : > { %v1641_v0 = vor.u32 %v1640_v3, %v8386_v58  ;;  %v1643_v36 = vrot.slane %v1640_v3, 4  ;;  %v7035_v58 = vrot.slane %v7018_v16, 11  ;;  %v1903_v53 = vrot.slane %v1901_v11, 4 }
 0x102   : > { %v1297_v7 = vpop.f32.mrf.mxu3  ;;  %v712_v27 = vpop.f32.mrf.mxu1  ;;  %v1904_v18 = vrot.slane %v8825_v35, 7  ;;  %v2452_v14 = vunpack.c.l.b16 %v2414_v60  ;;  %v2453_v45 = vunpack.c.l.b16 %v2417_v57  ;;  %v2178_v39 = vrot.slane %v2177_v47, 4 }
 0x103   : > { %7101 = vmatmul.msk.bf16.gmra.mxu0 %vm533_vm2, %v2463_v20  ;;  %v1328_v33 = vadd.f32 %v1297_v7, %v935_v24  ;;  %v2187_v20 = vor.u32 %v2186_v50, %v8849_v10  ;;  %v1642_v55 = vsel %vm8543_vm14, %v6973_v56, %v1641_v0  ;;  %v1902_v38 = vsel %vm8557_vm15, %v7035_v58, %v1901_v11  ;;  %v8878_v7 = vld [vmem:[%s8001_s13 + $0xf8] sm:$0xf] }
 0x104   : > { %v1686_v5 = vunpack.c.l.b16 %v1642_v55  ;;  %v713_v34 = vadd.f32 %v712_v27, %v8476_v49  ;;  %v1905_v46 = vsel %vm8557_vm15, %v1903_v53, %v1904_v18  ;;  %v2192_v9 = vrot.slane %v2190_v29, 5  ;;  %v8906_v53 = vld [vmem:[%s8001_s13 + $0xfc] sm:$0xf] }
 0x105   : > { %6992 = vmatmul.msk.bf16.gmra.mxu1 %vm533_vm2, %v1696_v28  ;;  %v8858_v23 = vadd.f32 %v1539_v37, %v1328_v33  ;;  %v2267_v37 = vpack.c.b16 %v2256_v51, %v2255_v44  ;;  %v2188_v3 = vrot.slane %v2187_v20, 4  ;;  %v2420_v4 = vrot.slane %v8825_v35, 6  ;;  %v7835_v33 = vld [vmem:[%s8001_s13 + $0xc0] sm:$0xf] }
 0x106   : > { %v906_v31 = vpop.f32.mrf.mxu2  ;;  %v1655_v40 = vshrl.u32 %v7835_v33, 16  ;;  %v2464_v41 = vpack.c.b16 %v2453_v45, %v2452_v14  ;;  %v1935_v56 = vunpack.c.l.b16 %v1902_v38  ;;  %v2195_v16 = vshrl.u32 %v8875_v48, 16  ;;  %v11356_v38 = vld [vmem:[#allocation5_spill] sm:$0xff] }
 0x107   : > { %v936_v6 = vadd.f32 %v906_v31, %v710_v12  ;;  %v1648_v12 = vsel %vm8543_vm14, %v1643_v36, %v1647_v42  ;;  %v2198_v50 = vshll.u32 %v8875_v48, 16  ;;  %v2204_v49 = vshll.u32 %v8878_v7, 16 }
 0x108   : > { %v1541_v43 = vpop.f32.mrf.mxu0  ;;  %v1687_v28 = vunpack.c.l.b16 %v1648_v12  ;;  %v2208_v27 = vshrl.u32 %v8878_v7, 16  ;;  %v1936_v25 = vunpack.c.l.b16 %v1905_v46  ;;  %v2183_v35 = vsel %vm8027_vm3, %v2178_v39, %v8849_v10  ;;  %v11357_v39 = vld [vmem:[#allocation6_spill] sm:$0xff]  ;;  %v7022_v46 = vld [vmem:[%s8001_s13 + $0xf0] sm:$0xf] }
 0x109   : > { %v7083_v42 = vrot.slane %v8820_v22, 10  ;;  %v2193_v31 = vsel %vm8027_vm3, %v2188_v3, %v2192_v9  ;;  %v2423_v44 = vrot.slane %v8856_v19, 6  ;;  %v1651_v58 = vrot.slane %v8419_v21, 7 }
 0x10a   : > { %v1299_v24 = vpop.f32.mrf.mxu3  ;;  %v714_v15 = vpop.f32.mrf.mxu1  ;;  %v1697_v36 = vpack.c.b16 %v1687_v28, %v1686_v5  ;;  %v2197_v47 = vrot.slane %v2195_v16, 4  ;;  %v2200_v20 = vrot.slane %v2198_v50, 5  ;;  %v8901_v22 = vrot.slane %v2204_v49, 5 }
 0x10b   : > { %v1329_v13 = vadd.f32 %v1299_v24, %v936_v6  ;;  %7054 = vmatmul.msk.bf16.gmra.mxu2 %vm533_vm2, %v1945_v8  ;;  %v2422_v8 = vrot.slane %v2420_v4, 4  ;;  %v1657_v6 = vrot.slane %v1655_v40, 7  ;;  %v2210_v29 = vrot.slane %v2208_v27, 4 }
 0x10c   : > { %v1946_v55 = vpack.c.b16 %v1936_v25, %v1935_v56  ;;  %v2257_v12 = vunpack.c.l.b16 %v2183_v35  ;;  %v2258_v19 = vunpack.c.l.b16 %v2193_v31  ;;  %v715_v18 = vadd.f32 %v714_v15, %v8527_v30 }
 0x10d   : > { %v8897_v51 = vadd.f32 %v1541_v43, %v1329_v13  ;;  %v2421_v43 = vsel %vm8605_vm4, %v7083_v42, %v2420_v4  ;;  %v2424_v21 = vsel %vm8605_vm4, %v2422_v8, %v2423_v44  ;;  %v1908_v24 = vrot.slane %v8875_v48, 7  ;;  %v11355_v13 = vld [vmem:[#allocation4_spill] sm:$0xff]  ;;  %v11359_v8 = vld [vmem:[#allocation13_spill] sm:$0xff] }
 0x10e   : > { %v909_v52 = vpop.f32.mrf.mxu2  ;;  %v1652_v5 = vor.u32 %v1651_v58, %v11356_v38  ;;  %v1654_v28 = vrot.slane %v1651_v58, 4  ;;  %v11358_v3 = vshll.u32 %v11357_v39, 16  ;;  %v2201_v15 = vor.u32 %v2200_v20, %v2197_v47  ;;  %v8931_v58 = vld [vmem:[%s8001_s13 + $0x108] sm:$0xf]  ;;  %v7836_v47 = vld [vmem:[%s8001_s13 + $0xd4] sm:$0xf] }
 0x10f   : > { %7074 = vmatmul.msk.bf16.gmra.mxu3 %vm533_vm2, %v2267_v37  ;;  %v937_v11 = vadd.f32 %v909_v52, %v713_v34  ;;  %v6974_v37 = vrot.slane %v11355_v13, 11  ;;  %v2211_v9 = vor.u32 %v2210_v29, %v8901_v22  ;;  %v2214_v4 = vshll.u32 %v8906_v53, 16 }
 0x110   : > { %v1544_v0 = vpop.f32.mrf.mxu0  ;;  %v1658_v34 = vor.u32 %v1657_v6, %v11358_v3  ;;  %v2268_v40 = vpack.c.b16 %v2258_v19, %v2257_v12  ;;  %v2455_v52 = vunpack.c.l.b16 %v2424_v21  ;;  %v7036_v56 = vrot.slane %v7022_v46, 11 }
 0x111   : > { %v1653_v50 = vsel %vm8543_vm14, %v6974_v37, %v1652_v5  ;;  %v1910_v27 = vrot.slane %v1908_v24, 4  ;;  %v2202_v25 = vrot.slane %v2201_v15, 4  ;;  %v2212_v35 = vrot.slane %v2211_v9, 4  ;;  %v11360_v5 = vld [vmem:[#allocation8_spill] sm:$0xff] }
 0x112   : > { %v1302_v60 = vpop.f32.mrf.mxu3  ;;  %v717_v57 = vpop.f32.mrf.mxu1  ;;  %v1659_v49 = vsel %vm8543_vm14, %v1654_v28, %v1658_v34  ;;  %v2216_v42 = vrot.slane %v2214_v4, 5  ;;  %v2427_v31 = vrot.slane %v8878_v7, 6  ;;  %v1688_v6 = vunpack.c.l.b16 %v1653_v50  ;;  %v11362_v50 = vld [vmem:[#allocation7_spill] sm:$0xff] }
 0x113   : > { %7102 = vmatmul.msk.bf16.gmra.mxu0 %vm533_vm2, %v2464_v41  ;;  %v1330_v10 = vadd.f32 %v1302_v60, %v937_v11  ;;  %v2454_v41 = vunpack.c.l.b16 %v2421_v43  ;;  %v718_v44 = vadd.f32 %v717_v57, %v11359_v8  ;;  %v1689_v60 = vunpack.c.l.b16 %v1659_v49 }
 0x114   : > { %v1909_v12 = vsel %vm8557_vm15, %v7036_v56, %v1908_v24  ;;  %v2207_v57 = vsel %vm8027_vm3, %v2202_v25, %v8901_v22  ;;  %v2217_v19 = vsel %vm8027_vm3, %v2212_v35, %v2216_v42  ;;  %v7084_v43 = vrot.slane %v8875_v48, 10  ;;  %v11361_v56 = vld [vmem:[#allocation15_spill] sm:$0xff]  ;;  %v11364_v42 = vld [vmem:[#allocation10_spill] sm:$0xff] }
 0x115   : > { %6993 = vmatmul.msk.bf16.gmra.mxu1 %vm533_vm2, %v1697_v36  ;;  %v8913_v14 = vadd.f32 %v1544_v0, %v1330_v10  ;;  %v1911_v0 = vrot.slane %v8878_v7, 7  ;;  %v1666_v10 = vshrl.u32 %v7836_v47, 16  ;;  %v2465_v20 = vpack.c.b16 %v2455_v52, %v2454_v41 }
 0x116   : > { %v911_v45 = vpop.f32.mrf.mxu2  ;;  %v2430_v24 = vrot.slane %v8906_v53, 6  ;;  %v2219_v13 = vshrl.u32 %v8931_v58, 16  ;;  %v2222_v37 = vshll.u32 %v8931_v58, 16  ;;  %v1698_v38 = vpack.c.b16 %v1689_v60, %v1688_v6 }
 0x117   : > { %v938_v30 = vadd.f32 %v911_v45, %v715_v18  ;;  %v8946_v18 = vld [vmem:[%s8001_s13 + $0x10c] sm:$0xf]  ;;  %v2429_v45 = vrot.slane %v2427_v31, 4  ;;  %v1662_v28 = vrot.slane %v11360_v5, 7  ;;  %v1668_v22 = vrot.slane %v1666_v10, 7 }
 0x118   : > { %v1546_v33 = vpop.f32.mrf.mxu0  ;;  %v1937_v46 = vunpack.c.l.b16 %v1909_v12  ;;  %v2228_v48 = vshll.u32 %v8946_v18, 16  ;;  %v2259_v9 = vunpack.c.l.b16 %v2207_v57  ;;  %v2260_v4 = vunpack.c.l.b16 %v2217_v19  ;;  %v8979_v19 = vld [vmem:[%s8001_s13 + $0xb4] sm:$0xf] }
 0x119   : > { %v2221_v41 = vrot.slane %v2219_v13, 4  ;;  %v2224_v52 = vrot.slane %v2222_v37, 5  ;;  %v6975_v49 = vrot.slane %v11362_v50, 11  ;;  %v1665_v35 = vrot.slane %v1662_v28, 4 }
 0x11a   : > { %v1304_v16 = vpop.f32.mrf.mxu3  ;;  %v719_v11 = vpop.f32.mrf.mxu1  ;;  %v1915_v10 = vrot.slane %v8931_v58, 7  ;;  %v2269_v12 = vpack.c.b16 %v2260_v4, %v2259_v9  ;;  %v8994_v4 = vld [vmem:[%s8001_s13 + $0xbc] sm:$0xf] }
 0x11b   : > { %v1331_v36 = vadd.f32 %v1304_v16, %v938_v30  ;;  %7055 = vmatmul.msk.bf16.gmra.mxu2 %vm533_vm2, %v1946_v55  ;;  %v1912_v55 = vsel %vm8557_vm15, %v1910_v27, %v1911_v0  ;;  %v2232_v30 = vshrl.u32 %v8946_v18, 16  ;;  %v720_v16 = vadd.f32 %v719_v11, %v11361_v56  ;;  %v11363_v27 = vld [vmem:[#allocation9_spill] sm:$0xff]  ;;  %v7026_v11 = vld [vmem:[%s8001_s13 + $0x104] sm:$0xf] }
 0x11c   : > { %v1938_v15 = vunpack.c.l.b16 %v1912_v55  ;;  %v1663_v0 = vor.u32 %v1662_v28, %v11363_v27  ;;  %v2225_v13 = vor.u32 %v2224_v52, %v2221_v41  ;;  %v1917_v28 = vrot.slane %v1915_v10, 4 }
 0x11d   : > { %v8952_v39 = vadd.f32 %v1546_v33, %v1331_v36  ;;  %v2431_v33 = vsel %vm8605_vm4, %v2429_v45, %v2430_v24  ;;  %v2234_v6 = vrot.slane %v2232_v30, 4  ;;  %v7037_v24 = vrot.slane %v7026_v11, 11 }
 0x11e   : > { %v914_v29 = vpop.f32.mrf.mxu2  ;;  %v1947_v47 = vpack.c.b16 %v1938_v15, %v1937_v46  ;;  %v1664_v57 = vsel %vm8543_vm14, %v6975_v49, %v1663_v0  ;;  %v2763_v30 = vshll.u32 %v8979_v19, 16 }
 0x11f   : > { %7075 = vmatmul.msk.bf16.gmra.mxu3 %vm533_vm2, %v2268_v40  ;;  %v939_v7 = vadd.f32 %v914_v29, %v718_v44  ;;  %v2428_v40 = vsel %vm8605_vm4, %v7084_v43, %v2427_v31  ;;  %v11365_v31 = vshll.u32 %v11364_v42, 16  ;;  %v8969_v44 = vrot.slane %v2228_v48, 5  ;;  %v8974_v29 = vld [vmem:[%s8001_s13 + $0x110] sm:$0xf] }
 0x120   : > { %v1549_v21 = vpop.f32.mrf.mxu0  ;;  %v2456_v55 = vunpack.c.l.b16 %v2428_v40  ;;  %v1690_v46 = vunpack.c.l.b16 %v1664_v57  ;;  %v2760_v48 = vshrl.u32 %v8979_v19, 16  ;;  %v1916_v56 = vsel %vm8557_vm15, %v7037_v24, %v1915_v10  ;;  %v7757_v24 = vld [vmem:[%s11247_s1 + $0xf8] sm:$0xff] }
 0x121   : > { %v1669_v8 = vor.u32 %v1668_v22, %v11365_v31  ;;  %v2235_v37 = vor.u32 %v2234_v6, %v8969_v44  ;;  %v1918_v22 = vrot.slane %v8946_v18, 7  ;;  %v2765_v31 = vrot.slane %v2763_v30, 6  ;;  %v7755_v6 = vld [vmem:[%s11247_s1 + $0xe8] sm:$0xff]  ;;  %4096 = vmatpush.bf16.msra.mxu3 %v7757_v24 }
 0x122   : > { %v1307_v3 = vpop.f32.mrf.mxu3  ;;  %v722_v34 = vpop.f32.mrf.mxu1  ;;  %v2762_v42 = vrot.slane %v2760_v48, 5  ;;  %v9016_v10 = vshll.u32 %v8994_v4, 16  ;;  %3902 = vmatpush.bf16.msra.mxu2 %v7755_v6 }
 0x123   : > { %7103 = vmatmul.msk.bf16.gmra.mxu0 %vm533_vm2, %v2465_v20  ;;  %v1332_v53 = vadd.f32 %v1307_v3, %v939_v7  ;;  %v2457_v7 = vunpack.c.l.b16 %v2431_v33  ;;  %v1670_v45 = vsel %vm8543_vm14, %v1665_v35, %v1669_v8  ;;  %v2238_v3 = vshll.u32 %v8974_v29, 16 }
 0x124   : > { %v1691_v9 = vunpack.c.l.b16 %v1670_v45  ;;  %v2236_v50 = vrot.slane %v2235_v37, 4  ;;  %v2434_v35 = vrot.slane %v8946_v18, 6  ;;  %v9009_v8 = vshrl.u32 %v8994_v4, 16 }
 0x125   : > { %6994 = vmatmul.msk.bf16.gmra.mxu1 %vm533_vm2, %v1698_v38  ;;  %v8965_v36 = vadd.f32 %v1549_v21, %v1332_v53  ;;  %v8985_v38 = vld [vmem:[%s8001_s13 + $0xb8] sm:$0xf]  ;;  %v11366_v53 = vld [vmem:[#allocation11_spill] sm:$0xff]  ;;  %v2466_v41 = vpack.c.b16 %v2457_v7, %v2456_v55  ;;  %v2240_v27 = vrot.slane %v2238_v3, 5  ;;  %v1939_v55 = vunpack.c.l.b16 %v1916_v56 }
 0x126   : > { %v916_v25 = vpop.f32.mrf.mxu2  ;;  %v723_v15 = vadd.f32 %v722_v34, %v11366_v53  ;;  %v8997_v40 = vshrl.u32 %v8985_v38, 16  ;;  %v2772_v33 = vshll.u32 %v8985_v38, 16  ;;  %v1919_v34 = vsel %vm8557_vm15, %v1917_v28, %v1918_v22  ;;  %v11367_v22 = vld [vmem:[#allocation12_spill] sm:$0xff] }
 0x127   : > { %v940_v60 = vadd.f32 %v916_v25, %v720_v16  ;;  %v2226_v16 = vrot.slane %v2225_v13, 4  ;;  %v1940_v57 = vunpack.c.l.b16 %v1919_v34  ;;  %v7085_v45 = vrot.slane %v8931_v58, 10  ;;  %v7753_v13 = vld [vmem:[%s11247_s1 + $0xd8] sm:$0xff] }
 0x128   : > { %v1551_v20 = vpop.f32.mrf.mxu0  ;;  %v2774_v11 = vrot.slane %v2772_v33, 6  ;;  %v2436_v37 = vrot.slane %v2434_v35, 4  ;;  %v2781_v28 = vrot.slane %v9009_v8, 5  ;;  %v2784_v58 = vrot.slane %v9016_v10, 6  ;;  %3684 = vmatpush.bf16.msra.mxu1 %v7753_v13 }
 0x129   : > { %v2231_v18 = vsel %vm8027_vm3, %v2226_v16, %v8969_v44  ;;  %v2437_v44 = vrot.slane %v8974_v29, 6  ;;  %v3123_v56 = vrot.slane %v8985_v38, 7  ;;  %v3307_v16 = vrot.slane %v8997_v40, 4 }
 0x12a   : > { %v1309_v43 = vpop.f32.mrf.mxu3  ;;  %v724_v21 = vpop.f32.mrf.mxu1  ;;  %v3313_v6 = vrot.slane %v9009_v8, 4 }
 0x12b   : > { %v1333_v5 = vadd.f32 %v1309_v43, %v940_v60  ;;  %7056 = vmatmul.msk.bf16.gmra.mxu2 %vm533_vm2, %v1947_v47  ;;  %v1699_v60 = vpack.c.b16 %v1691_v9, %v1690_v46  ;;  %v2771_v47 = vrot.slane %v8997_v40, 5  ;;  %v2241_v43 = vsel %vm8027_vm3, %v2236_v50, %v2240_v27  ;;  %v7759_v50 = vld [vmem:[%s11247_s1 + $0x108] sm:$0xff] }
 0x12c   : > { %v725_v3 = vadd.f32 %v724_v21, %v11367_v22  ;;  %v2261_v9 = vunpack.c.l.b16 %v2231_v18  ;;  %v2438_v21 = vsel %vm8605_vm4, %v2436_v37, %v2437_v44  ;;  %v2785_v27 = vor.u32 %v2784_v58, %v2781_v28  ;;  %4342 = vmatpush.bf16.msra.mxu0 %v7759_v50  ;;  %v9064_v44 = vld [vmem:[%s8001_s13 + $0xcc] sm:$0xf] }
 0x12d   : > { %v9005_v0 = vadd.f32 %v1551_v20, %v1333_v5  ;;  %v2766_v5 = vor.u32 %v2765_v31, %v2762_v42  ;;  %v2775_v46 = vor.u32 %v2774_v11, %v2771_v47  ;;  %v2459_v11 = vunpack.c.l.b16 %v2438_v21 }
 0x12e   : > { %v919_v52 = vpop.f32.mrf.mxu2  ;;  %v3125_v18 = vrot.slane %v3123_v56, 4 }
 0x12f   : > { %7076 = vmatmul.msk.bf16.gmra.mxu3 %vm533_vm2, %v2269_v12  ;;  %v941_v49 = vadd.f32 %v919_v52, %v723_v15  ;;  %v1948_v15 = vpack.c.b16 %v1940_v57, %v1939_v55  ;;  %v2435_v52 = vsel %vm8605_vm4, %v7085_v45, %v2434_v35  ;;  %v2777_v34 = vrot.slane %v2775_v46, 4  ;;  %v9054_v55 = vld [vmem:[%s8001_s13 + $0xc8] sm:$0xf]  ;;  %v11368_v57 = vld [vmem:[#allocation14_spill] sm:$0xff]  ;;  %v10538_v45 = vld [vmem:[%s8001_s13 + $0x170] sm:$0xf] }
 0x130   : > { %v1554_v25 = vpop.f32.mrf.mxu0  ;;  %v3311_v35 = vrot.slane %v9016_v10, 5  ;;  %v2458_v47 = vunpack.c.l.b16 %v2435_v52  ;;  %v2788_v22 = vshrl.u32 %v9054_v55, 16 }
 0x131   : > { %v2786_v13 = vsel %vm8180_vm9, %v2777_v34, %v2785_v27 }
 0x132   : > { %v1312_v20 = vpop.f32.mrf.mxu3  ;;  %v727_v12 = vpop.f32.mrf.mxu1  ;;  %v3314_v28 = vor.u32 %v3313_v6, %v3311_v35  ;;  %v2989_v21 = vunpack.c.l.b16 %v2786_v13  ;;  %v2790_v27 = vrot.slane %v2788_v22, 5 }
 0x133   : > { %7104 = vmatmul.msk.bf16.gmra.mxu0 %vm533_vm2, %v2466_v41  ;;  %v1334_v7 = vadd.f32 %v1312_v20, %v941_v49  ;;  %v2262_v41 = vunpack.c.l.b16 %v2241_v43  ;;  %v2767_v49 = vrot.slane %v2766_v5, 4  ;;  %v9051_v20 = vld [vmem:[%s8001_s13 + $0xc0] sm:$0xf]  ;;  %v728_v43 = vadd.f32 %v727_v12, %v11368_v57 }
 0x134   : > { %v2467_v12 = vpack.c.b16 %v2459_v11, %v2458_v47  ;;  %v3315_v34 = vrot.slane %v3314_v28, 4 }
 0x135   : > { %6995 = vmatmul.msk.bf16.gmra.mxu1 %vm533_vm2, %v1699_v60  ;;  %v9036_v48 = vadd.f32 %v1554_v25, %v1334_v7  ;;  %v3308_v25 = vrot.slane %v2772_v33, 5  ;;  %v2270_v60 = vpack.c.b16 %v2262_v41, %v2261_v9  ;;  %v7220_v33 = vrot.slane %v8979_v19, 11  ;;  %v7736_v41 = vld [vmem:[%s8001_s13 + $0xb4] sm:$0xff] }
 0x136   : > { %v921_v30 = vpop.f32.mrf.mxu2  ;;  %v3126_v7 = vrot.slane %v8994_v4, 7  ;;  %v2776_v24 = vsel %vm8180_vm9, %v2767_v49, %v2775_v46  ;;  %v11269_v19 = vshll.u32 %v9051_v20, 16  ;;  %v2791_v4 = vshll.u32 %v9054_v55, 16 }
 0x137   : > { %v942_v53 = vadd.f32 %v921_v30, %v725_v3  ;;  %v3309_v37 = vor.u32 %v3308_v25, %v3307_v16  ;;  %v3124_v30 = vsel %vm8557_vm15, %v7220_v33, %v3123_v56  ;;  %v2800_v9 = vshll.u32 %v9064_v44, 16  ;;  %v11370_v33 = vld [vmem:[#allocation16_spill] sm:$0xff] }
 0x138   : > { %v1556_v29 = vpop.f32.mrf.mxu0  ;;  %v2988_v52 = vunpack.c.l.b16 %v2776_v24  ;;  %v3127_v16 = vsel %vm8557_vm15, %v3125_v18, %v3126_v7  ;;  %v3319_v56 = vrot.slane %v11269_v19, 5  ;;  %v2793_v25 = vrot.slane %v2791_v4, 6 }
 0x139   : > { %v3310_v50 = vrot.slane %v3309_v37, 4  ;;  %v2802_v11 = vrot.slane %v2800_v9, 6  ;;  %v3182_v7 = vunpack.c.l.b16 %v3124_v30  ;;  %v3183_v13 = vunpack.c.l.b16 %v3127_v16 }
 0x13a   : > { %v1314_v42 = vpop.f32.mrf.mxu3  ;;  %v729_v31 = vpop.f32.mrf.mxu1  ;;  %v3004_v24 = vpack.c.b16 %v2989_v21, %v2988_v52  ;;  %v2794_v37 = vor.u32 %v2793_v25, %v2790_v27  ;;  %v3320_v28 = vsel %vm8027_vm3, %v3315_v34, %v3319_v56  ;;  %v3322_v30 = vrot.slane %v2800_v9, 5  ;;  %v9110_v34 = vld [vmem:[%s8001_s13 + $0xd4] sm:$0xf]  ;;  %v9113_v56 = vld [vmem:[%s8001_s13 + $0xdc] sm:$0xf] }
 0x13b   : > { %v1335_v38 = vadd.f32 %v1314_v42, %v942_v53  ;;  %7057 = vmatmul.msk.bf16.gmra.mxu2 %vm533_vm2, %v1948_v15  ;;  %v9075_v53 = vld [vmem:[%s8001_s13 + $0xd0] sm:$0xf]  ;;  %v9078_v15 = vshrl.u32 %v9064_v44, 16  ;;  %v730_v18 = vadd.f32 %v729_v31, %v11370_v33  ;;  %v3198_v21 = vpack.c.b16 %v3183_v13, %v3182_v7 }
 0x13c   : > { %v7221_v25 = vrot.slane %v9054_v55, 11  ;;  %v3133_v33 = vrot.slane %v9075_v53, 7  ;;  %v2816_v13 = vshrl.u32 %v9113_v56, 16 }
 0x13d   : > { %v9070_v46 = vadd.f32 %v1556_v29, %v1335_v38  ;;  %v9089_v38 = vshrl.u32 %v9075_v53, 16  ;;  %v2799_v47 = vrot.slane %v9078_v15, 5 }
 0x13e   : > { %v924_v5 = vpop.f32.mrf.mxu2 }
 0x13f   : > { %7077 = vmatmul.msk.bf16.gmra.mxu3 %vm533_vm2, %v2270_v60  ;;  %v943_v3 = vadd.f32 %v924_v5, %v728_v43  ;;  %v9092_v60 = vshll.u32 %v9075_v53, 16  ;;  %v2809_v22 = vrot.slane %v9089_v38, 5 }
 0x140   : > { %v1559_v58 = vpop.f32.mrf.mxu0 }
 0x141   : > { %v2812_v31 = vrot.slane %v9092_v60, 6 }
 0x142   : > { %v1317_v29 = vpop.f32.mrf.mxu3  ;;  %v1745_v49 = vpop.f32.mrf.mxu1 }
 0x143   : > { %7105 = vmatmul.msk.bf16.gmra.mxu0 %vm533_vm2, %v2467_v12  ;;  %v1336_v42 = vadd.f32 %v1317_v29, %v943_v3  ;;  %v1785_v6 = vadd.f32 %v1745_v49, %v8677_v54  ;;  %v3312_v54 = vsel %vm8027_vm3, %v3310_v50, %v3311_v35  ;;  %v2803_v12 = vor.u32 %v2802_v11, %v2799_v47 }
 0x144   : > { %v3130_v3 = vrot.slane %v9064_v44, 7  ;;  %v3325_v35 = vrot.slane %v9092_v60, 5  ;;  %v3424_v16 = vunpack.c.l.b16 %v3312_v54  ;;  %v3425_v50 = vunpack.c.l.b16 %v3320_v28  ;;  %v9133_v28 = vld [vmem:[%s8001_s13 + $0xe4] sm:$0xf] }
 0x145   : > { %7192 = vmatmul.msk.bf16.vlgmr.msrb.gmra.mxu1 %vm533_vm2, %v7736_v41  ;;  %v9097_v57 = vadd.f32 %v1559_v58, %v1336_v42  ;;  %v3321_v58 = vrot.slane %v9078_v15, 4  ;;  %v3327_v41 = vrot.slane %v9089_v38, 4  ;;  %v2795_v49 = vrot.slane %v2794_v37, 4  ;;  %v9119_v42 = vld [vmem:[%s8001_s13 + $0xe0] sm:$0xf] }
 0x146   : > { %v926_v43 = vpop.f32.mrf.mxu2  ;;  %v2813_v9 = vor.u32 %v2812_v31, %v2809_v22  ;;  %v2805_v47 = vrot.slane %v2803_v12, 4  ;;  %v3132_v11 = vrot.slane %v3130_v3, 4  ;;  %v9126_v54 = vshrl.u32 %v9119_v42, 16 }
 0x147   : > { %v944_v5 = vadd.f32 %v926_v43, %v730_v18  ;;  %v3323_v18 = vor.u32 %v3322_v30, %v3321_v58  ;;  %v3328_v7 = vor.u32 %v3327_v41, %v3325_v35  ;;  %v11268_v43 = vshll.u32 %v9110_v34, 16 }
 0x148   : > { %v1561_v4 = vpop.f32.mrf.mxu0  ;;  %11371 = vst [vmem:[#allocation4_spill] sm:$0xff] %v9126_v54  ;;  %v2828_v55 = vshll.u32 %v9119_v42, 16  ;;  %v3440_v37 = vpack.c.b16 %v3425_v50, %v3424_v16  ;;  %v2804_v53 = vsel %vm8180_vm9, %v2795_v49, %v2803_v12  ;;  %v2814_v58 = vsel %vm8180_vm9, %v2805_v47, %v2813_v9 }
 0x149   : > { %v3131_v30 = vsel %vm8557_vm15, %v7221_v25, %v3130_v3  ;;  %v3134_v41 = vsel %vm8557_vm15, %v3132_v11, %v3133_v33  ;;  %v3333_v12 = vrot.slane %v11268_v43, 5  ;;  %v2818_v16 = vrot.slane %v2816_v13, 5 }
 0x14a   : > { %v1319_v52 = vpop.f32.mrf.mxu3  ;;  %v1747_v29 = vpop.f32.mrf.mxu1  ;;  %v2827_v49 = vrot.slane %v9126_v54, 5  ;;  %v9148_v9 = vshrl.u32 %v9133_v28, 16  ;;  %v9151_v3 = vshll.u32 %v9133_v28, 16  ;;  %v2990_v11 = vunpack.c.l.b16 %v2804_v53 }
 0x14b   : > { %v1337_v27 = vadd.f32 %v1319_v52, %v944_v5  ;;  %7212 = vmatmul.msk.bf16.vlgmr.msrb.gmra.mxu2 %vm533_vm2, %v3004_v24  ;;  %v1786_v44 = vadd.f32 %v1747_v29, %v8718_v17  ;;  %v2819_v24 = vshll.u32 %v9113_v56, 16  ;;  %v3324_v52 = vrot.slane %v3323_v18, 4 }
 0x14c   : > { %11372 = vst [vmem:[#allocation5_spill] sm:$0xff] %v9151_v3  ;;  %v2991_v33 = vunpack.c.l.b16 %v2814_v58  ;;  %v3184_v18 = vunpack.c.l.b16 %v3131_v30 }
 0x14d   : > { %v9135_v22 = vadd.f32 %v1561_v4, %v1337_v27  ;;  %v2821_v50 = vrot.slane %v2819_v24, 6  ;;  %v2830_v27 = vrot.slane %v2828_v55, 6  ;;  %v3326_v13 = vsel %vm8027_vm3, %v3324_v52, %v3325_v35 }
 0x14e   : > { %v1994_v17 = vpop.f32.mrf.mxu2  ;;  %v3005_v58 = vpack.c.b16 %v2991_v33, %v2990_v11  ;;  %v3137_v52 = vrot.slane %v9119_v42, 7  ;;  %v9174_v11 = vld [vmem:[%s8001_s13 + $0xe8] sm:$0xf] }
 0x14f   : > { %7240 = vmatmul.msk.bf16.vlgmr.msrb.gmra.mxu3 %vm533_vm2, %v3198_v21  ;;  %v2034_v5 = vadd.f32 %v1994_v17, %v1785_v6  ;;  %v7737_v21 = vld [vmem:[%s8001_s13 + $0xc8] sm:$0xff]  ;;  %v3329_v6 = vrot.slane %v3328_v7, 4  ;;  %v3185_v7 = vunpack.c.l.b16 %v3134_v41  ;;  %v2822_v17 = vor.u32 %v2821_v50, %v2818_v16  ;;  %11373 = vst [vmem:[#allocation6_spill] sm:$0xff] %v9174_v11 }
 0x150   : > { %v2513_v31 = vpop.f32.mrf.mxu0  ;;  %v3426_v41 = vunpack.c.l.b16 %v3326_v13  ;;  %v3335_v50 = vrot.slane %v9126_v54, 4  ;;  %v9181_v13 = vld [vmem:[%s8001_s13 + $0xf4] sm:$0xf] }
 0x151   : > { %v3334_v24 = vsel %vm8027_vm3, %v3329_v6, %v3333_v12  ;;  %v2823_v35 = vrot.slane %v2822_v17, 4 }
 0x152   : > { %v2316_v4 = vpop.f32.mrf.mxu3  ;;  %v1750_v29 = vpop.f32.mrf.mxu1 }
 0x153   : > { %7260 = vmatmul.msk.bf16.vlgmr.msrb.gmra.mxu0 %vm533_vm2, %v3440_v37  ;;  %v2356_v25 = vadd.f32 %v2316_v4, %v2034_v5  ;;  %v1787_v47 = vadd.f32 %v1750_v29, %v8730_v1  ;;  %v2831_v37 = vor.u32 %v2830_v27, %v2827_v49  ;;  %v2837_v5 = vrot.slane %v9148_v9, 5 }
 0x154   : > { %v2840_v1 = vrot.slane %v9151_v3, 6  ;;  %v3199_v4 = vpack.c.b16 %v3185_v7, %v3184_v18  ;;  %v3336_v29 = vrot.slane %v2828_v55, 5  ;;  %v3341_v27 = vrot.slane %v9148_v9, 4 }
 0x155   : > { %7193 = vmatmul.msk.bf16.gmra.mxu1 %vm533_vm2, %v7737_v21  ;;  %v9160_v43 = vadd.f32 %v2513_v31, %v2356_v25  ;;  %v3427_v21 = vunpack.c.l.b16 %v3334_v24  ;;  %v2833_v12 = vrot.slane %v2831_v37, 4  ;;  %v9171_v25 = vld [vmem:[%s8001_s13 + $0xf0] sm:$0xf]  ;;  %v2832_v33 = vsel %vm8180_vm9, %v2823_v35, %v2831_v37  ;;  %v7738_v35 = vld [vmem:[%s8001_s13 + $0xdc] sm:$0xff] }
 0x156   : > { %v1996_v19 = vpop.f32.mrf.mxu2  ;;  %v2841_v16 = vor.u32 %v2840_v1, %v2837_v5  ;;  %v7222_v18 = vrot.slane %v9113_v56, 11  ;;  %v3139_v55 = vrot.slane %v3137_v52, 4  ;;  %v3140_v7 = vrot.slane %v9133_v28, 7 }
 0x157   : > { %v2035_v53 = vadd.f32 %v1996_v19, %v1786_v44  ;;  %v3339_v44 = vrot.slane %v9151_v3, 5  ;;  %v3441_v42 = vpack.c.b16 %v3427_v21, %v3426_v41  ;;  %v3337_v17 = vor.u32 %v3336_v29, %v3335_v50 }
 0x158   : > { %v2515_v30 = vpop.f32.mrf.mxu0  ;;  %v2842_v24 = vsel %vm8180_vm9, %v2833_v12, %v2841_v16  ;;  %v2844_v5 = vshrl.u32 %v9171_v25, 16  ;;  %v2847_v1 = vshll.u32 %v9171_v25, 16  ;;  %v9192_v41 = vshrl.u32 %v9181_v13, 16 }
 0x159   : > { %v3342_v56 = vor.u32 %v3341_v27, %v3339_v44  ;;  %v2856_v21 = vshll.u32 %v9181_v13, 16  ;;  %v3338_v50 = vrot.slane %v3337_v17, 4 }
 0x15a   : > { %v2318_v6 = vpop.f32.mrf.mxu3  ;;  %v1752_v31 = vpop.f32.mrf.mxu1  ;;  %11374 = vst [vmem:[#allocation13_spill] sm:$0xff] %v9192_v41  ;;  %v2846_v29 = vrot.slane %v2844_v5, 5 }
 0x15b   : > { %v2357_v49 = vadd.f32 %v2318_v6, %v2035_v53  ;;  %7213 = vmatmul.msk.bf16.gmra.mxu2 %vm533_vm2, %v3005_v58  ;;  %v1788_v19 = vadd.f32 %v1752_v31, %v8772_v59  ;;  %v11270_v53 = vshll.u32 %v9174_v11, 16  ;;  %v2992_v6 = vunpack.c.l.b16 %v2832_v33 }
 0x15c   : > { %v3138_v31 = vsel %vm8557_vm15, %v7222_v18, %v3137_v52  ;;  %v3343_v33 = vrot.slane %v3342_v56, 4  ;;  %v2855_v18 = vrot.slane %v9192_v41, 5 }
 0x15d   : > { %v9189_v58 = vadd.f32 %v2515_v30, %v2357_v49  ;;  %v2993_v30 = vunpack.c.l.b16 %v2842_v24  ;;  %v2849_v49 = vrot.slane %v2847_v1, 6  ;;  %v3347_v52 = vrot.slane %v11270_v53, 5 }
 0x15e   : > { %v1999_v59 = vpop.f32.mrf.mxu2  ;;  %v3186_v17 = vunpack.c.l.b16 %v3138_v31  ;;  %v3144_v31 = vrot.slane %v9181_v13, 7 }
 0x15f   : > { %7241 = vmatmul.msk.bf16.gmra.mxu3 %vm533_vm2, %v3199_v4  ;;  %v2036_v37 = vadd.f32 %v1999_v59, %v1787_v47  ;;  %v3141_v4 = vsel %vm8557_vm15, %v3139_v55, %v3140_v7  ;;  %v9201_v47 = vld [vmem:[%s8001_s13 + $0xf8] sm:$0xf]  ;;  %v2858_v55 = vrot.slane %v2856_v21, 6  ;;  %v2850_v1 = vor.u32 %v2849_v49, %v2846_v29 }
 0x160   : > { %v2518_v28 = vpop.f32.mrf.mxu0  ;;  %v9209_v7 = vshrl.u32 %v9201_v47, 16  ;;  %v9212_v24 = vshll.u32 %v9201_v47, 16  ;;  %v3006_v56 = vpack.c.b16 %v2993_v30, %v2992_v6 }
 0x161   : > { %v2859_v11 = vor.u32 %v2858_v55, %v2855_v18  ;;  %v2851_v30 = vrot.slane %v2850_v1, 4  ;;  %v9232_v18 = vld [vmem:[%s8001_s13 + $0x108] sm:$0xf]  ;;  %v3147_v1 = vrot.slane %v9201_v47, 7 }
 0x162   : > { %v2321_v12 = vpop.f32.mrf.mxu3  ;;  %v1755_v16 = vpop.f32.mrf.mxu1  ;;  %11375 = vst [vmem:[#allocation8_spill] sm:$0xff] %v9209_v7  ;;  %v2865_v3 = vrot.slane %v9209_v7, 5 }
 0x163   : > { %7261 = vmatmul.msk.bf16.gmra.mxu0 %vm533_vm2, %v3441_v42  ;;  %v2358_v27 = vadd.f32 %v2321_v12, %v2036_v37  ;;  %v1789_v59 = vadd.f32 %v1755_v16, %v8796_v63  ;;  %11376 = vst [vmem:[#allocation15_spill] sm:$0xff] %v9212_v24  ;;  %v3187_v42 = vunpack.c.l.b16 %v3141_v4  ;;  %v3340_v12 = vsel %vm8027_vm3, %v3338_v50, %v3339_v44  ;;  %v9226_v50 = vld [vmem:[%s8001_s13 + $0x104] sm:$0xf] }
 0x164   : > { %v3348_v16 = vsel %vm8027_vm3, %v3343_v33, %v3347_v52  ;;  %v3349_v44 = vrot.slane %v9192_v41, 4  ;;  %v7223_v33 = vrot.slane %v9171_v25, 11  ;;  %v3350_v52 = vrot.slane %v2856_v21, 5 }
 0x165   : > { %7194 = vmatmul.msk.bf16.gmra.mxu1 %vm533_vm2, %v7738_v35  ;;  %v9215_v5 = vadd.f32 %v2518_v28, %v2358_v27  ;;  %v2868_v35 = vrot.slane %v9212_v24, 6  ;;  %v3200_v28 = vpack.c.b16 %v3187_v42, %v3186_v17  ;;  %v3429_v29 = vunpack.c.l.b16 %v3348_v16 }
 0x166   : > { %v2001_v63 = vpop.f32.mrf.mxu2  ;;  %v2861_v13 = vrot.slane %v2859_v11, 4  ;;  %v3353_v17 = vrot.slane %v9212_v24, 5  ;;  %v3355_v42 = vrot.slane %v9209_v7, 4  ;;  %v2860_v21 = vsel %vm8180_vm9, %v2851_v30, %v2859_v11 }
 0x167   : > { %v2037_v37 = vadd.f32 %v2001_v63, %v1788_v19  ;;  %v3428_v19 = vunpack.c.l.b16 %v3340_v12  ;;  %v2869_v55 = vor.u32 %v2868_v35, %v2865_v3  ;;  %v3146_v63 = vrot.slane %v3144_v31, 4 }
 0x168   : > { %v2520_v53 = vpop.f32.mrf.mxu0  ;;  %v9245_v3 = vshrl.u32 %v9232_v18, 16  ;;  %v2884_v12 = vshll.u32 %v9232_v18, 16  ;;  %v3145_v35 = vsel %vm8557_vm15, %v7223_v33, %v3144_v31  ;;  %v3351_v30 = vor.u32 %v3350_v52, %v3349_v44 }
 0x169   : > { %v3442_v16 = vpack.c.b16 %v3429_v29, %v3428_v19  ;;  %v2870_v11 = vsel %vm8180_vm9, %v2861_v13, %v2869_v55  ;;  %v3356_v41 = vor.u32 %v3355_v42, %v3353_v17  ;;  %v2994_v19 = vunpack.c.l.b16 %v2860_v21 }
 0x16a   : > { %v2323_v4 = vpop.f32.mrf.mxu3  ;;  %v1757_v6 = vpop.f32.mrf.mxu1  ;;  %11377 = vst [vmem:[#allocation7_spill] sm:$0xff] %v9245_v3  ;;  %v3148_v31 = vsel %vm8557_vm15, %v3146_v63, %v3147_v1  ;;  %v2886_v13 = vrot.slane %v2884_v12, 6  ;;  %v2995_v63 = vunpack.c.l.b16 %v2870_v11  ;;  %v3188_v1 = vunpack.c.l.b16 %v3145_v35 }
 0x16b   : > { %v2359_v49 = vadd.f32 %v2323_v4, %v2037_v37  ;;  %7214 = vmatmul.msk.bf16.gmra.mxu2 %vm533_vm2, %v3006_v56  ;;  %v1790_v27 = vadd.f32 %v1757_v6, %v8839_v2  ;;  %v9238_v37 = vld [vmem:[%s8001_s13 + $0xfc] sm:$0xf]  ;;  %v2872_v56 = vshrl.u32 %v9226_v50, 16  ;;  %v2875_v2 = vshll.u32 %v9226_v50, 16  ;;  %v9252_v4 = vld [vmem:[%s8001_s13 + $0x10c] sm:$0xf] }
 0x16c   : > { %v9267_v44 = vshrl.u32 %v9252_v4, 16  ;;  %v9270_v52 = vshll.u32 %v9252_v4, 16  ;;  %v3189_v21 = vunpack.c.l.b16 %v3148_v31  ;;  %v3352_v7 = vrot.slane %v3351_v30, 4 }
 0x16d   : > { %v9254_v6 = vadd.f32 %v2520_v53, %v2359_v49  ;;  %v2874_v29 = vrot.slane %v2872_v56, 5  ;;  %v2877_v53 = vrot.slane %v2875_v2, 6  ;;  %v7756_v56 = vld [vmem:[%s11247_s1 + $0xf0] sm:$0xff]  ;;  %v3007_v31 = vpack.c.b16 %v2995_v63, %v2994_v19 }
 0x16e   : > { %v2004_v25 = vpop.f32.mrf.mxu2  ;;  %11379 = vst [vmem:[#allocation10_spill] sm:$0xff] %v9267_v44  ;;  %v7752_v2 = vld [vmem:[%s11247_s1 + $0xd0] sm:$0xff]  ;;  %4097 = vmatpush.bf16.msra.mxu3 %v7756_v56  ;;  %v2893_v11 = vrot.slane %v9267_v44, 5  ;;  %v3364_v19 = vrot.slane %v2884_v12, 5  ;;  %v9304_v12 = vld [vmem:[%s8001_s13 + $0x118] sm:$0xf] }
 0x16f   : > { %7242 = vmatmul.msk.bf16.gmra.mxu3 %vm533_vm2, %v3200_v28  ;;  %v2038_v47 = vadd.f32 %v2004_v25, %v1789_v59  ;;  %11378 = vst [vmem:[#allocation9_spill] sm:$0xff] %v9254_v6  ;;  %v7754_v28 = vld [vmem:[%s11247_s1 + $0xe0] sm:$0xff]  ;;  %v7739_v59 = vld [vmem:[%s8001_s13 + $0xf0] sm:$0xff]  ;;  %v2883_v25 = vrot.slane %v9245_v3, 5  ;;  %v3357_v6 = vrot.slane %v3356_v41, 4  ;;  %3685 = vmatpush.bf16.msra.mxu1 %v7752_v2  ;;  %v3201_v41 = vpack.c.b16 %v3189_v21, %v3188_v1 }
 0x170   : > { %v2523_v24 = vpop.f32.mrf.mxu0  ;;  %11380 = vst [vmem:[#allocation11_spill] sm:$0xff] %v9270_v52  ;;  %3903 = vmatpush.bf16.msra.mxu2 %v7754_v28  ;;  %v11381_v28 = vshll.u32 %v9238_v37, 16  ;;  %v9301_v56 = vld [vmem:[%s8001_s13 + $0x110] sm:$0xf]  ;;  %v7224_v2 = vrot.slane %v9226_v50, 11  ;;  %v2900_v50 = vshrl.u32 %v9304_v12, 16 }
 0x171   : > { %v2887_v35 = vor.u32 %v2886_v13, %v2883_v25 }
 0x172   : > { %v2326_v49 = vpop.f32.mrf.mxu3  ;;  %v1760_v33 = vpop.f32.mrf.mxu1  ;;  %v3361_v54 = vrot.slane %v11381_v28, 5  ;;  %v3354_v28 = vsel %vm8027_vm3, %v3352_v7, %v3353_v17  ;;  %v3367_v7 = vrot.slane %v9270_v52, 5 }
 0x173   : > { %7262 = vmatmul.msk.bf16.gmra.mxu0 %vm533_vm2, %v3442_v16  ;;  %v2360_v55 = vadd.f32 %v2326_v49, %v2038_v47  ;;  %v1791_v42 = vadd.f32 %v1760_v33, %v8858_v23  ;;  %v2878_v16 = vor.u32 %v2877_v53, %v2874_v29  ;;  %v2896_v49 = vrot.slane %v9270_v52, 6 }
 0x174   : > { %v3151_v53 = vrot.slane %v9232_v18, 7 }
 0x175   : > { %7195 = vmatmul.msk.bf16.gmra.mxu1 %vm533_vm2, %v7739_v59  ;;  %v9283_v23 = vadd.f32 %v2523_v24, %v2360_v55  ;;  %v3362_v59 = vsel %vm8027_vm3, %v3357_v6, %v3361_v54  ;;  %v7758_v24 = vld [vmem:[%s11247_s1 + $0x100] sm:$0xff]  ;;  %v2879_v29 = vrot.slane %v2878_v16, 4  ;;  %v2889_v55 = vrot.slane %v2887_v35, 4 }
 0x176   : > { %v2006_v47 = vpop.f32.mrf.mxu2  ;;  %v2897_v63 = vor.u32 %v2896_v49, %v2893_v11  ;;  %v3369_v54 = vrot.slane %v9267_v44, 4  ;;  %4343 = vmatpush.bf16.msra.mxu0 %v7758_v24  ;;  %v3430_v6 = vunpack.c.l.b16 %v3354_v28  ;;  %v3431_v1 = vunpack.c.l.b16 %v3362_v59  ;;  %v9311_v49 = vld [vmem:[%s8001_s13 + $0x11c] sm:$0xf] }
 0x177   : > { %v2039_v33 = vadd.f32 %v2006_v47, %v1790_v27  ;;  %v3363_v27 = vrot.slane %v9245_v3, 4  ;;  %v2888_v21 = vsel %vm8180_vm9, %v2879_v29, %v2887_v35  ;;  %v3153_v16 = vrot.slane %v3151_v53, 4 }
 0x178   : > { %v2525_v30 = vpop.f32.mrf.mxu0  ;;  %v3154_v47 = vrot.slane %v9252_v4, 7  ;;  %v11279_v28 = vshll.u32 %v9301_v56, 16  ;;  %v3443_v35 = vpack.c.b16 %v3431_v1, %v3430_v6  ;;  %v2903_v24 = vshll.u32 %v9304_v12, 16 }
 0x179   : > { %v3365_v11 = vor.u32 %v3364_v19, %v3363_v27  ;;  %v9322_v27 = vld [vmem:[%s8001_s13 + $0x120] sm:$0xf]  ;;  %v9325_v19 = vshrl.u32 %v9311_v49, 16 }
 0x17a   : > { %v2328_v25 = vpop.f32.mrf.mxu3  ;;  %v1762_v13 = vpop.f32.mrf.mxu1  ;;  %v3375_v1 = vrot.slane %v11279_v28, 5  ;;  %v9338_v3 = vshrl.u32 %v9322_v27, 16 }
 0x17b   : > { %v2361_v17 = vadd.f32 %v2328_v25, %v2039_v33  ;;  %7215 = vmatmul.msk.bf16.gmra.mxu2 %vm533_vm2, %v3007_v31  ;;  %v1792_v18 = vadd.f32 %v1762_v13, %v8897_v51  ;;  %v2898_v51 = vsel %vm8180_vm9, %v2889_v55, %v2897_v63  ;;  %v3370_v31 = vor.u32 %v3369_v54, %v3367_v7  ;;  %v7740_v13 = vld [vmem:[%s8001_s13 + $0x104] sm:$0xff] }
 0x17c   : > { %11382 = vst [vmem:[#allocation12_spill] sm:$0xff] %v9325_v19  ;;  %v2912_v25 = vshll.u32 %v9311_v49, 16  ;;  %v2996_v55 = vunpack.c.l.b16 %v2888_v21  ;;  %v2997_v63 = vunpack.c.l.b16 %v2898_v51  ;;  %v2905_v51 = vrot.slane %v2903_v24, 6 }
 0x17d   : > { %v9319_v4 = vadd.f32 %v2525_v30, %v2361_v17  ;;  %v3366_v17 = vrot.slane %v3365_v11, 4  ;;  %v3371_v6 = vrot.slane %v3370_v31, 4  ;;  %11383 = vst [vmem:[#allocation14_spill] sm:$0xff] %v9338_v3 }
 0x17e   : > { %v2009_v33 = vpop.f32.mrf.mxu2  ;;  %v3008_v31 = vpack.c.b16 %v2997_v63, %v2996_v55  ;;  %v3378_v55 = vrot.slane %v2912_v25, 5 }
 0x17f   : > { %7243 = vmatmul.msk.bf16.gmra.mxu3 %vm533_vm2, %v3201_v41  ;;  %v2040_v59 = vadd.f32 %v2009_v33, %v1791_v42  ;;  %v3152_v41 = vsel %vm8557_vm15, %v7224_v2, %v3151_v53  ;;  %v3155_v42 = vsel %vm8557_vm15, %v3153_v16, %v3154_v47  ;;  %v2902_v33 = vrot.slane %v2900_v50, 5 }
 0x180   : > { %v2528_v29 = vpop.f32.mrf.mxu0  ;;  %v2911_v53 = vrot.slane %v9325_v19, 5  ;;  %v2914_v2 = vrot.slane %v2912_v25, 6  ;;  %v9342_v16 = vshll.u32 %v9322_v27, 16  ;;  %v3190_v50 = vunpack.c.l.b16 %v3152_v41 }
 0x181   : > { %v3376_v24 = vsel %vm8027_vm3, %v3371_v6, %v3375_v1  ;;  %v9357_v6 = vld [vmem:[%s8001_s13 + $0x124] sm:$0xf]  ;;  %v9360_v1 = vld [vmem:[%s8001_s13 + $0x12c] sm:$0xf]  ;;  %v3158_v25 = vrot.slane %v9311_v49, 7 }
 0x182   : > { %v2331_v54 = vpop.f32.mrf.mxu3  ;;  %v1765_v30 = vpop.f32.mrf.mxu1  ;;  %11384 = vst [vmem:[#allocation3_spill] sm:$0xff] %v9342_v16  ;;  %v3381_v63 = vrot.slane %v9342_v16, 5  ;;  %v2928_v44 = vshrl.u32 %v9360_v1, 16 }
 0x183   : > { %7263 = vmatmul.msk.bf16.gmra.mxu0 %vm533_vm2, %v3443_v35  ;;  %v2362_v52 = vadd.f32 %v2331_v54, %v2040_v59  ;;  %v1793_v21 = vadd.f32 %v1765_v30, %v8913_v14  ;;  %v3191_v35 = vunpack.c.l.b16 %v3155_v42  ;;  %v3368_v14 = vsel %vm8027_vm3, %v3366_v17, %v3367_v7 }
 0x184   : > { %v2906_v54 = vor.u32 %v2905_v51, %v2902_v33  ;;  %v2921_v30 = vrot.slane %v9338_v3, 5  ;;  %v3383_v7 = vrot.slane %v9338_v3, 4  ;;  %v3432_v41 = vunpack.c.l.b16 %v3368_v14 }
 0x185   : > { %7196 = vmatmul.msk.bf16.gmra.mxu1 %vm533_vm2, %v7740_v13  ;;  %v9345_v47 = vadd.f32 %v2528_v29, %v2362_v52  ;;  %v2915_v13 = vor.u32 %v2914_v2, %v2911_v53  ;;  %v2924_v52 = vrot.slane %v9342_v16, 6  ;;  %v3377_v29 = vrot.slane %v9325_v19, 4  ;;  %v9366_v2 = vld [vmem:[%s8001_s13 + $0x130] sm:$0xf] }
 0x186   : > { %v2011_v11 = vpop.f32.mrf.mxu2  ;;  %v3433_v42 = vunpack.c.l.b16 %v3376_v24  ;;  %v3202_v51 = vpack.c.b16 %v3191_v35, %v3190_v50  ;;  %v3384_v19 = vor.u32 %v3383_v7, %v3381_v63  ;;  %v11284_v3 = vshll.u32 %v9357_v6, 16 }
 0x187   : > { %11385 = vst [vmem:[#allocation16_spill] sm:$0xff] %v9345_v47  ;;  %v2041_v59 = vadd.f32 %v2011_v11, %v1792_v18  ;;  %v2907_v11 = vrot.slane %v2906_v54, 4  ;;  %v2917_v16 = vrot.slane %v2915_v13, 4  ;;  %v2925_v14 = vor.u32 %v2924_v52, %v2921_v30  ;;  %v9378_v52 = vld [vmem:[%s8001_s13 + $0x134] sm:$0xf] }
 0x188   : > { %v2530_v28 = vpop.f32.mrf.mxu0  ;;  %v3379_v24 = vor.u32 %v3378_v55, %v3377_v29  ;;  %v2940_v49 = vshll.u32 %v9366_v2, 16  ;;  %v7225_v54 = vrot.slane %v9304_v12, 11  ;;  %v3160_v30 = vrot.slane %v3158_v25, 4 }
 0x189   : > { %v2916_v7 = vsel %vm8180_vm9, %v2907_v11, %v2915_v13  ;;  %v3389_v12 = vrot.slane %v11284_v3, 5  ;;  %v9392_v13 = vshrl.u32 %v9378_v52, 16 }
 0x18a   : > { %v2333_v18 = vpop.f32.mrf.mxu3  ;;  %v1767_v17 = vpop.f32.mrf.mxu1  ;;  %v2998_v11 = vunpack.c.l.b16 %v2916_v7 }
 0x18b   : > { %v2363_v33 = vadd.f32 %v2333_v18, %v2041_v59  ;;  %7216 = vmatmul.msk.bf16.gmra.mxu2 %vm533_vm2, %v3008_v31  ;;  %v1794_v53 = vadd.f32 %v1767_v17, %v8952_v39  ;;  %v2931_v59 = vshll.u32 %v9360_v1, 16  ;;  %v3444_v31 = vpack.c.b16 %v3433_v42, %v3432_v41  ;;  %v7741_v17 = vld [vmem:[%s8001_s13 + $0x118] sm:$0xff]  ;;  %11388 = vst [vmem:[#allocation19_spill] sm:$0xff] %v9392_v13 }
 0x18c   : > { %v9372_v39 = vshrl.u32 %v9366_v2, 16  ;;  %v2926_v18 = vsel %vm8180_vm9, %v2917_v16, %v2925_v14  ;;  %v3161_v41 = vrot.slane %v9322_v27, 7  ;;  %v3380_v42 = vrot.slane %v3379_v24, 4 }
 0x18d   : > { %v9380_v29 = vadd.f32 %v2530_v28, %v2363_v33  ;;  %v9395_v16 = vshll.u32 %v9378_v52, 16  ;;  %v2999_v14 = vunpack.c.l.b16 %v2926_v18  ;;  %v2949_v7 = vrot.slane %v9392_v13, 5 }
 0x18e   : > { %v2014_v50 = vpop.f32.mrf.mxu2  ;;  %11386 = vst [vmem:[#allocation17_spill] sm:$0xff] %v9372_v39  ;;  %v2939_v33 = vrot.slane %v9372_v39, 5  ;;  %v3162_v24 = vsel %vm8557_vm15, %v3160_v30, %v3161_v41 }
 0x18f   : > { %7244 = vmatmul.msk.bf16.gmra.mxu3 %vm533_vm2, %v3202_v51  ;;  %v2042_v35 = vadd.f32 %v2014_v50, %v1793_v21  ;;  %11387 = vst [vmem:[#allocation18_spill] sm:$0xff] %v9380_v29  ;;  %v3385_v51 = vrot.slane %v3384_v19, 4  ;;  %v2930_v21 = vrot.slane %v2928_v44, 5  ;;  %v2933_v50 = vrot.slane %v2931_v59, 6 }
 0x190   : > { %v2533_v55 = vpop.f32.mrf.mxu0  ;;  %v2942_v29 = vrot.slane %v2940_v49, 6  ;;  %11389 = vst [vmem:[#allocation20_spill] sm:$0xff] %v9395_v16  ;;  %v3159_v44 = vsel %vm8557_vm15, %v7225_v54, %v3158_v25  ;;  %v3382_v59 = vsel %vm8027_vm3, %v3380_v42, %v3381_v63  ;;  %v2952_v25 = vrot.slane %v9395_v16, 6 }
 0x191   : > { %v3390_v3 = vsel %vm8027_vm3, %v3385_v51, %v3389_v12  ;;  %v3009_v18 = vpack.c.b16 %v2999_v14, %v2998_v11  ;;  %v3192_v30 = vunpack.c.l.b16 %v3159_v44  ;;  %v3193_v41 = vunpack.c.l.b16 %v3162_v24  ;;  %v9419_v44 = vld [vmem:[%s8001_s13 + $0x138] sm:$0xf]  ;;  %v9422_v24 = vld [vmem:[%s8001_s13 + $0x140] sm:$0xf] }
 0x192   : > { %v2336_v47 = vpop.f32.mrf.mxu3  ;;  %v1770_v28 = vpop.f32.mrf.mxu1  ;;  %v3435_v63 = vunpack.c.l.b16 %v3390_v3  ;;  %v3165_v51 = vrot.slane %v9366_v2, 7  ;;  %v3392_v12 = vrot.slane %v2940_v49, 5 }
 0x193   : > { %7264 = vmatmul.msk.bf16.gmra.mxu0 %vm533_vm2, %v3444_v31  ;;  %v2364_v27 = vadd.f32 %v2336_v47, %v2042_v35  ;;  %v1795_v19 = vadd.f32 %v1770_v28, %v8965_v36  ;;  %v2934_v31 = vor.u32 %v2933_v50, %v2930_v21  ;;  %v2943_v35 = vor.u32 %v2942_v29, %v2939_v33 }
 0x194   : > { %v3434_v28 = vunpack.c.l.b16 %v3382_v59  ;;  %v2953_v33 = vor.u32 %v2952_v25, %v2949_v7  ;;  %v3203_v3 = vpack.c.b16 %v3193_v41, %v3192_v30  ;;  %v7226_v59 = vrot.slane %v9360_v1, 11  ;;  %v9429_v7 = vld [vmem:[%s8001_s13 + $0x144] sm:$0xf] }
 0x195   : > { %7197 = vmatmul.msk.bf16.gmra.mxu1 %vm533_vm2, %v7741_v17  ;;  %v9408_v47 = vadd.f32 %v2533_v55, %v2364_v27  ;;  %v2935_v42 = vrot.slane %v2934_v31, 4  ;;  %v3391_v55 = vrot.slane %v9372_v39, 4  ;;  %v2945_v50 = vrot.slane %v2943_v35, 4 }
 0x196   : > { %v2016_v36 = vpop.f32.mrf.mxu2  ;;  %v3397_v27 = vrot.slane %v9392_v13, 4  ;;  %v3445_v2 = vpack.c.b16 %v3435_v63, %v3434_v28  ;;  %v3167_v31 = vrot.slane %v3165_v51, 4  ;;  %v11286_v30 = vshll.u32 %v9419_v44, 16 }
 0x197   : > { %v2043_v54 = vadd.f32 %v2016_v36, %v1794_v53  ;;  %v3395_v53 = vrot.slane %v9395_v16, 5  ;;  %v2944_v49 = vsel %vm8180_vm9, %v2935_v42, %v2943_v35  ;;  %v3168_v36 = vrot.slane %v9378_v52, 7 }
 0x198   : > { %v2535_v17 = vpop.f32.mrf.mxu0  ;;  %v2956_v1 = vshrl.u32 %v9422_v24, 16  ;;  %v2959_v41 = vshll.u32 %v9422_v24, 16  ;;  %v9440_v63 = vshrl.u32 %v9429_v7, 16  ;;  %v2968_v42 = vshll.u32 %v9429_v7, 16 }
 0x19a   : > { %v2338_v29 = vpop.f32.mrf.mxu3  ;;  %v1772_v21 = vpop.f32.mrf.mxu1  ;;  %11390 = vst [vmem:[#allocation21_spill] sm:$0xff] %v9440_v63  ;;  %v2958_v16 = vrot.slane %v2956_v1, 5 }
 0x19b   : > { %v2365_v11 = vadd.f32 %v2338_v29, %v2043_v54  ;;  %7217 = vmatmul.msk.bf16.gmra.mxu2 %vm533_vm2, %v3009_v18  ;;  %v1796_v14 = vadd.f32 %v1772_v21, %v9005_v0  ;;  %v2954_v0 = vsel %vm8180_vm9, %v2945_v50, %v2953_v33  ;;  %v3393_v54 = vor.u32 %v3392_v12, %v3391_v55  ;;  %v7742_v29 = vld [vmem:[%s8001_s13 + $0x12c] sm:$0xff]  ;;  %v9449_v21 = vld [vmem:[%s8001_s13 + $0x148] sm:$0xf] }
 0x19c   : > { %v3398_v18 = vor.u32 %v3397_v27, %v3395_v53  ;;  %v3000_v55 = vunpack.c.l.b16 %v2944_v49  ;;  %v3166_v12 = vsel %vm8557_vm15, %v7226_v59, %v3165_v51  ;;  %v2961_v51 = vrot.slane %v2959_v41, 6 }
 0x19d   : > { %v9437_v28 = vadd.f32 %v2535_v17, %v2365_v11  ;;  %v3001_v17 = vunpack.c.l.b16 %v2954_v0  ;;  %v3394_v27 = vrot.slane %v3393_v54, 4  ;;  %v2967_v59 = vrot.slane %v9440_v63, 5 }
 0x19e   : > { %v2019_v25 = vpop.f32.mrf.mxu2  ;;  %v3399_v11 = vrot.slane %v3398_v18, 4  ;;  %v9460_v0 = vshll.u32 %v9449_v21, 16  ;;  %v2962_v41 = vor.u32 %v2961_v51, %v2958_v16 }
 0x19f   : > { %7245 = vmatmul.msk.bf16.gmra.mxu3 %vm533_vm2, %v3203_v3  ;;  %v2044_v35 = vadd.f32 %v2019_v25, %v1795_v19  ;;  %v3169_v19 = vsel %vm8557_vm15, %v3167_v31, %v3168_v36  ;;  %v3403_v3 = vrot.slane %v11286_v30, 5  ;;  %v2970_v31 = vrot.slane %v2968_v42, 6 }
 0x1a0   : > { %v2538_v52 = vpop.f32.mrf.mxu0  ;;  %v9457_v36 = vshrl.u32 %v9449_v21, 16  ;;  %11391 = vst [vmem:[#allocation22_spill] sm:$0xff] %v9460_v0  ;;  %v3396_v1 = vsel %vm8027_vm3, %v3394_v27, %v3395_v53  ;;  %v3172_v27 = vrot.slane %v9429_v7, 7 }
 0x1a1   : > { %v3404_v30 = vsel %vm8027_vm3, %v3399_v11, %v3403_v3  ;;  %v2971_v39 = vor.u32 %v2970_v31, %v2967_v59  ;;  %v2963_v59 = vrot.slane %v2962_v41, 4  ;;  %v7763_v41 = vld [vmem:[%s11247_s1 + $0x128] sm:$0xff] }
 0x1a2   : > { %v2341_v50 = vpop.f32.mrf.mxu3  ;;  %v1775_v33 = vpop.f32.mrf.mxu1  ;;  %v2977_v13 = vrot.slane %v9457_v36, 5  ;;  %v3437_v3 = vunpack.c.l.b16 %v3404_v30  ;;  %v3174_v7 = vrot.slane %v3172_v27, 4  ;;  %4858 = vmatpush.bf16.msrb.mxu2 %v7763_v41 }
 0x1a3   : > { %7265 = vmatmul.msk.bf16.gmra.mxu0 %vm533_vm2, %v3445_v2  ;;  %v2366_v25 = vadd.f32 %v2341_v50, %v2044_v35  ;;  %v1797_v49 = vadd.f32 %v1775_v33, %v9036_v48  ;;  %v3194_v2 = vunpack.c.l.b16 %v3166_v12  ;;  %v3195_v35 = vunpack.c.l.b16 %v3169_v19 }
 0x1a4   : > { %v3010_v48 = vpack.c.b16 %v3001_v17, %v3000_v55  ;;  %v3406_v12 = vrot.slane %v2968_v42, 5  ;;  %v3411_v55 = vrot.slane %v9457_v36, 4  ;;  %v3436_v17 = vunpack.c.l.b16 %v3396_v1 }
 0x1a5   : > { %7198 = vmatmul.msk.bf16.gmra.mxu1 %vm533_vm2, %v7742_v29  ;;  %v9463_v54 = vadd.f32 %v2538_v52, %v2366_v25  ;;  %v2980_v52 = vrot.slane %v9460_v0, 6  ;;  %v3405_v29 = vrot.slane %v9440_v63, 4  ;;  %v3204_v53 = vpack.c.b16 %v3195_v35, %v3194_v2  ;;  %v9476_v25 = vld [vmem:[%s8001_s13 + $0x14c] sm:$0xf] }
 0x1a6   : > { %v2021_v18 = vpop.f32.mrf.mxu2  ;;  %v2973_v42 = vrot.slane %v2971_v39, 4  ;;  %v11291_v35 = vshll.u32 %v9476_v25, 16  ;;  %v3175_v63 = vrot.slane %v9449_v21, 7  ;;  %v7743_v21 = vld [vmem:[%s8001_s13 + $0x140] sm:$0xff] }
 0x1a7   : > { %v2045_v50 = vadd.f32 %v2021_v18, %v1796_v14  ;;  %v3409_v14 = vrot.slane %v9460_v0, 5  ;;  %v2981_v31 = vor.u32 %v2980_v52, %v2977_v13  ;;  %v7227_v18 = vrot.slane %v9422_v24, 11 }
 0x1a8   : > { %v2540_v33 = vpop.f32.mrf.mxu0  ;;  %v3407_v0 = vor.u32 %v3406_v12, %v3405_v29 }
 0x1a9   : > { %v3412_v2 = vor.u32 %v3411_v55, %v3409_v14  ;;  %v2982_v24 = vsel %vm8180_vm9, %v2973_v42, %v2981_v31 }
 0x1aa   : > { %v2343_v19 = vpop.f32.mrf.mxu3  ;;  %v1777_v16 = vpop.f32.mrf.mxu1  ;;  %v3408_v52 = vrot.slane %v3407_v0, 4 }
 0x1ab   : > { %v2367_v11 = vadd.f32 %v2343_v19, %v2045_v50  ;;  %7218 = vmatmul.msk.bf16.gmra.mxu2 %vm533_vm2, %v3010_v48  ;;  %v1798_v51 = vadd.f32 %v1777_v16, %v9070_v46  ;;  %v3446_v50 = vpack.c.b16 %v3437_v3, %v3436_v17  ;;  %v2972_v46 = vsel %vm8180_vm9, %v2963_v59, %v2971_v39  ;;  %v9501_v17 = vld [vmem:[%s8001_s13 + $0xbc] sm:$0xf] }
 0x1ac   : > { %v3173_v48 = vsel %vm8557_vm15, %v7227_v18, %v3172_v27  ;;  %v3413_v29 = vrot.slane %v3412_v2, 4  ;;  %v3002_v19 = vunpack.c.l.b16 %v2972_v46  ;;  %v3559_v16 = vrot.slane %v9501_v17, 6  ;;  %v7765_v59 = vld [vmem:[%s11247_s1 + $0x138] sm:$0xff] }
 0x1ad   : > { %v9496_v12 = vadd.f32 %v2540_v33, %v2367_v11  ;;  %v3003_v3 = vunpack.c.l.b16 %v2982_v24  ;;  %v7838_v33 = vld [vmem:[%s8001_s13 + $0xc0] sm:$0xf]  ;;  %v3196_v42 = vunpack.c.l.b16 %v3173_v48  ;;  %v3410_v18 = vsel %vm8027_vm3, %v3408_v52, %v3409_v14  ;;  %5248 = vmatpush.bf16.msrb.mxu3 %v7765_v59  ;;  %v7767_v14 = vld [vmem:[%s11247_s1 + $0x148] sm:$0xff] }
 0x1ae   : > { %v2024_v1 = vpop.f32.mrf.mxu2  ;;  %v3749_v11 = vshrl.u32 %v7838_v33, 16  ;;  %v3562_v46 = vrot.slane %v7838_v33, 6  ;;  %v3745_v24 = vrot.slane %v9009_v8, 7  ;;  %5490 = vmatpush.bf16.msrb.mxu0 %v7767_v14 }
 0x1af   : > { %7246 = vmatmul.msk.bf16.gmra.mxu3 %vm533_vm2, %v3204_v53  ;;  %v2046_v30 = vadd.f32 %v2024_v1, %v1797_v49  ;;  %v3417_v49 = vrot.slane %v11291_v35, 5  ;;  %v3176_v53 = vsel %vm8557_vm15, %v3174_v7, %v3175_v63  ;;  %v7761_v63 = vld [vmem:[%s11247_s1 + $0x118] sm:$0xff]  ;;  %v3011_v41 = vpack.c.b16 %v3003_v3, %v3002_v19  ;;  %v7112_v3 = vld [vmem:[%s8001_s13 + $0xc4] sm:$0x1] }
 0x1b0   : > { %v2543_v13 = vpop.f32.mrf.mxu0  ;;  %v3197_v31 = vunpack.c.l.b16 %v3176_v53  ;;  %v7839_v7 = vld [vmem:[%s8001_s13 + $0xb8] sm:$0xf]  ;;  %4664 = vmatpush.bf16.msrb.mxu1 %v7761_v63  ;;  %v7296_v19 = vrot.slane %v8997_v40, 11  ;;  %v3748_v59 = vrot.slane %v3745_v24, 4  ;;  %v11392_v63 = vshll.u32 %v9051_v20, 16 }
 0x1b2   : > { %v2346_v39 = vpop.f32.mrf.mxu3  ;;  %v1780_v55 = vpop.f32.mrf.mxu1  ;;  %v3205_v52 = vpack.c.b16 %v3197_v31, %v3196_v42  ;;  %v9538_v31 = vld [vmem:[%s8001_s13 + $0xf4] sm:$0xf] }
 0x1b3   : > { %7266 = vmatmul.msk.bf16.gmra.mxu0 %vm533_vm2, %v3446_v50  ;;  %v2368_v0 = vadd.f32 %v2346_v39, %v2046_v30  ;;  %v1799_v27 = vadd.f32 %v1780_v55, %v9097_v57  ;;  %v3418_v57 = vsel %vm8027_vm3, %v3413_v29, %v3417_v49  ;;  %v7268_v50 = vrot.slane %v7839_v7, 10 }
 0x1b4   : > { %v3561_v30 = vrot.slane %v3559_v16, 4  ;;  %v3439_v29 = vunpack.c.l.b16 %v3418_v57  ;;  %v3971_v49 = vrot.slane %v7838_v33, 5  ;;  %v3974_v57 = vrot.slane %v7112_v3, 5 }
 0x1b5   : > { %7199 = vmatmul.msk.bf16.gmra.mxu1 %vm533_vm2, %v7743_v21  ;;  %v9518_v2 = vadd.f32 %v2543_v13, %v2368_v0  ;;  %v3751_v21 = vrot.slane %v3749_v11, 7  ;;  %v3438_v13 = vunpack.c.l.b16 %v3410_v18  ;;  %v3560_v8 = vsel %vm8605_vm4, %v7268_v50, %v3559_v16 }
 0x1b6   : > { %v2026_v1 = vpop.f32.mrf.mxu2  ;;  %v3746_v0 = vor.u32 %v3745_v24, %v9016_v10  ;;  %v7324_v16 = vrot.slane %v9501_v17, 9  ;;  %v3618_v40 = vunpack.c.l.b16 %v3560_v8  ;;  %v3973_v10 = vrot.slane %v3971_v49, 4  ;;  %v7354_v17 = vld [vmem:[%s8001_s13 + $0xf0] sm:$0xf] }
 0x1b7   : > { %v2047_v48 = vadd.f32 %v2026_v1, %v1798_v51  ;;  %v3563_v51 = vsel %vm8605_vm4, %v3561_v30, %v3562_v46  ;;  %v3752_v42 = vor.u32 %v3751_v21, %v11392_v63  ;;  %v3447_v1 = vpack.c.b16 %v3439_v29, %v3438_v13 }
 0x1b8   : > { %v2545_v39 = vpop.f32.mrf.mxu0  ;;  %v3619_v18 = vunpack.c.l.b16 %v3563_v51  ;;  %v4217_v30 = vrot.slane %v9538_v31, 7  ;;  %v3975_v14 = vsel %vm8143_vm6, %v3973_v10, %v3974_v57  ;;  %v7386_v51 = vrot.slane %v7354_v17, 11 }
 0x1b9   : > { %v3753_v20 = vsel %vm8543_vm14, %v3748_v59, %v3752_v42  ;;  %v4031_v63 = vunpack.c.l.b16 %v3975_v14  ;;  %v7841_v42 = vld [vmem:[%s8001_s13 + $0xd4] sm:$0xf] }
 0x1ba   : > { %v2348_v55 = vpop.f32.mrf.mxu3  ;;  %v1782_v53 = vpop.f32.mrf.mxu1  ;;  %v3634_v21 = vpack.c.b16 %v3619_v18, %v3618_v40  ;;  %v3837_v8 = vunpack.c.l.b16 %v3753_v20  ;;  %v3569_v18 = vrot.slane %v7841_v42, 6 }
 0x1bb   : > { %v2369_v11 = vadd.f32 %v2348_v55, %v2047_v48  ;;  %7219 = vmatmul.msk.bf16.gmra.mxu2 %vm533_vm2, %v3011_v41  ;;  %v1800_v33 = vadd.f32 %v1782_v53, %v9135_v22  ;;  %v3747_v22 = vsel %vm8543_vm14, %v7296_v19, %v3746_v0  ;;  %v3972_v48 = vsel %vm8143_vm6, %v7324_v16, %v3971_v49  ;;  %v9550_v41 = vld [vmem:[%s8001_s13 + $0xf8] sm:$0xf] }
 0x1bc   : > { %v3836_v53 = vunpack.c.l.b16 %v3747_v22  ;;  %v4219_v0 = vrot.slane %v4217_v30, 4  ;;  %v4220_v3 = vrot.slane %v9550_v41, 7  ;;  %v4030_v59 = vunpack.c.l.b16 %v3972_v48 }
 0x1bd   : > { %v9558_v13 = vadd.f32 %v2545_v39, %v2369_v11  ;;  %v3760_v16 = vshrl.u32 %v7841_v42, 16  ;;  %v7842_v39 = vld [vmem:[%s8001_s13 + $0xcc] sm:$0xf]  ;;  %v3756_v22 = vrot.slane %v9089_v38, 7 }
 0x1be   : > { %v2029_v7 = vpop.f32.mrf.mxu2  ;;  %v7269_v11 = vrot.slane %v7842_v39, 10  ;;  %v4046_v48 = vpack.c.b16 %v4031_v63, %v4030_v59  ;;  %v11394_v63 = vshll.u32 %v9110_v34, 16 }
 0x1bf   : > { %7247 = vmatmul.msk.bf16.gmra.mxu3 %vm533_vm2, %v3205_v52  ;;  %v2048_v50 = vadd.f32 %v2029_v7, %v1799_v27  ;;  %v9555_v27 = vld [vmem:[%s8001_s13 + $0xd0] sm:$0xf]  ;;  %v3762_v17 = vrot.slane %v3760_v16, 7 }
 0x1c0   : > { %v2548_v46 = vpop.f32.mrf.mxu0  ;;  %v3566_v52 = vrot.slane %v9555_v27, 6 }
 0x1c1   : > { %v3763_v16 = vor.u32 %v3762_v17, %v11394_v63 }
 0x1c2   : > { %v2351_v29 = vpop.f32.mrf.mxu3  ;;  %v2703_v55 = vpop.f32.mrf.mxu1  ;;  %v3568_v40 = vrot.slane %v3566_v52, 4 }
 0x1c3   : > { %7267 = vmatmul.msk.bf16.gmra.mxu0 %vm533_vm2, %v3447_v1  ;;  %v2370_v49 = vadd.f32 %v2351_v29, %v2048_v50  ;;  %v2743_v19 = vadd.f32 %v2703_v55, %v9160_v43  ;;  %v3852_v1 = vpack.c.b16 %v3837_v8, %v3836_v53  ;;  %v4218_v43 = vsel %vm8557_vm15, %v7386_v51, %v4217_v30  ;;  %v9579_v8 = vld [vmem:[%s8001_s13 + $0x108] sm:$0xf] }
 0x1c4   : > { %v4221_v50 = vsel %vm8557_vm15, %v4219_v0, %v4220_v3  ;;  %v7297_v30 = vrot.slane %v9078_v15, 11  ;;  %v3978_v53 = vrot.slane %v7841_v42, 5  ;;  %v7117_v0 = vld [vmem:[%s8001_s13 + $0xd8] sm:$0x1]  ;;  %v7325_v15 = vrot.slane %v9555_v27, 9 }
 0x1c5   : > { %7288 = vmatmul.msk.bf16.vlgmr.msra.gmra.mxu1 %vm533_vm2, %v3634_v21  ;;  %v9566_v10 = vadd.f32 %v2548_v46, %v2370_v49  ;;  %v3567_v46 = vsel %vm8605_vm4, %v7269_v11, %v3566_v52  ;;  %v3570_v21 = vsel %vm8605_vm4, %v3568_v40, %v3569_v18  ;;  %v4277_v29 = vunpack.c.l.b16 %v4221_v50  ;;  %v7358_v18 = vld [vmem:[%s8001_s13 + $0x104] sm:$0xf] }
 0x1c6   : > { %v2031_v57 = vpop.f32.mrf.mxu2  ;;  %v3757_v52 = vor.u32 %v3756_v22, %v9092_v60  ;;  %v3759_v49 = vrot.slane %v3756_v22, 4  ;;  %v3620_v3 = vunpack.c.l.b16 %v3567_v46  ;;  %v3621_v59 = vunpack.c.l.b16 %v3570_v21 }
 0x1c7   : > { %v2049_v7 = vadd.f32 %v2031_v57, %v1800_v33  ;;  %v4276_v33 = vunpack.c.l.b16 %v4218_v43  ;;  %v4224_v42 = vrot.slane %v9579_v8, 7  ;;  %v3980_v11 = vrot.slane %v3978_v53, 4  ;;  %v9591_v57 = vld [vmem:[%s8001_s13 + $0x10c] sm:$0xf] }
 0x1c8   : > { %v2550_v20 = vpop.f32.mrf.mxu0  ;;  %v3981_v40 = vrot.slane %v7117_v0, 5  ;;  %v3764_v27 = vsel %vm8543_vm14, %v3759_v49, %v3763_v16  ;;  %v3979_v43 = vsel %vm8143_vm6, %v7325_v15, %v3978_v53  ;;  %v7387_v50 = vrot.slane %v7358_v18, 11  ;;  %v7845_v16 = vld [vmem:[%s8001_s13 + $0xe0] sm:$0xf] }
 0x1c9   : > { %v4292_v60 = vpack.c.b16 %v4277_v29, %v4276_v33  ;;  %v4226_v22 = vrot.slane %v4224_v42, 4  ;;  %v4227_v17 = vrot.slane %v9591_v57, 7  ;;  %v9606_v33 = vld [vmem:[%s8001_s13 + $0xe4] sm:$0xf]  ;;  %v3839_v53 = vunpack.c.l.b16 %v3764_v27 }
 0x1ca   : > { %v2353_v14 = vpop.f32.mrf.mxu3  ;;  %v2705_v55 = vpop.f32.mrf.mxu1  ;;  %v3573_v29 = vrot.slane %v9606_v33, 6  ;;  %v4225_v0 = vsel %vm8557_vm15, %v7387_v50, %v4224_v42  ;;  %v7270_v15 = vrot.slane %v7845_v16, 10  ;;  %v7326_v16 = vrot.slane %v9606_v33, 9 }
 0x1cb   : > { %v2371_v38 = vadd.f32 %v2353_v14, %v2049_v7  ;;  %7316 = vmatmul.msk.bf16.vlgmr.msra.gmra.mxu2 %vm533_vm2, %v3852_v1  ;;  %v2744_v51 = vadd.f32 %v2705_v55, %v9189_v58  ;;  %v3758_v1 = vsel %vm8543_vm14, %v7297_v30, %v3757_v52  ;;  %v3635_v7 = vpack.c.b16 %v3621_v59, %v3620_v3  ;;  %v7844_v52 = vld [vmem:[%s8001_s13 + $0xe8] sm:$0xf] }
 0x1cc   : > { %v3838_v21 = vunpack.c.l.b16 %v3758_v1  ;;  %v3982_v14 = vsel %vm8143_vm6, %v3980_v11, %v3981_v40  ;;  %v4228_v3 = vsel %vm8557_vm15, %v4226_v22, %v4227_v17  ;;  %v3767_v11 = vrot.slane %v9148_v9, 7  ;;  %v11395_v17 = vld [vmem:[#allocation4_spill] sm:$0xff] }
 0x1cd   : > { %v4033_v49 = vunpack.c.l.b16 %v3982_v14  ;;  %v4278_v42 = vunpack.c.l.b16 %v4225_v0  ;;  %v3985_v27 = vrot.slane %v7844_v52, 5  ;;  %v3574_v50 = vsel %vm8605_vm4, %v7270_v15, %v3573_v29 }
 0x1ce   : > { %v3057_v39 = vpop.f32.mrf.mxu2  ;;  %v3853_v18 = vpack.c.b16 %v3839_v53, %v3838_v21  ;;  %v7298_v9 = vrot.slane %v11395_v17, 11  ;;  %v11397_v21 = vld [vmem:[#allocation9_spill] sm:$0xff]  ;;  %v11398_v53 = vld [vmem:[#allocation6_spill] sm:$0xff] }
 0x1cf   : > { %7344 = vmatmul.msk.bf16.vlgmr.msra.gmra.mxu3 %vm533_vm2, %v4046_v48  ;;  %v3097_v58 = vadd.f32 %v3057_v39, %v2743_v19  ;;  %v9601_v48 = vadd.f32 %v2550_v20, %v2371_v38  ;;  %v3771_v20 = vshrl.u32 %v7844_v52, 16  ;;  %v4032_v38 = vunpack.c.l.b16 %v3979_v43  ;;  %v9642_v17 = vld [vmem:[%s8001_s13 + $0xf8] sm:$0xf] }
 0x1d0   : > { %v3493_v34 = vpop.f32.mrf.mxu0  ;;  %v3575_v39 = vrot.slane %v3573_v29, 4  ;;  %v7363_v29 = vld [vmem:[%s8001_s13 + $0x11c] sm:$0xf]  ;;  %v3987_v15 = vrot.slane %v3985_v27, 4  ;;  %v3580_v33 = vrot.slane %v9642_v17, 6 }
 0x1d1   : > { %v4047_v1 = vpack.c.b16 %v4033_v49, %v4032_v38  ;;  %v7122_v38 = vld [vmem:[%s8001_s13 + $0xec] sm:$0x1]  ;;  %v3622_v49 = vunpack.c.l.b16 %v3574_v50 }
 0x1d2   : > { %v3251_v46 = vpop.f32.mrf.mxu3  ;;  %v2708_v19 = vpop.f32.mrf.mxu1 }
 0x1d3   : > { %7406 = vmatmul.msk.bf16.vlgmr.msra.gmra.mxu0 %vm533_vm2, %v4292_v60  ;;  %v3291_v55 = vadd.f32 %v3251_v46, %v3097_v58  ;;  %v2745_v30 = vadd.f32 %v2708_v19, %v9215_v5  ;;  %v3576_v5 = vrot.slane %v7844_v52, 6  ;;  %v3773_v60 = vrot.slane %v3771_v20, 7 }
 0x1d4   : > { %v11399_v52 = vshll.u32 %v11398_v53, 16 }
 0x1d5   : > { %7289 = vmatmul.msk.bf16.gmra.mxu1 %vm533_vm2, %v3635_v7  ;;  %v9617_v59 = vadd.f32 %v3493_v34, %v3291_v55  ;;  %v4279_v7 = vunpack.c.l.b16 %v4228_v3  ;;  %v3577_v22 = vsel %vm8605_vm4, %v3575_v39, %v3576_v5  ;;  %v3770_v55 = vrot.slane %v3767_v11, 4 }
 0x1d6   : > { %v3059_v63 = vpop.f32.mrf.mxu2  ;;  %v3774_v20 = vor.u32 %v3773_v60, %v11399_v52  ;;  %v3623_v0 = vunpack.c.l.b16 %v3577_v22  ;;  %v3988_v39 = vrot.slane %v7122_v38, 5  ;;  %v4231_v60 = vrot.slane %v7363_v29, 7 }
 0x1d7   : > { %v3098_v40 = vadd.f32 %v3059_v63, %v2744_v51  ;;  %v11396_v51 = vld [vmem:[#allocation5_spill] sm:$0xff]  ;;  %v4293_v5 = vpack.c.b16 %v4279_v7, %v4278_v42  ;;  %v3986_v7 = vsel %vm8143_vm6, %v7326_v16, %v3985_v27  ;;  %v3582_v27 = vrot.slane %v3580_v33, 4 }
 0x1d8   : > { %v3495_v58 = vpop.f32.mrf.mxu0  ;;  %v3768_v46 = vor.u32 %v3767_v11, %v11396_v51  ;;  %v3636_v50 = vpack.c.b16 %v3623_v0, %v3622_v49  ;;  %v3989_v51 = vsel %vm8143_vm6, %v3987_v15, %v3988_v39  ;;  %v4233_v53 = vrot.slane %v4231_v60, 4 }
 0x1da   : > { %v3253_v43 = vpop.f32.mrf.mxu3  ;;  %v2710_v34 = vpop.f32.mrf.mxu1  ;;  %v3769_v63 = vsel %vm8543_vm14, %v7298_v9, %v3768_v46 }
 0x1db   : > { %v3292_v19 = vadd.f32 %v3253_v43, %v3098_v40  ;;  %7317 = vmatmul.msk.bf16.gmra.mxu2 %vm533_vm2, %v3853_v18  ;;  %v2746_v14 = vadd.f32 %v2710_v34, %v11397_v21  ;;  %v3775_v40 = vsel %vm8543_vm14, %v3770_v55, %v3774_v20  ;;  %v7362_v18 = vld [vmem:[%s8001_s13 + $0x118] sm:$0xf]  ;;  %v7364_v34 = vld [vmem:[%s8001_s13 + $0x120] sm:$0xf]  ;;  %v3840_v22 = vunpack.c.l.b16 %v3769_v63  ;;  %v9654_v20 = vld [vmem:[%s8001_s13 + $0xfc] sm:$0xf] }
 0x1dc   : > { %v7388_v46 = vrot.slane %v7362_v18, 11  ;;  %v4234_v52 = vrot.slane %v7364_v34, 7  ;;  %v3583_v29 = vrot.slane %v9654_v20, 6  ;;  %v4034_v63 = vunpack.c.l.b16 %v3986_v7 }
 0x1dd   : > { %v9645_v9 = vadd.f32 %v3495_v58, %v3292_v19  ;;  %v3782_v58 = vshrl.u32 %v9654_v20, 16  ;;  %v7848_v19 = vld [vmem:[%s8001_s13 + $0xf4] sm:$0xf] }
 0x1de   : > { %v3062_v3 = vpop.f32.mrf.mxu2  ;;  %v7271_v38 = vrot.slane %v7848_v19, 10  ;;  %v4232_v15 = vsel %vm8557_vm15, %v7388_v46, %v4231_v60  ;;  %v4235_v39 = vsel %vm8557_vm15, %v4233_v53, %v4234_v52  ;;  %v3584_v34 = vsel %vm8605_vm4, %v3582_v27, %v3583_v29  ;;  %v7127_v29 = vld [vmem:[%s8001_s13 + $0x100] sm:$0x1] }
 0x1df   : > { %7345 = vmatmul.msk.bf16.gmra.mxu3 %vm533_vm2, %v4047_v1  ;;  %v3099_v11 = vadd.f32 %v3062_v3, %v2745_v30  ;;  %v3841_v30 = vunpack.c.l.b16 %v3775_v40  ;;  %v3784_v18 = vrot.slane %v3782_v58, 7  ;;  %v3625_v58 = vunpack.c.l.b16 %v3584_v34 }
 0x1e0   : > { %v3498_v43 = vpop.f32.mrf.mxu0 }
 0x1e1   : > { %v3854_v3 = vpack.c.b16 %v3841_v30, %v3840_v22  ;;  %v7367_v30 = vld [vmem:[%s8001_s13 + $0x130] sm:$0xf] }
 0x1e2   : > { %v3256_v1 = vpop.f32.mrf.mxu3  ;;  %v2713_v42 = vpop.f32.mrf.mxu1 }
 0x1e3   : > { %7407 = vmatmul.msk.bf16.gmra.mxu0 %vm533_vm2, %v4293_v5  ;;  %v3293_v21 = vadd.f32 %v3256_v1, %v3099_v11  ;;  %v2747_v55 = vadd.f32 %v2713_v42, %v9283_v23  ;;  %v4035_v23 = vunpack.c.l.b16 %v3989_v51  ;;  %v11400_v5 = vld [vmem:[#allocation8_spill] sm:$0xff]  ;;  %v4281_v1 = vunpack.c.l.b16 %v4235_v39 }
 0x1e4   : > { %v3778_v11 = vrot.slane %v11400_v5, 7  ;;  %v3992_v42 = vrot.slane %v9654_v20, 5  ;;  %v7366_v20 = vld [vmem:[%s8001_s13 + $0x12c] sm:$0xf] }
 0x1e5   : > { %7290 = vmatmul.msk.bf16.gmra.mxu1 %vm533_vm2, %v3636_v50  ;;  %v9660_v49 = vadd.f32 %v3498_v43, %v3293_v21  ;;  %v3581_v43 = vsel %vm8605_vm4, %v7271_v38, %v3580_v33  ;;  %v4048_v22 = vpack.c.b16 %v4035_v23, %v4034_v63  ;;  %v11401_v33 = vld [vmem:[#allocation13_spill] sm:$0xff]  ;;  %v11402_v21 = vld [vmem:[#allocation15_spill] sm:$0xff]  ;;  %v11403_v38 = vshll.u32 %v9238_v37, 16  ;;  %v7368_v23 = vld [vmem:[%s8001_s13 + $0x134] sm:$0xf] }
 0x1e6   : > { %v3064_v0 = vpop.f32.mrf.mxu2  ;;  %v7299_v46 = vrot.slane %v11401_v33, 11  ;;  %v3779_v53 = vor.u32 %v3778_v11, %v11402_v21  ;;  %v3624_v52 = vunpack.c.l.b16 %v3581_v43  ;;  %v3781_v19 = vrot.slane %v3778_v11, 4  ;;  %v7762_v43 = vld [vmem:[%s11247_s1 + $0x120] sm:$0xff] }
 0x1e7   : > { %v3100_v16 = vadd.f32 %v3064_v0, %v2746_v14  ;;  %v4280_v14 = vunpack.c.l.b16 %v4232_v15  ;;  %v3785_v27 = vor.u32 %v3784_v18, %v11403_v38  ;;  %v4238_v0 = vrot.slane %v7367_v30, 7  ;;  %4859 = vmatpush.bf16.msrb.mxu2 %v7762_v43  ;;  %v11405_v38 = vld [vmem:[#allocation10_spill] sm:$0xff] }
 0x1e8   : > { %v3500_v40 = vpop.f32.mrf.mxu0  ;;  %v7327_v15 = vrot.slane %v9642_v17, 9  ;;  %v3637_v5 = vpack.c.b16 %v3625_v58, %v3624_v52  ;;  %v3994_v11 = vrot.slane %v3992_v42, 4  ;;  %v3995_v18 = vrot.slane %v7127_v29, 5 }
 0x1e9   : > { %v3786_v37 = vsel %vm8543_vm14, %v3781_v19, %v3785_v27  ;;  %v7389_v34 = vrot.slane %v7366_v20, 11  ;;  %v3793_v30 = vshrl.u32 %v9301_v56, 16  ;;  %v3789_v27 = vrot.slane %v11405_v38, 7  ;;  %v7371_v38 = vld [vmem:[%s8001_s13 + $0x144] sm:$0xf] }
 0x1ea   : > { %v3258_v50 = vpop.f32.mrf.mxu3  ;;  %v2715_v60 = vpop.f32.mrf.mxu1  ;;  %v3843_v52 = vunpack.c.l.b16 %v3786_v37  ;;  %v3993_v58 = vsel %vm8143_vm6, %v7327_v15, %v3992_v42  ;;  %v3996_v19 = vsel %vm8143_vm6, %v3994_v11, %v3995_v18 }
 0x1eb   : > { %v3294_v7 = vadd.f32 %v3258_v50, %v3100_v16  ;;  %7318 = vmatmul.msk.bf16.gmra.mxu2 %vm533_vm2, %v3854_v3  ;;  %v2748_v51 = vadd.f32 %v2715_v60, %v9319_v4  ;;  %v4294_v3 = vpack.c.b16 %v4281_v1, %v4280_v14  ;;  %v3780_v16 = vsel %vm8543_vm14, %v7299_v46, %v3779_v53  ;;  %v9694_v60 = vld [vmem:[%s8001_s13 + $0x10c] sm:$0xf]  ;;  %v11404_v46 = vld [vmem:[#allocation16_spill] sm:$0xff] }
 0x1ec   : > { %v4240_v50 = vrot.slane %v4238_v0, 4  ;;  %v3587_v17 = vrot.slane %v9694_v60, 6  ;;  %v3842_v53 = vunpack.c.l.b16 %v3780_v16  ;;  %v4239_v29 = vsel %vm8557_vm15, %v7389_v34, %v4238_v0  ;;  %v7851_v16 = vld [vmem:[%s8001_s13 + $0x110] sm:$0xf]  ;;  %v11406_v34 = vld [vmem:[#allocation7_spill] sm:$0xff] }
 0x1ed   : > { %v3590_v15 = vrot.slane %v7851_v16, 6  ;;  %v3795_v37 = vrot.slane %v3793_v30, 7  ;;  %v4036_v18 = vunpack.c.l.b16 %v3993_v58  ;;  %v4037_v0 = vunpack.c.l.b16 %v3996_v19 }
 0x1ee   : > { %v3067_v63 = vpop.f32.mrf.mxu2  ;;  %v3589_v42 = vrot.slane %v3587_v17, 4  ;;  %v3855_v11 = vpack.c.b16 %v3843_v52, %v3842_v53  ;;  %v11408_v58 = vshll.u32 %v9301_v56, 16 }
 0x1ef   : > { %7346 = vmatmul.msk.bf16.gmra.mxu3 %vm533_vm2, %v4048_v22  ;;  %v3101_v4 = vadd.f32 %v3067_v63, %v2747_v55  ;;  %v4241_v22 = vrot.slane %v7368_v23, 7  ;;  %v9691_v55 = vadd.f32 %v3500_v40, %v3294_v7  ;;  %v7764_v40 = vld [vmem:[%s11247_s1 + $0x130] sm:$0xff] }
 0x1f0   : > { %v3503_v39 = vpop.f32.mrf.mxu0  ;;  %v7760_v7 = vld [vmem:[%s11247_s1 + $0x110] sm:$0xff]  ;;  %5249 = vmatpush.bf16.msrb.mxu3 %v7764_v40  ;;  %v3591_v52 = vsel %vm8605_vm4, %v3589_v42, %v3590_v15  ;;  %v3796_v19 = vor.u32 %v3795_v37, %v11408_v58  ;;  %v7370_v15 = vld [vmem:[%s8001_s13 + $0x140] sm:$0xf]  ;;  %v7372_v37 = vld [vmem:[%s8001_s13 + $0x148] sm:$0xf] }
 0x1f1   : > { %v4242_v63 = vsel %vm8557_vm15, %v4240_v50, %v4241_v22  ;;  %4665 = vmatpush.bf16.msrb.mxu1 %v7760_v7  ;;  %v7300_v50 = vrot.slane %v11406_v34, 11  ;;  %v11407_v22 = vld [vmem:[#allocation11_spill] sm:$0xff]  ;;  %v7132_v40 = vld [vmem:[%s8001_s13 + $0x114] sm:$0x1]  ;;  %v3792_v7 = vrot.slane %v3789_v27, 4  ;;  %v3627_v56 = vunpack.c.l.b16 %v3591_v52 }
 0x1f2   : > { %v3261_v14 = vpop.f32.mrf.mxu3  ;;  %v2718_v1 = vpop.f32.mrf.mxu1  ;;  %v4002_v42 = vrot.slane %v7132_v40, 5  ;;  %v7390_v40 = vrot.slane %v7370_v15, 11  ;;  %v7854_v15 = vld [vmem:[%s8001_s13 + $0x124] sm:$0xf] }
 0x1f3   : > { %7408 = vmatmul.msk.bf16.gmra.mxu0 %vm533_vm2, %v4294_v3  ;;  %v3295_v33 = vadd.f32 %v3261_v14, %v3101_v4  ;;  %v2749_v21 = vadd.f32 %v2718_v1, %v11404_v46  ;;  %v7850_v3 = vld [vmem:[%s8001_s13 + $0x108] sm:$0xf]  ;;  %v3999_v14 = vrot.slane %v7851_v16, 5  ;;  %v7766_v1 = vld [vmem:[%s11247_s1 + $0x140] sm:$0xff]  ;;  %v4283_v46 = vunpack.c.l.b16 %v4242_v63 }
 0x1f4   : > { %v7272_v4 = vrot.slane %v7850_v3, 10  ;;  %5491 = vmatpush.bf16.msrb.mxu0 %v7766_v1  ;;  %v11409_v63 = vld [vmem:[#allocation18_spill] sm:$0xff]  ;;  %v7328_v16 = vrot.slane %v9694_v60, 9 }
 0x1f5   : > { %7291 = vmatmul.msk.bf16.gmra.mxu1 %vm533_vm2, %v3637_v5  ;;  %v9716_v20 = vadd.f32 %v3503_v39, %v3295_v33  ;;  %v3790_v39 = vor.u32 %v3789_v27, %v11407_v22  ;;  %v4282_v33 = vunpack.c.l.b16 %v4239_v29  ;;  %v4049_v29 = vpack.c.b16 %v4037_v0, %v4036_v18  ;;  %v9744_v0 = vld [vmem:[%s8001_s13 + $0x120] sm:$0xf] }
 0x1f6   : > { %v3069_v23 = vpop.f32.mrf.mxu2  ;;  %v3588_v53 = vsel %vm8605_vm4, %v7272_v4, %v3587_v17  ;;  %v4001_v4 = vrot.slane %v3999_v14, 4  ;;  %v4245_v27 = vrot.slane %v7371_v38, 7  ;;  %v3797_v18 = vsel %vm8543_vm14, %v3792_v7, %v3796_v19  ;;  %v7853_v7 = vld [vmem:[%s8001_s13 + $0x11c] sm:$0xf] }
 0x1f7   : > { %v3102_v5 = vadd.f32 %v3069_v23, %v2748_v51  ;;  %v3791_v17 = vsel %vm8543_vm14, %v7300_v50, %v3790_v39  ;;  %v3626_v34 = vunpack.c.l.b16 %v3588_v53  ;;  %v4295_v22 = vpack.c.b16 %v4283_v46, %v4282_v33 }
 0x1f8   : > { %v3505_v43 = vpop.f32.mrf.mxu0  ;;  %v3594_v60 = vrot.slane %v9744_v0, 6  ;;  %v3844_v39 = vunpack.c.l.b16 %v3791_v17  ;;  %v4000_v1 = vsel %vm8143_vm6, %v7328_v16, %v3999_v14  ;;  %v4003_v33 = vsel %vm8143_vm6, %v4001_v4, %v4002_v42 }
 0x1f9   : > { %v4247_v46 = vrot.slane %v4245_v27, 4  ;;  %v3638_v52 = vpack.c.b16 %v3627_v56, %v3626_v34  ;;  %v7273_v58 = vrot.slane %v7853_v7, 10  ;;  %v3845_v14 = vunpack.c.l.b16 %v3797_v18  ;;  %v7375_v56 = vld [vmem:[%s8001_s13 + $0x158] sm:$0xf]  ;;  %v11413_v18 = vld [vmem:[#allocation3_spill] sm:$0xff] }
 0x1fa   : > { %v3263_v30 = vpop.f32.mrf.mxu3  ;;  %v2720_v51 = vpop.f32.mrf.mxu1  ;;  %v4038_v16 = vunpack.c.l.b16 %v4000_v1  ;;  %v3596_v17 = vrot.slane %v3594_v60, 4  ;;  %v4246_v34 = vsel %vm8557_vm15, %v7390_v40, %v4245_v27  ;;  %v11414_v27 = vshll.u32 %v9357_v6, 16 }
 0x1fb   : > { %v3296_v23 = vadd.f32 %v3263_v30, %v3102_v5  ;;  %7319 = vmatmul.msk.bf16.gmra.mxu2 %vm533_vm2, %v3855_v11  ;;  %v2750_v3 = vadd.f32 %v2720_v51, %v11409_v63  ;;  %v3804_v5 = vshrl.u32 %v9357_v6, 16  ;;  %v4248_v30 = vrot.slane %v7372_v37, 7  ;;  %v11410_v51 = vld [vmem:[#allocation14_spill] sm:$0xff] }
 0x1fc   : > { %v3800_v53 = vrot.slane %v11410_v51, 7  ;;  %v4039_v37 = vunpack.c.l.b16 %v4003_v33  ;;  %v4006_v51 = vrot.slane %v7854_v15, 5  ;;  %v4252_v7 = vrot.slane %v7375_v56, 7 }
 0x1fd   : > { %v3806_v19 = vrot.slane %v3804_v5, 7  ;;  %v7329_v6 = vrot.slane %v9744_v0, 9 }
 0x1fe   : > { %v3072_v11 = vpop.f32.mrf.mxu2  ;;  %v3801_v1 = vor.u32 %v3800_v53, %v11413_v18  ;;  %v7374_v18 = vld [vmem:[%s8001_s13 + $0x154] sm:$0xf]  ;;  %v4254_v0 = vrot.slane %v4252_v7, 4 }
 0x1ff   : > { %7347 = vmatmul.msk.bf16.gmra.mxu3 %vm533_vm2, %v4049_v29  ;;  %v3103_v50 = vadd.f32 %v3072_v11, %v2749_v21  ;;  %v9754_v21 = vadd.f32 %v3505_v43, %v3296_v23  ;;  %v3597_v11 = vrot.slane %v7854_v15, 6  ;;  %v4249_v43 = vsel %vm8557_vm15, %v4247_v46, %v4248_v30  ;;  %v11412_v23 = vld [vmem:[#allocation12_spill] sm:$0xff] }
 0x200   : > { %v3508_v38 = vpop.f32.mrf.mxu0  ;;  %v7301_v5 = vrot.slane %v11412_v23, 11  ;;  %v3856_v46 = vpack.c.b16 %v3845_v14, %v3844_v39  ;;  %v4284_v15 = vunpack.c.l.b16 %v4246_v34  ;;  %v7137_v23 = vld [vmem:[%s8001_s13 + $0x128] sm:$0x1]  ;;  %v3815_v39 = vshrl.u32 %v9419_v44, 16 }
 0x201   : > { %11411 = vst [vmem:[#allocation2_spill] sm:$0xff] %v9754_v21  ;;  %v3598_v30 = vsel %vm8605_vm4, %v3596_v17, %v3597_v11  ;;  %v4008_v17 = vrot.slane %v4006_v51, 4  ;;  %v7391_v34 = vrot.slane %v7374_v18, 11 }
 0x202   : > { %v3266_v29 = vpop.f32.mrf.mxu3  ;;  %v2723_v63 = vpop.f32.mrf.mxu1  ;;  %v3629_v14 = vunpack.c.l.b16 %v3598_v30 }
 0x203   : > { %7409 = vmatmul.msk.bf16.gmra.mxu0 %vm533_vm2, %v4295_v22  ;;  %v3297_v4 = vadd.f32 %v3266_v29, %v3103_v50  ;;  %v2751_v42 = vadd.f32 %v2723_v63, %v9408_v47  ;;  %v3595_v47 = vsel %vm8605_vm4, %v7273_v58, %v3594_v60  ;;  %v3803_v22 = vrot.slane %v3800_v53, 4  ;;  %v7376_v60 = vld [vmem:[%s8001_s13 + $0x15c] sm:$0xf] }
 0x204   : > { %v3807_v50 = vor.u32 %v3806_v19, %v11414_v27  ;;  %v4050_v63 = vpack.c.b16 %v4039_v37, %v4038_v16  ;;  %v3628_v58 = vunpack.c.l.b16 %v3595_v47  ;;  %v9780_v19 = vld [vmem:[%s8001_s13 + $0x134] sm:$0xf]  ;;  %v4009_v37 = vrot.slane %v7137_v23, 5 }
 0x205   : > { %7292 = vmatmul.msk.bf16.gmra.mxu1 %vm533_vm2, %v3638_v52  ;;  %v9771_v40 = vadd.f32 %v3508_v38, %v3297_v4  ;;  %v4285_v52 = vunpack.c.l.b16 %v4249_v43  ;;  %v3601_v38 = vrot.slane %v9780_v19, 6  ;;  %v4255_v56 = vrot.slane %v7376_v60, 7 }
 0x206   : > { %v3074_v33 = vpop.f32.mrf.mxu2  ;;  %v3808_v16 = vsel %vm8543_vm14, %v3803_v22, %v3807_v50  ;;  %v3604_v22 = vrot.slane %v9419_v44, 6  ;;  %v3817_v50 = vrot.slane %v3815_v39, 7  ;;  %v3639_v23 = vpack.c.b16 %v3629_v14, %v3628_v58  ;;  %v7379_v39 = vld [vmem:[%s8001_s13 + $0x16c] sm:$0xf]  ;;  %v11417_v14 = vld [vmem:[#allocation17_spill] sm:$0xff] }
 0x207   : > { %11415 = vst [vmem:[#allocation4_spill] sm:$0xff] %v9771_v40  ;;  %v3104_v29 = vadd.f32 %v3074_v33, %v2750_v3  ;;  %v3802_v3 = vsel %vm8543_vm14, %v7301_v5, %v3801_v1  ;;  %v4296_v47 = vpack.c.b16 %v4285_v52, %v4284_v15  ;;  %v11416_v33 = vld [vmem:[#allocation19_spill] sm:$0xff]  ;;  %v7856_v5 = vld [vmem:[%s8001_s13 + $0x130] sm:$0xf]  ;;  %v3603_v35 = vrot.slane %v3601_v38, 4 }
 0x208   : > { %v3510_v53 = vpop.f32.mrf.mxu0  ;;  %v3811_v30 = vrot.slane %v11416_v33, 7  ;;  %v7274_v1 = vrot.slane %v7856_v5, 10  ;;  %v3846_v18 = vunpack.c.l.b16 %v3802_v3  ;;  %v3847_v40 = vunpack.c.l.b16 %v3808_v16  ;;  %v11418_v16 = vld [vmem:[#allocation20_spill] sm:$0xff] }
 0x209   : > { %v4253_v15 = vsel %vm8557_vm15, %v7391_v34, %v4252_v7  ;;  %v4256_v52 = vsel %vm8557_vm15, %v4254_v0, %v4255_v56  ;;  %v4013_v60 = vrot.slane %v9419_v44, 5  ;;  %v7302_v3 = vrot.slane %v11417_v14, 11 }
 0x20a   : > { %v3268_v11 = vpop.f32.mrf.mxu3  ;;  %v2725_v4 = vpop.f32.mrf.mxu1  ;;  %v3602_v7 = vsel %vm8605_vm4, %v7274_v1, %v3601_v38  ;;  %v4259_v56 = vrot.slane %v7379_v39, 7  ;;  %v4287_v14 = vunpack.c.l.b16 %v4256_v52  ;;  %v7378_v38 = vld [vmem:[%s8001_s13 + $0x168] sm:$0xf]  ;;  %v7380_v1 = vld [vmem:[%s8001_s13 + $0x170] sm:$0xf] }
 0x20b   : > { %v3298_v43 = vadd.f32 %v3268_v11, %v3104_v29  ;;  %7320 = vmatmul.msk.bf16.gmra.mxu2 %vm533_vm2, %v3856_v46  ;;  %v2752_v27 = vadd.f32 %v2725_v4, %v9437_v28  ;;  %v4007_v29 = vsel %vm8143_vm6, %v7329_v6, %v4006_v51  ;;  %v4010_v28 = vsel %vm8143_vm6, %v4008_v17, %v4009_v37  ;;  %v7142_v11 = vld [vmem:[%s8001_s13 + $0x13c] sm:$0x1] }
 0x20c   : > { %v3812_v51 = vor.u32 %v3811_v30, %v11418_v16  ;;  %v3814_v6 = vrot.slane %v3811_v30, 4  ;;  %v3605_v4 = vsel %vm8605_vm4, %v3603_v35, %v3604_v22  ;;  %v11419_v37 = vshll.u32 %v9419_v44, 16 }
 0x20d   : > { %v4041_v0 = vunpack.c.l.b16 %v4010_v28  ;;  %v9814_v33 = vadd.f32 %v3510_v53, %v3298_v43  ;;  %v4015_v16 = vrot.slane %v4013_v60, 4  ;;  %v4016_v21 = vrot.slane %v7142_v11, 5 }
 0x20e   : > { %v3077_v46 = vpop.f32.mrf.mxu2  ;;  %v3818_v34 = vor.u32 %v3817_v50, %v11419_v37  ;;  %v3630_v22 = vunpack.c.l.b16 %v3602_v7  ;;  %v3857_v50 = vpack.c.b16 %v3847_v40, %v3846_v18  ;;  %v9822_v53 = vsel %vm8543_vm14, %v7302_v3, %v3812_v51 }
 0x20f   : > { %7348 = vmatmul.msk.bf16.gmra.mxu3 %vm533_vm2, %v4050_v63  ;;  %v3105_v58 = vadd.f32 %v3077_v46, %v2751_v42  ;;  %v7330_v42 = vrot.slane %v9780_v19, 9  ;;  %v4040_v63 = vunpack.c.l.b16 %v4007_v29  ;;  %v4286_v46 = vunpack.c.l.b16 %v4253_v15 }
 0x210   : > { %v3513_v17 = vpop.f32.mrf.mxu0  ;;  %v3631_v19 = vunpack.c.l.b16 %v3605_v4  ;;  %v3819_v43 = vsel %vm8543_vm14, %v3814_v6, %v3818_v34  ;;  %v4261_v28 = vrot.slane %v4259_v56, 4  ;;  %v4017_v39 = vsel %vm8143_vm6, %v4015_v16, %v4016_v21 }
 0x211   : > { %v9828_v29 = vsel %vm8143_vm6, %v7330_v42, %v4013_v60  ;;  %v4051_v18 = vpack.c.b16 %v4041_v0, %v4040_v63  ;;  %v9833_v52 = vpack.c.b16 %v4287_v14, %v4286_v46  ;;  %v3849_v51 = vunpack.c.l.b16 %v3819_v43 }
 0x212   : > { %v3271_v30 = vpop.f32.mrf.mxu3  ;;  %v2728_v5 = vpop.f32.mrf.mxu1  ;;  %v9838_v60 = vpack.c.b16 %v3631_v19, %v3630_v22  ;;  %v4042_v11 = vunpack.c.l.b16 %v9828_v29  ;;  %v3822_v4 = vrot.slane %v9457_v36, 7  ;;  %v4043_v34 = vunpack.c.l.b16 %v4017_v39  ;;  %v11420_v36 = vld [vmem:[#allocation21_spill] sm:$0xff]  ;;  %v7147_v19 = vld [vmem:[%s8001_s13 + $0x150] sm:$0x1] }
 0x213   : > { %7410 = vmatmul.msk.bf16.gmra.mxu0 %vm533_vm2, %v4296_v47  ;;  %v3299_v35 = vadd.f32 %v3271_v30, %v3105_v58  ;;  %v2753_v44 = vadd.f32 %v2728_v5, %v9463_v54  ;;  %v7392_v47 = vrot.slane %v7378_v38, 11  ;;  %v4262_v54 = vrot.slane %v7380_v1, 7  ;;  %v7858_v30 = vld [vmem:[%s8001_s13 + $0x144] sm:$0xf] }
 0x214   : > { %v3826_v58 = vshrl.u32 %v9476_v25, 16  ;;  %v4020_v42 = vrot.slane %v9476_v25, 5  ;;  %v7275_v5 = vrot.slane %v7858_v30, 10  ;;  %v3611_v14 = vrot.slane %v9476_v25, 6  ;;  %v11421_v1 = vld [vmem:[#allocation22_spill] sm:$0xff] }
 0x215   : > { %7293 = vmatmul.msk.bf16.gmra.mxu1 %vm533_vm2, %v3639_v23  ;;  %v9831_v15 = vadd.f32 %v3513_v17, %v3299_v35  ;;  %v3848_v23 = vunpack.c.l.b16 %v9822_v53  ;;  %v7857_v17 = vld [vmem:[%s8001_s13 + $0x148] sm:$0xf]  ;;  %v4260_v21 = vsel %vm8557_vm15, %v7392_v47, %v4259_v56  ;;  %v7303_v16 = vrot.slane %v11420_v36, 11 }
 0x216   : > { %v3079_v40 = vpop.f32.mrf.mxu2  ;;  %v3608_v7 = vrot.slane %v7857_v17, 6  ;;  %v3828_v37 = vrot.slane %v3826_v58, 7  ;;  %v3823_v35 = vor.u32 %v3822_v4, %v11421_v1  ;;  %v3825_v22 = vrot.slane %v3822_v4, 4  ;;  %v7382_v58 = vld [vmem:[%s8001_s13 + $0x17c] sm:$0xf] }
 0x217   : > { %v3106_v3 = vadd.f32 %v3079_v40, %v2752_v27  ;;  %v4263_v27 = vsel %vm8557_vm15, %v4261_v28, %v4262_v54  ;;  %v11422_v29 = vshll.u32 %v9476_v25, 16  ;;  %v7331_v28 = vrot.slane %v7857_v17, 9  ;;  %v7383_v54 = vld [vmem:[%s8001_s13 + $0x180] sm:$0xf] }
 0x218   : > { %v3515_v6 = vpop.f32.mrf.mxu0  ;;  %v3610_v46 = vrot.slane %v3608_v7, 4  ;;  %v3609_v53 = vsel %vm8605_vm4, %v7275_v5, %v3608_v7  ;;  %v4288_v40 = vunpack.c.l.b16 %v4260_v21  ;;  %v4289_v39 = vunpack.c.l.b16 %v4263_v27 }
 0x219   : > { %v3829_v47 = vor.u32 %v3828_v37, %v11422_v29  ;;  %v4023_v30 = vrot.slane %v7147_v19, 5  ;;  %v9872_v21 = vsel %vm8143_vm6, %v7331_v28, %v4020_v42  ;;  %v9878_v1 = vpack.c.b16 %v4043_v34, %v4042_v11  ;;  %v7464_v34 = vld [vmem:[%s8001_s13 + $0x12c] sm:$0xf] }
 0x21a   : > { %v3273_v63 = vpop.f32.mrf.mxu3  ;;  %v2730_v0 = vpop.f32.mrf.mxu1  ;;  %v3612_v43 = vsel %vm8605_vm4, %v3610_v46, %v3611_v14  ;;  %v7393_v46 = vrot.slane %v7382_v58, 11  ;;  %v4266_v14 = vrot.slane %v7383_v54, 7  ;;  %v4044_v19 = vunpack.c.l.b16 %v9872_v21 }
 0x21b   : > { %v3300_v38 = vadd.f32 %v3273_v63, %v3106_v3  ;;  %7321 = vmatmul.msk.bf16.gmra.mxu2 %vm533_vm2, %v3857_v50  ;;  %v2754_v56 = vadd.f32 %v2730_v0, %v9496_v12  ;;  %v3824_v12 = vsel %vm8543_vm14, %v7303_v16, %v3823_v35  ;;  %v4022_v50 = vrot.slane %v4020_v42, 4  ;;  %v7384_v3 = vld [vmem:[%s8001_s13 + $0x184] sm:$0xf] }
 0x21c   : > { %v3632_v63 = vunpack.c.l.b16 %v3609_v53  ;;  %v3633_v0 = vunpack.c.l.b16 %v3612_v43  ;;  %v3830_v7 = vsel %vm8543_vm14, %v3825_v22, %v3829_v47  ;;  %v3850_v17 = vunpack.c.l.b16 %v3824_v12 }
 0x21d   : > { %v3851_v37 = vunpack.c.l.b16 %v3830_v7  ;;  %v4024_v5 = vsel %vm8143_vm6, %v4022_v50, %v4023_v30  ;;  %v4269_v36 = vrot.slane %v7384_v3, 7  ;;  %v3858_v16 = vpack.c.b16 %v3849_v51, %v3848_v23  ;;  %v7466_v3 = vld [vmem:[%s8001_s13 + $0x134] sm:$0xf]  ;;  %v7357_v7 = vld [vmem:[%s8001_s13 + $0xfc] sm:$0xf] }
 0x21e   : > { %v3082_v4 = vpop.f32.mrf.mxu2  ;;  %v9884_v22 = vpack.c.b16 %v3633_v0, %v3632_v63  ;;  %v4267_v53 = vsel %vm8557_vm15, %v7393_v46, %v4266_v14  ;;  %v4268_v43 = vrot.slane %v4266_v14, 4  ;;  %v4402_v47 = vshrl.u32 %v9538_v31, 16 }
 0x21f   : > { %7349 = vmatmul.msk.bf16.gmra.mxu3 %vm533_vm2, %v4051_v18  ;;  %v3107_v25 = vadd.f32 %v3082_v4, %v2753_v44  ;;  %v9880_v44 = vpack.c.b16 %v4289_v39, %v4288_v40  ;;  %v9882_v18 = vadd.f32 %v3515_v6, %v3300_v38  ;;  %v9894_v11 = vpack.c.b16 %v3851_v37, %v3850_v17  ;;  %v9898_v38 = vld [vmem:[%s8001_s13 + $0x130] sm:$0xf] }
 0x220   : > { %v9874_v27 = vpop.f32.mrf.mxu0  ;;  %v4045_v6 = vunpack.c.l.b16 %v4024_v5  ;;  %v4270_v29 = vsel %vm8557_vm15, %v4268_v43, %v4269_v36  ;;  %v4405_v28 = vshll.u32 %v9538_v31, 16  ;;  %v4415_v54 = vshrl.u32 %v9550_v41, 16 }
 0x221   : > { %v4954_v40 = vshrl.u32 %v7464_v34, 16  ;;  %v4957_v39 = vshll.u32 %v7464_v34, 16  ;;  %v4404_v50 = vrot.slane %v4402_v47, 4  ;;  %v9910_v4 = vshrl.u32 %v9898_v38, 16 }
 0x222   : > { %v3276_v35 = vpop.f32.mrf.mxu3  ;;  %v2733_v42 = vpop.f32.mrf.mxu1  ;;  %v4407_v58 = vrot.slane %v4405_v28, 5  ;;  %v4291_v0 = vunpack.c.l.b16 %v4270_v29  ;;  %v4417_v30 = vrot.slane %v4415_v54, 4  ;;  %v4421_v37 = vshll.u32 %v7357_v7, 16 }
 0x223   : > { %7411 = vmatmul.msk.bf16.gmra.mxu0 %vm533_vm2, %v9833_v52  ;;  %v9891_v23 = vadd.f32 %v3276_v35, %v3107_v25  ;;  %v2755_v51 = vadd.f32 %v2733_v42, %v9518_v2  ;;  %v4411_v52 = vshll.u32 %v9550_v41, 16  ;;  %v4290_v2 = vunpack.c.l.b16 %v4267_v53 }
 0x224   : > { %v4956_v25 = vrot.slane %v4954_v40, 5  ;;  %v4733_v21 = vrot.slane %v9550_v41, 6  ;;  %v4959_v5 = vrot.slane %v4957_v39, 6  ;;  %v4965_v14 = vrot.slane %v9910_v4, 5 }
 0x225   : > { %7294 = vmatmul.msk.bf16.gmra.mxu1 %vm533_vm2, %v9838_v60  ;;  %v4413_v61 = vrot.slane %v4411_v52, 5  ;;  %v4408_v60 = vor.u32 %v4407_v58, %v4404_v50  ;;  %v4966_v36 = vshll.u32 %v9898_v38, 16  ;;  %v9916_v35 = vshrl.u32 %v7466_v3, 16 }
 0x226   : > { %v3084_v12 = vpop.f32.mrf.mxu2  ;;  %v4423_v43 = vrot.slane %v4421_v37, 5  ;;  %v7434_v34 = vrot.slane %v9538_v31, 10  ;;  %v4735_v29 = vrot.slane %v4733_v21, 4  ;;  %v4736_v52 = vrot.slane %v7357_v7, 6 }
 0x227   : > { %v3108_v63 = vadd.f32 %v3084_v12, %v2754_v56  ;;  %v4418_v46 = vor.u32 %v4417_v30, %v4413_v61  ;;  %v4409_v56 = vrot.slane %v4408_v60, 4  ;;  %v9921_v54 = vpack.c.b16 %v4045_v6, %v4044_v19 }
 0x228   : > { %v3520_v17 = vpop.f32.mrf.mxu0  ;;  %v4960_v40 = vor.u32 %v4959_v5, %v4956_v25  ;;  %v4968_v39 = vrot.slane %v4966_v36, 6  ;;  %v9937_v6 = vpack.c.b16 %v4291_v0, %v4290_v2  ;;  %v4975_v7 = vrot.slane %v9916_v35, 5  ;;  %v9947_v25 = vld [vmem:[%s8001_s13 + $0x138] sm:$0xf] }
 0x229   : > { %v4419_v28 = vrot.slane %v4418_v46, 4  ;;  %v4414_v38 = vsel %vm8027_vm3, %v4409_v56, %v4413_v61  ;;  %v9944_v30 = vshll.u32 %v7466_v3, 16  ;;  %v5307_v60 = vrot.slane %v9910_v4, 4 }
 0x22a   : > { %v3278_v42 = vpop.f32.mrf.mxu3  ;;  %v2735_v53 = vpop.f32.mrf.mxu1  ;;  %v9927_v31 = vunpack.c.l.b16 %v4414_v38  ;;  %v4961_v58 = vrot.slane %v4960_v40, 4  ;;  %v4969_v61 = vor.u32 %v4968_v39, %v4965_v14  ;;  %v5308_v46 = vrot.slane %v4966_v36, 5  ;;  %v7781_v40 = vld [vmem:[%s11247_s1 + $0x178] sm:$0xff] }
 0x22b   : > { %v3302_v47 = vadd.f32 %v3278_v42, %v3108_v63  ;;  %7322 = vmatmul.msk.bf16.gmra.mxu2 %vm533_vm2, %v3858_v16  ;;  %v2756_v41 = vadd.f32 %v2735_v53, %v9558_v13  ;;  %v4424_v12 = vsel %vm8027_vm3, %v4419_v28, %v4423_v43  ;;  %v9931_v16 = vsel %vm8605_vm4, %v7434_v34, %v4733_v21 }
 0x22c   : > { %v9935_v13 = vsel %vm8605_vm4, %v4735_v29, %v4736_v52  ;;  %v9939_v50 = vunpack.c.l.b16 %v4424_v12  ;;  %v4792_v0 = vunpack.c.l.b16 %v9931_v16  ;;  %v4971_v3 = vrot.slane %v4969_v61, 4  ;;  %6220 = vmatpush.bf16.msra.mxu3 %v7781_v40  ;;  %v7470_v16 = vld [vmem:[%s8001_s13 + $0x148] sm:$0xf] }
 0x22d   : > { %v4793_v21 = vunpack.c.l.b16 %v9935_v13  ;;  %v4978_v5 = vrot.slane %v9944_v30, 6  ;;  %v5311_v14 = vrot.slane %v9944_v30, 5  ;;  %v5313_v56 = vrot.slane %v9916_v35, 4 }
 0x22e   : > { %v3087_v19 = vpop.f32.mrf.mxu2  ;;  %v4614_v2 = vpack.c.b16 %v9939_v50, %v9927_v31  ;;  %v11292_v43 = vshll.u32 %v9947_v25, 16  ;;  %v9967_v34 = vadd.f32 %v9874_v27, %v9891_v23  ;;  %v9969_v29 = vadd.f32 %v3520_v17, %v3302_v47  ;;  %v7769_v27 = vld [vmem:[%s11247_s1 + $0x158] sm:$0xff] }
 0x22f   : > { %7350 = vmatmul.msk.bf16.gmra.mxu3 %vm533_vm2, %v9878_v1  ;;  %v3109_v63 = vadd.f32 %v3087_v19, %v2755_v51  ;;  %v4970_v1 = vsel %vm8180_vm9, %v4961_v58, %v4969_v61  ;;  %v7779_v51 = vld [vmem:[%s11247_s1 + $0x168] sm:$0xff]  ;;  %v4979_v52 = vor.u32 %v4978_v5, %v4975_v7  ;;  %v5309_v38 = vor.u32 %v5308_v46, %v5307_v60  ;;  %v7468_v46 = vld [vmem:[%s8001_s13 + $0x140] sm:$0xf] }
 0x230   : > { %v9950_v37 = vpop.f32.mrf.mxu0  ;;  %5898 = vmatpush.bf16.msra.mxu2 %v7779_v51  ;;  %v5314_v23 = vor.u32 %v5313_v56, %v5311_v14  ;;  %v5319_v17 = vrot.slane %v11292_v43, 5  ;;  %v4435_v12 = vshll.u32 %v9591_v57, 16  ;;  %v4439_v19 = vshrl.u32 %v9591_v57, 16  ;;  %5708 = vmatpush.bf16.msra.mxu1 %v7769_v27  ;;  %v7361_v51 = vld [vmem:[%s8001_s13 + $0x110] sm:$0xf] }
 0x231   : > { %v4980_v47 = vsel %vm8180_vm9, %v4971_v3, %v4979_v52  ;;  %v5310_v39 = vrot.slane %v5309_v38, 4  ;;  %v5182_v61 = vunpack.c.l.b16 %v4970_v1  ;;  %v7783_v52 = vld [vmem:[%s11247_s1 + $0x188] sm:$0xff]  ;;  %v4740_v27 = vrot.slane %v9591_v57, 6 }
 0x232   : > { %v3281_v42 = vpop.f32.mrf.mxu3  ;;  %v2738_v53 = vpop.f32.mrf.mxu1  ;;  %v4437_v5 = vrot.slane %v4435_v12, 5  ;;  %v4441_v3 = vrot.slane %v4439_v19, 4  ;;  %6430 = vmatpush.bf16.msra.mxu0 %v7783_v52  ;;  %v4982_v12 = vshrl.u32 %v7468_v46, 16  ;;  %v10016_v57 = vpack.c.b16 %v4793_v21, %v4792_v0 }
 0x233   : > { %7412 = vmatmul.msk.bf16.gmra.mxu0 %vm533_vm2, %v9880_v44  ;;  %v9973_v28 = vadd.f32 %v3281_v42, %v3109_v63  ;;  %v9976_v36 = vadd.f32 %v2738_v53, %v9566_v10  ;;  %v4426_v44 = vshrl.u32 %v9579_v8, 16  ;;  %v4429_v10 = vshll.u32 %v9579_v8, 16 }
 0x234   : > { %v5315_v63 = vrot.slane %v5314_v23, 4  ;;  %v5183_v53 = vunpack.c.l.b16 %v4980_v47  ;;  %v4442_v40 = vor.u32 %v4441_v3, %v4437_v5  ;;  %v7859_v47 = vld [vmem:[%s8001_s13 + $0x108] sm:$0xf]  ;;  %v4984_v3 = vrot.slane %v4982_v12, 5 }
 0x235   : > { %7295 = vmatmul.msk.bf16.gmra.mxu1 %vm533_vm2, %v9884_v22  ;;  %v4428_v7 = vrot.slane %v4426_v44, 4  ;;  %v4431_v60 = vrot.slane %v4429_v10, 5  ;;  %v5312_v22 = vsel %vm8027_vm3, %v5310_v39, %v5311_v14  ;;  %v4445_v14 = vshll.u32 %v7361_v51, 16 }
 0x236   : > { %v3089_v58 = vpop.f32.mrf.mxu2  ;;  %v5320_v56 = vsel %vm8027_vm3, %v5315_v63, %v5319_v17  ;;  %v5424_v1 = vunpack.c.l.b16 %v5312_v22  ;;  %v7435_v39 = vrot.slane %v7859_v47, 10  ;;  %v4743_v17 = vrot.slane %v7361_v51, 6 }
 0x237   : > { %v3110_v8 = vadd.f32 %v3089_v58, %v2756_v41  ;;  %v4432_v41 = vor.u32 %v4431_v60, %v4428_v7  ;;  %v5425_v38 = vunpack.c.l.b16 %v5320_v56  ;;  %v4443_v63 = vrot.slane %v4442_v40, 4  ;;  %v7469_v7 = vld [vmem:[%s8001_s13 + $0x144] sm:$0xf] }
 0x238   : > { %v9998_v42 = vpop.f32.mrf.mxu0  ;;  %v4447_v22 = vrot.slane %v4445_v14, 5  ;;  %v4742_v51 = vrot.slane %v4740_v27, 4  ;;  %v4985_v13 = vshll.u32 %v7468_v46, 16  ;;  %v10036_v56 = vshrl.u32 %v7469_v7, 16  ;;  %v7472_v46 = vld [vmem:[%s8001_s13 + $0x154] sm:$0xf] }
 0x239   : > { %v4433_v10 = vrot.slane %v4432_v41, 4  ;;  %v4994_v52 = vshll.u32 %v7469_v7, 16  ;;  %v10047_v14 = vshrl.u32 %v7470_v16, 16 }
 0x23a   : > { %v3283_v23 = vpop.f32.mrf.mxu3  ;;  %v2740_v44 = vpop.f32.mrf.mxu1  ;;  %v4448_v21 = vsel %vm8027_vm3, %v4443_v63, %v4447_v22  ;;  %v10058_v63 = vld [vmem:[%s8001_s13 + $0x14c] sm:$0xf] }
 0x23b   : > { %v10007_v19 = vadd.f32 %v3283_v23, %v3110_v8  ;;  %7323 = vmatmul.msk.bf16.gmra.mxu2 %vm533_vm2, %v9894_v11  ;;  %v2758_v58 = vadd.f32 %v2740_v44, %v9601_v48  ;;  %v4438_v60 = vsel %vm8027_vm3, %v4433_v10, %v4437_v5  ;;  %v10023_v8 = vsel %vm8605_vm4, %v7435_v39, %v4740_v27 }
 0x23c   : > { %v10025_v11 = vpack.c.b16 %v5183_v53, %v5182_v61  ;;  %v10027_v48 = vpack.c.b16 %v5425_v38, %v5424_v1  ;;  %v10034_v5 = vsel %vm8605_vm4, %v4742_v51, %v4743_v17  ;;  %v10041_v53 = vunpack.c.l.b16 %v4438_v60  ;;  %11424 = vst [vmem:[#allocation9_spill] sm:$0xff] %v10058_v63 }
 0x23d   : > { %v4987_v1 = vrot.slane %v4985_v13, 6  ;;  %v4993_v38 = vrot.slane %v10036_v56, 5  ;;  %v4996_v40 = vrot.slane %v4994_v52, 6  ;;  %v10049_v27 = vshll.u32 %v7470_v16, 16 }
 0x23e   : > { %v3092_v0 = vpop.f32.mrf.mxu2  ;;  %v10051_v23 = vunpack.c.l.b16 %v4448_v21  ;;  %v5321_v44 = vrot.slane %v10036_v56, 4  ;;  %v5003_v17 = vrot.slane %v10047_v14, 5  ;;  %v5322_v7 = vrot.slane %v4994_v52, 5 }
 0x23f   : > { %7351 = vmatmul.msk.bf16.gmra.mxu3 %vm533_vm2, %v9921_v54  ;;  %v3111_v61 = vadd.f32 %v3092_v0, %v9976_v36  ;;  %11423 = vst [vmem:[#allocation5_spill] sm:$0xff] %v10049_v27  ;;  %v4795_v54 = vunpack.c.l.b16 %v10034_v5  ;;  %v4988_v36 = vor.u32 %v4987_v1, %v4984_v3  ;;  %v4997_v39 = vor.u32 %v4996_v40, %v4993_v38 }
 0x240   : > { %v10044_v41 = vpop.f32.mrf.mxu0  ;;  %v5006_v12 = vrot.slane %v10049_v27, 6  ;;  %v5325_v16 = vrot.slane %v10049_v27, 5  ;;  %v5323_v0 = vor.u32 %v5322_v7, %v5321_v44  ;;  %v5327_v21 = vrot.slane %v10047_v14, 4 }
 0x241   : > { %v4989_v51 = vrot.slane %v4988_v36, 4  ;;  %v4999_v3 = vrot.slane %v4997_v39, 4  ;;  %v11293_v5 = vshll.u32 %v10058_v63, 16 }
 0x242   : > { %v3286_v10 = vpop.f32.mrf.mxu3  ;;  %v3687_v47 = vpop.f32.mrf.mxu1  ;;  %v5007_v13 = vor.u32 %v5006_v12, %v5003_v17  ;;  %v5324_v36 = vrot.slane %v5323_v0, 4  ;;  %v5328_v31 = vor.u32 %v5327_v21, %v5325_v16 }
 0x243   : > { %7413 = vmatmul.msk.bf16.gmra.mxu0 %vm533_vm2, %v9937_v6  ;;  %v10062_v60 = vadd.f32 %v3286_v10, %v3111_v61  ;;  %v3727_v22 = vadd.f32 %v3687_v47, %v9617_v59  ;;  %v4998_v6 = vsel %vm8180_vm9, %v4989_v51, %v4997_v39  ;;  %v7860_v59 = vld [vmem:[%s8001_s13 + $0x11c] sm:$0xf]  ;;  %v5333_v44 = vrot.slane %v11293_v5, 5  ;;  %v7365_v10 = vld [vmem:[%s8001_s13 + $0x124] sm:$0xf] }
 0x244   : > { %v4450_v52 = vshrl.u32 %v7860_v59, 16  ;;  %v4453_v61 = vshll.u32 %v7860_v59, 16  ;;  %v5008_v40 = vsel %vm8180_vm9, %v4999_v3, %v5007_v13  ;;  %v5326_v17 = vsel %vm8027_vm3, %v5324_v36, %v5325_v16  ;;  %v7861_v51 = vld [vmem:[%s8001_s13 + $0x120] sm:$0xf]  ;;  %v7473_v36 = vld [vmem:[%s8001_s13 + $0x158] sm:$0xf] }
 0x245   : > { %7426 = vmatmul.msk.bf16.vlgmr.msrb.gmra.mxu1 %vm533_vm2, %v4614_v2  ;;  %v5184_v2 = vunpack.c.l.b16 %v4998_v6  ;;  %v5329_v12 = vrot.slane %v5328_v31, 4  ;;  %v4459_v43 = vshll.u32 %v7861_v51, 16  ;;  %v5185_v3 = vunpack.c.l.b16 %v5008_v40 }
 0x246   : > { %v3094_v1 = vpop.f32.mrf.mxu2  ;;  %v4452_v47 = vrot.slane %v4450_v52, 4  ;;  %v4455_v7 = vrot.slane %v4453_v61, 5  ;;  %v5426_v13 = vunpack.c.l.b16 %v5326_v17  ;;  %v4469_v0 = vshll.u32 %v7365_v10, 16 }
 0x247   : > { %v3112_v50 = vadd.f32 %v3094_v1, %v2758_v58  ;;  %v4463_v58 = vshrl.u32 %v7861_v51, 16  ;;  %v5334_v52 = vsel %vm8027_vm3, %v5329_v12, %v5333_v44  ;;  %v4461_v5 = vrot.slane %v4459_v43, 5 }
 0x248   : > { %v10082_v39 = vpop.f32.mrf.mxu0  ;;  %v4456_v1 = vor.u32 %v4455_v7, %v4452_v47  ;;  %v7436_v38 = vrot.slane %v7860_v59, 10  ;;  %v5427_v61 = vunpack.c.l.b16 %v5334_v52  ;;  %v11425_v31 = vunpack.c.l.b16 %v10023_v8 }
 0x249   : > { %v4465_v40 = vrot.slane %v4463_v58, 4  ;;  %v4747_v47 = vrot.slane %v7861_v51, 6  ;;  %v4750_v43 = vrot.slane %v7365_v10, 6  ;;  %v4471_v12 = vrot.slane %v4469_v0, 5  ;;  %v7474_v58 = vld [vmem:[%s8001_s13 + $0x15c] sm:$0xf] }
 0x24a   : > { %v3288_v21 = vpop.f32.mrf.mxu3  ;;  %v3689_v6 = vpop.f32.mrf.mxu1  ;;  %v10098_v17 = vpack.c.b16 %v4795_v54, %v11425_v31  ;;  %v4457_v44 = vrot.slane %v4456_v1, 4  ;;  %v5013_v7 = vshll.u32 %v7472_v46, 16  ;;  %v10100_v27 = vpack.c.b16 %v5185_v3, %v5184_v2 }
 0x24b   : > { %v10090_v63 = vadd.f32 %v3288_v21, %v3112_v50  ;;  %7454 = vmatmul.msk.bf16.vlgmr.msrb.gmra.mxu2 %vm533_vm2, %v10016_v57  ;;  %v3728_v16 = vadd.f32 %v3689_v6, %v9645_v9  ;;  %v4466_v59 = vor.u32 %v4465_v40, %v4461_v5  ;;  %v5010_v50 = vshrl.u32 %v7472_v46, 16 }
 0x24c   : > { %v4462_v9 = vsel %vm8027_vm3, %v4457_v44, %v4461_v5  ;;  %v4749_v57 = vrot.slane %v4747_v47, 4  ;;  %v10105_v6 = vshrl.u32 %v7473_v36, 16  ;;  %v10109_v54 = vpack.c.b16 %v5427_v61, %v5426_v13 }
 0x24d   : > { %v4467_v10 = vrot.slane %v4466_v59, 4  ;;  %v10113_v46 = vsel %vm8605_vm4, %v7436_v38, %v4747_v47  ;;  %v10117_v51 = vunpack.c.l.b16 %v4462_v9  ;;  %v5012_v3 = vrot.slane %v5010_v50, 5 }
 0x24e   : > { %v3905_v21 = vpop.f32.mrf.mxu2  ;;  %11426 = vst [vmem:[#allocation6_spill] sm:$0xff] %v10105_v6  ;;  %v4751_v5 = vsel %vm8605_vm4, %v4749_v57, %v4750_v43  ;;  %v5015_v0 = vrot.slane %v5013_v7, 6  ;;  %v5022_v13 = vshll.u32 %v7473_v36, 16  ;;  %v10124_v52 = vshrl.u32 %v7474_v58, 16  ;;  %v10135_v36 = vld [vmem:[%s8001_s13 + $0x160] sm:$0xf] }
 0x24f   : > { %7508 = vmatmul.msk.bf16.vlgmr.msrb.gmra.mxu3 %vm533_vm2, %v10025_v11  ;;  %v3945_v8 = vadd.f32 %v3905_v21, %v3727_v22  ;;  %v4472_v11 = vsel %vm8027_vm3, %v4467_v10, %v4471_v12  ;;  %v5021_v22 = vrot.slane %v10105_v6, 5  ;;  %v4796_v61 = vunpack.c.l.b16 %v10113_v46  ;;  %11429 = vst [vmem:[#allocation15_spill] sm:$0xff] %v10135_v36 }
 0x250   : > { %v10115_v2 = vpop.f32.mrf.mxu0  ;;  %11427 = vst [vmem:[#allocation8_spill] sm:$0xff] %v10124_v52  ;;  %v4797_v40 = vunpack.c.l.b16 %v4751_v5  ;;  %v5016_v31 = vor.u32 %v5015_v0, %v5012_v3  ;;  %v10127_v44 = vshll.u32 %v7474_v58, 16  ;;  %v5024_v59 = vrot.slane %v5022_v13, 6  ;;  %v7862_v3 = vld [vmem:[%s8001_s13 + $0x130] sm:$0xf] }
 0x251   : > { %v5335_v12 = vrot.slane %v10105_v6, 4  ;;  %v10138_v50 = vunpack.c.l.b16 %v4472_v11  ;;  %v5031_v21 = vrot.slane %v10124_v52, 5  ;;  %v5336_v57 = vrot.slane %v5022_v13, 5 }
 0x252   : > { %v4099_v38 = vpop.f32.mrf.mxu3  ;;  %v3692_v1 = vpop.f32.mrf.mxu1  ;;  %11428 = vst [vmem:[#allocation13_spill] sm:$0xff] %v10127_v44  ;;  %v5017_v7 = vrot.slane %v5016_v31, 4  ;;  %v5034_v9 = vrot.slane %v10127_v44, 6  ;;  %v5339_v58 = vrot.slane %v10127_v44, 5  ;;  %v11299_v5 = vshll.u32 %v10135_v36, 16 }
 0x253   : > { %7528 = vmatmul.msk.bf16.vlgmr.msrb.gmra.mxu0 %vm533_vm2, %v10027_v48  ;;  %v10131_v47 = vadd.f32 %v4099_v38, %v3945_v8  ;;  %v3729_v43 = vadd.f32 %v3692_v1, %v9660_v49  ;;  %v11430_v48 = vpack.c.b16 %v10051_v23, %v10041_v53  ;;  %v5025_v49 = vor.u32 %v5024_v59, %v5021_v22  ;;  %v7369_v22 = vld [vmem:[%s8001_s13 + $0x138] sm:$0xf] }
 0x254   : > { %v5341_v8 = vrot.slane %v10124_v52, 4  ;;  %v5035_v46 = vor.u32 %v5034_v9, %v5031_v21  ;;  %v4474_v0 = vshrl.u32 %v7862_v3, 16  ;;  %v4477_v11 = vshll.u32 %v7862_v3, 16 }
 0x255   : > { %7427 = vmatmul.msk.bf16.gmra.mxu1 %vm533_vm2, %v11430_v48  ;;  %v5026_v53 = vsel %vm8180_vm9, %v5017_v7, %v5025_v49  ;;  %v5027_v23 = vrot.slane %v5025_v49, 4  ;;  %v5337_v1 = vor.u32 %v5336_v57, %v5335_v12  ;;  %v5347_v21 = vrot.slane %v11299_v5, 5 }
 0x256   : > { %v3907_v10 = vpop.f32.mrf.mxu2  ;;  %v5186_v31 = vunpack.c.l.b16 %v5026_v53  ;;  %v5342_v59 = vor.u32 %v5341_v8, %v5339_v58  ;;  %v4476_v9 = vrot.slane %v4474_v0, 4  ;;  %v7437_v5 = vrot.slane %v7862_v3, 10 }
 0x257   : > { %v3946_v38 = vadd.f32 %v3907_v10, %v3728_v16  ;;  %v5036_v48 = vsel %vm8180_vm9, %v5027_v23, %v5035_v46  ;;  %v5338_v44 = vrot.slane %v5337_v1, 4  ;;  %v4479_v16 = vrot.slane %v4477_v11, 5  ;;  %v7863_v10 = vld [vmem:[%s8001_s13 + $0x134] sm:$0xf]  ;;  %v7476_v11 = vld [vmem:[%s8001_s13 + $0x168] sm:$0xf] }
 0x258   : > { %v10153_v13 = vpop.f32.mrf.mxu0  ;;  %v4483_v6 = vshll.u32 %v7863_v10, 16  ;;  %v5187_v12 = vunpack.c.l.b16 %v5036_v48  ;;  %v5343_v57 = vrot.slane %v5342_v59, 4  ;;  %v4487_v52 = vshrl.u32 %v7863_v10, 16 }
 0x259   : > { %11431 = vst [vmem:[#allocation16_spill] sm:$0xff] %v10153_v13  ;;  %v4493_v13 = vshll.u32 %v7369_v22, 16  ;;  %v5340_v46 = vsel %vm8027_vm3, %v5338_v44, %v5339_v58  ;;  %v4480_v0 = vor.u32 %v4479_v16, %v4476_v9  ;;  %v10168_v23 = vpack.c.b16 %v4797_v40, %v4796_v61  ;;  %v7477_v58 = vld [vmem:[%s8001_s13 + $0x16c] sm:$0xf]  ;;  %v7478_v16 = vld [vmem:[%s8001_s13 + $0x170] sm:$0xf] }
 0x25a   : > { %v4101_v7 = vpop.f32.mrf.mxu3  ;;  %v3694_v49 = vpop.f32.mrf.mxu1  ;;  %v5348_v1 = vsel %vm8027_vm3, %v5343_v57, %v5347_v21  ;;  %v5428_v59 = vunpack.c.l.b16 %v5340_v46  ;;  %v4485_v48 = vrot.slane %v4483_v6, 5  ;;  %v4754_v36 = vrot.slane %v7863_v10, 6 }
 0x25b   : > { %v10160_v53 = vadd.f32 %v4101_v7, %v3946_v38  ;;  %7455 = vmatmul.msk.bf16.gmra.mxu2 %vm533_vm2, %v10098_v17  ;;  %v3730_v8 = vadd.f32 %v3694_v49, %v9691_v55  ;;  %v4616_v38 = vpack.c.b16 %v10138_v50, %v10117_v51  ;;  %v5429_v17 = vunpack.c.l.b16 %v5348_v1 }
 0x25c   : > { %v4481_v7 = vrot.slane %v4480_v0, 4  ;;  %v4489_v55 = vrot.slane %v4487_v52, 4  ;;  %v4757_v44 = vrot.slane %v7369_v22, 6  ;;  %v5038_v9 = vshrl.u32 %v7476_v11, 16 }
 0x25d   : > { %v10177_v40 = vpack.c.b16 %v5187_v12, %v5186_v31  ;;  %v4495_v21 = vrot.slane %v4493_v13, 5  ;;  %v10182_v51 = vpack.c.b16 %v5429_v17, %v5428_v59  ;;  %v4755_v50 = vsel %vm8605_vm4, %v7437_v5, %v4754_v36 }
 0x25e   : > { %v3910_v49 = vpop.f32.mrf.mxu2  ;;  %v4490_v6 = vor.u32 %v4489_v55, %v4485_v48  ;;  %v4486_v52 = vsel %vm8027_vm3, %v4481_v7, %v4485_v48  ;;  %v4756_v3 = vrot.slane %v4754_v36, 4  ;;  %v5040_v10 = vrot.slane %v5038_v9, 5 }
 0x25f   : > { %7509 = vmatmul.msk.bf16.gmra.mxu3 %vm533_vm2, %v10100_v27  ;;  %v3947_v61 = vadd.f32 %v3910_v49, %v3729_v43  ;;  %v5041_v27 = vshll.u32 %v7476_v11, 16  ;;  %v10188_v43 = vshrl.u32 %v7477_v58, 16  ;;  %v5050_v46 = vshll.u32 %v7477_v58, 16  ;;  %v10210_v58 = vld [vmem:[%s8001_s13 + $0x174] sm:$0xf] }
 0x260   : > { %v10180_v57 = vpop.f32.mrf.mxu0  ;;  %v4491_v22 = vrot.slane %v4490_v6, 4  ;;  %v4758_v13 = vsel %vm8605_vm4, %v4756_v3, %v4757_v44  ;;  %v10192_v0 = vshrl.u32 %v7478_v16, 16  ;;  %v10194_v1 = vshll.u32 %v7478_v16, 16  ;;  %11435 = vst [vmem:[#allocation18_spill] sm:$0xff] %v10210_v58 }
 0x261   : > { %11432 = vst [vmem:[#allocation10_spill] sm:$0xff] %v10188_v43  ;;  %v10203_v59 = vunpack.c.l.b16 %v4486_v52  ;;  %v4798_v48 = vunpack.c.l.b16 %v4755_v50  ;;  %v5043_v17 = vrot.slane %v5041_v27, 6  ;;  %v5049_v7 = vrot.slane %v10188_v43, 5 }
 0x262   : > { %v4104_v31 = vpop.f32.mrf.mxu3  ;;  %v3697_v12 = vpop.f32.mrf.mxu1  ;;  %11433 = vst [vmem:[#allocation7_spill] sm:$0xff] %v10192_v0  ;;  %v4496_v11 = vsel %vm8027_vm3, %v4491_v22, %v4495_v21  ;;  %v5052_v55 = vrot.slane %v5050_v46, 6  ;;  %v4799_v49 = vunpack.c.l.b16 %v4758_v13  ;;  %v5059_v44 = vrot.slane %v10192_v0, 5 }
 0x263   : > { %11434 = vst [vmem:[#allocation11_spill] sm:$0xff] %v10194_v1  ;;  %7529 = vmatmul.msk.bf16.gmra.mxu0 %vm533_vm2, %v10109_v54  ;;  %v10198_v36 = vadd.f32 %v4104_v31, %v3947_v61  ;;  %v3731_v5 = vadd.f32 %v3697_v12, %v9716_v20  ;;  %v5062_v54 = vrot.slane %v10194_v1, 6  ;;  %v5349_v20 = vrot.slane %v10188_v43, 4 }
 0x264   : > { %v10213_v61 = vunpack.c.l.b16 %v4496_v11  ;;  %v5044_v6 = vor.u32 %v5043_v17, %v5040_v10  ;;  %v5053_v21 = vor.u32 %v5052_v55, %v5049_v7  ;;  %v5350_v16 = vrot.slane %v5050_v46, 5  ;;  %v7864_v11 = vld [vmem:[%s8001_s13 + $0x144] sm:$0xf]  ;;  %v7865_v7 = vld [vmem:[%s8001_s13 + $0x148] sm:$0xf] }
 0x265   : > { %7428 = vmatmul.msk.bf16.gmra.mxu1 %vm533_vm2, %v4616_v38  ;;  %v5063_v50 = vor.u32 %v5062_v54, %v5059_v44  ;;  %v5353_v38 = vrot.slane %v10194_v1, 5  ;;  %v5355_v3 = vrot.slane %v10192_v0, 4  ;;  %v11305_v13 = vshll.u32 %v10210_v58, 16 }
 0x266   : > { %v3912_v9 = vpop.f32.mrf.mxu2  ;;  %v5045_v27 = vrot.slane %v5044_v6, 4  ;;  %v5055_v31 = vrot.slane %v5053_v21, 4  ;;  %v5351_v12 = vor.u32 %v5350_v16, %v5349_v20  ;;  %v4498_v10 = vshrl.u32 %v7864_v11, 16  ;;  %v11438_v16 = vld [vmem:[#allocation2_spill] sm:$0xff] }
 0x267   : > { %v3948_v52 = vadd.f32 %v3912_v9, %v3730_v8  ;;  %v5356_v43 = vor.u32 %v5355_v3, %v5353_v38  ;;  %v4501_v17 = vshll.u32 %v7864_v11, 16  ;;  %v4507_v46 = vshll.u32 %v7865_v7, 16 }
 0x268   : > { %v10217_v22 = vpop.f32.mrf.mxu0  ;;  %v5054_v44 = vsel %vm8180_vm9, %v5045_v27, %v5053_v21  ;;  %v5064_v54 = vsel %vm8180_vm9, %v5055_v31, %v5063_v50  ;;  %v5352_v9 = vrot.slane %v5351_v12, 4  ;;  %v5361_v20 = vrot.slane %v11305_v13, 5  ;;  %v7373_v21 = vld [vmem:[%s8001_s13 + $0x14c] sm:$0xf] }
 0x269   : > { %11436 = vst [vmem:[#allocation14_spill] sm:$0xff] %v10217_v22  ;;  %v10235_v1 = vpack.c.b16 %v4799_v49, %v4798_v48  ;;  %v5188_v0 = vunpack.c.l.b16 %v5054_v44  ;;  %v5357_v27 = vrot.slane %v5356_v43, 4  ;;  %v4500_v31 = vrot.slane %v4498_v10, 4  ;;  %v7480_v22 = vld [vmem:[%s8001_s13 + $0x17c] sm:$0xf] }
 0x26a   : > { %v4106_v8 = vpop.f32.mrf.mxu3  ;;  %v3699_v55 = vpop.f32.mrf.mxu1  ;;  %v5354_v50 = vsel %vm8027_vm3, %v5352_v9, %v5353_v38  ;;  %v4503_v12 = vrot.slane %v4501_v17, 5  ;;  %v5189_v58 = vunpack.c.l.b16 %v5064_v54  ;;  %v4517_v48 = vshll.u32 %v7373_v21, 16 }
 0x26b   : > { %v10228_v6 = vadd.f32 %v4106_v8, %v3948_v52  ;;  %7456 = vmatmul.msk.bf16.gmra.mxu2 %vm533_vm2, %v10168_v23  ;;  %v10233_v3 = vadd.f32 %v3699_v55, %v11438_v16  ;;  %v5430_v13 = vunpack.c.l.b16 %v5354_v50  ;;  %v4509_v52 = vrot.slane %v4507_v46, 5  ;;  %v7481_v50 = vld [vmem:[%s8001_s13 + $0x180] sm:$0xf] }
 0x26c   : > { %v4511_v8 = vshrl.u32 %v7865_v7, 16  ;;  %v5362_v23 = vsel %vm8027_vm3, %v5357_v27, %v5361_v20  ;;  %v4504_v55 = vor.u32 %v4503_v12, %v4500_v31  ;;  %v7438_v49 = vrot.slane %v7864_v11, 10  ;;  %v7778_v11 = vld [vmem:[%s11247_s1 + $0x160] sm:$0xff] }
 0x26d   : > { %11437 = vst [vmem:[#allocation12_spill] sm:$0xff] %v10228_v6  ;;  %v5431_v43 = vunpack.c.l.b16 %v5362_v23  ;;  %v4761_v17 = vrot.slane %v7865_v7, 6  ;;  %v4617_v46 = vpack.c.b16 %v10213_v61, %v10203_v59  ;;  %v4764_v9 = vrot.slane %v7373_v21, 6  ;;  %v7482_v61 = vld [vmem:[%s8001_s13 + $0x184] sm:$0xf]  ;;  %5899 = vmatpush.bf16.msra.mxu2 %v7778_v11 }
 0x26e   : > { %v3915_v6 = vpop.f32.mrf.mxu2  ;;  %v4513_v10 = vrot.slane %v4511_v8, 4  ;;  %v4505_v54 = vrot.slane %v4504_v55, 4  ;;  %v5066_v20 = vshrl.u32 %v7480_v22, 16  ;;  %v10252_v16 = vpack.c.b16 %v5189_v58, %v5188_v0  ;;  %v11439_v58 = vld [vmem:[#allocation4_spill] sm:$0xff] }
 0x26f   : > { %7510 = vmatmul.msk.bf16.gmra.mxu3 %vm533_vm2, %v10177_v40  ;;  %v3949_v38 = vadd.f32 %v3915_v6, %v3731_v5  ;;  %v4519_v5 = vrot.slane %v4517_v48, 5  ;;  %v4763_v6 = vrot.slane %v4761_v17, 4  ;;  %v10255_v31 = vpack.c.b16 %v5431_v43, %v5430_v13  ;;  %v7780_v55 = vld [vmem:[%s11247_s1 + $0x170] sm:$0xff] }
 0x270   : > { %v10245_v44 = vpop.f32.mrf.mxu0  ;;  %v4514_v40 = vor.u32 %v4513_v10, %v4509_v52  ;;  %v4762_v59 = vsel %vm8605_vm4, %v7438_v49, %v4761_v17  ;;  %v5068_v21 = vrot.slane %v5066_v20, 5  ;;  %v5069_v12 = vshll.u32 %v7480_v22, 16  ;;  %v7768_v22 = vld [vmem:[%s11247_s1 + $0x150] sm:$0xff]  ;;  %6221 = vmatpush.bf16.msra.mxu3 %v7780_v55 }
 0x271   : > { %v4510_v23 = vsel %vm8027_vm3, %v4505_v54, %v4509_v52  ;;  %v10277_v49 = vshrl.u32 %v7481_v50, 16  ;;  %v4800_v43 = vunpack.c.l.b16 %v4762_v59  ;;  %v10282_v10 = vshrl.u32 %v7482_v61, 16  ;;  %5709 = vmatpush.bf16.msra.mxu1 %v7768_v22 }
 0x272   : > { %v4109_v7 = vpop.f32.mrf.mxu3  ;;  %v3702_v27 = vpop.f32.mrf.mxu1  ;;  %v4515_v13 = vrot.slane %v4514_v40, 4  ;;  %v5071_v48 = vrot.slane %v5069_v12, 6  ;;  %v10284_v17 = vshll.u32 %v7482_v61, 16 }
 0x273   : > { %7530 = vmatmul.msk.bf16.gmra.mxu0 %vm533_vm2, %v10182_v51  ;;  %v10262_v0 = vadd.f32 %v4109_v7, %v3949_v38  ;;  %v10265_v8 = vadd.f32 %v3702_v27, %v11439_v58  ;;  %v4765_v51 = vsel %vm8605_vm4, %v4763_v6, %v4764_v9  ;;  %11440 = vst [vmem:[#allocation3_spill] sm:$0xff] %v10277_v49  ;;  %v5078_v38 = vshll.u32 %v7481_v50, 16  ;;  %v10293_v7 = vld [vmem:[%s8001_s13 + $0x188] sm:$0xf] }
 0x274   : > { %v4520_v52 = vsel %vm8027_vm3, %v4515_v13, %v4519_v5  ;;  %11441 = vst [vmem:[#allocation19_spill] sm:$0xff] %v10282_v10  ;;  %v4801_v20 = vunpack.c.l.b16 %v4765_v51  ;;  %v5072_v11 = vor.u32 %v5071_v48, %v5068_v21  ;;  %v5077_v9 = vrot.slane %v10277_v49, 5 }
 0x275   : > { %7429 = vmatmul.msk.bf16.gmra.mxu1 %vm533_vm2, %v4617_v46  ;;  %11442 = vst [vmem:[#allocation17_spill] sm:$0xff] %v10284_v17  ;;  %v5080_v40 = vrot.slane %v5078_v38, 6  ;;  %v10288_v46 = vunpack.c.l.b16 %v4510_v23  ;;  %v5087_v50 = vrot.slane %v10282_v10, 5  ;;  %v5090_v5 = vrot.slane %v10284_v17, 6 }
 0x276   : > { %v3917_v54 = vpop.f32.mrf.mxu2  ;;  %11443 = vst [vmem:[#allocation20_spill] sm:$0xff] %v10293_v7  ;;  %v10297_v59 = vunpack.c.l.b16 %v4520_v52  ;;  %v5073_v61 = vrot.slane %v5072_v11, 4  ;;  %v5363_v12 = vrot.slane %v10277_v49, 4  ;;  %v5364_v23 = vrot.slane %v5078_v38, 5 }
 0x277   : > { %v3950_v6 = vadd.f32 %v3917_v54, %v10233_v3  ;;  %v5081_v21 = vor.u32 %v5080_v40, %v5077_v9  ;;  %v7782_v3 = vld [vmem:[%s11247_s1 + $0x180] sm:$0xff]  ;;  %v5091_v58 = vor.u32 %v5090_v5, %v5087_v50  ;;  %v5367_v13 = vrot.slane %v10284_v17, 5 }
 0x278   : > { %v10295_v27 = vpop.f32.mrf.mxu0  ;;  %v5369_v55 = vrot.slane %v10282_v10, 4  ;;  %v10305_v48 = vpack.c.b16 %v4801_v20, %v4800_v43  ;;  %v11306_v11 = vshll.u32 %v10293_v7, 16  ;;  %6431 = vmatpush.bf16.msra.mxu0 %v7782_v3  ;;  %v5365_v43 = vor.u32 %v5364_v23, %v5363_v12  ;;  %v7866_v3 = vld [vmem:[%s8001_s13 + $0x158] sm:$0xf]  ;;  %v7867_v23 = vld [vmem:[%s8001_s13 + $0x15c] sm:$0xf] }
 0x279   : > { %v5082_v52 = vsel %vm8180_vm9, %v5073_v61, %v5081_v21  ;;  %v5083_v54 = vrot.slane %v5081_v21, 4  ;;  %v10321_v61 = vadd.f32 %v9998_v42, %v10007_v19  ;;  %v4618_v12 = vpack.c.b16 %v10297_v59, %v10288_v46  ;;  %v7377_v59 = vld [vmem:[%s8001_s13 + $0x160] sm:$0xf]  ;;  %v7485_v10 = vld [vmem:[%s8001_s13 + $0x194] sm:$0xf] }
 0x27a   : > { %v4111_v22 = vpop.f32.mrf.mxu3  ;;  %v3704_v51 = vpop.f32.mrf.mxu1  ;;  %v5190_v40 = vunpack.c.l.b16 %v5082_v52  ;;  %v5370_v50 = vor.u32 %v5369_v55, %v5367_v13  ;;  %v5375_v5 = vrot.slane %v11306_v11, 5  ;;  %v5366_v21 = vrot.slane %v5365_v43, 4 }
 0x27b   : > { %v10310_v9 = vadd.f32 %v4111_v22, %v3950_v6  ;;  %7457 = vmatmul.msk.bf16.gmra.mxu2 %vm533_vm2, %v10235_v1  ;;  %v3734_v38 = vadd.f32 %v3704_v51, %v9814_v33  ;;  %v5092_v20 = vsel %vm8180_vm9, %v5083_v54, %v5091_v58  ;;  %v4522_v1 = vshrl.u32 %v7866_v3, 16  ;;  %v7484_v22 = vld [vmem:[%s8001_s13 + $0x190] sm:$0xf] }
 0x27c   : > { %v5191_v6 = vunpack.c.l.b16 %v5092_v20  ;;  %v4525_v33 = vshll.u32 %v7866_v3, 16  ;;  %v5371_v58 = vrot.slane %v5370_v50, 4  ;;  %v4531_v55 = vshll.u32 %v7867_v23, 16 }
 0x27d   : > { %v4535_v52 = vshrl.u32 %v7867_v23, 16  ;;  %v5368_v19 = vsel %vm8027_vm3, %v5366_v21, %v5367_v13  ;;  %v4524_v54 = vrot.slane %v4522_v1, 4  ;;  %v10335_v43 = vadd.f32 %v9950_v37, %v9973_v28 }
 0x27e   : > { %v3920_v51 = vpop.f32.mrf.mxu2  ;;  %v5376_v46 = vsel %vm8027_vm3, %v5371_v58, %v5375_v5  ;;  %v4527_v50 = vrot.slane %v4525_v33, 5  ;;  %v4533_v11 = vrot.slane %v4531_v55, 5  ;;  %v10342_v7 = vpack.c.b16 %v5191_v6, %v5190_v40  ;;  %v7486_v58 = vld [vmem:[%s8001_s13 + $0x198] sm:$0xf] }
 0x27f   : > { %7511 = vmatmul.msk.bf16.gmra.mxu3 %vm533_vm2, %v10252_v16  ;;  %v3951_v42 = vadd.f32 %v3920_v51, %v10265_v8  ;;  %v5094_v16 = vshrl.u32 %v7484_v22, 16  ;;  %v4537_v8 = vrot.slane %v4535_v52, 4  ;;  %v4541_v13 = vshll.u32 %v7377_v59, 16 }
 0x280   : > { %v10337_v20 = vpop.f32.mrf.mxu0  ;;  %v7439_v21 = vrot.slane %v7866_v3, 10  ;;  %v5432_v37 = vunpack.c.l.b16 %v5368_v19  ;;  %v4528_v28 = vor.u32 %v4527_v50, %v4524_v54  ;;  %v4768_v17 = vrot.slane %v7867_v23, 6 }
 0x281   : > { %11444 = vst [vmem:[#allocation21_spill] sm:$0xff] %v10337_v20  ;;  %v4771_v49 = vrot.slane %v7377_v59, 6  ;;  %v5433_v40 = vunpack.c.l.b16 %v5376_v46  ;;  %v4538_v6 = vor.u32 %v4537_v8, %v4533_v11  ;;  %v4543_v52 = vrot.slane %v4541_v13, 5 }
 0x282   : > { %v4114_v1 = vpop.f32.mrf.mxu3  ;;  %v3707_v51 = vpop.f32.mrf.mxu1  ;;  %v4529_v55 = vrot.slane %v4528_v28, 4  ;;  %v4769_v3 = vsel %vm8605_vm4, %v7439_v21, %v4768_v17  ;;  %v4770_v19 = vrot.slane %v4768_v17, 4  ;;  %v5096_v54 = vrot.slane %v5094_v16, 5 }
 0x283   : > { %7531 = vmatmul.msk.bf16.gmra.mxu0 %vm533_vm2, %v10255_v31  ;;  %v10347_v5 = vadd.f32 %v4114_v1, %v3951_v42  ;;  %v3735_v33 = vadd.f32 %v3707_v51, %v9831_v15  ;;  %v4539_v23 = vrot.slane %v4538_v6, 4  ;;  %v5097_v59 = vshll.u32 %v7484_v22, 16 }
 0x284   : > { %v10354_v50 = vshrl.u32 %v7485_v10, 16  ;;  %v4534_v15 = vsel %vm8027_vm3, %v4529_v55, %v4533_v11  ;;  %v4772_v42 = vsel %vm8605_vm4, %v4770_v19, %v4771_v49  ;;  %v5106_v46 = vshll.u32 %v7485_v10, 16 }
 0x285   : > { %11445 = vst [vmem:[#allocation22_spill] sm:$0xff] %v10347_v5  ;;  %7430 = vmatmul.msk.bf16.gmra.mxu1 %vm533_vm2, %v4618_v12  ;;  %v10360_v8 = vshrl.u32 %v7486_v58, 16  ;;  %v5444_v21 = vpack.c.b16 %v5433_v40, %v5432_v37  ;;  %v4544_v17 = vsel %vm8027_vm3, %v4539_v23, %v4543_v52  ;;  %v4802_v12 = vunpack.c.l.b16 %v4769_v3  ;;  %v10374_v3 = vld [vmem:[%s8001_s13 + $0x19c] sm:$0xf] }
 0x286   : > { %11446 = vst [vmem:[#allocation2_spill] sm:$0xff] %v10354_v50  ;;  %v3922_v31 = vpop.f32.mrf.mxu2  ;;  %v10366_v16 = vunpack.c.l.b16 %v4534_v15  ;;  %v5099_v1 = vrot.slane %v5097_v59, 6  ;;  %v5105_v11 = vrot.slane %v10354_v50, 5  ;;  %v5108_v51 = vrot.slane %v5106_v46, 6 }
 0x287   : > { %11447 = vst [vmem:[#allocation4_spill] sm:$0xff] %v10360_v8  ;;  %v3952_v13 = vadd.f32 %v3922_v31, %v3734_v38  ;;  %v4803_v28 = vunpack.c.l.b16 %v4772_v42  ;;  %v5115_v49 = vrot.slane %v10360_v8, 5  ;;  %v10370_v10 = vshll.u32 %v7486_v58, 16 }
 0x288   : > { %v10364_v22 = vpop.f32.mrf.mxu0  ;;  %v5377_v38 = vrot.slane %v10354_v50, 4  ;;  %v4609_v6 = vunpack.c.l.b16 %v4544_v17  ;;  %v5100_v55 = vor.u32 %v5099_v1, %v5096_v54  ;;  %v5109_v52 = vor.u32 %v5108_v51, %v5105_v11  ;;  %11449 = vst [vmem:[#allocation24_spill] sm:$0xff] %v10374_v3 }
 0x289   : > { %11448 = vst [vmem:[#allocation23_spill] sm:$0xff] %v10370_v10  ;;  %v5378_v19 = vrot.slane %v5106_v46, 5  ;;  %v5118_v58 = vrot.slane %v10370_v10, 6  ;;  %v5381_v31 = vrot.slane %v10370_v10, 5  ;;  %v5383_v54 = vrot.slane %v10360_v8, 4 }
 0x28a   : > { %v4116_v37 = vpop.f32.mrf.mxu3  ;;  %v3709_v40 = vpop.f32.mrf.mxu1  ;;  %v5101_v15 = vrot.slane %v5100_v55, 4  ;;  %v5111_v42 = vrot.slane %v5109_v52, 4  ;;  %v10384_v17 = vpack.c.b16 %v4803_v28, %v4802_v12  ;;  %v11312_v46 = vshll.u32 %v10374_v3, 16 }
 0x28b   : > { %v10376_v23 = vadd.f32 %v4116_v37, %v3952_v13  ;;  %7458 = vmatmul.msk.bf16.gmra.mxu2 %vm533_vm2, %v10305_v48  ;;  %v3736_v59 = vadd.f32 %v3709_v40, %v9882_v18  ;;  %v5379_v50 = vor.u32 %v5378_v19, %v5377_v38  ;;  %v5119_v1 = vor.u32 %v5118_v58, %v5115_v49 }
 0x28c   : > { %v10389_v48 = vadd.f32 %v10082_v39, %v10090_v63  ;;  %v5110_v13 = vsel %vm8180_vm9, %v5101_v15, %v5109_v52  ;;  %v5384_v51 = vor.u32 %v5383_v54, %v5381_v31  ;;  %v10395_v12 = vadd.f32 %v10115_v2, %v10131_v47  ;;  %v7381_v2 = vld [vmem:[%s8001_s13 + $0x174] sm:$0xf]  ;;  %v7868_v47 = vld [vmem:[%s8001_s13 + $0x16c] sm:$0xf]  ;;  %v7869_v52 = vld [vmem:[%s8001_s13 + $0x170] sm:$0xf] }
 0x28d   : > { %v5380_v11 = vrot.slane %v5379_v50, 4  ;;  %v5120_v63 = vsel %vm8180_vm9, %v5111_v42, %v5119_v1  ;;  %v5192_v39 = vunpack.c.l.b16 %v5110_v13  ;;  %v5389_v49 = vrot.slane %v11312_v46, 5 }
 0x28e   : > { %v3925_v18 = vpop.f32.mrf.mxu2  ;;  %v5193_v50 = vunpack.c.l.b16 %v5120_v63  ;;  %v5385_v40 = vrot.slane %v5384_v51, 4  ;;  %v4546_v55 = vshrl.u32 %v7868_v47, 16  ;;  %v4555_v19 = vshll.u32 %v7869_v52, 16  ;;  %v7488_v51 = vld [vmem:[%s8001_s13 + $0x1a4] sm:$0xf] }
 0x28f   : > { %7512 = vmatmul.msk.bf16.gmra.mxu3 %vm533_vm2, %v10342_v7  ;;  %v3953_v28 = vadd.f32 %v3925_v18, %v3735_v33  ;;  %v5382_v37 = vsel %vm8027_vm3, %v5380_v11, %v5381_v31  ;;  %v4619_v7 = vpack.c.b16 %v4609_v6, %v10366_v16  ;;  %v4549_v33 = vshll.u32 %v7868_v47, 16  ;;  %v7489_v63 = vld [vmem:[%s8001_s13 + $0x1a8] sm:$0xf] }
 0x290   : > { %v10403_v38 = vpop.f32.mrf.mxu0  ;;  %v4559_v58 = vshrl.u32 %v7869_v52, 16  ;;  %v5390_v54 = vsel %vm8027_vm3, %v5385_v40, %v5389_v49  ;;  %v5434_v1 = vunpack.c.l.b16 %v5382_v37  ;;  %v4548_v18 = vrot.slane %v4546_v55, 4 }
 0x291   : > { %v4565_v31 = vshll.u32 %v7381_v2, 16  ;;  %v5203_v6 = vpack.c.b16 %v5193_v50, %v5192_v39  ;;  %v4551_v11 = vrot.slane %v4549_v33, 5  ;;  %v5435_v46 = vunpack.c.l.b16 %v5390_v54 }
 0x292   : > { %v4119_v15 = vpop.f32.mrf.mxu3  ;;  %v3712_v42 = vpop.f32.mrf.mxu1  ;;  %v4557_v3 = vrot.slane %v4555_v19, 5  ;;  %v4561_v10 = vrot.slane %v4559_v58, 4  ;;  %v7440_v8 = vrot.slane %v7868_v47, 10  ;;  %v4775_v40 = vrot.slane %v7869_v52, 6 }
 0x293   : > { %7532 = vmatmul.msk.bf16.gmra.mxu0 %vm533_vm2, %v5444_v21  ;;  %v10414_v13 = vadd.f32 %v4119_v15, %v3953_v28  ;;  %v3737_v16 = vadd.f32 %v3712_v42, %v9967_v34  ;;  %v4552_v49 = vor.u32 %v4551_v11, %v4548_v18  ;;  %v4567_v37 = vrot.slane %v4565_v31, 5 }
 0x294   : > { %v4778_v55 = vrot.slane %v7381_v2, 6  ;;  %v4562_v21 = vor.u32 %v4561_v10, %v4557_v3  ;;  %v5122_v28 = vshrl.u32 %v7488_v51, 16  ;;  %v5125_v15 = vshll.u32 %v7488_v51, 16 }
 0x295   : > { %7431 = vmatmul.msk.bf16.gmra.mxu1 %vm533_vm2, %v4619_v7  ;;  %v10420_v34 = vshrl.u32 %v7489_v63, 16  ;;  %v4553_v50 = vrot.slane %v4552_v49, 4  ;;  %v10424_v33 = vsel %vm8605_vm4, %v7440_v8, %v4775_v40  ;;  %v4777_v47 = vrot.slane %v4775_v40, 4 }
 0x296   : > { %v3927_v20 = vpop.f32.mrf.mxu2  ;;  %v5445_v7 = vpack.c.b16 %v5435_v46, %v5434_v1  ;;  %v4563_v58 = vrot.slane %v4562_v21, 4  ;;  %v5124_v52 = vrot.slane %v5122_v28, 5  ;;  %v5127_v2 = vrot.slane %v5125_v15, 6 }
 0x297   : > { %11450 = vst [vmem:[#allocation25_spill] sm:$0xff] %v10420_v34  ;;  %v3954_v39 = vadd.f32 %v3927_v20, %v3736_v59  ;;  %v4558_v10 = vsel %vm8027_vm3, %v4553_v50, %v4557_v3  ;;  %v10432_v42 = vsel %vm8605_vm4, %v4777_v47, %v4778_v55  ;;  %v7490_v20 = vld [vmem:[%s8001_s13 + $0x1ac] sm:$0xf]  ;;  %v5133_v59 = vrot.slane %v10420_v34, 5  ;;  %v10450_v50 = vld [vmem:[%s8001_s13 + $0x1b0] sm:$0xf] }
 0x298   : > { %v10426_v19 = vpop.f32.mrf.mxu0  ;;  %v5134_v54 = vshll.u32 %v7489_v63, 16  ;;  %v4568_v46 = vsel %vm8027_vm3, %v4563_v58, %v4567_v37  ;;  %v4610_v1 = vunpack.c.l.b16 %v4558_v10  ;;  %v5128_v11 = vor.u32 %v5127_v2, %v5124_v52  ;;  %11453 = vst [vmem:[#allocation28_spill] sm:$0xff] %v10450_v50 }
 0x299   : > { %v4611_v49 = vunpack.c.l.b16 %v4568_v46  ;;  %v4805_v63 = vunpack.c.l.b16 %v10432_v42  ;;  %v10445_v21 = vshrl.u32 %v7490_v20, 16  ;;  %v10447_v28 = vshll.u32 %v7490_v20, 16 }
 0x29a   : > { %v4121_v8 = vpop.f32.mrf.mxu3  ;;  %v3714_v18 = vpop.f32.mrf.mxu1  ;;  %v5136_v40 = vrot.slane %v5134_v54, 6  ;;  %v5129_v55 = vrot.slane %v5128_v11, 4  ;;  %v5392_v47 = vrot.slane %v5134_v54, 5 }
 0x29b   : > { %v10439_v51 = vadd.f32 %v4121_v8, %v3954_v39  ;;  %7459 = vmatmul.msk.bf16.gmra.mxu2 %vm533_vm2, %v10384_v17  ;;  %v3738_v3 = vadd.f32 %v3714_v18, %v9969_v29  ;;  %11451 = vst [vmem:[#allocation26_spill] sm:$0xff] %v10445_v21  ;;  %v4620_v37 = vpack.c.b16 %v4611_v49, %v4610_v1  ;;  %v5391_v39 = vrot.slane %v10420_v34, 4  ;;  %v7870_v49 = vld [vmem:[%s8001_s13 + $0x180] sm:$0xf] }
 0x29c   : > { %11452 = vst [vmem:[#allocation27_spill] sm:$0xff] %v10447_v28  ;;  %v5137_v15 = vor.u32 %v5136_v40, %v5133_v59  ;;  %v5143_v29 = vrot.slane %v10445_v21, 5  ;;  %v5146_v17 = vrot.slane %v10447_v28, 6  ;;  %v5395_v52 = vrot.slane %v10447_v28, 5  ;;  %v7871_v28 = vld [vmem:[%s8001_s13 + $0x184] sm:$0xf] }
 0x29d   : > { %v5397_v2 = vrot.slane %v10445_v21, 4  ;;  %v5393_v59 = vor.u32 %v5392_v47, %v5391_v39  ;;  %v11317_v1 = vshll.u32 %v10450_v50, 16  ;;  %v4570_v40 = vshrl.u32 %v7870_v49, 16 }
 0x29e   : > { %v3930_v58 = vpop.f32.mrf.mxu2  ;;  %v5138_v42 = vsel %vm8180_vm9, %v5129_v55, %v5137_v15  ;;  %v5139_v20 = vrot.slane %v5137_v15, 4  ;;  %v5147_v8 = vor.u32 %v5146_v17, %v5143_v29  ;;  %v4573_v31 = vshll.u32 %v7870_v49, 16 }
 0x29f   : > { %7513 = vmatmul.msk.bf16.gmra.mxu3 %vm533_vm2, %v5203_v6  ;;  %v3955_v10 = vadd.f32 %v3930_v58, %v3737_v16  ;;  %v5194_v18 = vunpack.c.l.b16 %v5138_v42  ;;  %v5398_v46 = vor.u32 %v5397_v2, %v5395_v52  ;;  %v5394_v11 = vrot.slane %v5393_v59, 4  ;;  %v7385_v59 = vld [vmem:[%s8001_s13 + $0x188] sm:$0xf] }
 0x2a0   : > { %v10460_v54 = vpop.f32.mrf.mxu0  ;;  %v4579_v6 = vshll.u32 %v7871_v28, 16  ;;  %v5148_v55 = vsel %vm8180_vm9, %v5139_v20, %v5147_v8  ;;  %v5403_v39 = vrot.slane %v11317_v1, 5  ;;  %v4583_v47 = vshrl.u32 %v7871_v28, 16 }
 0x2a1   : > { %v5399_v15 = vrot.slane %v5398_v46, 4  ;;  %v5195_v2 = vunpack.c.l.b16 %v5148_v55  ;;  %v5396_v42 = vsel %vm8027_vm3, %v5394_v11, %v5395_v52  ;;  %v4572_v46 = vrot.slane %v4570_v40, 4  ;;  %v7492_v55 = vld [vmem:[%s8001_s13 + $0x1b8] sm:$0xf] }
 0x2a2   : > { %v4124_v16 = vpop.f32.mrf.mxu3  ;;  %v3717_v58 = vpop.f32.mrf.mxu1  ;;  %v5436_v8 = vunpack.c.l.b16 %v5396_v42  ;;  %v4575_v1 = vrot.slane %v4573_v31, 5  ;;  %v4589_v52 = vshll.u32 %v7385_v59, 16  ;;  %v4782_v11 = vrot.slane %v7871_v28, 6 }
 0x2a3   : > { %7533 = vmatmul.msk.bf16.gmra.mxu0 %vm533_vm2, %v5445_v7  ;;  %v10470_v29 = vadd.f32 %v4124_v16, %v3955_v10  ;;  %v3739_v17 = vadd.f32 %v3717_v58, %v10335_v43  ;;  %v5404_v20 = vsel %vm8027_vm3, %v5399_v15, %v5403_v39  ;;  %v4581_v10 = vrot.slane %v4579_v6, 5 }
 0x2a4   : > { %v5437_v7 = vunpack.c.l.b16 %v5404_v20  ;;  %v4585_v16 = vrot.slane %v4583_v47, 4  ;;  %v10481_v43 = vadd.f32 %v10044_v41, %v10062_v60  ;;  %v4576_v58 = vor.u32 %v4575_v1, %v4572_v46 }
 0x2a5   : > { %7432 = vmatmul.msk.bf16.gmra.mxu1 %vm533_vm2, %v4620_v37  ;;  %v11454_v15 = vunpack.c.l.b16 %v10424_v33  ;;  %v7441_v31 = vrot.slane %v7870_v49, 10  ;;  %v7493_v37 = vld [vmem:[%s8001_s13 + $0x1bc] sm:$0xf]  ;;  %v5204_v6 = vpack.c.b16 %v5195_v2, %v5194_v18  ;;  %v4591_v50 = vrot.slane %v4589_v52, 5 }
 0x2a6   : > { %v3932_v34 = vpop.f32.mrf.mxu2  ;;  %v4586_v39 = vor.u32 %v4585_v16, %v4581_v10  ;;  %v5446_v47 = vpack.c.b16 %v5437_v7, %v5436_v8  ;;  %v4577_v20 = vrot.slane %v4576_v58, 4  ;;  %v4785_v60 = vrot.slane %v7385_v59, 6 }
 0x2a7   : > { %v3956_v21 = vadd.f32 %v3932_v34, %v3738_v3  ;;  %v4814_v40 = vpack.c.b16 %v4805_v63, %v11454_v15  ;;  %v5150_v1 = vshrl.u32 %v7492_v55, 16  ;;  %v5153_v46 = vshll.u32 %v7492_v55, 16  ;;  %v7494_v3 = vld [vmem:[%s8001_s13 + $0x1c0] sm:$0xf] }
 0x2a8   : > { %v10487_v42 = vpop.f32.mrf.mxu0  ;;  %v4587_v41 = vrot.slane %v4586_v39, 4  ;;  %v4582_v34 = vsel %vm8027_vm3, %v4577_v20, %v4581_v10  ;;  %v4784_v33 = vrot.slane %v4782_v11, 4  ;;  %v10492_v63 = vshrl.u32 %v7493_v37, 16  ;;  %v10510_v39 = vld [vmem:[%s8001_s13 + $0x1c4] sm:$0xf] }
 0x2a9   : > { %v5162_v49 = vshll.u32 %v7493_v37, 16  ;;  %v4783_v59 = vsel %vm8605_vm4, %v7441_v31, %v4782_v11  ;;  %v4612_v8 = vunpack.c.l.b16 %v4582_v34  ;;  %v5152_v10 = vrot.slane %v5150_v1, 5 }
 0x2aa   : > { %v4126_v28 = vpop.f32.mrf.mxu3  ;;  %v3719_v5 = vpop.f32.mrf.mxu1  ;;  %v4592_v2 = vsel %vm8027_vm3, %v4587_v41, %v4591_v50  ;;  %v5155_v58 = vrot.slane %v5153_v46, 6  ;;  %v5161_v52 = vrot.slane %v10492_v63, 5  ;;  %v10505_v15 = vshll.u32 %v7494_v3, 16 }
 0x2ab   : > { %v10494_v16 = vadd.f32 %v4126_v28, %v3956_v21  ;;  %7460 = vmatmul.msk.bf16.gmra.mxu2 %vm533_vm2, %v4814_v40  ;;  %v3740_v18 = vadd.f32 %v3719_v5, %v10321_v61  ;;  %v4613_v7 = vunpack.c.l.b16 %v4592_v2  ;;  %v5164_v55 = vrot.slane %v5162_v49, 6 }
 0x2ac   : > { %v10503_v21 = vshrl.u32 %v7494_v3, 16  ;;  %v4786_v61 = vsel %vm8605_vm4, %v4784_v33, %v4785_v60  ;;  %v4806_v5 = vunpack.c.l.b16 %v4783_v59  ;;  %v5156_v50 = vor.u32 %v5155_v58, %v5152_v10 }
 0x2ad   : > { %v5405_v11 = vrot.slane %v10492_v63, 4  ;;  %v5165_v37 = vor.u32 %v5164_v55, %v5161_v52  ;;  %v5174_v41 = vrot.slane %v10505_v15, 6  ;;  %v5406_v26 = vrot.slane %v5162_v49, 5  ;;  %v7567_v49 = vld [vmem:[%s8001_s13 + $0x16c] sm:$0xf] }
 0x2ae   : > { %v3935_v40 = vpop.f32.mrf.mxu2  ;;  %v5171_v20 = vrot.slane %v10503_v21, 5  ;;  %v5157_v46 = vrot.slane %v5156_v50, 4  ;;  %v5409_v60 = vrot.slane %v10505_v15, 5  ;;  %v5411_v28 = vrot.slane %v10503_v21, 4 }
 0x2af   : > { %7514 = vmatmul.msk.bf16.gmra.mxu3 %vm533_vm2, %v5204_v6  ;;  %v3957_v31 = vadd.f32 %v3935_v40, %v3739_v17  ;;  %v4621_v34 = vpack.c.b16 %v4613_v7, %v4612_v8  ;;  %v5167_v33 = vrot.slane %v5165_v37, 4  ;;  %v5415_v6 = vshll.u32 %v10510_v39, 16 }
 0x2b0   : > { %v10516_v1 = vpop.f32.mrf.mxu0  ;;  %v5175_v3 = vor.u32 %v5174_v41, %v5171_v20  ;;  %v5166_v59 = vsel %vm8180_vm9, %v5157_v46, %v5165_v37  ;;  %v5407_v10 = vor.u32 %v5406_v26, %v5405_v11  ;;  %v5412_v58 = vor.u32 %v5411_v28, %v5409_v60  ;;  %v7872_v41 = vld [vmem:[%s8001_s13 + $0x138] sm:$0xf] }
 0x2b1   : > { %v5551_v52 = vrot.slane %v9916_v35, 7  ;;  %v4807_v7 = vunpack.c.l.b16 %v4786_v61  ;;  %v5417_v11 = vrot.slane %v5415_v6, 5  ;;  %v5196_v35 = vunpack.c.l.b16 %v5166_v59 }
 0x2b2   : > { %v4129_v17 = vpop.f32.mrf.mxu3  ;;  %v3722_v2 = vpop.f32.mrf.mxu1  ;;  %v5176_v40 = vsel %vm8180_vm9, %v5167_v33, %v5175_v3  ;;  %v5408_v50 = vrot.slane %v5407_v10, 4  ;;  %v5413_v20 = vrot.slane %v5412_v58, 4  ;;  %v5961_v26 = vshll.u32 %v7567_v49, 16 }
 0x2b3   : > { %7534 = vmatmul.msk.bf16.gmra.mxu0 %vm533_vm2, %v5446_v47  ;;  %v10526_v55 = vadd.f32 %v4129_v17, %v3957_v31  ;;  %v3741_v8 = vadd.f32 %v3722_v2, %v10481_v43  ;;  %v5197_v37 = vunpack.c.l.b16 %v5176_v40  ;;  %v5555_v47 = vshrl.u32 %v7872_v41, 16  ;;  %v7569_v40 = vld [vmem:[%s8001_s13 + $0x174] sm:$0xf] }
 0x2b4   : > { %v5958_v31 = vshrl.u32 %v7567_v49, 16  ;;  %v7536_v43 = vrot.slane %v9910_v4, 11  ;;  %v5552_v61 = vor.u32 %v5551_v52, %v9944_v30  ;;  %v4815_v33 = vpack.c.b16 %v4807_v7, %v4806_v5 }
 0x2b5   : > { %7433 = vmatmul.msk.bf16.gmra.mxu1 %vm533_vm2, %v4621_v34  ;;  %v5410_v3 = vsel %vm8027_vm3, %v5408_v50, %v5409_v60  ;;  %v5418_v34 = vsel %vm8027_vm3, %v5413_v20, %v5417_v11  ;;  %v5554_v2 = vrot.slane %v5551_v52, 4  ;;  %v5557_v59 = vrot.slane %v5555_v47, 7 }
 0x2b6   : > { %v3937_v46 = vpop.f32.mrf.mxu2  ;;  %v5960_v10 = vrot.slane %v5958_v31, 4  ;;  %v5963_v58 = vrot.slane %v5961_v26, 5  ;;  %v5205_v4 = vpack.c.b16 %v5197_v37, %v5196_v35  ;;  %v5967_v30 = vshll.u32 %v10538_v45, 16 }
 0x2b7   : > { %v3958_v28 = vadd.f32 %v3937_v46, %v3740_v18  ;;  %v5971_v49 = vshrl.u32 %v10538_v45, 16  ;;  %v5438_v5 = vunpack.c.l.b16 %v5410_v3  ;;  %v5439_v7 = vunpack.c.l.b16 %v5418_v34 }
 0x2b8   : > { %v10544_v17 = vpop.f32.mrf.mxu0  ;;  %v5553_v60 = vsel %vm8543_vm14, %v7536_v43, %v5552_v61  ;;  %v11455_v50 = vshll.u32 %v9947_v25, 16  ;;  %v5969_v35 = vrot.slane %v5967_v30, 5  ;;  %v5964_v31 = vor.u32 %v5963_v58, %v5960_v10 }
 0x2b9   : > { %v5973_v37 = vrot.slane %v5971_v49, 4  ;;  %v5977_v46 = vshll.u32 %v7569_v40, 16  ;;  %v5642_v26 = vunpack.c.l.b16 %v5553_v60  ;;  %v7873_v49 = vld [vmem:[%s8001_s13 + $0x14c] sm:$0xf] }
 0x2ba   : > { %v4131_v18 = vpop.f32.mrf.mxu3  ;;  %v3724_v41 = vpop.f32.mrf.mxu1  ;;  %v5558_v20 = vor.u32 %v5557_v59, %v11455_v50  ;;  %v5965_v34 = vrot.slane %v5964_v31, 4  ;;  %v5566_v10 = vshrl.u32 %v7873_v49, 16 }
 0x2bb   : > { %v10553_v52 = vadd.f32 %v4131_v18, %v3958_v28  ;;  %7461 = vmatmul.msk.bf16.gmra.mxu2 %vm533_vm2, %v4815_v33  ;;  %v3742_v11 = vadd.f32 %v3724_v41, %v10389_v48  ;;  %v5974_v25 = vor.u32 %v5973_v37, %v5969_v35  ;;  %v5447_v28 = vpack.c.b16 %v5439_v7, %v5438_v5  ;;  %v7572_v41 = vld [vmem:[%s8001_s13 + $0x180] sm:$0xf] }
 0x2bc   : > { %v5559_v47 = vsel %vm8543_vm14, %v5554_v2, %v5558_v20  ;;  %v6305_v48 = vrot.slane %v7569_v40, 5  ;;  %v5979_v30 = vrot.slane %v5977_v46, 5  ;;  %v7570_v2 = vld [vmem:[%s8001_s13 + $0x178] sm:$0x1]  ;;  %v7678_v18 = vrot.slane %v10538_v45, 9 }
 0x2bd   : > { %v5643_v43 = vunpack.c.l.b16 %v5559_v47  ;;  %v5975_v59 = vrot.slane %v5974_v25, 4  ;;  %v5568_v5 = vrot.slane %v5566_v10, 7  ;;  %v6308_v37 = vrot.slane %v7570_v2, 5  ;;  %v7770_v2 = vld [vmem:[%s8001_s13 + $0x168] sm:$0xff] }
 0x2be   : > { %v3940_v61 = vpop.f32.mrf.mxu2  ;;  %v6307_v20 = vrot.slane %v6305_v48, 4  ;;  %v5970_v45 = vsel %vm8027_vm3, %v5965_v34, %v5969_v35  ;;  %v5982_v31 = vshrl.u32 %v7572_v41, 16  ;;  %v6306_v46 = vsel %vm8143_vm6, %v7678_v18, %v6305_v48 }
 0x2bf   : > { %7515 = vmatmul.msk.bf16.gmra.mxu3 %vm533_vm2, %v5205_v4  ;;  %v3959_v33 = vadd.f32 %v3940_v61, %v3741_v8  ;;  %v5658_v58 = vpack.c.b16 %v5643_v43, %v5642_v26  ;;  %v5562_v4 = vrot.slane %v10047_v14, 7  ;;  %v10568_v8 = vld [vmem:[%s8001_s13 + $0x184] sm:$0xf]  ;;  %v5980_v47 = vsel %vm8027_vm3, %v5975_v59, %v5979_v30  ;;  %v11456_v61 = vld [vmem:[#allocation5_spill] sm:$0xff] }
 0x2c0   : > { %v10560_v3 = vpop.f32.mrf.mxu0  ;;  %v5985_v14 = vshll.u32 %v7572_v41, 16  ;;  %v5991_v26 = vshll.u32 %v10568_v8, 16  ;;  %v7537_v25 = vrot.slane %v10036_v56, 11  ;;  %v6154_v49 = vunpack.c.l.b16 %v5970_v45 }
 0x2c1   : > { %v5563_v35 = vor.u32 %v5562_v4, %v11456_v61  ;;  %v6155_v10 = vunpack.c.l.b16 %v5980_v47  ;;  %v6309_v48 = vsel %vm8143_vm6, %v6307_v20, %v6308_v37  ;;  %v5984_v18 = vrot.slane %v5982_v31, 4  ;;  %v10597_v61 = vld [vmem:[%s8001_s13 + $0x188] sm:$0xf] }
 0x2c2   : > { %v4134_v60 = vpop.f32.mrf.mxu3  ;;  %v4667_v50 = vpop.f32.mrf.mxu1  ;;  %v5987_v41 = vrot.slane %v5985_v14, 5  ;;  %v6365_v31 = vunpack.c.l.b16 %v6309_v48 }
 0x2c3   : > { %7535 = vmatmul.msk.bf16.gmra.mxu0 %vm533_vm2, %v5447_v28  ;;  %v10571_v40 = vadd.f32 %v4134_v60, %v3959_v33  ;;  %v4707_v7 = vadd.f32 %v4667_v50, %v10395_v12  ;;  %v5995_v12 = vshrl.u32 %v10568_v8, 16  ;;  %v5565_v28 = vrot.slane %v5562_v4, 4  ;;  %v11457_v33 = vld [vmem:[#allocation9_spill] sm:$0xff]  ;;  %v11459_v50 = vld [vmem:[#allocation16_spill] sm:$0xff] }
 0x2c4   : > { %v11458_v34 = vshll.u32 %v11457_v33, 16  ;;  %v10592_v60 = vrot.slane %v5991_v26, 5  ;;  %v4386_v4 = vadd.f32 %v11459_v50, %v10160_v53  ;;  %v5564_v45 = vsel %vm8543_vm14, %v7537_v25, %v5563_v35  ;;  %v11460_v50 = vld [vmem:[#allocation8_spill] sm:$0xff] }
 0x2c5   : > { %7556 = vmatmul.msk.bf16.vlgmr.msra.gmra.mxu1 %vm533_vm2, %v5658_v58  ;;  %v5997_v56 = vrot.slane %v5995_v12, 4  ;;  %v6170_v47 = vpack.c.b16 %v6155_v10, %v6154_v49  ;;  %v5988_v53 = vor.u32 %v5987_v41, %v5984_v18  ;;  %v5644_v12 = vunpack.c.l.b16 %v5564_v45  ;;  %v7874_v18 = vld [vmem:[%s8001_s13 + $0x160] sm:$0xf] }
 0x2c6   : > { %v3942_v43 = vpop.f32.mrf.mxu2  ;;  %v5569_v59 = vor.u32 %v5568_v5, %v11458_v34  ;;  %v5577_v41 = vshrl.u32 %v7874_v18, 16  ;;  %v11463_v18 = vld [vmem:[#allocation15_spill] sm:$0xff] }
 0x2c7   : > { %v3960_v30 = vadd.f32 %v3942_v43, %v3742_v11  ;;  %v6364_v11 = vunpack.c.l.b16 %v6306_v46  ;;  %v5998_v26 = vor.u32 %v5997_v56, %v10592_v60  ;;  %v6001_v46 = vshll.u32 %v10597_v61, 16  ;;  %v7577_v56 = vld [vmem:[%s8001_s13 + $0x194] sm:$0xf] }
 0x2c8   : > { %v10590_v58 = vpop.f32.mrf.mxu0  ;;  %v5570_v20 = vsel %vm8543_vm14, %v5565_v28, %v5569_v59  ;;  %v10610_v28 = vadd.f32 %v10364_v22, %v10376_v23  ;;  %v7575_v59 = vld [vmem:[%s8001_s13 + $0x18c] sm:$0x1]  ;;  %v5989_v49 = vrot.slane %v5988_v53, 4  ;;  %v4387_v22 = vadd.f32 %v10180_v57, %v10198_v36 }
 0x2c9   : > { %v5645_v25 = vunpack.c.l.b16 %v5570_v20  ;;  %v6380_v33 = vpack.c.b16 %v6365_v31, %v6364_v11  ;;  %v5999_v10 = vrot.slane %v5998_v26, 4  ;;  %v6003_v48 = vrot.slane %v6001_v46, 5 }
 0x2ca   : > { %v4136_v5 = vpop.f32.mrf.mxu3  ;;  %v4669_v43 = vpop.f32.mrf.mxu1  ;;  %v6006_v45 = vshrl.u32 %v7577_v56, 16  ;;  %v6009_v20 = vshll.u32 %v7577_v56, 16  ;;  %v6315_v31 = vrot.slane %v7575_v59, 5  ;;  %v5994_v53 = vsel %vm8027_vm3, %v5989_v49, %v10592_v60 }
 0x2cb   : > { %v10603_v37 = vadd.f32 %v4136_v5, %v3960_v30  ;;  %7650 = vmatmul.msk.bf16.vlgmr.msra.gmra.mxu2 %vm533_vm2, %v7770_v2  ;;  %v4708_v14 = vadd.f32 %v4669_v43, %v4386_v4  ;;  %v6312_v30 = vrot.slane %v10597_v61, 5  ;;  %v5659_v23 = vpack.c.b16 %v5645_v25, %v5644_v12  ;;  %v10623_v5 = vld [vmem:[%s8001_s13 + $0x198] sm:$0xf]  ;;  %v11461_v12 = vld [vmem:[#allocation6_spill] sm:$0xff] }
 0x2cc   : > { %v5573_v4 = vrot.slane %v11460_v50, 7  ;;  %v7679_v61 = vrot.slane %v10568_v8, 9  ;;  %v5579_v43 = vrot.slane %v5577_v41, 7  ;;  %v6004_v8 = vsel %vm8027_vm3, %v5999_v10, %v6003_v48  ;;  %v7771_v10 = vld [vmem:[%s8001_s13 + $0x17c] sm:$0xff] }
 0x2cd   : > { %v6314_v36 = vrot.slane %v6312_v30, 4  ;;  %v6015_v26 = vshll.u32 %v10623_v5, 16  ;;  %v6019_v46 = vshrl.u32 %v10623_v5, 16  ;;  %v7538_v25 = vrot.slane %v11461_v12, 11 }
 0x2ce   : > { %v4861_v35 = vpop.f32.mrf.mxu2  ;;  %v5576_v59 = vrot.slane %v5573_v4, 4  ;;  %v11464_v41 = vshll.u32 %v11463_v18, 16  ;;  %v6008_v60 = vrot.slane %v6006_v45, 4  ;;  %v6011_v49 = vrot.slane %v6009_v20, 5  ;;  %v11466_v45 = vld [vmem:[#allocation14_spill] sm:$0xff] }
 0x2cf   : > { %7670 = vmatmul.msk.bf16.vlgmr.msra.gmra.mxu3 %vm533_vm2, %v6170_v47  ;;  %v4901_v34 = vadd.f32 %v4861_v35, %v4707_v7  ;;  %v11462_v35 = vld [vmem:[#allocation13_spill] sm:$0xff]  ;;  %v6156_v48 = vunpack.c.l.b16 %v5994_v53  ;;  %v6157_v50 = vunpack.c.l.b16 %v6004_v8  ;;  %v6017_v12 = vrot.slane %v6015_v26, 5 }
 0x2d0   : > { %v10615_v2 = vpop.f32.mrf.mxu0  ;;  %v5580_v56 = vor.u32 %v5579_v43, %v11464_v41  ;;  %v11465_v43 = vld [vmem:[#allocation12_spill] sm:$0xff]  ;;  %v7579_v20 = vld [vmem:[%s8001_s13 + $0x19c] sm:$0xf] }
 0x2d1   : > { %v6025_v18 = vshll.u32 %v7579_v20, 16 }
 0x2d2   : > { %v5251_v7 = vpop.f32.mrf.mxu3  ;;  %v4672_v11 = vpop.f32.mrf.mxu1 }
 0x2d3   : > { %7698 = vmatmul.msk.bf16.vlgmr.msra.gmra.mxu0 %vm533_vm2, %v6380_v33  ;;  %v10631_v47 = vadd.f32 %v5251_v7, %v4901_v34  ;;  %v4709_v57 = vadd.f32 %v4672_v11, %v4387_v22  ;;  %v5574_v33 = vor.u32 %v5573_v4, %v11462_v35  ;;  %v6313_v7 = vsel %vm8143_vm6, %v7679_v61, %v6312_v30 }
 0x2d4   : > { %v6316_v11 = vsel %vm8143_vm6, %v6314_v36, %v6315_v31  ;;  %v6021_v35 = vrot.slane %v6019_v46, 4  ;;  %v10654_v4 = vadd.f32 %v10403_v38, %v10414_v13  ;;  %v6366_v8 = vunpack.c.l.b16 %v6313_v7 }
 0x2d5   : > { %7557 = vmatmul.msk.bf16.gmra.mxu1 %vm533_vm2, %v5659_v23  ;;  %v5575_v30 = vsel %vm8543_vm14, %v7538_v25, %v5574_v33  ;;  %v5581_v61 = vsel %vm8543_vm14, %v5576_v59, %v5580_v56  ;;  %v6012_v36 = vor.u32 %v6011_v49, %v6008_v60  ;;  %v6171_v38 = vpack.c.b16 %v6157_v50, %v6156_v48  ;;  %v7580_v60 = vld [vmem:[%s8001_s13 + $0x1a0] sm:$0x1]  ;;  %v7875_v50 = vld [vmem:[%s8001_s13 + $0x174] sm:$0xf] }
 0x2d6   : > { %v4863_v34 = vpop.f32.mrf.mxu2  ;;  %v6367_v13 = vunpack.c.l.b16 %v6316_v11  ;;  %v6022_v46 = vor.u32 %v6021_v35, %v6017_v12  ;;  %v5646_v41 = vunpack.c.l.b16 %v5575_v30  ;;  %v5647_v7 = vunpack.c.l.b16 %v5581_v61  ;;  %v7582_v35 = vld [vmem:[%s8001_s13 + $0x1a8] sm:$0xf] }
 0x2d7   : > { %v4902_v22 = vadd.f32 %v4863_v34, %v4708_v14  ;;  %v4388_v14 = vadd.f32 %v11466_v45, %v11465_v43  ;;  %v6013_v25 = vrot.slane %v6012_v36, 4  ;;  %v10668_v33 = vadd.f32 %v10426_v19, %v10439_v51  ;;  %v10680_v51 = vld [vmem:[%s8001_s13 + $0x1ac] sm:$0xf] }
 0x2d8   : > { %v10648_v23 = vpop.f32.mrf.mxu0  ;;  %v6381_v59 = vpack.c.b16 %v6367_v13, %v6366_v8  ;;  %v6319_v49 = vrot.slane %v7579_v20, 5  ;;  %v6027_v48 = vrot.slane %v6025_v18, 5  ;;  %v5588_v11 = vshrl.u32 %v7875_v50, 16  ;;  %v11470_v50 = vld [vmem:[#allocation18_spill] sm:$0xff] }
 0x2d9   : > { %v4389_v45 = vadd.f32 %v10245_v44, %v10262_v0  ;;  %v7680_v19 = vrot.slane %v10623_v5, 9  ;;  %v6322_v20 = vrot.slane %v7580_v60, 5  ;;  %v6030_v0 = vshrl.u32 %v7582_v35, 16 }
 0x2da   : > { %v5253_v53 = vpop.f32.mrf.mxu3  ;;  %v4674_v34 = vpop.f32.mrf.mxu1  ;;  %v5590_v61 = vrot.slane %v5588_v11, 7  ;;  %v6321_v44 = vrot.slane %v6319_v49, 4  ;;  %v6033_v13 = vshll.u32 %v7582_v35, 16  ;;  %v7772_v35 = vld [vmem:[%s8001_s13 + $0x190] sm:$0xff] }
 0x2db   : > { %v10663_v31 = vadd.f32 %v5253_v53, %v4902_v22  ;;  %7651 = vmatmul.msk.bf16.gmra.mxu2 %vm533_vm2, %v7771_v10  ;;  %v4710_v26 = vadd.f32 %v4674_v34, %v4388_v14  ;;  %v6023_v10 = vrot.slane %v6022_v46, 4  ;;  %v5660_v14 = vpack.c.b16 %v5647_v7, %v5646_v41  ;;  %v11467_v34 = vld [vmem:[#allocation7_spill] sm:$0xff] }
 0x2dc   : > { %v5584_v30 = vrot.slane %v11467_v34, 7  ;;  %v6039_v46 = vshll.u32 %v10680_v51, 16  ;;  %v6320_v41 = vsel %vm8143_vm6, %v7680_v19, %v6319_v49  ;;  %v6035_v49 = vrot.slane %v6033_v13, 5 }
 0x2dd   : > { %v6028_v5 = vsel %vm8027_vm3, %v6023_v10, %v6027_v48  ;;  %v11471_v10 = vshll.u32 %v11470_v50, 16  ;;  %v10708_v34 = vadd.f32 %v10460_v54, %v10470_v29 }
 0x2de   : > { %v4866_v43 = vpop.f32.mrf.mxu2  ;;  %v5587_v60 = vrot.slane %v5584_v30, 4  ;;  %v10704_v19 = vrot.slane %v6039_v46, 5 }
 0x2df   : > { %7671 = vmatmul.msk.bf16.gmra.mxu3 %vm533_vm2, %v6171_v38  ;;  %v4903_v56 = vadd.f32 %v4866_v43, %v4709_v57  ;;  %v6018_v57 = vsel %vm8027_vm3, %v6013_v25, %v6017_v12  ;;  %v6043_v12 = vshrl.u32 %v10680_v51, 16  ;;  %v11468_v43 = vld [vmem:[#allocation10_spill] sm:$0xff]  ;;  %v5591_v48 = vor.u32 %v5590_v61, %v11471_v10 }
 0x2e0   : > { %v10672_v22 = vpop.f32.mrf.mxu0  ;;  %v6158_v18 = vunpack.c.l.b16 %v6018_v57  ;;  %v7539_v25 = vrot.slane %v11468_v43, 11 }
 0x2e1   : > { %v6045_v57 = vrot.slane %v6043_v12, 4 }
 0x2e2   : > { %v5256_v53 = vpop.f32.mrf.mxu3  ;;  %v4677_v8 = vpop.f32.mrf.mxu1 }
 0x2e3   : > { %7699 = vmatmul.msk.bf16.gmra.mxu0 %vm533_vm2, %v6381_v59  ;;  %v10686_v36 = vadd.f32 %v5256_v53, %v4903_v56  ;;  %v4711_v38 = vadd.f32 %v4677_v8, %v4389_v45  ;;  %v11469_v59 = vld [vmem:[#allocation11_spill] sm:$0xff]  ;;  %v6159_v45 = vunpack.c.l.b16 %v6028_v5  ;;  %v6032_v53 = vrot.slane %v6030_v0, 4 }
 0x2e4   : > { %v5585_v56 = vor.u32 %v5584_v30, %v11469_v59  ;;  %v4390_v30 = vadd.f32 %v10295_v27, %v10310_v9  ;;  %v6368_v5 = vunpack.c.l.b16 %v6320_v41  ;;  %v6046_v9 = vor.u32 %v6045_v57, %v10704_v19  ;;  %v11474_v57 = vld [vmem:[#allocation19_spill] sm:$0xff] }
 0x2e5   : > { %7558 = vmatmul.msk.bf16.gmra.mxu1 %vm533_vm2, %v5660_v14  ;;  %v6323_v14 = vsel %vm8143_vm6, %v6321_v44, %v6322_v20  ;;  %v5592_v44 = vsel %vm8543_vm14, %v5587_v60, %v5591_v48  ;;  %v6172_v54 = vpack.c.b16 %v6159_v45, %v6158_v18  ;;  %v6036_v27 = vor.u32 %v6035_v49, %v6032_v53  ;;  %v11472_v53 = vld [vmem:[#allocation22_spill] sm:$0xff]  ;;  %v11473_v49 = vld [vmem:[#allocation21_spill] sm:$0xff] }
 0x2e6   : > { %v4868_v7 = vpop.f32.mrf.mxu2  ;;  %v5586_v20 = vsel %vm8543_vm14, %v7539_v25, %v5585_v56  ;;  %v6369_v29 = vunpack.c.l.b16 %v6323_v14  ;;  %v5649_v41 = vunpack.c.l.b16 %v5592_v44  ;;  %v10726_v25 = vadd.f32 %v10487_v42, %v10494_v16  ;;  %v7585_v56 = vld [vmem:[%s8001_s13 + $0x1b4] sm:$0x1]  ;;  %v7587_v14 = vld [vmem:[%s8001_s13 + $0x1bc] sm:$0xf] }
 0x2e7   : > { %v4904_v11 = vadd.f32 %v4868_v7, %v4710_v26  ;;  %v10713_v26 = vld [vmem:[%s8001_s13 + $0x1b0] sm:$0xf]  ;;  %v5648_v12 = vunpack.c.l.b16 %v5586_v20  ;;  %v6037_v10 = vrot.slane %v6036_v27, 4  ;;  %v6047_v48 = vrot.slane %v6046_v9, 4 }
 0x2e8   : > { %v10702_v8 = vpop.f32.mrf.mxu0  ;;  %v6049_v46 = vshll.u32 %v10713_v26, 16  ;;  %v6382_v18 = vpack.c.b16 %v6369_v29, %v6368_v5  ;;  %v6326_v60 = vrot.slane %v10713_v26, 5  ;;  %v4391_v42 = vadd.f32 %v11473_v49, %v11472_v53 }
 0x2e9   : > { %v5661_v16 = vpack.c.b16 %v5649_v41, %v5648_v12  ;;  %v7681_v26 = vrot.slane %v10680_v51, 9  ;;  %v6054_v20 = vshrl.u32 %v7587_v14, 16  ;;  %v6057_v44 = vshll.u32 %v7587_v14, 16  ;;  %v11477_v14 = vld [vmem:[#allocation20_spill] sm:$0xff] }
 0x2ea   : > { %v5258_v61 = vpop.f32.mrf.mxu3  ;;  %v4679_v7 = vpop.f32.mrf.mxu1  ;;  %v6328_v27 = vrot.slane %v6326_v60, 4  ;;  %v6329_v9 = vrot.slane %v7585_v56, 5  ;;  %v11478_v53 = vshll.u32 %v11477_v14, 16 }
 0x2eb   : > { %v10719_v0 = vadd.f32 %v5258_v61, %v4904_v11  ;;  %7652 = vmatmul.msk.bf16.gmra.mxu2 %vm533_vm2, %v7772_v35  ;;  %v4712_v13 = vadd.f32 %v4679_v7, %v4390_v30  ;;  %v6051_v11 = vrot.slane %v6049_v46, 5  ;;  %v7876_v35 = vld [vmem:[%s8001_s13 + $0x188] sm:$0xf]  ;;  %v5595_v30 = vrot.slane %v11474_v57, 7  ;;  %v10739_v61 = vld [vmem:[%s8001_s13 + $0x1c0] sm:$0xf] }
 0x2ec   : > { %v5599_v45 = vshrl.u32 %v7876_v35, 16  ;;  %v6042_v46 = vsel %vm8027_vm3, %v6037_v10, %v10704_v19  ;;  %v6063_v51 = vshll.u32 %v10739_v61, 16  ;;  %v6067_v41 = vshrl.u32 %v10739_v61, 16 }
 0x2ed   : > { %v6052_v12 = vsel %vm8027_vm3, %v6047_v48, %v6051_v11  ;;  %v5598_v56 = vrot.slane %v5595_v30, 4  ;;  %v6056_v19 = vrot.slane %v6054_v20, 4  ;;  %v6059_v10 = vrot.slane %v6057_v44, 5  ;;  %v7773_v48 = vld [vmem:[%s8001_s13 + $0x1a4] sm:$0xff] }
 0x2ee   : > { %v4871_v43 = vpop.f32.mrf.mxu2  ;;  %v5601_v7 = vrot.slane %v5599_v45, 7  ;;  %v6160_v11 = vunpack.c.l.b16 %v6042_v46  ;;  %v6161_v57 = vunpack.c.l.b16 %v6052_v12 }
 0x2ef   : > { %7672 = vmatmul.msk.bf16.gmra.mxu3 %vm533_vm2, %v6172_v54  ;;  %v4905_v59 = vadd.f32 %v4871_v43, %v4711_v38  ;;  %v11475_v43 = vld [vmem:[#allocation3_spill] sm:$0xff] }
 0x2f0   : > { %v10731_v50 = vpop.f32.mrf.mxu0  ;;  %v5602_v49 = vor.u32 %v5601_v7, %v11478_v53  ;;  %v7589_v7 = vld [vmem:[%s8001_s13 + $0x1c4] sm:$0xf] }
 0x2f2   : > { %v5261_v38 = vpop.f32.mrf.mxu3  ;;  %v4682_v5 = vpop.f32.mrf.mxu1 }
 0x2f3   : > { %7700 = vmatmul.msk.bf16.gmra.mxu0 %vm533_vm2, %v6382_v18  ;;  %v10743_v54 = vadd.f32 %v5261_v38, %v4905_v59  ;;  %v4713_v29 = vadd.f32 %v4682_v5, %v4391_v42  ;;  %v7540_v18 = vrot.slane %v11475_v43, 11  ;;  %v11476_v59 = vld [vmem:[#allocation17_spill] sm:$0xff]  ;;  %v6327_v38 = vsel %vm8143_vm6, %v7681_v26, %v6326_v60 }
 0x2f4   : > { %v5596_v35 = vor.u32 %v5595_v30, %v11476_v59  ;;  %v6330_v5 = vsel %vm8143_vm6, %v6328_v27, %v6329_v9  ;;  %v6065_v43 = vrot.slane %v6063_v51, 5  ;;  %v6069_v59 = vrot.slane %v6067_v41, 4 }
 0x2f5   : > { %7559 = vmatmul.msk.bf16.gmra.mxu1 %vm533_vm2, %v5661_v16  ;;  %v10766_v30 = vadd.f32 %v10516_v1, %v10526_v55  ;;  %v5603_v60 = vsel %vm8543_vm14, %v5598_v56, %v5602_v49  ;;  %v6060_v26 = vor.u32 %v6059_v10, %v6056_v19  ;;  %v6173_v27 = vpack.c.b16 %v6161_v57, %v6160_v11  ;;  %v7590_v49 = vld [vmem:[%s8001_s13 + $0x1c8] sm:$0x1]  ;;  %v7592_v57 = vld [vmem:[%s8001_s13 + $0x1d0] sm:$0xf] }
 0x2f6   : > { %v4873_v45 = vpop.f32.mrf.mxu2  ;;  %v5597_v46 = vsel %vm8543_vm14, %v7540_v18, %v5596_v35  ;;  %v6371_v9 = vunpack.c.l.b16 %v6330_v5  ;;  %v6070_v55 = vor.u32 %v6069_v59, %v6065_v43  ;;  %v6073_v51 = vshll.u32 %v7589_v7, 16  ;;  %v10789_v59 = vld [vmem:[%s8001_s13 + $0x1d4] sm:$0xf] }
 0x2f7   : > { %v4906_v42 = vadd.f32 %v4873_v45, %v4712_v13  ;;  %v6370_v13 = vunpack.c.l.b16 %v6327_v38  ;;  %v5650_v41 = vunpack.c.l.b16 %v5597_v46  ;;  %v5651_v45 = vunpack.c.l.b16 %v5603_v60 }
 0x2f8   : > { %v10760_v16 = vpop.f32.mrf.mxu0  ;;  %v6061_v35 = vrot.slane %v6060_v26, 4  ;;  %v10779_v56 = vadd.f32 %v10544_v17, %v10553_v52  ;;  %v6333_v19 = vrot.slane %v7589_v7, 5  ;;  %v6071_v10 = vrot.slane %v6070_v55, 4 }
 0x2f9   : > { %v6383_v14 = vpack.c.b16 %v6371_v9, %v6370_v13  ;;  %v5662_v38 = vpack.c.b16 %v5651_v45, %v5650_v41  ;;  %v7682_v5 = vrot.slane %v10739_v61, 9  ;;  %v11479_v13 = vld [vmem:[#allocation4_spill] sm:$0xff]  ;;  %v6078_v61 = vshrl.u32 %v7592_v57, 16 }
 0x2fa   : > { %v5263_v20 = vpop.f32.mrf.mxu3  ;;  %v4684_v44 = vpop.f32.mrf.mxu1  ;;  %v5606_v7 = vrot.slane %v11479_v13, 7  ;;  %v6335_v26 = vrot.slane %v6333_v19, 4  ;;  %v6081_v9 = vshll.u32 %v7592_v57, 16  ;;  %v6087_v55 = vshll.u32 %v10789_v59, 16 }
 0x2fb   : > { %v10773_v12 = vadd.f32 %v5263_v20, %v4906_v42  ;;  %7653 = vmatmul.msk.bf16.gmra.mxu2 %vm533_vm2, %v7773_v48  ;;  %v4714_v1 = vadd.f32 %v4684_v44, %v10610_v28  ;;  %v6075_v42 = vrot.slane %v6073_v51, 5  ;;  %v7877_v48 = vld [vmem:[%s8001_s13 + $0x19c] sm:$0xf]  ;;  %v6066_v20 = vsel %vm8027_vm3, %v6061_v35, %v6065_v43  ;;  %v11481_v35 = vld [vmem:[#allocation23_spill] sm:$0xff] }
 0x2fc   : > { %v5610_v11 = vshrl.u32 %v7877_v48, 16  ;;  %v6091_v43 = vshrl.u32 %v10789_v59, 16  ;;  %v6162_v51 = vunpack.c.l.b16 %v6066_v20  ;;  %v6334_v41 = vsel %vm8143_vm6, %v7682_v5, %v6333_v19 }
 0x2fd   : > { %v6083_v19 = vrot.slane %v6081_v9, 5  ;;  %v6089_v5 = vrot.slane %v6087_v55, 5  ;;  %v10816_v13 = vadd.f32 %v10560_v3, %v10571_v40 }
 0x2fe   : > { %v4876_v18 = vpop.f32.mrf.mxu2  ;;  %v5612_v44 = vrot.slane %v5610_v11, 7  ;;  %v7774_v11 = vld [vmem:[%s8001_s13 + $0x1b8] sm:$0xff]  ;;  %v6093_v20 = vrot.slane %v6091_v43, 4 }
 0x2ff   : > { %7673 = vmatmul.msk.bf16.gmra.mxu3 %vm533_vm2, %v6173_v27  ;;  %v4907_v53 = vadd.f32 %v4876_v18, %v4713_v29  ;;  %v6336_v29 = vrot.slane %v7590_v49, 5  ;;  %v6076_v27 = vsel %vm8027_vm3, %v6071_v10, %v6075_v42  ;;  %v11482_v49 = vld [vmem:[#allocation24_spill] sm:$0xff] }
 0x300   : > { %v10783_v28 = vpop.f32.mrf.mxu0  ;;  %v11483_v10 = vshll.u32 %v11482_v49, 16  ;;  %v6163_v57 = vunpack.c.l.b16 %v6076_v27  ;;  %v6094_v9 = vor.u32 %v6093_v20, %v6089_v5 }
 0x302   : > { %v5266_v17 = vpop.f32.mrf.mxu3  ;;  %v4687_v52 = vpop.f32.mrf.mxu1  ;;  %v5613_v42 = vor.u32 %v5612_v44, %v11483_v10 }
 0x303   : > { %7701 = vmatmul.msk.bf16.gmra.mxu0 %vm533_vm2, %v6383_v14  ;;  %v10795_v46 = vadd.f32 %v5266_v17, %v4907_v53  ;;  %v4715_v60 = vadd.f32 %v4687_v52, %v10654_v4  ;;  %v11480_v4 = vld [vmem:[#allocation2_spill] sm:$0xff]  ;;  %v5607_v14 = vor.u32 %v5606_v7, %v11481_v35  ;;  %v5609_v53 = vrot.slane %v5606_v7, 4  ;;  %v7594_v7 = vld [vmem:[%s8001_s13 + $0x1d8] sm:$0xf] }
 0x304   : > { %v7541_v18 = vrot.slane %v11480_v4, 11  ;;  %v6080_v17 = vrot.slane %v6078_v61, 4  ;;  %v6372_v35 = vunpack.c.l.b16 %v6334_v41  ;;  %v6174_v61 = vpack.c.b16 %v6163_v57, %v6162_v51  ;;  %v7595_v51 = vld [vmem:[%s8001_s13 + $0x1dc] sm:$0x1] }
 0x305   : > { %7560 = vmatmul.msk.bf16.gmra.mxu1 %vm533_vm2, %v5662_v38  ;;  %v6337_v38 = vsel %vm8143_vm6, %v6335_v26, %v6336_v29  ;;  %v5614_v29 = vsel %vm8543_vm14, %v5609_v53, %v5613_v42  ;;  %v6097_v55 = vshll.u32 %v7594_v7, 16  ;;  %v6340_v49 = vrot.slane %v7594_v7, 5 }
 0x306   : > { %v4878_v45 = vpop.f32.mrf.mxu2  ;;  %v6373_v27 = vunpack.c.l.b16 %v6337_v38  ;;  %v6084_v40 = vor.u32 %v6083_v19, %v6080_v17  ;;  %v5653_v41 = vunpack.c.l.b16 %v5614_v29  ;;  %v6095_v42 = vrot.slane %v6094_v9, 4  ;;  %v7597_v38 = vld [vmem:[%s8001_s13 + $0x1e4] sm:$0xf] }
 0x307   : > { %v4908_v48 = vadd.f32 %v4878_v45, %v4714_v1  ;;  %v5608_v1 = vsel %vm8543_vm14, %v7541_v18, %v5607_v14  ;;  %v10829_v18 = vadd.f32 %v10590_v58, %v10603_v37  ;;  %v11485_v19 = vld [vmem:[#allocation26_spill] sm:$0xff]  ;;  %v6105_v7 = vshll.u32 %v7597_v38, 16 }
 0x308   : > { %v10812_v52 = vpop.f32.mrf.mxu0  ;;  %v5652_v43 = vunpack.c.l.b16 %v5608_v1  ;;  %v6384_v14 = vpack.c.b16 %v6373_v27, %v6372_v35  ;;  %v5617_v20 = vrot.slane %v11485_v19, 7  ;;  %v7683_v35 = vrot.slane %v10789_v59, 9 }
 0x309   : > { %v6343_v27 = vrot.slane %v7595_v51, 5 }
 0x30a   : > { %v5268_v4 = vpop.f32.mrf.mxu3  ;;  %v4689_v44 = vpop.f32.mrf.mxu1  ;;  %v5663_v17 = vpack.c.b16 %v5653_v41, %v5652_v43  ;;  %v11486_v43 = vld [vmem:[#allocation25_spill] sm:$0xff] }
 0x30b   : > { %v10823_v26 = vadd.f32 %v5268_v4, %v4908_v48  ;;  %7654 = vmatmul.msk.bf16.gmra.mxu2 %vm533_vm2, %v7774_v11  ;;  %v4716_v3 = vadd.f32 %v4689_v44, %v10668_v33  ;;  %v6085_v33 = vrot.slane %v6084_v40, 4  ;;  %v6099_v48 = vrot.slane %v6097_v55, 5  ;;  %v11484_v11 = vld [vmem:[#allocation28_spill] sm:$0xff]  ;;  %v10839_v4 = vld [vmem:[%s8001_s13 + $0x1e8] sm:$0xf] }
 0x30c   : > { %v5621_v57 = vshrl.u32 %v11484_v11, 16  ;;  %v6102_v44 = vshrl.u32 %v7597_v38, 16  ;;  %v6111_v59 = vshll.u32 %v10839_v4, 16  ;;  %v6115_v55 = vshrl.u32 %v10839_v4, 16 }
 0x30d   : > { %v6090_v40 = vsel %vm8027_vm3, %v6085_v33, %v6089_v5  ;;  %v6100_v9 = vsel %vm8027_vm3, %v6095_v42, %v6099_v48  ;;  %v7542_v41 = vrot.slane %v11486_v43, 11  ;;  %v11488_v51 = vshll.u32 %v11484_v11, 16  ;;  %v7775_v42 = vld [vmem:[%s8001_s13 + $0x1cc] sm:$0xff] }
 0x30e   : > { %v4881_v45 = vpop.f32.mrf.mxu2  ;;  %v6104_v5 = vrot.slane %v6102_v44, 4  ;;  %v6107_v33 = vrot.slane %v6105_v7, 5  ;;  %v6164_v48 = vunpack.c.l.b16 %v6090_v40  ;;  %v6165_v19 = vunpack.c.l.b16 %v6100_v9 }
 0x30f   : > { %7674 = vmatmul.msk.bf16.gmra.mxu3 %vm533_vm2, %v6174_v61  ;;  %v4909_v53 = vadd.f32 %v4881_v45, %v4715_v60  ;;  %v5623_v60 = vrot.slane %v5621_v57, 7  ;;  %v6342_v61 = vrot.slane %v6340_v49, 4  ;;  %v11487_v45 = vld [vmem:[#allocation27_spill] sm:$0xff]  ;;  %v6113_v43 = vrot.slane %v6111_v59, 5 }
 0x310   : > { %v10833_v10 = vpop.f32.mrf.mxu0  ;;  %v10866_v11 = vadd.f32 %v10615_v2, %v10631_v47 }
 0x311   : > { %v5624_v57 = vor.u32 %v5623_v60, %v11488_v51 }
 0x312   : > { %v5271_v58 = vpop.f32.mrf.mxu3  ;;  %v4692_v37 = vpop.f32.mrf.mxu1 }
 0x313   : > { %7702 = vmatmul.msk.bf16.gmra.mxu0 %vm533_vm2, %v6384_v14  ;;  %v10843_v1 = vadd.f32 %v5271_v58, %v4909_v53  ;;  %v4717_v29 = vadd.f32 %v4692_v37, %v10708_v34  ;;  %v5618_v14 = vor.u32 %v5617_v20, %v11487_v45  ;;  %v5620_v53 = vrot.slane %v5617_v20, 4  ;;  %v7599_v20 = vld [vmem:[%s8001_s13 + $0x1ec] sm:$0xf] }
 0x314   : > { %v6341_v58 = vsel %vm8143_vm6, %v7683_v35, %v6340_v49  ;;  %v6344_v37 = vsel %vm8143_vm6, %v6342_v61, %v6343_v27  ;;  %v6117_v45 = vrot.slane %v6115_v55, 4  ;;  %v6108_v35 = vor.u32 %v6107_v33, %v6104_v5 }
 0x315   : > { %7561 = vmatmul.msk.bf16.gmra.mxu1 %vm533_vm2, %v5663_v17  ;;  %v5619_v7 = vsel %vm8543_vm14, %v7542_v41, %v5618_v14  ;;  %v5625_v49 = vsel %vm8543_vm14, %v5620_v53, %v5624_v57  ;;  %v6175_v61 = vpack.c.b16 %v6165_v19, %v6164_v48  ;;  %v6375_v27 = vunpack.c.l.b16 %v6344_v37  ;;  %v7600_v57 = vld [vmem:[%s8001_s13 + $0x1f0] sm:$0x1]  ;;  %v7602_v48 = vld [vmem:[%s8001_s13 + $0x1f8] sm:$0xf]  ;;  %v10889_v37 = vld [vmem:[%s8001_s13 + $0x1fc] sm:$0xf] }
 0x316   : > { %v4883_v34 = vpop.f32.mrf.mxu2  ;;  %v6118_v47 = vor.u32 %v6117_v45, %v6113_v43  ;;  %v6121_v9 = vshll.u32 %v7599_v20, 16  ;;  %v5654_v59 = vunpack.c.l.b16 %v5619_v7  ;;  %v5655_v55 = vunpack.c.l.b16 %v5625_v49 }
 0x317   : > { %v4910_v38 = vadd.f32 %v4883_v34, %v4716_v3  ;;  %v6374_v3 = vunpack.c.l.b16 %v6341_v58  ;;  %v6109_v14 = vrot.slane %v6108_v35, 4  ;;  %v10879_v34 = vadd.f32 %v10648_v23, %v10663_v31 }
 0x318   : > { %v10860_v17 = vpop.f32.mrf.mxu0  ;;  %v6347_v5 = vrot.slane %v7599_v20, 5  ;;  %v6119_v33 = vrot.slane %v6118_v47, 4  ;;  %v5664_v19 = vpack.c.b16 %v5655_v55, %v5654_v59  ;;  %v7684_v58 = vrot.slane %v10839_v4, 9 }
 0x319   : > { %v6385_v53 = vpack.c.b16 %v6375_v27, %v6374_v3  ;;  %v6350_v45 = vrot.slane %v7600_v57, 5  ;;  %v5628_v20 = vrot.slane %v10503_v21, 7  ;;  %v6126_v4 = vshrl.u32 %v7602_v48, 16 }
 0x31a   : > { %v5273_v60 = vpop.f32.mrf.mxu3  ;;  %v4694_v44 = vpop.f32.mrf.mxu1  ;;  %v6349_v7 = vrot.slane %v6347_v5, 4  ;;  %v6129_v21 = vshll.u32 %v7602_v48, 16  ;;  %v6135_v49 = vshll.u32 %v10889_v37, 16  ;;  %v6139_v35 = vshrl.u32 %v10889_v37, 16 }
 0x31b   : > { %v10873_v40 = vadd.f32 %v5273_v60, %v4910_v38  ;;  %7655 = vmatmul.msk.bf16.gmra.mxu2 %vm533_vm2, %v7775_v42  ;;  %v4718_v2 = vadd.f32 %v4694_v44, %v10726_v25  ;;  %v6123_v38 = vrot.slane %v6121_v9, 5  ;;  %v5632_v42 = vshrl.u32 %v10510_v39, 16 }
 0x31c   : > { %v7543_v47 = vrot.slane %v10492_v63, 11  ;;  %v5629_v9 = vor.u32 %v5628_v20, %v10505_v15  ;;  %v5631_v59 = vrot.slane %v5628_v20, 4  ;;  %v6128_v57 = vrot.slane %v6126_v4, 4  ;;  %v7604_v15 = vld [vmem:[%s8001_s13 + $0x200] sm:$0xf] }
 0x31d   : > { %v5634_v60 = vrot.slane %v5632_v42, 7  ;;  %v6141_v42 = vrot.slane %v6139_v35, 4  ;;  %v10922_v63 = vadd.f32 %v10672_v22, %v10686_v36  ;;  %v10935_v4 = vadd.f32 %v10702_v8, %v10719_v0 }
 0x31e   : > { %v4886_v41 = vpop.f32.mrf.mxu2  ;;  %v7685_v0 = vrot.slane %v10889_v37, 9 }
 0x31f   : > { %7675 = vmatmul.msk.bf16.gmra.mxu3 %vm533_vm2, %v6175_v61  ;;  %v4911_v51 = vadd.f32 %v4886_v41, %v4717_v29  ;;  %v6114_v29 = vsel %vm8027_vm3, %v6109_v14, %v6113_v43  ;;  %v6124_v43 = vsel %vm8027_vm3, %v6119_v33, %v6123_v38  ;;  %v5635_v55 = vor.u32 %v5634_v60, %v5415_v6  ;;  %v7776_v14 = vld [vmem:[%s8001_s13 + $0x1e0] sm:$0xff] }
 0x320   : > { %v10883_v25 = vpop.f32.mrf.mxu0  ;;  %v6166_v61 = vunpack.c.l.b16 %v6114_v29  ;;  %v6137_v38 = vrot.slane %v6135_v49, 5 }
 0x322   : > { %v5276_v23 = vpop.f32.mrf.mxu3  ;;  %v4697_v31 = vpop.f32.mrf.mxu1  ;;  %v6142_v36 = vor.u32 %v6141_v42, %v6137_v38 }
 0x323   : > { %7703 = vmatmul.msk.bf16.gmra.mxu0 %vm533_vm2, %v6385_v53  ;;  %v10896_v3 = vadd.f32 %v5276_v23, %v4911_v51  ;;  %v4719_v44 = vadd.f32 %v4697_v31, %v10766_v30  ;;  %v6348_v30 = vsel %vm8143_vm6, %v7684_v58, %v6347_v5  ;;  %v6167_v53 = vunpack.c.l.b16 %v6124_v43 }
 0x324   : > { %v6351_v51 = vsel %vm8143_vm6, %v6349_v7, %v6350_v45  ;;  %v6131_v5 = vrot.slane %v6129_v21, 5  ;;  %v6376_v39 = vunpack.c.l.b16 %v6348_v30  ;;  %v6145_v45 = vshll.u32 %v7604_v15, 16 }
 0x325   : > { %7562 = vmatmul.msk.bf16.gmra.mxu1 %vm533_vm2, %v5664_v19  ;;  %v5636_v19 = vsel %vm8543_vm14, %v5631_v59, %v5635_v55  ;;  %v6176_v23 = vpack.c.b16 %v6167_v53, %v6166_v61  ;;  %v6377_v31 = vunpack.c.l.b16 %v6351_v51  ;;  %v6143_v35 = vrot.slane %v6142_v36, 4 }
 0x326   : > { %v4888_v27 = vpop.f32.mrf.mxu2  ;;  %v6132_v22 = vor.u32 %v6131_v5, %v6128_v57  ;;  %v5657_v60 = vunpack.c.l.b16 %v5636_v19  ;;  %v6354_v61 = vrot.slane %v7604_v15, 5  ;;  %v10953_v51 = vadd.f32 %v10731_v50, %v10743_v54  ;;  %v7777_v5 = vld [vmem:[%s8001_s13 + $0x1f4] sm:$0xff] }
 0x327   : > { %v4912_v41 = vadd.f32 %v4888_v27, %v4718_v2  ;;  %v5630_v2 = vsel %vm8543_vm14, %v7543_v47, %v5629_v9  ;;  %v6386_v62 = vpack.c.b16 %v6377_v31, %v6376_v39  ;;  %v7605_v27 = vld [vmem:[%s8001_s13 + $0x204] sm:$0x1]  ;;  %s6790_s13 = sshll.u32 %s7900_s15, 3 }
 0x328   : > { %v10918_v33 = vpop.f32.mrf.mxu0  ;;  %v5656_v20 = vunpack.c.l.b16 %v5630_v2  ;;  %v6133_v49 = vrot.slane %v6132_v22, 4  ;;  %v6355_v37 = vsel %vm8143_vm6, %v7685_v0, %v6354_v61  ;;  %p236_p6 = scmp.lt.s32.totalorder %s6790_s13, 15 }
 0x32a   : > { %v5278_v48 = vpop.f32.mrf.mxu3  ;;  %v4699_v6 = vpop.f32.mrf.mxu1  ;;  %v5665_v30 = vpack.c.b16 %v5657_v60, %v5656_v20  ;;  %s11502_s13 = smov (!%p236_p6, %s6790_s13), 15 }
 0x32b   : > { %v10929_v58 = vadd.f32 %v5278_v48, %v4912_v41  ;;  %7656 = vmatmul.msk.bf16.gmra.mxu2 %vm533_vm2, %v7776_v14  ;;  %v4720_v29 = vadd.f32 %v4699_v6, %v10779_v56  ;;  %v6147_v56 = vrot.slane %v6145_v45, 5  ;;  %v6356_v41 = vrot.slane %v6354_v61, 4  ;;  %s6791_s26 = sshll.u32 %s11502_s13, 1 }
 0x32c   : > { %v6357_v14 = vrot.slane %v7605_v27, 5  ;;  %v6378_v48 = vunpack.c.l.b16 %v6355_v37  ;;  %s240_s28 = sadd.s32 %s6792_s27, %s6791_s26  ;;  %v10996_v27 = vld [vmem:[%s232_s14] ss:$0 sm:$0xff] }
 0x32d   : > { %v6148_v55 = vsel %vm8027_vm3, %v6143_v35, %v6147_v56  ;;  %v10989_v35 = vadd.f32 %v10812_v52, %v10823_v26  ;;  %s6793_s29 = sshll.u32 %s240_s28, 3  ;;  %v11006_v26 = vadd.f32 %v10833_v10, %v10843_v1  ;;  %v11017_v10 = vadd.f32 %v10860_v17, %v10873_v40 }
 0x32e   : > { %v4891_v7 = vpop.f32.mrf.mxu2  ;;  %v6169_v42 = vunpack.c.l.b16 %v6148_v55  ;;  %v6358_v32 = vsel %vm8143_vm6, %v6356_v41, %v6357_v14  ;;  %s11002_s8 = scalar_lea.vmem %s11249_s3, %s6793_s29  ;;  %v11028_v17 = vadd.f32 %v10883_v25, %v10896_v3  ;;  %v11039_v25 = vadd.f32 %v10918_v33, %v10929_v58 }
 0x32f   : > { %7676 = vmatmul.msk.bf16.gmra.mxu3 %vm533_vm2, %v6176_v23  ;;  %v4913_v43 = vadd.f32 %v4891_v7, %v4719_v44  ;;  %v6138_v44 = vsel %vm8027_vm3, %v6133_v49, %v6137_v38  ;;  %v6379_v54 = vunpack.c.l.b16 %v6358_v32  ;;  %v10968_v23 = vadd.f32 %v10760_v16, %v10773_v12 }
 0x330   : > { %v10938_v21 = vpop.f32.mrf.mxu0  ;;  %v10979_v16 = vadd.f32 %v10783_v28, %v10795_v46 }
 0x331   : > { %v6387_v24 = vpack.c.b16 %v6379_v54, %v6378_v48 }
 0x332   : > { %v5281_v47 = vpop.f32.mrf.mxu3  ;;  %v4702_v9 = vpop.f32.mrf.mxu1 }
 0x333   : > { %7704 = vmatmul.msk.bf16.gmra.mxu0 %vm533_vm2, %v6386_v62  ;;  %v10942_v59 = vadd.f32 %v5281_v47, %v4913_v43  ;;  %v4721_v8 = vadd.f32 %v4702_v9, %v10816_v13  ;;  %v6168_v13 = vunpack.c.l.b16 %v6138_v44 }
 0x335   : > { %7563 = vmatmul.msk.bf16.gmra.mxu1 %vm533_vm2, %v5665_v30  ;;  %v6177_v50 = vpack.c.b16 %v6169_v42, %v6168_v13  ;;  %v11050_v33 = vadd.f32 %v10938_v21, %v10942_v59 }
 0x336   : > { %v4893_v53 = vpop.f32.mrf.mxu2 }
 0x337   : > { %v4914_v57 = vadd.f32 %v4893_v53, %v4720_v29 }
 0x338   : > { %v10958_v38 = vpop.f32.mrf.mxu0 }
 0x33a   : > { %v5283_v15 = vpop.f32.mrf.mxu3  ;;  %v4704_v39 = vpop.f32.mrf.mxu1 }
 0x33b   : > { %v10962_v6 = vadd.f32 %v5283_v15, %v4914_v57  ;;  %7657 = vmatmul.msk.bf16.gmra.mxu2 %vm533_vm2, %v7777_v5  ;;  %v4722_v2 = vadd.f32 %v4704_v39, %v10829_v18 }
 0x33d   : > { %v11061_v21 = vadd.f32 %v10958_v38, %v10962_v6 }
 0x33e   : > { %v4896_v19 = vpop.f32.mrf.mxu2 }
 0x33f   : > { %7677 = vmatmul.msk.bf16.gmra.mxu3 %vm533_vm2, %v6177_v50  ;;  %v4915_v31 = vadd.f32 %v4896_v19, %v4721_v8 }
 0x340   : > { %v10971_v29 = vpop.f32.mrf.mxu0 }
 0x342   : > { %v5286_v22 = vpop.f32.mrf.mxu3  ;;  %v5711_v36 = vpop.f32.mrf.mxu1 }
 0x343   : > { %7705 = vmatmul.msk.bf16.gmra.mxu0 %vm533_vm2, %v6387_v24  ;;  %v10975_v45 = vadd.f32 %v5286_v22, %v4915_v31  ;;  %v5751_v43 = vadd.f32 %v5711_v36, %v10866_v11  ;;  %vm6509_vm2 = vcmask 130048  }
 0x345   : > { %v11072_v38 = vadd.f32 %v10971_v29, %v10975_v45 }
 0x346   : > { %v4898_v18 = vpop.f32.mrf.mxu2 }
 0x347   : > { %v4916_v12 = vadd.f32 %v4898_v18, %v4722_v2 }
 0x348   : > { %v10981_v20 = vpop.f32.mrf.mxu0 }
 0x34a   : > { %v5288_v60 = vpop.f32.mrf.mxu3  ;;  %v5713_v7 = vpop.f32.mrf.mxu1 }
 0x34b   : > { %v10983_v62 = vadd.f32 %v5288_v60, %v4916_v12  ;;  %v5752_v47 = vadd.f32 %v5713_v7, %v10879_v34 }
 0x34d   : > { %v11083_v29 = vadd.f32 %v10981_v20, %v10983_v62 }
 0x34e   : > { %v5901_v49 = vpop.f32.mrf.mxu2 }
 0x34f   : > { %v5941_v28 = vadd.f32 %v5901_v49, %v5751_v43 }
 0x350   : > { %v6433_v46 = vpop.f32.mrf.mxu0 }
 0x352   : > { %v6223_v56 = vpop.f32.mrf.mxu3  ;;  %v5716_v61 = vpop.f32.mrf.mxu1 }
 0x353   : > { %v6263_v30 = vadd.f32 %v6223_v56, %v5941_v28  ;;  %v5753_v14 = vadd.f32 %v5716_v61, %v10922_v63 }
 0x355   : > { %v6473_v11 = vadd.f32 %v6433_v46, %v6263_v30 }
 0x356   : > { %v5903_v52 = vpop.f32.mrf.mxu2 }
 0x357   : > { %v11009_v9 = vadd.f32 %v10996_v27, %v6473_v11  ;;  %v5942_v8 = vadd.f32 %v5903_v52, %v5752_v47 }
 0x358   : > { %v6435_v0 = vpop.f32.mrf.mxu0 }
 0x359   : > { %6510 = vst.msk [vmem:[%s11002_s8] sm:$0xff] %vm6509_vm2, %v11009_v9 }
 0x35a   : > { %v6225_v34 = vpop.f32.mrf.mxu3  ;;  %v5718_v44 = vpop.f32.mrf.mxu1 }
 0x35b   : > { %v6264_v55 = vadd.f32 %v6225_v34, %v5942_v8  ;;  %v5754_v63 = vadd.f32 %v5718_v44, %v10935_v4 }
 0x35d   : > { %v6474_v41 = vadd.f32 %v6435_v0, %v6264_v55 }
 0x35e   : > { %v5906_v53 = vpop.f32.mrf.mxu2 }
 0x35f   : > { %v11020_v1 = vadd.f32 %v10996_v27, %v6474_v41  ;;  %v5943_v57 = vadd.f32 %v5906_v53, %v5753_v14 }
 0x360   : > { %v6438_v5 = vpop.f32.mrf.mxu0 }
 0x361   : > { %6511 = vst.msk [vmem:[%s11002_s8 + $0x8] sm:$0xff] %vm6509_vm2, %v11020_v1 }
 0x362   : > { %v6228_v13 = vpop.f32.mrf.mxu3  ;;  %v5721_v42 = vpop.f32.mrf.mxu1 }
 0x363   : > { %v6265_v37 = vadd.f32 %v6228_v13, %v5943_v57  ;;  %v5755_v4 = vadd.f32 %v5721_v42, %v10953_v51 }
 0x365   : > { %v6475_v32 = vadd.f32 %v6438_v5, %v6265_v37 }
 0x366   : > { %v5908_v15 = vpop.f32.mrf.mxu2 }
 0x367   : > { %v11031_v40 = vadd.f32 %v10996_v27, %v6475_v32  ;;  %v5944_v48 = vadd.f32 %v5908_v15, %v5754_v63 }
 0x368   : > { %v6440_v39 = vpop.f32.mrf.mxu0 }
 0x369   : > { %6512 = vst.msk [vmem:[%s11002_s8 + $0x10] sm:$0xff] %vm6509_vm2, %v11031_v40 }
 0x36a   : > { %v6230_v50 = vpop.f32.mrf.mxu3  ;;  %v5723_v54 = vpop.f32.mrf.mxu1 }
 0x36b   : > { %v6266_v2 = vadd.f32 %v6230_v50, %v5944_v48  ;;  %v5756_v51 = vadd.f32 %v5723_v54, %v10968_v23 }
 0x36d   : > { %v6476_v19 = vadd.f32 %v6440_v39, %v6266_v2 }
 0x36e   : > { %v5911_v24 = vpop.f32.mrf.mxu2 }
 0x36f   : > { %v11042_v3 = vadd.f32 %v10996_v27, %v6476_v19  ;;  %v5945_v31 = vadd.f32 %v5911_v24, %v5755_v4 }
 0x370   : > { %v6443_v22 = vpop.f32.mrf.mxu0 }
 0x371   : > { %6513 = vst.msk [vmem:[%s11002_s8 + $0x18] sm:$0xff] %vm6509_vm2, %v11042_v3 }
 0x372   : > { %v6233_v36 = vpop.f32.mrf.mxu3  ;;  %v5726_v18 = vpop.f32.mrf.mxu1 }
 0x373   : > { %v6267_v12 = vadd.f32 %v6233_v36, %v5945_v31  ;;  %v5757_v23 = vadd.f32 %v5726_v18, %v10979_v16 }
 0x375   : > { %v6477_v60 = vadd.f32 %v6443_v22, %v6267_v12 }
 0x376   : > { %v5913_v7 = vpop.f32.mrf.mxu2 }
 0x377   : > { %v11053_v58 = vadd.f32 %v10996_v27, %v6477_v60  ;;  %v5946_v43 = vadd.f32 %v5913_v7, %v5756_v51 }
 0x378   : > { %v6445_v49 = vpop.f32.mrf.mxu0 }
 0x379   : > { %6514 = vst.msk [vmem:[%s11002_s8 + $0x20] sm:$0xff] %vm6509_vm2, %v11053_v58 }
 0x37a   : > { %v6235_v28 = vpop.f32.mrf.mxu3  ;;  %v5728_v46 = vpop.f32.mrf.mxu1 }
 0x37b   : > { %v6268_v56 = vadd.f32 %v6235_v28, %v5946_v43  ;;  %v5758_v16 = vadd.f32 %v5728_v46, %v10989_v35 }
 0x37d   : > { %v6478_v61 = vadd.f32 %v6445_v49, %v6268_v56 }
 0x37e   : > { %v5916_v30 = vpop.f32.mrf.mxu2 }
 0x37f   : > { %v11064_v59 = vadd.f32 %v10996_v27, %v6478_v61  ;;  %v5947_v11 = vadd.f32 %v5916_v30, %v5757_v23 }
 0x380   : > { %v6448_v47 = vpop.f32.mrf.mxu0 }
 0x381   : > { %6515 = vst.msk [vmem:[%s11002_s8 + $0x28] sm:$0xff] %vm6509_vm2, %v11064_v59 }
 0x382   : > { %v6238_v52 = vpop.f32.mrf.mxu3  ;;  %v5731_v8 = vpop.f32.mrf.mxu1 }
 0x383   : > { %v6269_v0 = vadd.f32 %v6238_v52, %v5947_v11  ;;  %v5759_v35 = vadd.f32 %v5731_v8, %v11006_v26 }
 0x385   : > { %v6479_v34 = vadd.f32 %v6448_v47, %v6269_v0 }
 0x386   : > { %v5918_v44 = vpop.f32.mrf.mxu2 }
 0x387   : > { %v11075_v6 = vadd.f32 %v10996_v27, %v6479_v34  ;;  %v5948_v55 = vadd.f32 %v5918_v44, %v5758_v16 }
 0x388   : > { %v6450_v41 = vpop.f32.mrf.mxu0 }
 0x389   : > { %6516 = vst.msk [vmem:[%s11002_s8 + $0x30] sm:$0xff] %vm6509_vm2, %v11075_v6 }
 0x38a   : > { %v6240_v14 = vpop.f32.mrf.mxu3  ;;  %v5733_v53 = vpop.f32.mrf.mxu1 }
 0x38b   : > { %v6270_v57 = vadd.f32 %v6240_v14, %v5948_v55  ;;  %v5760_v26 = vadd.f32 %v5733_v53, %v11017_v10 }
 0x38d   : > { %v6480_v5 = vadd.f32 %v6450_v41, %v6270_v57 }
 0x38e   : > { %v5921_v13 = vpop.f32.mrf.mxu2 }
 0x38f   : > { %v11086_v45 = vadd.f32 %v10996_v27, %v6480_v5  ;;  %v5949_v42 = vadd.f32 %v5921_v13, %v5759_v35 }
 0x390   : > { %v6453_v37 = vpop.f32.mrf.mxu0 }
 0x391   : > { %6517 = vst.msk [vmem:[%s11002_s8 + $0x38] sm:$0xff] %vm6509_vm2, %v11086_v45 }
 0x392   : > { %v6243_v32 = vpop.f32.mrf.mxu3  ;;  %v5736_v63 = vpop.f32.mrf.mxu1 }
 0x393   : > { %v6271_v15 = vadd.f32 %v6243_v32, %v5949_v42  ;;  %v5761_v24 = vadd.f32 %v5736_v63, %v11028_v17 }
 0x395   : > { %v6481_v48 = vadd.f32 %v6453_v37, %v6271_v15 }
 0x396   : > { %v5923_v39 = vpop.f32.mrf.mxu2 }
 0x397   : > { %v11093_v50 = vadd.f32 %v10996_v27, %v6481_v48  ;;  %v5950_v20 = vadd.f32 %v5923_v39, %v5760_v26 }
 0x398   : > { %v6455_v62 = vpop.f32.mrf.mxu0 }
 0x399   : > { %6518 = vst.msk [vmem:[%s11002_s8 + $0x40] sm:$0xff] %vm6509_vm2, %v11093_v50 }
 0x39a   : > { %v6245_v54 = vpop.f32.mrf.mxu3  ;;  %v5738_v2 = vpop.f32.mrf.mxu1 }
 0x39b   : > { %v6272_v19 = vadd.f32 %v6245_v54, %v5950_v20  ;;  %v5762_v7 = vadd.f32 %v5738_v2, %v11039_v25 }
 0x39d   : > { %v6482_v4 = vadd.f32 %v6455_v62, %v6272_v19 }
 0x39e   : > { %v5926_v31 = vpop.f32.mrf.mxu2 }
 0x39f   : > { %v11100_v22 = vadd.f32 %v10996_v27, %v6482_v4  ;;  %v5951_v10 = vadd.f32 %v5926_v31, %v5761_v24 }
 0x3a0   : > { %v6458_v36 = vpop.f32.mrf.mxu0 }
 0x3a1   : > { %6519 = vst.msk [vmem:[%s11002_s8 + $0x48] sm:$0xff] %vm6509_vm2, %v11100_v22 }
 0x3a2   : > { %v6248_v18 = vpop.f32.mrf.mxu3  ;;  %v5741_v60 = vpop.f32.mrf.mxu1 }
 0x3a3   : > { %v6273_v12 = vadd.f32 %v6248_v18, %v5951_v10  ;;  %v5763_v23 = vadd.f32 %v5741_v60, %v11050_v33 }
 0x3a5   : > { %v6483_v51 = vadd.f32 %v6458_v36, %v6273_v12 }
 0x3a6   : > { %v5928_v43 = vpop.f32.mrf.mxu2 }
 0x3a7   : > { %v11107_v49 = vadd.f32 %v10996_v27, %v6483_v51  ;;  %v5952_v17 = vadd.f32 %v5928_v43, %v5762_v7 }
 0x3a8   : > { %v6460_v28 = vpop.f32.mrf.mxu0 }
 0x3a9   : > { %6520 = vst.msk [vmem:[%s11002_s8 + $0x50] sm:$0xff] %vm6509_vm2, %v11107_v49 }
 0x3aa   : > { %v6250_v46 = vpop.f32.mrf.mxu3  ;;  %v5743_v30 = vpop.f32.mrf.mxu1 }
 0x3ab   : > { %v6274_v56 = vadd.f32 %v6250_v46, %v5952_v17  ;;  %v5764_v16 = vadd.f32 %v5743_v30, %v11061_v21 }
 0x3ad   : > { %v6484_v61 = vadd.f32 %v6460_v28, %v6274_v56 }
 0x3ae   : > { %v5931_v11 = vpop.f32.mrf.mxu2 }
 0x3af   : > { %v11114_v47 = vadd.f32 %v10996_v27, %v6484_v61  ;;  %v5953_v25 = vadd.f32 %v5931_v11, %v5763_v23 }
 0x3b0   : > { %v6463_v52 = vpop.f32.mrf.mxu0 }
 0x3b1   : > { %6521 = vst.msk [vmem:[%s11002_s8 + $0x58] sm:$0xff] %vm6509_vm2, %v11114_v47 }
 0x3b2   : > { %v6253_v8 = vpop.f32.mrf.mxu3  ;;  %v5746_v41 = vpop.f32.mrf.mxu1 }
 0x3b3   : > { %v6275_v0 = vadd.f32 %v6253_v8, %v5953_v25  ;;  %v5765_v35 = vadd.f32 %v5746_v41, %v11072_v38 }
 0x3b5   : > { %v6485_v34 = vadd.f32 %v6463_v52, %v6275_v0 }
 0x3b6   : > { %v5933_v44 = vpop.f32.mrf.mxu2 }
 0x3b7   : > { %v11121_v33 = vadd.f32 %v10996_v27, %v6485_v34  ;;  %v5954_v55 = vadd.f32 %v5933_v44, %v5764_v16 }
 0x3b8   : > { %v6465_v14 = vpop.f32.mrf.mxu0 }
 0x3b9   : > { %6522 = vst.msk [vmem:[%s11002_s8 + $0x60] sm:$0xff] %vm6509_vm2, %v11121_v33 }
 0x3ba   : > { %v6255_v53 = vpop.f32.mrf.mxu3  ;;  %v5748_v37 = vpop.f32.mrf.mxu1 }
 0x3bb   : > { %v6276_v57 = vadd.f32 %v6255_v53, %v5954_v55  ;;  %v5766_v26 = vadd.f32 %v5748_v37, %v11083_v29 }
 0x3bd   : > { %v6486_v5 = vadd.f32 %v6465_v14, %v6276_v57 }
 0x3be   : > { %v5936_v13 = vpop.f32.mrf.mxu2 }
 0x3bf   : > { %v11128_v42 = vadd.f32 %v10996_v27, %v6486_v5  ;;  %v5955_v21 = vadd.f32 %v5936_v13, %v5765_v35 }
 0x3c0   : > { %v6468_v32 = vpop.f32.mrf.mxu0 }
 0x3c1   : > { %6523 = vst.msk [vmem:[%s11002_s8 + $0x68] sm:$0xff] %vm6509_vm2, %v11128_v42 }
 0x3c2   : > { %v6258_v63 = vpop.f32.mrf.mxu3 }
 0x3c3   : > { %v6277_v15 = vadd.f32 %v6258_v63, %v5955_v21 }
 0x3c5   : > { %v6487_v48 = vadd.f32 %v6468_v32, %v6277_v15 }
 0x3c6   : > { %v5938_v39 = vpop.f32.mrf.mxu2 }
 0x3c7   : > { %v11135_v20 = vadd.f32 %v10996_v27, %v6487_v48  ;;  %v5956_v38 = vadd.f32 %v5938_v39, %v5766_v26 }
 0x3c8   : > { %v6470_v2 = vpop.f32.mrf.mxu0 }
 0x3c9   : > { %6524 = vst.msk [vmem:[%s11002_s8 + $0x70] sm:$0xff] %vm6509_vm2, %v11135_v20 }
 0x3ca   : > { %v6260_v62 = vpop.f32.mrf.mxu3 }
 0x3cb   : > { %v6278_v54 = vadd.f32 %v6260_v62, %v5956_v38 }
 0x3cd   : > { %v6488_v19 = vadd.f32 %v6470_v2, %v6278_v54  ;;  %6529 = sbr.rel (%p7706_p7) target bundleno = 980 (0x3d4), region = 36 }
 0x3cf   : > { %v11141_v4 = vadd.f32 %v10996_v27, %v6488_v19 }
 0x3d1   : > { %6525 = vst.msk [vmem:[%s11002_s8 + $0x78] sm:$0xff] %vm6509_vm2, %v11141_v4 }
 0x3d2   : > { %vm6530_vm3 = vcmask 123904   ;;  %v7918_v29 = vmov 0.0  }
 0x3d3   : > { %6531 = vst.msk [vmem:[%s10902_s25] sm:$0x3] %vm6530_vm3, %v7918_v29 }
 0x3d4 PF: > { %v6533_v24 = vsel %vm6509_vm2, %v11009_v9, 0.0  ;;  %v6534_v31 = vsel %vm6509_vm2, %v11020_v1, 0.0  ;;  %v6536_v27 = vsel %vm6509_vm2, %v11031_v40, 0.0  ;;  %v6538_v36 = vsel %vm6509_vm2, %v11042_v3, 0.0 }
 0x3d5   : > { %v6535_v10 = vadd.f32 %v6534_v31, %v6533_v24  ;;  %v6540_v12 = vsel %vm6509_vm2, %v11053_v58, 0.0  ;;  %v6570_v51 = vmul.f32 %v11009_v9, %v11009_v9  ;;  %v6571_v7 = vmul.f32 %v11020_v1, %v11020_v1 }
 0x3d6   : > { %v6572_v43 = vmul.f32 %v11031_v40, %v11031_v40  ;;  %v6542_v17 = vsel %vm6509_vm2, %v11064_v59, 0.0  ;;  %v6573_v46 = vmul.f32 %v11042_v3, %v11042_v3  ;;  %v6544_v56 = vsel %vm6509_vm2, %v11075_v6, 0.0 }
 0x3d7   : > { %v6537_v18 = vadd.f32 %v6536_v27, %v6535_v10  ;;  %v6574_v61 = vmul.f32 %v11053_v58, %v11053_v58  ;;  %v6586_v23 = vsel %vm6509_vm2, %v6570_v51, 0.0  ;;  %v6587_v1 = vsel %vm6509_vm2, %v6571_v7, 0.0 }
 0x3d8   : > { %v6589_v40 = vsel %vm6509_vm2, %v6572_v43, 0.0  ;;  %v6546_v30 = vsel %vm6509_vm2, %v11086_v45, 0.0  ;;  %v6588_v11 = vadd.f32 %v6587_v1, %v6586_v23  ;;  %v6575_v3 = vmul.f32 %v11064_v59, %v11064_v59 }
 0x3d9   : > { %v6539_v60 = vadd.f32 %v6538_v36, %v6537_v18  ;;  %v6591_v52 = vsel %vm6509_vm2, %v6573_v46, 0.0  ;;  %v6548_v58 = vsel %vm6509_vm2, %v11093_v50, 0.0  ;;  %v6576_v34 = vmul.f32 %v11075_v6, %v11075_v6 }
 0x3da   : > { %v6590_v8 = vadd.f32 %v6589_v40, %v6588_v11  ;;  %v6593_v16 = vsel %vm6509_vm2, %v6574_v61, 0.0  ;;  %v6550_v44 = vsel %vm6509_vm2, %v11100_v22, 0.0  ;;  %v6577_v59 = vmul.f32 %v11086_v45, %v11086_v45 }
 0x3db   : > { %v6541_v28 = vadd.f32 %v6540_v12, %v6539_v60  ;;  %v6595_v14 = vsel %vm6509_vm2, %v6575_v3, 0.0  ;;  %v6552_v53 = vsel %vm6509_vm2, %v11107_v49, 0.0  ;;  %v6578_v6 = vmul.f32 %v11093_v50, %v11093_v50 }
 0x3dc   : > { %v6592_v55 = vadd.f32 %v6591_v52, %v6590_v8  ;;  %v6597_v35 = vsel %vm6509_vm2, %v6576_v34, 0.0  ;;  %v6554_v13 = vsel %vm6509_vm2, %v11114_v47, 0.0  ;;  %v6579_v45 = vmul.f32 %v11100_v22, %v11100_v22 }
 0x3dd   : > { %v6543_v9 = vadd.f32 %v6542_v17, %v6541_v28  ;;  %v6599_v32 = vsel %vm6509_vm2, %v6577_v59, 0.0  ;;  %v6556_v63 = vsel %vm6509_vm2, %v11121_v33, 0.0  ;;  %v6580_v50 = vmul.f32 %v11107_v49, %v11107_v49 }
 0x3de   : > { %v6594_v57 = vadd.f32 %v6593_v16, %v6592_v55  ;;  %v6601_v26 = vsel %vm6509_vm2, %v6578_v6, 0.0  ;;  %v6558_v39 = vsel %vm6509_vm2, %v11128_v42, 0.0  ;;  %v6581_v22 = vmul.f32 %v11114_v47, %v11114_v47 }
 0x3df   : > { %v6545_v25 = vadd.f32 %v6544_v56, %v6543_v9  ;;  %v6603_v54 = vsel %vm6509_vm2, %v6579_v45, 0.0  ;;  %v6560_v2 = vsel %vm6509_vm2, %v11135_v20, 0.0  ;;  %v6582_v49 = vmul.f32 %v11121_v33, %v11121_v33 }
 0x3e0   : > { %v6596_v21 = vadd.f32 %v6595_v14, %v6594_v57  ;;  %v6605_v24 = vsel %vm6509_vm2, %v6580_v50, 0.0  ;;  %v6562_v31 = vsel %vm6509_vm2, %v11141_v4, 0.0  ;;  %v6583_v47 = vmul.f32 %v11128_v42, %v11128_v42 }
 0x3e1   : > { %v6547_v0 = vadd.f32 %v6546_v30, %v6545_v25  ;;  %v6607_v36 = vsel %vm6509_vm2, %v6581_v22, 0.0  ;;  %v6584_v60 = vmul.f32 %v11135_v20, %v11135_v20  ;;  %v6609_v51 = vsel %vm6509_vm2, %v6582_v49, 0.0 }
 0x3e2   : > { %v6598_v15 = vadd.f32 %v6597_v35, %v6596_v21  ;;  %v6585_v43 = vmul.f32 %v11141_v4, %v11141_v4  ;;  %v6611_v17 = vsel %vm6509_vm2, %v6583_v47, 0.0  ;;  %vm6626_vm5 = vcmask 123904  }
 0x3e3   : > { %v6549_v41 = vadd.f32 %v6548_v58, %v6547_v0  ;;  %v6613_v42 = vsel %vm6509_vm2, %v6584_v60, 0.0  ;;  %v6532_v58 = vld [vmem:[%s10902_s25] sm:$0x3] }
 0x3e4   : > { %v6600_v38 = vadd.f32 %v6599_v32, %v6598_v15  ;;  %v6615_v61 = vsel %vm6509_vm2, %v6585_v43, 0.0 }
 0x3e5   : > { %v6551_v5 = vadd.f32 %v6550_v44, %v6549_v41 }
 0x3e6   : > { %v6602_v19 = vadd.f32 %v6601_v26, %v6600_v38 }
 0x3e7   : > { %v6553_v37 = vadd.f32 %v6552_v53, %v6551_v5 }
 0x3e8   : > { %v6604_v27 = vadd.f32 %v6603_v54, %v6602_v19 }
 0x3e9   : > { %v6555_v48 = vadd.f32 %v6554_v13, %v6553_v37 }
 0x3ea   : > { %v6606_v18 = vadd.f32 %v6605_v24, %v6604_v27 }
 0x3eb   : > { %v6557_v62 = vadd.f32 %v6556_v63, %v6555_v48 }
 0x3ec   : > { %v6608_v33 = vadd.f32 %v6607_v36, %v6606_v18 }
 0x3ed   : > { %v6559_v29 = vadd.f32 %v6558_v39, %v6557_v62 }
 0x3ee   : > { %v6610_v28 = vadd.f32 %v6609_v51, %v6608_v33 }
 0x3ef   : > { %v6561_v10 = vadd.f32 %v6560_v2, %v6559_v29 }
 0x3f0   : > { %v6612_v56 = vadd.f32 %v6611_v17, %v6610_v28 }
 0x3f1   : > { %v6563_v12 = vadd.f32 %v6562_v31, %v6561_v10 }
 0x3f2   : > { %v6614_v20 = vadd.f32 %v6613_v42, %v6612_v56 }
 0x3f3   : > { %v6564_v7 = vrot.slane %v6563_v12, 4 }
 0x3f4   : > { %v6616_v23 = vadd.f32 %v6615_v61, %v6614_v20 }
 0x3f5   : > { %v6565_v46 = vadd.f32 %v6564_v7, %v6563_v12 }
 0x3f6   : > { %v6617_v40 = vrot.slane %v6616_v23, 4 }
 0x3f7   : > { %v6566_v9 = vrot.slane %v6565_v46, 2 }
 0x3f8   : > { %v6618_v30 = vadd.f32 %v6617_v40, %v6616_v23 }
 0x3f9   : > { %v6567_v1 = vadd.f32 %v6566_v9, %v6565_v46 }
 0x3fa   : > { %v6619_v25 = vrot.slane %v6618_v30, 2 }
 0x3fb   : > { %v6568_v11 = vrot.slane %v6567_v1, 1 }
 0x3fc   : > { %v6620_v4 = vadd.f32 %v6619_v25, %v6618_v30 }
 0x3fd   : > { %v6569_v3 = vadd.f32 %v6568_v11, %v6567_v1 }
 0x3fe   : > { %v6621_v52 = vrot.slane %v6620_v4, 1 }
 0x400   : > { %v6622_v8 = vadd.f32 %v6621_v52, %v6620_v4 }
 0x402   : > { %v6624_v0 = vsel %vm1861_vm12, %v6569_v3, %v6622_v8 }
 0x403   : > { %v6625_v34 = vadd.f32 %v6624_v0, %v6532_v58 }
 0x405   : > { %6627 = vst.msk [vmem:[%s10902_s25] sm:$0x3] %vm6626_vm5, %v6625_v34 }
 0x406 PF: > { %s15_s19 = sadd.s32 1, %s7916_s19   ;;  %s11489_s15 = smov %s7908_s17 }
 0x407   : > { %p12_p8 = scmp.ge.s32.totalorder %s15_s19, 6   ;;  %s11490_s16 = smov %s7912_s18 }
 0x408   : > { %s11491_s17 = smov %s11494_s20  ;;  %s11492_s18 = smov %s11498_s21 }
 0x409   :  { %14 = sbr.rel (!%p12_p8) target bundleno = 3 (0x3), region = 112 }

</bundles_post_ra>
